<compile_context>
chip_gen: v7x
topology: tpu7x:2x2x1
jax: 0.10.0
libtpu: 0.0.40
codegen_flags: <defaults>
</compile_context>

<pallas_src>
import functools

import numpy as np
import jax
import jax.numpy as jnp
from jax.experimental import pallas as pl
from jax.experimental.pallas import tpu as pltpu

EPS = 1e-5  # BatchNorm2d / InstanceNorm2d default eps

# ---------------- configuration (small, consistent with the module) ----------
B = 2
IN_CH = 3
OUT_CH = 2
FC_IN = 6
FILTERS = [8, 16, 32]
LAYERS = 2
HW_IN = 16              # spatial size; must be divisible by 2**len(FILTERS)
SE_REDUCTION = 4


# ============================ in-kernel helpers ===============================
def _conv3x3(lhs_ref, T_ref, nB, Hp, H, n_out):
    """3x3 conv (pad=1) as ONE dot against a kh-concatenated Toeplitz weight.

    lhs_ref: (nB*Hp, K) f32 scratch, Hp = H+2 rows per batch with zero top/bottom
    pad rows.  T_ref: (K, 3*Np) bf16 where Np = n_out rounded up to 128 lanes and
    column block kh holds the kh-Toeplitz (no W padding: out-of-range kw columns
    are simply absent).  Returns a list of per-batch (H, n_out) f32 tiles.
    """
    Np = T_ref.shape[-1] // 3
    P = jnp.dot(lhs_ref[...].astype(jnp.bfloat16), T_ref[...],
                preferred_element_type=jnp.float32)          # (nB*Hp, 3*Np)
    outs = []
    for b in range(nB):
        r0 = b * Hp
        acc = (P[r0:r0 + H, 0:Np]
               + P[r0 + 1:r0 + 1 + H, Np:2 * Np]
               + P[r0 + 2:r0 + 2 + H, 2 * Np:3 * Np])
        outs.append(acc[:, 0:n_out] if n_out != Np else acc)
    return outs


def _bn_scale_shift(ys, Mf, g_row, bt_row, inv_cnt):
    """Training-mode BatchNorm folded to per-lane scale/shift rows.

    Per-channel stats via ONE (2, N) x (N, N) dot against the 0/1 fold matrix
    Mf (replaces the eight 1-row E / E^T matvecs of the previous version).
    """
    N = g_row.shape[-1]
    s = jnp.zeros((1, N), jnp.float32)
    q = jnp.zeros((1, N), jnp.float32)
    for y in ys:
        s = s + jnp.sum(y, axis=0, keepdims=True)
        q = q + jnp.sum(y * y, axis=0, keepdims=True)
    F = jnp.dot(jnp.concatenate([s, q], axis=0), Mf,
                preferred_element_type=jnp.float32) * inv_cnt   # (2, N)
    mu = F[0:1]
    var = jnp.maximum(F[1:2] - mu * mu, 0.0)
    sc = g_row * jax.lax.rsqrt(var + EPS)
    return sc, bt_row - mu * sc


# ============================ Pallas kernels ==================================
def _enc_block_kernel(x_ref, T1_ref, T2_ref, Mf_ref, c_ref, out_ref,
                      lhs_ref, mid_ref, *, nB, H, W, N):
    """Fused encoder block: 2x [conv3x3 + bias + ReLU + BatchNorm]."""
    Hp = H + 2
    inv_bn = 1.0 / float(nB * H * W)
    cv = c_ref[...]                       # (6, N): [b1, g1, bt1, b2, g2, bt2]
    Mf = Mf_ref[...]

    # stack batches into M, zero only the two H pad rows per batch
    zin = jnp.zeros((1, lhs_ref.shape[1]), jnp.float32)
    for b in range(nB):
        r0 = b * Hp
        lhs_ref[r0:r0 + 1, :] = zin
        lhs_ref[r0 + 1:r0 + 1 + H, :] = x_ref[b]
        lhs_ref[r0 + H + 1:r0 + H + 2, :] = zin

    # layer 1
    y1 = _conv3x3(lhs_ref, T1_ref, nB, Hp, H, N)
    y1 = [jnp.maximum(y + cv[0:1], 0.0) for y in y1]
    sc1, sh1 = _bn_scale_shift(y1, Mf, cv[1:2], cv[2:3], inv_bn)
    zmid = jnp.zeros((1, N), jnp.float32)
    for b in range(nB):
        r0 = b * Hp
        mid_ref[r0:r0 + 1, :] = zmid
        mid_ref[r0 + 1:r0 + 1 + H, :] = y1[b] * sc1 + sh1
        mid_ref[r0 + H + 1:r0 + H + 2, :] = zmid

    # layer 2
    y2 = _conv3x3(mid_ref, T2_ref, nB, Hp, H, N)
    y2 = [jnp.maximum(y + cv[3:4], 0.0) for y in y2]
    sc2, sh2 = _bn_scale_shift(y2, Mf, cv[4:5], cv[5:6], inv_bn)
    for b in range(nB):
        out_ref[b] = y2[b] * sc2 + sh2


def _dec_block_kernel(*refs, nB, H, W, Ns, Nm, No, final):
    """Fused decoder level: FiLM(skip) + concat + conv block.

    FiLM = residual modulation (gamma/beta rows precomputed in XLA from bc_vec)
    + InstanceNorm(affine) + SE (folded to constant weff/beff rows at pack time).
    Layer 1 consumes the [t_mod | x_up] lane-concat through a K-stacked Toeplitz.
    """
    if final:
        (t_ref, x_ref, cv_ref, T1_ref, T2_ref, Mf1_ref, c2_ref,
         out_ref, lhs_ref, mid_ref) = refs
        Mf2_ref = None
    else:
        (t_ref, x_ref, cv_ref, T1_ref, T2_ref, Mf1_ref, Mf2_ref, c2_ref,
         out_ref, lhs_ref, mid_ref) = refs
    Hp = H + 2
    inv_in = 1.0 / float(H * W)
    inv_bn = 1.0 / float(nB * H * W)
    cv = cv_ref[...]                      # (2*nB+5, Ns)
    c2v = c2_ref[...]
    Mf1 = Mf1_ref[...]
    weff, beff = cv[2 * nB:2 * nB + 1], cv[2 * nB + 1:2 * nB + 2]
    b1 = cv[2 * nB + 2:2 * nB + 3]
    g1 = cv[2 * nB + 3:2 * nB + 4]
    bt1 = cv[2 * nB + 4:2 * nB + 5]

    # ---- FiLM on the skip and assembly of the layer-1 LHS --------------------
    ys, rows = [], []
    for b in range(nB):
        tb = t_ref[b]
        y = tb + tb * cv[2 * b:2 * b + 1] + cv[2 * b + 1:2 * b + 2]
        ys.append(y)
        rows.append(jnp.sum(y, axis=0, keepdims=True))
        rows.append(jnp.sum(y * y, axis=0, keepdims=True))
    F = jnp.dot(jnp.concatenate(rows, axis=0), Mf1,
                preferred_element_type=jnp.float32) * inv_in     # (2*nB, Ns)
    zin = jnp.zeros((1, 2 * Ns), jnp.float32)
    for b in range(nB):
        mu = F[2 * b:2 * b + 1]
        var = jnp.maximum(F[2 * b + 1:2 * b + 2] - mu * mu, 0.0)
        tmod = (ys[b] - mu) * jax.lax.rsqrt(var + EPS) * weff + beff
        r0 = b * Hp
        lhs_ref[r0:r0 + 1, :] = zin
        lhs_ref[r0 + 1:r0 + 1 + H, 0:Ns] = tmod                  # torch.cat([t_mod, x])
        lhs_ref[r0 + 1:r0 + 1 + H, Ns:2 * Ns] = x_ref[b]
        lhs_ref[r0 + H + 1:r0 + H + 2, :] = zin

    # ---- layer 1: fused concat-conv3x3 + bias + ReLU + BatchNorm -------------
    y1 = _conv3x3(lhs_ref, T1_ref, nB, Hp, H, Nm)
    y1 = [jnp.maximum(y + b1, 0.0) for y in y1]
    sc1, sh1 = _bn_scale_shift(y1, Mf1, g1, bt1, inv_bn)
    zmid = jnp.zeros((1, Nm), jnp.float32)
    for b in range(nB):
        r0 = b * Hp
        mid_ref[r0:r0 + 1, :] = zmid
        mid_ref[r0 + 1:r0 + 1 + H, :] = y1[b] * sc1 + sh1
        mid_ref[r0 + H + 1:r0 + H + 2, :] = zmid

    # ---- layer 2: conv3x3 + bias (+ ReLU + BatchNorm unless final) -----------
    y2 = _conv3x3(mid_ref, T2_ref, nB, Hp, H, No)
    if final:
        for b in range(nB):
            out_ref[b] = y2[b] + c2v[0:1]
    else:
        y2 = [jnp.maximum(y + c2v[0:1], 0.0) for y in y2]
        sc2, sh2 = _bn_scale_shift(y2, Mf2_ref[...], c2v[1:2], c2v[2:3], inv_bn)
        for b in range(nB):
            out_ref[b] = y2[b] * sc2 + sh2


# ============================ pallas_call wrappers ============================
def _full_spec(shape):
    z = (0,) * len(shape)
    return pl.BlockSpec(tuple(shape), lambda i, _z=z: _z)


def _stk_spec(tail):
    z = (0,) * len(tail)
    return pl.BlockSpec((None,) + tuple(tail), lambda i, _z=z: (i,) + _z)


def encoder_block(x, blk):
    nB, H, WCin = x.shape
    W = H                                  # spatial maps stay square in this net
    N = blk["c"].shape[1]                  # W * Cout
    Hp = H + 2
    kern = functools.partial(_enc_block_kernel, nB=nB, H=H, W=W, N=N)
    ins = [x, blk["T1"], blk["T2"], blk["Mf"], blk["c"]]
    return pl.pallas_call(
        kern,
        grid=(1,),
        in_specs=[_full_spec(a.shape) for a in ins],
        out_specs=_full_spec((nB, H, N)),
        out_shape=jax.ShapeDtypeStruct((nB, H, N), jnp.float32),
        scratch_shapes=[pltpu.VMEM((nB * Hp, WCin), jnp.float32),
                        pltpu.VMEM((nB * Hp, N), jnp.float32)],
        compiler_params=pltpu.CompilerParams(dimension_semantics=("arbitrary",)),
    )(*ins)


def decoder_block(t, xup, cvec, blk):
    nd = blk["T1"].shape[0]
    nB, H, Ns = t.shape
    W = H
    Hp = H + 2
    Nm = blk["c1"].shape[2]
    No = blk["c2"].shape[2]
    assert Ns == Nm                        # skip channels == decoder layer-1 channels
    final = "Mf2" not in blk
    kern = functools.partial(_dec_block_kernel, nB=nB, H=H, W=W,
                             Ns=Ns, Nm=Nm, No=No, final=final)
    ins = [t, xup, cvec, blk["T1"], blk["T2"], blk["Mf1"]]
    specs = [_full_spec(t.shape), _stk_spec(xup.shape[1:]), _stk_spec(cvec.shape[1:]),
             _stk_spec(blk["T1"].shape[1:]), _stk_spec(blk["T2"].shape[1:]),
             _full_spec(blk["Mf1"].shape)]
    if not final:
        ins.append(blk["Mf2"])
        specs.append(_full_spec(blk["Mf2"].shape))
    ins.append(blk["c2"])
    specs.append(_stk_spec(blk["c2"].shape[1:]))
    return pl.pallas_call(
        kern,
        grid=(nd,),                        # the two output decoders
        in_specs=specs,
        out_specs=_stk_spec((nB, H, No)),
        out_shape=jax.ShapeDtypeStruct((nd, nB, H, No), jnp.float32),
        scratch_shapes=[pltpu.VMEM((nB * Hp, 2 * Ns), jnp.float32),
                        pltpu.VMEM((nB * Hp, Nm), jnp.float32)],
        compiler_params=pltpu.CompilerParams(dimension_semantics=("arbitrary",)),
    )(*ins)


# ============================ XLA glue (row-layout pool / unpool / MLP) =======
def maxpool_rows(y, C):
    """F.max_pool2d(.,2,2,return_indices=True) in (B, H, W*C) row layout."""
    B_, H, WC = y.shape
    W = WC // C
    r = y.reshape(B_, H // 2, 2, W // 2, 2, C)
    r = r.transpose(0, 1, 3, 2, 4, 5).reshape(B_, H // 2, W // 2, 4, C)
    pooled = r.max(axis=3)
    idx = r.argmax(axis=3)
    return pooled.reshape(B_, H // 2, (W // 2) * C), idx


def maxunpool_rows(x, idx, C):
    """F.max_unpool2d(.,2,2) in row layout; x: (nd,B,h,w*C), idx: (B,h,w,C)."""
    nd, B_, h, wC = x.shape
    w = wC // C
    xr = x.reshape(nd, B_, h, w, C)
    oh = jax.nn.one_hot(idx, 4, dtype=x.dtype)           # (B, h, w, C, 4)
    y = xr[..., None] * oh[None]                          # (nd, B, h, w, C, 4)
    y = y.reshape(nd, B_, h, w, C, 2, 2)
    y = y.transpose(0, 1, 2, 5, 3, 6, 4)                  # nd, B, h, dh, w, dw, C
    return y.reshape(nd, B_, 2 * h, 2 * w * C)


def _film_mlp(bc, fw):
    """FiLM gamma/beta MLP (bc_vec-only), batched over the two decoders."""
    h = jax.nn.relu(jnp.einsum("bf,dfh->dbh", bc, fw["w1"]) + fw["b1"][:, None, :])
    h = jax.nn.relu(jnp.einsum("dbh,dhk->dbk", h, fw["w2"]) + fw["b2"][:, None, :])
    return jnp.einsum("dbk,dko->dbo", h, fw["w3"]) + fw["b3"][:, None, :]


# ============================ parameter packing ===============================
def _round_up(n, m):
    return ((n + m - 1) // m) * m


def _toeplitz_cat(w_oihw, W, npad):
    """(Cout,Cin,3,3) -> (W*Cin, 3*npad) kh-concatenated block-Toeplitz, no W pad."""
    w = np.asarray(w_oihw, np.float32)
    Cout, Cin = w.shape[0], w.shape[1]
    T = np.zeros((W * Cin, 3 * npad), np.float32)
    for kh in range(3):
        for kw in range(3):
            blk = w[:, :, kh, kw].T                         # (Cin, Cout)
            for wo in range(W):
                wi = wo + kw - 1
                if 0 <= wi < W:
                    T[wi * Cin:(wi + 1) * Cin,
                      kh * npad + wo * Cout: kh * npad + (wo + 1) * Cout] = blk
    return T


def _fold(W, C):
    """0/1 (W*C, W*C) matrix: row @ fold = per-channel sum replicated per lane."""
    return np.tile(np.eye(C, dtype=np.float32), (W, W))


def _tile_row(v, W):
    return np.tile(np.asarray(v, np.float32), W).reshape(1, -1)


def _convT_to_conv(wt_iohw):
    """ConvTranspose2d(k=3,s=1,p=1) weight (in,out,kh,kw) -> equiv conv (out,in,kh,kw)."""
    w = np.asarray(wt_iohw, np.float32)
    return np.ascontiguousarray(np.transpose(w[:, :, ::-1, ::-1], (1, 0, 2, 3)))


def pack_params(raw):
    nlev = len(FILTERS)

    # ---- encoder blocks ----
    enc = []
    hw = HW_IN
    for lvl_raw in raw["encoder"]:
        W = hw
        l0, l1 = lvl_raw
        C = int(np.asarray(l0["w"]).shape[0])
        Np = _round_up(W * C, 128)
        enc.append(dict(
            T1=jnp.asarray(_toeplitz_cat(l0["w"], W, Np), jnp.bfloat16),
            T2=jnp.asarray(_toeplitz_cat(l1["w"], W, Np), jnp.bfloat16),
            Mf=jnp.asarray(_fold(W, C), jnp.float32),
            c=jnp.asarray(np.concatenate(
                [_tile_row(l0["b"], W), _tile_row(l0["g"], W), _tile_row(l0["bt"], W),
                 _tile_row(l1["b"], W), _tile_row(l1["g"], W), _tile_row(l1["bt"], W)],
                axis=0), jnp.float32)))
        hw //= 2

    # ---- decoder blocks (stacked over the OUT_CH decoders) ----
    dec = []
    for lvl in range(nlev):
        W = HW_IN >> (nlev - 1 - lvl)
        final = (lvl == nlev - 1)
        T1s, T2s, c1s, c2s = [], [], [], []
        Cm = Co = None
        for d in range(OUT_CH):
            l0, l1 = raw["decoders"][d][lvl]
            f = raw["film"][d][lvl]
            w0 = _convT_to_conv(l0["w"])                    # (Cm, 2*Cs, 3, 3)
            w1c = _convT_to_conv(l1["w"])                   # (Co, Cm, 3, 3)
            Cm = w0.shape[0]
            Cs = w0.shape[1] // 2
            Co = w1c.shape[0]
            Nmp = _round_up(W * Cm, 128)
            Nop = _round_up(W * Co, 128)
            T1s.append(np.concatenate(                      # K-stack: [skip ; upsampled]
                [_toeplitz_cat(w0[:, :Cs], W, Nmp),
                 _toeplitz_cat(w0[:, Cs:], W, Nmp)], axis=0))
            T2s.append(_toeplitz_cat(w1c, W, Nop))
            # SE branch is exact per-channel constant: its input (spatial mean of
            # the InstanceNorm output) equals the IN bias.  Fold it into the IN
            # affine params -> weff/beff rows.
            inw = np.asarray(f["in_w"], np.float32)
            inb = np.asarray(f["in_b"], np.float32)
            s1 = np.maximum(np.asarray(f["se_w1"], np.float32) @ inb
                            + np.asarray(f["se_b1"], np.float32), 0.0)
            se = 1.0 / (1.0 + np.exp(-(np.asarray(f["se_w2"], np.float32) @ s1
                                       + np.asarray(f["se_b2"], np.float32))))
            c1s.append(np.concatenate(
                [_tile_row(inw * se, W), _tile_row(inb * se, W),
                 _tile_row(l0["b"], W), _tile_row(l0["g"], W), _tile_row(l0["bt"], W)],
                axis=0))
            if final:
                c2s.append(_tile_row(l1["b"], W))
            else:
                c2s.append(np.concatenate(
                    [_tile_row(l1["b"], W), _tile_row(l1["g"], W),
                     _tile_row(l1["bt"], W)], axis=0))
        blk = dict(T1=jnp.asarray(np.stack(T1s), jnp.bfloat16),
                   T2=jnp.asarray(np.stack(T2s), jnp.bfloat16),
                   c1=jnp.asarray(np.stack(c1s), jnp.float32),
                   c2=jnp.asarray(np.stack(c2s), jnp.float32),
                   Mf1=jnp.asarray(_fold(W, Cm), jnp.float32))
        if not final:
            blk["Mf2"] = jnp.asarray(_fold(W, Co), jnp.float32)
        dec.append(blk)

    # ---- FiLM MLP weights (hoisted to XLA; transposed to (in, out)) ----
    film = []
    for lvl in range(nlev):
        fw = {}
        for name in ("w1", "w2", "w3"):
            fw[name] = jnp.asarray(np.stack(
                [np.asarray(raw["film"][d][lvl][name], np.float32).T
                 for d in range(OUT_CH)]), jnp.float32)
        for name in ("b1", "b2", "b3"):
            fw[name] = jnp.asarray(np.stack(
                [np.asarray(raw["film"][d][lvl][name], np.float32)
                 for d in range(OUT_CH)]), jnp.float32)
        film.append(fw)

    return dict(enc=enc, dec=dec, film=film)


# ============================ raw parameters ==================================
class PInit:
    def __init__(self, key):
        self.key = key

    def __call__(self, shape, scale=0.1):
        self.key, k = jax.random.split(self.key)
        return scale * jax.random.normal(k, shape, jnp.float32)


def build_raw_params(key):
    pi = PInit(key)

    encoder = []
    for i, f in enumerate(FILTERS):
        prev = IN_CH if i == 0 else FILTERS[i - 1]
        lvl = []
        for li in range(LAYERS):
            cin = prev if li == 0 else f
            lvl.append(dict(w=pi((f, cin, 3, 3)), b=pi((f,)),
                            g=jnp.ones((f,), jnp.float32),
                            bt=jnp.zeros((f,), jnp.float32)))
        encoder.append(lvl)

    def build_decoder():
        blocks = []
        for i in range(len(FILTERS)):
            fin = FILTERS[i]
            fout = 1 if i == 0 else FILTERS[i - 1]
            layers_p = []
            for li in range(LAYERS):
                _in = fin * 2 if li == 0 else fin
                _out = fin if li < LAYERS - 1 else fout
                layers_p.append(dict(w=pi((_in, _out, 3, 3)),   # ConvT weight (in,out,kh,kw)
                                     b=pi((_out,)),
                                     g=jnp.ones((_out,), jnp.float32),
                                     bt=jnp.zeros((_out,), jnp.float32)))
            blocks.append(layers_p)
        return blocks[::-1]

    decoders = [build_decoder() for _ in range(OUT_CH)]

    skip_ch = list(reversed(FILTERS))

    def build_film(C):
        r = SE_REDUCTION
        return dict(w1=pi((2 * C, FC_IN)), b1=pi((2 * C,)),      # Linear (out, in)
                    w2=pi((4 * C, 2 * C)), b2=pi((4 * C,)),
                    w3=pi((2 * C, 4 * C)), b3=pi((2 * C,)),
                    in_w=jnp.ones((C,), jnp.float32),
                    in_b=jnp.zeros((C,), jnp.float32),
                    se_w1=pi((C // r, C)), se_b1=pi((C // r,)),  # 1x1 convs as (out, in)
                    se_w2=pi((C, C // r)), se_b2=pi((C,)))

    film = [[build_film(c) for c in skip_ch] for _ in range(OUT_CH)]
    return dict(encoder=encoder, decoders=decoders, film=film)


# ============================ forward =========================================
@jax.jit
def enhanced_unet_film_forward(x, bc_vec, packed):
    nB, Cin, H0, W0 = x.shape
    cur = jnp.transpose(x, (0, 2, 3, 1)).reshape(nB, H0, W0 * Cin)   # row layout

    # ---- encode ----
    skips, idxs = [], []
    for blk in packed["enc"]:
        y = encoder_block(cur, blk)                      # (B, H, W*C)
        skips.append(y)
        C = blk["c"].shape[1] // y.shape[1]              # W == H (square)
        cur, idx = maxpool_rows(y, C)
        idxs.append(idx)

    # ---- decode (both output decoders on the pallas grid axis) ----
    nd = packed["dec"][0]["T1"].shape[0]
    xcur = jnp.broadcast_to(cur[None], (nd,) + cur.shape)
    for lvl, blk in enumerate(packed["dec"]):
        t = skips.pop()
        idx = idxs.pop()
        H = t.shape[1]
        W = H
        Cs = t.shape[2] // W
        gb = _film_mlp(bc_vec, packed["film"][lvl])      # (nd, B, 2*Cs), hoisted MLP
        grow = jnp.tile(gb[..., :Cs], (1, 1, W))
        brow = jnp.tile(gb[..., Cs:], (1, 1, W))
        gbrows = jnp.stack([grow, brow], axis=2).reshape(nd, 2 * nB, W * Cs)
        cvec = jnp.concatenate([gbrows, blk["c1"]], axis=1)
        xup = maxunpool_rows(xcur, idx, Cs)              # (nd, B, H, W*Cs)
        xcur = decoder_block(t, xup, cvec, blk)          # (nd, B, H, W*Co)

    # final level Co == 1 -> (nd, B, H, W) -> (B, OUT_CH, H, W); final_activation None
    return jnp.transpose(xcur, (1, 0, 2, 3))


# ============================ main ============================================
if __name__ == "__main__":
    key = jax.random.PRNGKey(0)
    kx, kv, kp = jax.random.split(key, 3)
    x = jax.random.normal(kx, (B, IN_CH, HW_IN, HW_IN), jnp.float32)
    bc = jax.random.normal(kv, (B, FC_IN), jnp.float32)
    raw = build_raw_params(kp)
    packed = pack_params(raw)

    y = enhanced_unet_film_forward(x, bc, packed)
    y = jax.block_until_ready(y)
    assert y.shape == (B, OUT_CH, HW_IN, HW_IN), y.shape
    assert bool(jnp.all(jnp.isfinite(y)))
    print("KERNEL_OK")
</pallas_src>

<mosaic_0001>
module attributes {stable_mosaic.version = 11 : i64} {
  func.func @_enc_block_kernel(%arg0: i32, %arg1: memref<2x16x48xf32, #tpu.memory_space<vmem>>, %arg2: memref<48x384xbf16, #tpu.memory_space<vmem>>, %arg3: memref<128x384xbf16, #tpu.memory_space<vmem>>, %arg4: memref<128x128xf32, #tpu.memory_space<vmem>>, %arg5: memref<6x128xf32, #tpu.memory_space<vmem>>, %arg6: memref<2x16x128xf32, #tpu.memory_space<vmem>>, %arg7: memref<36x48xf32, #tpu.memory_space<vmem>>, %arg8: memref<36x128xf32, #tpu.memory_space<vmem>>) attributes {dimension_semantics = [#tpu.dimension_semantics<arbitrary>], iteration_bounds = array<i64: 1>, scalar_prefetch = 0 : i64, scratch_operands = 2 : i64, tpu.core_type = #tpu.core_type<tc>, window_params = [{pipeline_mode = #tpu.pipeline_mode<synchronous>, transform_indices = @transform_0, window_bounds = array<i64: 2, 16, 48>}, {pipeline_mode = #tpu.pipeline_mode<synchronous>, transform_indices = @transform_1, window_bounds = array<i64: 48, 384>}, {pipeline_mode = #tpu.pipeline_mode<synchronous>, transform_indices = @transform_2, window_bounds = array<i64: 128, 384>}, {pipeline_mode = #tpu.pipeline_mode<synchronous>, transform_indices = @transform_3, window_bounds = array<i64: 128, 128>}, {pipeline_mode = #tpu.pipeline_mode<synchronous>, transform_indices = @transform_4, window_bounds = array<i64: 6, 128>}, {pipeline_mode = #tpu.pipeline_mode<synchronous>, transform_indices = @transform_5, window_bounds = array<i64: 2, 16, 128>}]} {
    %c0 = arith.constant 0 : index
    %c0_0 = arith.constant 0 : index
    %0 = vector.load %arg5[%c0, %c0_0] : memref<6x128xf32, #tpu.memory_space<vmem>>, vector<6x128xf32>
    %c0_1 = arith.constant 0 : index
    %c0_2 = arith.constant 0 : index
    %1 = vector.load %arg4[%c0_1, %c0_2] : memref<128x128xf32, #tpu.memory_space<vmem>>, vector<128x128xf32>
    %cst = arith.constant 0.000000e+00 : f32
    %2 = vector.broadcast %cst : f32 to vector<1x48xf32>
    %c0_3 = arith.constant 0 : index
    %c0_4 = arith.constant 0 : index
    %3 = vector.load %arg7[%c0_3, %c0_4] : memref<36x48xf32, #tpu.memory_space<vmem>>, vector<1x48xf32>
    tpu.vector_store %arg7[%c0_3, %c0_4], %2 {strides = array<i32>} : memref<36x48xf32, #tpu.memory_space<vmem>>, vector<1x48xf32>,
    %c0_5 = arith.constant 0 : index
    %c0_6 = arith.constant 0 : index
    %c0_7 = arith.constant 0 : index
    %4 = vector.load %arg1[%c0_5, %c0_6, %c0_7] : memref<2x16x48xf32, #tpu.memory_space<vmem>>, vector<1x16x48xf32>
    %5 = vector.shape_cast %4 : vector<1x16x48xf32> to vector<16x48xf32>
    %c1 = arith.constant 1 : index
    %c0_8 = arith.constant 0 : index
    %6 = vector.load %arg7[%c1, %c0_8] : memref<36x48xf32, #tpu.memory_space<vmem>>, vector<16x48xf32>
    tpu.vector_store %arg7[%c1, %c0_8], %5 {strides = array<i32>} : memref<36x48xf32, #tpu.memory_space<vmem>>, vector<16x48xf32>,
    %c17 = arith.constant 17 : index
    %c0_9 = arith.constant 0 : index
    %7 = vector.load %arg7[%c17, %c0_9] : memref<36x48xf32, #tpu.memory_space<vmem>>, vector<1x48xf32>
    tpu.vector_store %arg7[%c17, %c0_9], %2 {strides = array<i32>} : memref<36x48xf32, #tpu.memory_space<vmem>>, vector<1x48xf32>,
    %c18 = arith.constant 18 : index
    %c0_10 = arith.constant 0 : index
    %8 = vector.load %arg7[%c18, %c0_10] : memref<36x48xf32, #tpu.memory_space<vmem>>, vector<1x48xf32>
    tpu.vector_store %arg7[%c18, %c0_10], %2 {strides = array<i32>} : memref<36x48xf32, #tpu.memory_space<vmem>>, vector<1x48xf32>,
    %c1_11 = arith.constant 1 : index
    %c0_12 = arith.constant 0 : index
    %c0_13 = arith.constant 0 : index
    %9 = vector.load %arg1[%c1_11, %c0_12, %c0_13] : memref<2x16x48xf32, #tpu.memory_space<vmem>>, vector<1x16x48xf32>
    %10 = vector.shape_cast %9 : vector<1x16x48xf32> to vector<16x48xf32>
    %c19 = arith.constant 19 : index
    %c0_14 = arith.constant 0 : index
    %11 = vector.load %arg7[%c19, %c0_14] : memref<36x48xf32, #tpu.memory_space<vmem>>, vector<16x48xf32>
    tpu.vector_store %arg7[%c19, %c0_14], %10 {strides = array<i32>} : memref<36x48xf32, #tpu.memory_space<vmem>>, vector<16x48xf32>,
    %c35 = arith.constant 35 : index
    %c0_15 = arith.constant 0 : index
    %12 = vector.load %arg7[%c35, %c0_15] : memref<36x48xf32, #tpu.memory_space<vmem>>, vector<1x48xf32>
    tpu.vector_store %arg7[%c35, %c0_15], %2 {strides = array<i32>} : memref<36x48xf32, #tpu.memory_space<vmem>>, vector<1x48xf32>,
    %c0_16 = arith.constant 0 : index
    %c0_17 = arith.constant 0 : index
    %13 = vector.load %arg7[%c0_16, %c0_17] : memref<36x48xf32, #tpu.memory_space<vmem>>, vector<36x48xf32>
    %14 = arith.truncf %13 : vector<36x48xf32> to vector<36x48xbf16>
    %c0_18 = arith.constant 0 : index
    %c0_19 = arith.constant 0 : index
    %15 = vector.load %arg2[%c0_18, %c0_19] : memref<48x384xbf16, #tpu.memory_space<vmem>>, vector<48x384xbf16>
    %cst_20 = arith.constant dense<0.000000e+00> : vector<36x384xf32>
    %16 = tpu.matmul %14, %15, %cst_20 {dimension_numbers = #tpu.dot_dimension_numbers<[1], [0], [0], [1], [0, 0, 1, 1], [], []>} : vector<36x48xbf16>, vector<48x384xbf16>, vector<36x384xf32> -> vector<36x384xf32>
    %17 = vector.extract_strided_slice %16 {offsets = [0, 0], sizes = [16, 128], strides = [1, 1]} : vector<36x384xf32> to vector<16x128xf32>
    %18 = vector.extract_strided_slice %16 {offsets = [1, 128], sizes = [16, 128], strides = [1, 1]} : vector<36x384xf32> to vector<16x128xf32>
    %19 = arith.addf %17, %18 : vector<16x128xf32>
    %20 = vector.extract_strided_slice %16 {offsets = [2, 256], sizes = [16, 128], strides = [1, 1]} : vector<36x384xf32> to vector<16x128xf32>
    %21 = arith.addf %19, %20 : vector<16x128xf32>
    %22 = vector.extract_strided_slice %16 {offsets = [18, 0], sizes = [16, 128], strides = [1, 1]} : vector<36x384xf32> to vector<16x128xf32>
    %23 = vector.extract_strided_slice %16 {offsets = [19, 128], sizes = [16, 128], strides = [1, 1]} : vector<36x384xf32> to vector<16x128xf32>
    %24 = arith.addf %22, %23 : vector<16x128xf32>
    %25 = vector.extract_strided_slice %16 {offsets = [20, 256], sizes = [16, 128], strides = [1, 1]} : vector<36x384xf32> to vector<16x128xf32>
    %26 = arith.addf %24, %25 : vector<16x128xf32>
    %27 = vector.extract_strided_slice %0 {offsets = [0, 0], sizes = [1, 128], strides = [1, 1]} : vector<6x128xf32> to vector<1x128xf32>
    %28 = vector.broadcast %27 : vector<1x128xf32> to vector<16x128xf32>
    %29 = arith.addf %21, %28 : vector<16x128xf32>
    %cst_21 = arith.constant 0.000000e+00 : f32
    %30 = vector.broadcast %cst_21 : f32 to vector<16x128xf32>
    %31 = arith.maximumf %29, %30 : vector<16x128xf32>
    %32 = vector.extract_strided_slice %0 {offsets = [0, 0], sizes = [1, 128], strides = [1, 1]} : vector<6x128xf32> to vector<1x128xf32>
    %33 = vector.broadcast %32 : vector<1x128xf32> to vector<16x128xf32>
    %34 = arith.addf %26, %33 : vector<16x128xf32>
    %cst_22 = arith.constant 0.000000e+00 : f32
    %35 = vector.broadcast %cst_22 : f32 to vector<16x128xf32>
    %36 = arith.maximumf %34, %35 : vector<16x128xf32>
    %37 = vector.extract_strided_slice %0 {offsets = [1, 0], sizes = [1, 128], strides = [1, 1]} : vector<6x128xf32> to vector<1x128xf32>
    %38 = vector.extract_strided_slice %0 {offsets = [2, 0], sizes = [1, 128], strides = [1, 1]} : vector<6x128xf32> to vector<1x128xf32>
    %cst_23 = arith.constant 0.000000e+00 : f32
    %39 = vector.broadcast %cst_23 : f32 to vector<1x128xf32>
    %cst_24 = arith.constant 0.000000e+00 : f32
    %40 = vector.broadcast %cst_24 : f32 to vector<1x128xf32>
    %cst_25 = arith.constant dense<0.000000e+00> : vector<128xf32>
    %41 = vector.multi_reduction <add>, %31, %cst_25 [0] : vector<16x128xf32> to vector<128xf32>
    %42 = vector.shape_cast %41 : vector<128xf32> to vector<1x128xf32>
    %43 = arith.addf %39, %42 : vector<1x128xf32>
    %44 = arith.mulf %31, %31 : vector<16x128xf32>
    %cst_26 = arith.constant dense<0.000000e+00> : vector<128xf32>
    %45 = vector.multi_reduction <add>, %44, %cst_26 [0] : vector<16x128xf32> to vector<128xf32>
    %46 = vector.shape_cast %45 : vector<128xf32> to vector<1x128xf32>
    %47 = arith.addf %40, %46 : vector<1x128xf32>
    %cst_27 = arith.constant dense<0.000000e+00> : vector<128xf32>
    %48 = vector.multi_reduction <add>, %36, %cst_27 [0] : vector<16x128xf32> to vector<128xf32>
    %49 = vector.shape_cast %48 : vector<128xf32> to vector<1x128xf32>
    %50 = arith.addf %43, %49 : vector<1x128xf32>
    %51 = arith.mulf %36, %36 : vector<16x128xf32>
    %cst_28 = arith.constant dense<0.000000e+00> : vector<128xf32>
    %52 = vector.multi_reduction <add>, %51, %cst_28 [0] : vector<16x128xf32> to vector<128xf32>
    %53 = vector.shape_cast %52 : vector<128xf32> to vector<1x128xf32>
    %54 = arith.addf %47, %53 : vector<1x128xf32>
    %55 = tpu.concatenate %50, %54 in 0 : vector<1x128xf32>, vector<1x128xf32> -> vector<2x128xf32>
    %cst_29 = arith.constant dense<0.000000e+00> : vector<2x128xf32>
    %56 = tpu.matmul %55, %1, %cst_29 {dimension_numbers = #tpu.dot_dimension_numbers<[1], [0], [0], [1], [0, 0, 1, 1], [], []>} : vector<2x128xf32>, vector<128x128xf32>, vector<2x128xf32> -> vector<2x128xf32>
    %cst_30 = arith.constant 0.001953125 : f32
    %57 = vector.broadcast %cst_30 : f32 to vector<2x128xf32>
    %58 = arith.mulf %56, %57 : vector<2x128xf32>
    %59 = vector.extract_strided_slice %58 {offsets = [0, 0], sizes = [1, 128], strides = [1, 1]} : vector<2x128xf32> to vector<1x128xf32>
    %60 = vector.extract_strided_slice %58 {offsets = [1, 0], sizes = [1, 128], strides = [1, 1]} : vector<2x128xf32> to vector<1x128xf32>
    %61 = arith.mulf %59, %59 : vector<1x128xf32>
    %62 = arith.subf %60, %61 : vector<1x128xf32>
    %cst_31 = arith.constant 0.000000e+00 : f32
    %63 = vector.broadcast %cst_31 : f32 to vector<1x128xf32>
    %64 = arith.maximumf %62, %63 : vector<1x128xf32>
    %cst_32 = arith.constant 9.99999974E-6 : f32
    %65 = vector.broadcast %cst_32 : f32 to vector<1x128xf32>
    %66 = arith.addf %64, %65 : vector<1x128xf32>
    %67 = math.rsqrt %66 : vector<1x128xf32>
    %68 = arith.mulf %37, %67 : vector<1x128xf32>
    %69 = arith.mulf %59, %68 : vector<1x128xf32>
    %70 = arith.subf %38, %69 : vector<1x128xf32>
    %cst_33 = arith.constant 0.000000e+00 : f32
    %71 = vector.broadcast %cst_33 : f32 to vector<1x128xf32>
    %c0_34 = arith.constant 0 : index
    %c0_35 = arith.constant 0 : index
    %72 = vector.load %arg8[%c0_34, %c0_35] : memref<36x128xf32, #tpu.memory_space<vmem>>, vector<1x128xf32>
    tpu.vector_store %arg8[%c0_34, %c0_35], %71 {strides = array<i32>} : memref<36x128xf32, #tpu.memory_space<vmem>>, vector<1x128xf32>,
    %73 = vector.broadcast %68 : vector<1x128xf32> to vector<16x128xf32>
    %74 = arith.mulf %31, %73 : vector<16x128xf32>
    %75 = vector.broadcast %70 : vector<1x128xf32> to vector<16x128xf32>
    %76 = arith.addf %74, %75 : vector<16x128xf32>
    %c1_36 = arith.constant 1 : index
    %c0_37 = arith.constant 0 : index
    %77 = vector.load %arg8[%c1_36, %c0_37] : memref<36x128xf32, #tpu.memory_space<vmem>>, vector<16x128xf32>
    tpu.vector_store %arg8[%c1_36, %c0_37], %76 {strides = array<i32>} : memref<36x128xf32, #tpu.memory_space<vmem>>, vector<16x128xf32>,
    %c17_38 = arith.constant 17 : index
    %c0_39 = arith.constant 0 : index
    %78 = vector.load %arg8[%c17_38, %c0_39] : memref<36x128xf32, #tpu.memory_space<vmem>>, vector<1x128xf32>
    tpu.vector_store %arg8[%c17_38, %c0_39], %71 {strides = array<i32>} : memref<36x128xf32, #tpu.memory_space<vmem>>, vector<1x128xf32>,
    %c18_40 = arith.constant 18 : index
    %c0_41 = arith.constant 0 : index
    %79 = vector.load %arg8[%c18_40, %c0_41] : memref<36x128xf32, #tpu.memory_space<vmem>>, vector<1x128xf32>
    tpu.vector_store %arg8[%c18_40, %c0_41], %71 {strides = array<i32>} : memref<36x128xf32, #tpu.memory_space<vmem>>, vector<1x128xf32>,
    %80 = vector.broadcast %68 : vector<1x128xf32> to vector<16x128xf32>
    %81 = arith.mulf %36, %80 : vector<16x128xf32>
    %82 = vector.broadcast %70 : vector<1x128xf32> to vector<16x128xf32>
    %83 = arith.addf %81, %82 : vector<16x128xf32>
    %c19_42 = arith.constant 19 : index
    %c0_43 = arith.constant 0 : index
    %84 = vector.load %arg8[%c19_42, %c0_43] : memref<36x128xf32, #tpu.memory_space<vmem>>, vector<16x128xf32>
    tpu.vector_store %arg8[%c19_42, %c0_43], %83 {strides = array<i32>} : memref<36x128xf32, #tpu.memory_space<vmem>>, vector<16x128xf32>,
    %c35_44 = arith.constant 35 : index
    %c0_45 = arith.constant 0 : index
    %85 = vector.load %arg8[%c35_44, %c0_45] : memref<36x128xf32, #tpu.memory_space<vmem>>, vector<1x128xf32>
    tpu.vector_store %arg8[%c35_44, %c0_45], %71 {strides = array<i32>} : memref<36x128xf32, #tpu.memory_space<vmem>>, vector<1x128xf32>,
    %c0_46 = arith.constant 0 : index
    %c0_47 = arith.constant 0 : index
    %86 = vector.load %arg8[%c0_46, %c0_47] : memref<36x128xf32, #tpu.memory_space<vmem>>, vector<36x128xf32>
    %87 = arith.truncf %86 : vector<36x128xf32> to vector<36x128xbf16>
    %c0_48 = arith.constant 0 : index
    %c0_49 = arith.constant 0 : index
    %88 = vector.load %arg3[%c0_48, %c0_49] : memref<128x384xbf16, #tpu.memory_space<vmem>>, vector<128x384xbf16>
    %cst_50 = arith.constant dense<0.000000e+00> : vector<36x384xf32>
    %89 = tpu.matmul %87, %88, %cst_50 {dimension_numbers = #tpu.dot_dimension_numbers<[1], [0], [0], [1], [0, 0, 1, 1], [], []>} : vector<36x128xbf16>, vector<128x384xbf16>, vector<36x384xf32> -> vector<36x384xf32>
    %90 = vector.extract_strided_slice %89 {offsets = [0, 0], sizes = [16, 128], strides = [1, 1]} : vector<36x384xf32> to vector<16x128xf32>
    %91 = vector.extract_strided_slice %89 {offsets = [1, 128], sizes = [16, 128], strides = [1, 1]} : vector<36x384xf32> to vector<16x128xf32>
    %92 = arith.addf %90, %91 : vector<16x128xf32>
    %93 = vector.extract_strided_slice %89 {offsets = [2, 256], sizes = [16, 128], strides = [1, 1]} : vector<36x384xf32> to vector<16x128xf32>
    %94 = arith.addf %92, %93 : vector<16x128xf32>
    %95 = vector.extract_strided_slice %89 {offsets = [18, 0], sizes = [16, 128], strides = [1, 1]} : vector<36x384xf32> to vector<16x128xf32>
    %96 = vector.extract_strided_slice %89 {offsets = [19, 128], sizes = [16, 128], strides = [1, 1]} : vector<36x384xf32> to vector<16x128xf32>
    %97 = arith.addf %95, %96 : vector<16x128xf32>
    %98 = vector.extract_strided_slice %89 {offsets = [20, 256], sizes = [16, 128], strides = [1, 1]} : vector<36x384xf32> to vector<16x128xf32>
    %99 = arith.addf %97, %98 : vector<16x128xf32>
    %100 = vector.extract_strided_slice %0 {offsets = [3, 0], sizes = [1, 128], strides = [1, 1]} : vector<6x128xf32> to vector<1x128xf32>
    %101 = vector.broadcast %100 : vector<1x128xf32> to vector<16x128xf32>
    %102 = arith.addf %94, %101 : vector<16x128xf32>
    %cst_51 = arith.constant 0.000000e+00 : f32
    %103 = vector.broadcast %cst_51 : f32 to vector<16x128xf32>
    %104 = arith.maximumf %102, %103 : vector<16x128xf32>
    %105 = vector.extract_strided_slice %0 {offsets = [3, 0], sizes = [1, 128], strides = [1, 1]} : vector<6x128xf32> to vector<1x128xf32>
    %106 = vector.broadcast %105 : vector<1x128xf32> to vector<16x128xf32>
    %107 = arith.addf %99, %106 : vector<16x128xf32>
    %cst_52 = arith.constant 0.000000e+00 : f32
    %108 = vector.broadcast %cst_52 : f32 to vector<16x128xf32>
    %109 = arith.maximumf %107, %108 : vector<16x128xf32>
    %110 = vector.extract_strided_slice %0 {offsets = [4, 0], sizes = [1, 128], strides = [1, 1]} : vector<6x128xf32> to vector<1x128xf32>
    %111 = vector.extract_strided_slice %0 {offsets = [5, 0], sizes = [1, 128], strides = [1, 1]} : vector<6x128xf32> to vector<1x128xf32>
    %cst_53 = arith.constant 0.000000e+00 : f32
    %112 = vector.broadcast %cst_53 : f32 to vector<1x128xf32>
    %cst_54 = arith.constant 0.000000e+00 : f32
    %113 = vector.broadcast %cst_54 : f32 to vector<1x128xf32>
    %cst_55 = arith.constant dense<0.000000e+00> : vector<128xf32>
    %114 = vector.multi_reduction <add>, %104, %cst_55 [0] : vector<16x128xf32> to vector<128xf32>
    %115 = vector.shape_cast %114 : vector<128xf32> to vector<1x128xf32>
    %116 = arith.addf %112, %115 : vector<1x128xf32>
    %117 = arith.mulf %104, %104 : vector<16x128xf32>
    %cst_56 = arith.constant dense<0.000000e+00> : vector<128xf32>
    %118 = vector.multi_reduction <add>, %117, %cst_56 [0] : vector<16x128xf32> to vector<128xf32>
    %119 = vector.shape_cast %118 : vector<128xf32> to vector<1x128xf32>
    %120 = arith.addf %113, %119 : vector<1x128xf32>
    %cst_57 = arith.constant dense<0.000000e+00> : vector<128xf32>
    %121 = vector.multi_reduction <add>, %109, %cst_57 [0] : vector<16x128xf32> to vector<128xf32>
    %122 = vector.shape_cast %121 : vector<128xf32> to vector<1x128xf32>
    %123 = arith.addf %116, %122 : vector<1x128xf32>
    %124 = arith.mulf %109, %109 : vector<16x128xf32>
    %cst_58 = arith.constant dense<0.000000e+00> : vector<128xf32>
    %125 = vector.multi_reduction <add>, %124, %cst_58 [0] : vector<16x128xf32> to vector<128xf32>
    %126 = vector.shape_cast %125 : vector<128xf32> to vector<1x128xf32>
    %127 = arith.addf %120, %126 : vector<1x128xf32>
    %128 = tpu.concatenate %123, %127 in 0 : vector<1x128xf32>, vector<1x128xf32> -> vector<2x128xf32>
    %cst_59 = arith.constant dense<0.000000e+00> : vector<2x128xf32>
    %129 = tpu.matmul %128, %1, %cst_59 {dimension_numbers = #tpu.dot_dimension_numbers<[1], [0], [0], [1], [0, 0, 1, 1], [], []>} : vector<2x128xf32>, vector<128x128xf32>, vector<2x128xf32> -> vector<2x128xf32>
    %cst_60 = arith.constant 0.001953125 : f32
    %130 = vector.broadcast %cst_60 : f32 to vector<2x128xf32>
    %131 = arith.mulf %129, %130 : vector<2x128xf32>
    %132 = vector.extract_strided_slice %131 {offsets = [0, 0], sizes = [1, 128], strides = [1, 1]} : vector<2x128xf32> to vector<1x128xf32>
    %133 = vector.extract_strided_slice %131 {offsets = [1, 0], sizes = [1, 128], strides = [1, 1]} : vector<2x128xf32> to vector<1x128xf32>
    %134 = arith.mulf %132, %132 : vector<1x128xf32>
    %135 = arith.subf %133, %134 : vector<1x128xf32>
    %cst_61 = arith.constant 0.000000e+00 : f32
    %136 = vector.broadcast %cst_61 : f32 to vector<1x128xf32>
    %137 = arith.maximumf %135, %136 : vector<1x128xf32>
    %cst_62 = arith.constant 9.99999974E-6 : f32
    %138 = vector.broadcast %cst_62 : f32 to vector<1x128xf32>
    %139 = arith.addf %137, %138 : vector<1x128xf32>
    %140 = math.rsqrt %139 : vector<1x128xf32>
    %141 = arith.mulf %110, %140 : vector<1x128xf32>
    %142 = arith.mulf %132, %141 : vector<1x128xf32>
    %143 = arith.subf %111, %142 : vector<1x128xf32>
    %144 = vector.broadcast %141 : vector<1x128xf32> to vector<16x128xf32>
    %145 = arith.mulf %104, %144 : vector<16x128xf32>
    %146 = vector.broadcast %143 : vector<1x128xf32> to vector<16x128xf32>
    %147 = arith.addf %145, %146 : vector<16x128xf32>
    %c0_63 = arith.constant 0 : index
    %c0_64 = arith.constant 0 : index
    %c0_65 = arith.constant 0 : index
    %148 = vector.load %arg6[%c0_63, %c0_64, %c0_65] : memref<2x16x128xf32, #tpu.memory_space<vmem>>, vector<1x16x128xf32>
    %149 = vector.shape_cast %148 : vector<1x16x128xf32> to vector<16x128xf32>
    %150 = vector.shape_cast %147 : vector<16x128xf32> to vector<1x16x128xf32>
    tpu.vector_store %arg6[%c0_63, %c0_64, %c0_65], %150 {strides = array<i32>} : memref<2x16x128xf32, #tpu.memory_space<vmem>>, vector<1x16x128xf32>,
    %151 = vector.broadcast %141 : vector<1x128xf32> to vector<16x128xf32>
    %152 = arith.mulf %109, %151 : vector<16x128xf32>
    %153 = vector.broadcast %143 : vector<1x128xf32> to vector<16x128xf32>
    %154 = arith.addf %152, %153 : vector<16x128xf32>
    %c1_66 = arith.constant 1 : index
    %c0_67 = arith.constant 0 : index
    %c0_68 = arith.constant 0 : index
    %155 = vector.load %arg6[%c1_66, %c0_67, %c0_68] : memref<2x16x128xf32, #tpu.memory_space<vmem>>, vector<1x16x128xf32>
    %156 = vector.shape_cast %155 : vector<1x16x128xf32> to vector<16x128xf32>
    %157 = vector.shape_cast %154 : vector<16x128xf32> to vector<1x16x128xf32>
    tpu.vector_store %arg6[%c1_66, %c0_67, %c0_68], %157 {strides = array<i32>} : memref<2x16x128xf32, #tpu.memory_space<vmem>>, vector<1x16x128xf32>,
    return
  }
  func.func @transform_0(%arg0: i32) -> (i32, i32, i32) {
    %c0_i32 = arith.constant 0 : i32
    %c0_i32_0 = arith.constant 0 : i32
    %c0_i32_1 = arith.constant 0 : i32
    %c0_i32_2 = arith.constant 0 : i32
    return %c0_i32, %c0_i32_0, %c0_i32_1 : i32, i32, i32
  }
  func.func @transform_1(%arg0: i32) -> (i32, i32) {
    %c0_i32 = arith.constant 0 : i32
    %c0_i32_0 = arith.constant 0 : i32
    %c0_i32_1 = arith.constant 0 : i32
    return %c0_i32, %c0_i32_0 : i32, i32
  }
  func.func @transform_2(%arg0: i32) -> (i32, i32) {
    %c0_i32 = arith.constant 0 : i32
    %c0_i32_0 = arith.constant 0 : i32
    %c0_i32_1 = arith.constant 0 : i32
    return %c0_i32, %c0_i32_0 : i32, i32
  }
  func.func @transform_3(%arg0: i32) -> (i32, i32) {
    %c0_i32 = arith.constant 0 : i32
    %c0_i32_0 = arith.constant 0 : i32
    %c0_i32_1 = arith.constant 0 : i32
    return %c0_i32, %c0_i32_0 : i32, i32
  }
  func.func @transform_4(%arg0: i32) -> (i32, i32) {
    %c0_i32 = arith.constant 0 : i32
    %c0_i32_0 = arith.constant 0 : i32
    %c0_i32_1 = arith.constant 0 : i32
    return %c0_i32, %c0_i32_0 : i32, i32
  }
  func.func @transform_5(%arg0: i32) -> (i32, i32, i32) {
    %c0_i32 = arith.constant 0 : i32
    %c0_i32_0 = arith.constant 0 : i32
    %c0_i32_1 = arith.constant 0 : i32
    %c0_i32_2 = arith.constant 0 : i32
    return %c0_i32, %c0_i32_0, %c0_i32_1 : i32, i32, i32
  }
}

module attributes {stable_mosaic.version = 11 : i64} {
  func.func @_enc_block_kernel(%arg0: i32, %arg1: memref<2x8x64xf32, #tpu.memory_space<vmem>>, %arg2: memref<64x384xbf16, #tpu.memory_space<vmem>>, %arg3: memref<128x384xbf16, #tpu.memory_space<vmem>>, %arg4: memref<128x128xf32, #tpu.memory_space<vmem>>, %arg5: memref<6x128xf32, #tpu.memory_space<vmem>>, %arg6: memref<2x8x128xf32, #tpu.memory_space<vmem>>, %arg7: memref<20x64xf32, #tpu.memory_space<vmem>>, %arg8: memref<20x128xf32, #tpu.memory_space<vmem>>) attributes {dimension_semantics = [#tpu.dimension_semantics<arbitrary>], iteration_bounds = array<i64: 1>, scalar_prefetch = 0 : i64, scratch_operands = 2 : i64, tpu.core_type = #tpu.core_type<tc>, window_params = [{pipeline_mode = #tpu.pipeline_mode<synchronous>, transform_indices = @transform_0, window_bounds = array<i64: 2, 8, 64>}, {pipeline_mode = #tpu.pipeline_mode<synchronous>, transform_indices = @transform_1, window_bounds = array<i64: 64, 384>}, {pipeline_mode = #tpu.pipeline_mode<synchronous>, transform_indices = @transform_2, window_bounds = array<i64: 128, 384>}, {pipeline_mode = #tpu.pipeline_mode<synchronous>, transform_indices = @transform_3, window_bounds = array<i64: 128, 128>}, {pipeline_mode = #tpu.pipeline_mode<synchronous>, transform_indices = @transform_4, window_bounds = array<i64: 6, 128>}, {pipeline_mode = #tpu.pipeline_mode<synchronous>, transform_indices = @transform_5, window_bounds = array<i64: 2, 8, 128>}]} {
    %c0 = arith.constant 0 : index
    %c0_0 = arith.constant 0 : index
    %0 = vector.load %arg5[%c0, %c0_0] : memref<6x128xf32, #tpu.memory_space<vmem>>, vector<6x128xf32>
    %c0_1 = arith.constant 0 : index
    %c0_2 = arith.constant 0 : index
    %1 = vector.load %arg4[%c0_1, %c0_2] : memref<128x128xf32, #tpu.memory_space<vmem>>, vector<128x128xf32>
    %cst = arith.constant 0.000000e+00 : f32
    %2 = vector.broadcast %cst : f32 to vector<1x64xf32>
    %c0_3 = arith.constant 0 : index
    %c0_4 = arith.constant 0 : index
    %3 = vector.load %arg7[%c0_3, %c0_4] : memref<20x64xf32, #tpu.memory_space<vmem>>, vector<1x64xf32>
    tpu.vector_store %arg7[%c0_3, %c0_4], %2 {strides = array<i32>} : memref<20x64xf32, #tpu.memory_space<vmem>>, vector<1x64xf32>,
    %c0_5 = arith.constant 0 : index
    %c0_6 = arith.constant 0 : index
    %c0_7 = arith.constant 0 : index
    %4 = vector.load %arg1[%c0_5, %c0_6, %c0_7] : memref<2x8x64xf32, #tpu.memory_space<vmem>>, vector<1x8x64xf32>
    %5 = vector.shape_cast %4 : vector<1x8x64xf32> to vector<8x64xf32>
    %c1 = arith.constant 1 : index
    %c0_8 = arith.constant 0 : index
    %6 = vector.load %arg7[%c1, %c0_8] : memref<20x64xf32, #tpu.memory_space<vmem>>, vector<8x64xf32>
    tpu.vector_store %arg7[%c1, %c0_8], %5 {strides = array<i32>} : memref<20x64xf32, #tpu.memory_space<vmem>>, vector<8x64xf32>,
    %c9 = arith.constant 9 : index
    %c0_9 = arith.constant 0 : index
    %7 = vector.load %arg7[%c9, %c0_9] : memref<20x64xf32, #tpu.memory_space<vmem>>, vector<1x64xf32>
    tpu.vector_store %arg7[%c9, %c0_9], %2 {strides = array<i32>} : memref<20x64xf32, #tpu.memory_space<vmem>>, vector<1x64xf32>,
    %c10 = arith.constant 10 : index
    %c0_10 = arith.constant 0 : index
    %8 = vector.load %arg7[%c10, %c0_10] : memref<20x64xf32, #tpu.memory_space<vmem>>, vector<1x64xf32>
    tpu.vector_store %arg7[%c10, %c0_10], %2 {strides = array<i32>} : memref<20x64xf32, #tpu.memory_space<vmem>>, vector<1x64xf32>,
    %c1_11 = arith.constant 1 : index
    %c0_12 = arith.constant 0 : index
    %c0_13 = arith.constant 0 : index
    %9 = vector.load %arg1[%c1_11, %c0_12, %c0_13] : memref<2x8x64xf32, #tpu.memory_space<vmem>>, vector<1x8x64xf32>
    %10 = vector.shape_cast %9 : vector<1x8x64xf32> to vector<8x64xf32>
    %c11 = arith.constant 11 : index
    %c0_14 = arith.constant 0 : index
    %11 = vector.load %arg7[%c11, %c0_14] : memref<20x64xf32, #tpu.memory_space<vmem>>, vector<8x64xf32>
    tpu.vector_store %arg7[%c11, %c0_14], %10 {strides = array<i32>} : memref<20x64xf32, #tpu.memory_space<vmem>>, vector<8x64xf32>,
    %c19 = arith.constant 19 : index
    %c0_15 = arith.constant 0 : index
    %12 = vector.load %arg7[%c19, %c0_15] : memref<20x64xf32, #tpu.memory_space<vmem>>, vector<1x64xf32>
    tpu.vector_store %arg7[%c19, %c0_15], %2 {strides = array<i32>} : memref<20x64xf32, #tpu.memory_space<vmem>>, vector<1x64xf32>,
    %c0_16 = arith.constant 0 : index
    %c0_17 = arith.constant 0 : index
    %13 = vector.load %arg7[%c0_16, %c0_17] : memref<20x64xf32, #tpu.memory_space<vmem>>, vector<20x64xf32>
    %14 = arith.truncf %13 : vector<20x64xf32> to vector<20x64xbf16>
    %c0_18 = arith.constant 0 : index
    %c0_19 = arith.constant 0 : index
    %15 = vector.load %arg2[%c0_18, %c0_19] : memref<64x384xbf16, #tpu.memory_space<vmem>>, vector<64x384xbf16>
    %cst_20 = arith.constant dense<0.000000e+00> : vector<20x384xf32>
    %16 = tpu.matmul %14, %15, %cst_20 {dimension_numbers = #tpu.dot_dimension_numbers<[1], [0], [0], [1], [0, 0, 1, 1], [], []>} : vector<20x64xbf16>, vector<64x384xbf16>, vector<20x384xf32> -> vector<20x384xf32>
    %17 = vector.extract_strided_slice %16 {offsets = [0, 0], sizes = [8, 128], strides = [1, 1]} : vector<20x384xf32> to vector<8x128xf32>
    %18 = vector.extract_strided_slice %16 {offsets = [1, 128], sizes = [8, 128], strides = [1, 1]} : vector<20x384xf32> to vector<8x128xf32>
    %19 = arith.addf %17, %18 : vector<8x128xf32>
    %20 = vector.extract_strided_slice %16 {offsets = [2, 256], sizes = [8, 128], strides = [1, 1]} : vector<20x384xf32> to vector<8x128xf32>
    %21 = arith.addf %19, %20 : vector<8x128xf32>
    %22 = vector.extract_strided_slice %16 {offsets = [10, 0], sizes = [8, 128], strides = [1, 1]} : vector<20x384xf32> to vector<8x128xf32>
    %23 = vector.extract_strided_slice %16 {offsets = [11, 128], sizes = [8, 128], strides = [1, 1]} : vector<20x384xf32> to vector<8x128xf32>
    %24 = arith.addf %22, %23 : vector<8x128xf32>
    %25 = vector.extract_strided_slice %16 {offsets = [12, 256], sizes = [8, 128], strides = [1, 1]} : vector<20x384xf32> to vector<8x128xf32>
    %26 = arith.addf %24, %25 : vector<8x128xf32>
    %27 = vector.extract_strided_slice %0 {offsets = [0, 0], sizes = [1, 128], strides = [1, 1]} : vector<6x128xf32> to vector<1x128xf32>
    %28 = vector.broadcast %27 : vector<1x128xf32> to vector<8x128xf32>
    %29 = arith.addf %21, %28 : vector<8x128xf32>
    %cst_21 = arith.constant 0.000000e+00 : f32
    %30 = vector.broadcast %cst_21 : f32 to vector<8x128xf32>
    %31 = arith.maximumf %29, %30 : vector<8x128xf32>
    %32 = vector.extract_strided_slice %0 {offsets = [0, 0], sizes = [1, 128], strides = [1, 1]} : vector<6x128xf32> to vector<1x128xf32>
    %33 = vector.broadcast %32 : vector<1x128xf32> to vector<8x128xf32>
    %34 = arith.addf %26, %33 : vector<8x128xf32>
    %cst_22 = arith.constant 0.000000e+00 : f32
    %35 = vector.broadcast %cst_22 : f32 to vector<8x128xf32>
    %36 = arith.maximumf %34, %35 : vector<8x128xf32>
    %37 = vector.extract_strided_slice %0 {offsets = [1, 0], sizes = [1, 128], strides = [1, 1]} : vector<6x128xf32> to vector<1x128xf32>
    %38 = vector.extract_strided_slice %0 {offsets = [2, 0], sizes = [1, 128], strides = [1, 1]} : vector<6x128xf32> to vector<1x128xf32>
    %cst_23 = arith.constant 0.000000e+00 : f32
    %39 = vector.broadcast %cst_23 : f32 to vector<1x128xf32>
    %cst_24 = arith.constant 0.000000e+00 : f32
    %40 = vector.broadcast %cst_24 : f32 to vector<1x128xf32>
    %cst_25 = arith.constant dense<0.000000e+00> : vector<128xf32>
    %41 = vector.multi_reduction <add>, %31, %cst_25 [0] : vector<8x128xf32> to vector<128xf32>
    %42 = vector.shape_cast %41 : vector<128xf32> to vector<1x128xf32>
    %43 = arith.addf %39, %42 : vector<1x128xf32>
    %44 = arith.mulf %31, %31 : vector<8x128xf32>
    %cst_26 = arith.constant dense<0.000000e+00> : vector<128xf32>
    %45 = vector.multi_reduction <add>, %44, %cst_26 [0] : vector<8x128xf32> to vector<128xf32>
    %46 = vector.shape_cast %45 : vector<128xf32> to vector<1x128xf32>
    %47 = arith.addf %40, %46 : vector<1x128xf32>
    %cst_27 = arith.constant dense<0.000000e+00> : vector<128xf32>
    %48 = vector.multi_reduction <add>, %36, %cst_27 [0] : vector<8x128xf32> to vector<128xf32>
    %49 = vector.shape_cast %48 : vector<128xf32> to vector<1x128xf32>
    %50 = arith.addf %43, %49 : vector<1x128xf32>
    %51 = arith.mulf %36, %36 : vector<8x128xf32>
    %cst_28 = arith.constant dense<0.000000e+00> : vector<128xf32>
    %52 = vector.multi_reduction <add>, %51, %cst_28 [0] : vector<8x128xf32> to vector<128xf32>
    %53 = vector.shape_cast %52 : vector<128xf32> to vector<1x128xf32>
    %54 = arith.addf %47, %53 : vector<1x128xf32>
    %55 = tpu.concatenate %50, %54 in 0 : vector<1x128xf32>, vector<1x128xf32> -> vector<2x128xf32>
    %cst_29 = arith.constant dense<0.000000e+00> : vector<2x128xf32>
    %56 = tpu.matmul %55, %1, %cst_29 {dimension_numbers = #tpu.dot_dimension_numbers<[1], [0], [0], [1], [0, 0, 1, 1], [], []>} : vector<2x128xf32>, vector<128x128xf32>, vector<2x128xf32> -> vector<2x128xf32>
    %cst_30 = arith.constant 7.812500e-03 : f32
    %57 = vector.broadcast %cst_30 : f32 to vector<2x128xf32>
    %58 = arith.mulf %56, %57 : vector<2x128xf32>
    %59 = vector.extract_strided_slice %58 {offsets = [0, 0], sizes = [1, 128], strides = [1, 1]} : vector<2x128xf32> to vector<1x128xf32>
    %60 = vector.extract_strided_slice %58 {offsets = [1, 0], sizes = [1, 128], strides = [1, 1]} : vector<2x128xf32> to vector<1x128xf32>
    %61 = arith.mulf %59, %59 : vector<1x128xf32>
    %62 = arith.subf %60, %61 : vector<1x128xf32>
    %cst_31 = arith.constant 0.000000e+00 : f32
    %63 = vector.broadcast %cst_31 : f32 to vector<1x128xf32>
    %64 = arith.maximumf %62, %63 : vector<1x128xf32>
    %cst_32 = arith.constant 9.99999974E-6 : f32
    %65 = vector.broadcast %cst_32 : f32 to vector<1x128xf32>
    %66 = arith.addf %64, %65 : vector<1x128xf32>
    %67 = math.rsqrt %66 : vector<1x128xf32>
    %68 = arith.mulf %37, %67 : vector<1x128xf32>
    %69 = arith.mulf %59, %68 : vector<1x128xf32>
    %70 = arith.subf %38, %69 : vector<1x128xf32>
    %cst_33 = arith.constant 0.000000e+00 : f32
    %71 = vector.broadcast %cst_33 : f32 to vector<1x128xf32>
    %c0_34 = arith.constant 0 : index
    %c0_35 = arith.constant 0 : index
    %72 = vector.load %arg8[%c0_34, %c0_35] : memref<20x128xf32, #tpu.memory_space<vmem>>, vector<1x128xf32>
    tpu.vector_store %arg8[%c0_34, %c0_35], %71 {strides = array<i32>} : memref<20x128xf32, #tpu.memory_space<vmem>>, vector<1x128xf32>,
    %73 = vector.broadcast %68 : vector<1x128xf32> to vector<8x128xf32>
    %74 = arith.mulf %31, %73 : vector<8x128xf32>
    %75 = vector.broadcast %70 : vector<1x128xf32> to vector<8x128xf32>
    %76 = arith.addf %74, %75 : vector<8x128xf32>
    %c1_36 = arith.constant 1 : index
    %c0_37 = arith.constant 0 : index
    %77 = vector.load %arg8[%c1_36, %c0_37] : memref<20x128xf32, #tpu.memory_space<vmem>>, vector<8x128xf32>
    tpu.vector_store %arg8[%c1_36, %c0_37], %76 {strides = array<i32>} : memref<20x128xf32, #tpu.memory_space<vmem>>, vector<8x128xf32>,
    %c9_38 = arith.constant 9 : index
    %c0_39 = arith.constant 0 : index
    %78 = vector.load %arg8[%c9_38, %c0_39] : memref<20x128xf32, #tpu.memory_space<vmem>>, vector<1x128xf32>
    tpu.vector_store %arg8[%c9_38, %c0_39], %71 {strides = array<i32>} : memref<20x128xf32, #tpu.memory_space<vmem>>, vector<1x128xf32>,
    %c10_40 = arith.constant 10 : index
    %c0_41 = arith.constant 0 : index
    %79 = vector.load %arg8[%c10_40, %c0_41] : memref<20x128xf32, #tpu.memory_space<vmem>>, vector<1x128xf32>
    tpu.vector_store %arg8[%c10_40, %c0_41], %71 {strides = array<i32>} : memref<20x128xf32, #tpu.memory_space<vmem>>, vector<1x128xf32>,
    %80 = vector.broadcast %68 : vector<1x128xf32> to vector<8x128xf32>
    %81 = arith.mulf %36, %80 : vector<8x128xf32>
    %82 = vector.broadcast %70 : vector<1x128xf32> to vector<8x128xf32>
    %83 = arith.addf %81, %82 : vector<8x128xf32>
    %c11_42 = arith.constant 11 : index
    %c0_43 = arith.constant 0 : index
    %84 = vector.load %arg8[%c11_42, %c0_43] : memref<20x128xf32, #tpu.memory_space<vmem>>, vector<8x128xf32>
    tpu.vector_store %arg8[%c11_42, %c0_43], %83 {strides = array<i32>} : memref<20x128xf32, #tpu.memory_space<vmem>>, vector<8x128xf32>,
    %c19_44 = arith.constant 19 : index
    %c0_45 = arith.constant 0 : index
    %85 = vector.load %arg8[%c19_44, %c0_45] : memref<20x128xf32, #tpu.memory_space<vmem>>, vector<1x128xf32>
    tpu.vector_store %arg8[%c19_44, %c0_45], %71 {strides = array<i32>} : memref<20x128xf32, #tpu.memory_space<vmem>>, vector<1x128xf32>,
    %c0_46 = arith.constant 0 : index
    %c0_47 = arith.constant 0 : index
    %86 = vector.load %arg8[%c0_46, %c0_47] : memref<20x128xf32, #tpu.memory_space<vmem>>, vector<20x128xf32>
    %87 = arith.truncf %86 : vector<20x128xf32> to vector<20x128xbf16>
    %c0_48 = arith.constant 0 : index
    %c0_49 = arith.constant 0 : index
    %88 = vector.load %arg3[%c0_48, %c0_49] : memref<128x384xbf16, #tpu.memory_space<vmem>>, vector<128x384xbf16>
    %cst_50 = arith.constant dense<0.000000e+00> : vector<20x384xf32>
    %89 = tpu.matmul %87, %88, %cst_50 {dimension_numbers = #tpu.dot_dimension_numbers<[1], [0], [0], [1], [0, 0, 1, 1], [], []>} : vector<20x128xbf16>, vector<128x384xbf16>, vector<20x384xf32> -> vector<20x384xf32>
    %90 = vector.extract_strided_slice %89 {offsets = [0, 0], sizes = [8, 128], strides = [1, 1]} : vector<20x384xf32> to vector<8x128xf32>
    %91 = vector.extract_strided_slice %89 {offsets = [1, 128], sizes = [8, 128], strides = [1, 1]} : vector<20x384xf32> to vector<8x128xf32>
    %92 = arith.addf %90, %91 : vector<8x128xf32>
    %93 = vector.extract_strided_slice %89 {offsets = [2, 256], sizes = [8, 128], strides = [1, 1]} : vector<20x384xf32> to vector<8x128xf32>
    %94 = arith.addf %92, %93 : vector<8x128xf32>
    %95 = vector.extract_strided_slice %89 {offsets = [10, 0], sizes = [8, 128], strides = [1, 1]} : vector<20x384xf32> to vector<8x128xf32>
    %96 = vector.extract_strided_slice %89 {offsets = [11, 128], sizes = [8, 128], strides = [1, 1]} : vector<20x384xf32> to vector<8x128xf32>
    %97 = arith.addf %95, %96 : vector<8x128xf32>
    %98 = vector.extract_strided_slice %89 {offsets = [12, 256], sizes = [8, 128], strides = [1, 1]} : vector<20x384xf32> to vector<8x128xf32>
    %99 = arith.addf %97, %98 : vector<8x128xf32>
    %100 = vector.extract_strided_slice %0 {offsets = [3, 0], sizes = [1, 128], strides = [1, 1]} : vector<6x128xf32> to vector<1x128xf32>
    %101 = vector.broadcast %100 : vector<1x128xf32> to vector<8x128xf32>
    %102 = arith.addf %94, %101 : vector<8x128xf32>
    %cst_51 = arith.constant 0.000000e+00 : f32
    %103 = vector.broadcast %cst_51 : f32 to vector<8x128xf32>
    %104 = arith.maximumf %102, %103 : vector<8x128xf32>
    %105 = vector.extract_strided_slice %0 {offsets = [3, 0], sizes = [1, 128], strides = [1, 1]} : vector<6x128xf32> to vector<1x128xf32>
    %106 = vector.broadcast %105 : vector<1x128xf32> to vector<8x128xf32>
    %107 = arith.addf %99, %106 : vector<8x128xf32>
    %cst_52 = arith.constant 0.000000e+00 : f32
    %108 = vector.broadcast %cst_52 : f32 to vector<8x128xf32>
    %109 = arith.maximumf %107, %108 : vector<8x128xf32>
    %110 = vector.extract_strided_slice %0 {offsets = [4, 0], sizes = [1, 128], strides = [1, 1]} : vector<6x128xf32> to vector<1x128xf32>
    %111 = vector.extract_strided_slice %0 {offsets = [5, 0], sizes = [1, 128], strides = [1, 1]} : vector<6x128xf32> to vector<1x128xf32>
    %cst_53 = arith.constant 0.000000e+00 : f32
    %112 = vector.broadcast %cst_53 : f32 to vector<1x128xf32>
    %cst_54 = arith.constant 0.000000e+00 : f32
    %113 = vector.broadcast %cst_54 : f32 to vector<1x128xf32>
    %cst_55 = arith.constant dense<0.000000e+00> : vector<128xf32>
    %114 = vector.multi_reduction <add>, %104, %cst_55 [0] : vector<8x128xf32> to vector<128xf32>
    %115 = vector.shape_cast %114 : vector<128xf32> to vector<1x128xf32>
    %116 = arith.addf %112, %115 : vector<1x128xf32>
    %117 = arith.mulf %104, %104 : vector<8x128xf32>
    %cst_56 = arith.constant dense<0.000000e+00> : vector<128xf32>
    %118 = vector.multi_reduction <add>, %117, %cst_56 [0] : vector<8x128xf32> to vector<128xf32>
    %119 = vector.shape_cast %118 : vector<128xf32> to vector<1x128xf32>
    %120 = arith.addf %113, %119 : vector<1x128xf32>
    %cst_57 = arith.constant dense<0.000000e+00> : vector<128xf32>
    %121 = vector.multi_reduction <add>, %109, %cst_57 [0] : vector<8x128xf32> to vector<128xf32>
    %122 = vector.shape_cast %121 : vector<128xf32> to vector<1x128xf32>
    %123 = arith.addf %116, %122 : vector<1x128xf32>
    %124 = arith.mulf %109, %109 : vector<8x128xf32>
    %cst_58 = arith.constant dense<0.000000e+00> : vector<128xf32>
    %125 = vector.multi_reduction <add>, %124, %cst_58 [0] : vector<8x128xf32> to vector<128xf32>
    %126 = vector.shape_cast %125 : vector<128xf32> to vector<1x128xf32>
    %127 = arith.addf %120, %126 : vector<1x128xf32>
    %128 = tpu.concatenate %123, %127 in 0 : vector<1x128xf32>, vector<1x128xf32> -> vector<2x128xf32>
    %cst_59 = arith.constant dense<0.000000e+00> : vector<2x128xf32>
    %129 = tpu.matmul %128, %1, %cst_59 {dimension_numbers = #tpu.dot_dimension_numbers<[1], [0], [0], [1], [0, 0, 1, 1], [], []>} : vector<2x128xf32>, vector<128x128xf32>, vector<2x128xf32> -> vector<2x128xf32>
    %cst_60 = arith.constant 7.812500e-03 : f32
    %130 = vector.broadcast %cst_60 : f32 to vector<2x128xf32>
    %131 = arith.mulf %129, %130 : vector<2x128xf32>
    %132 = vector.extract_strided_slice %131 {offsets = [0, 0], sizes = [1, 128], strides = [1, 1]} : vector<2x128xf32> to vector<1x128xf32>
    %133 = vector.extract_strided_slice %131 {offsets = [1, 0], sizes = [1, 128], strides = [1, 1]} : vector<2x128xf32> to vector<1x128xf32>
    %134 = arith.mulf %132, %132 : vector<1x128xf32>
    %135 = arith.subf %133, %134 : vector<1x128xf32>
    %cst_61 = arith.constant 0.000000e+00 : f32
    %136 = vector.broadcast %cst_61 : f32 to vector<1x128xf32>
    %137 = arith.maximumf %135, %136 : vector<1x128xf32>
    %cst_62 = arith.constant 9.99999974E-6 : f32
    %138 = vector.broadcast %cst_62 : f32 to vector<1x128xf32>
    %139 = arith.addf %137, %138 : vector<1x128xf32>
    %140 = math.rsqrt %139 : vector<1x128xf32>
    %141 = arith.mulf %110, %140 : vector<1x128xf32>
    %142 = arith.mulf %132, %141 : vector<1x128xf32>
    %143 = arith.subf %111, %142 : vector<1x128xf32>
    %144 = vector.broadcast %141 : vector<1x128xf32> to vector<8x128xf32>
    %145 = arith.mulf %104, %144 : vector<8x128xf32>
    %146 = vector.broadcast %143 : vector<1x128xf32> to vector<8x128xf32>
    %147 = arith.addf %145, %146 : vector<8x128xf32>
    %c0_63 = arith.constant 0 : index
    %c0_64 = arith.constant 0 : index
    %c0_65 = arith.constant 0 : index
    %148 = vector.load %arg6[%c0_63, %c0_64, %c0_65] : memref<2x8x128xf32, #tpu.memory_space<vmem>>, vector<1x8x128xf32>
    %149 = vector.shape_cast %148 : vector<1x8x128xf32> to vector<8x128xf32>
    %150 = vector.shape_cast %147 : vector<8x128xf32> to vector<1x8x128xf32>
    tpu.vector_store %arg6[%c0_63, %c0_64, %c0_65], %150 {strides = array<i32>} : memref<2x8x128xf32, #tpu.memory_space<vmem>>, vector<1x8x128xf32>,
    %151 = vector.broadcast %141 : vector<1x128xf32> to vector<8x128xf32>
    %152 = arith.mulf %109, %151 : vector<8x128xf32>
    %153 = vector.broadcast %143 : vector<1x128xf32> to vector<8x128xf32>
    %154 = arith.addf %152, %153 : vector<8x128xf32>
    %c1_66 = arith.constant 1 : index
    %c0_67 = arith.constant 0 : index
    %c0_68 = arith.constant 0 : index
    %155 = vector.load %arg6[%c1_66, %c0_67, %c0_68] : memref<2x8x128xf32, #tpu.memory_space<vmem>>, vector<1x8x128xf32>
    %156 = vector.shape_cast %155 : vector<1x8x128xf32> to vector<8x128xf32>
    %157 = vector.shape_cast %154 : vector<8x128xf32> to vector<1x8x128xf32>
    tpu.vector_store %arg6[%c1_66, %c0_67, %c0_68], %157 {strides = array<i32>} : memref<2x8x128xf32, #tpu.memory_space<vmem>>, vector<1x8x128xf32>,
    return
  }
  func.func @transform_0(%arg0: i32) -> (i32, i32, i32) {
    %c0_i32 = arith.constant 0 : i32
    %c0_i32_0 = arith.constant 0 : i32
    %c0_i32_1 = arith.constant 0 : i32
    %c0_i32_2 = arith.constant 0 : i32
    return %c0_i32, %c0_i32_0, %c0_i32_1 : i32, i32, i32
  }
  func.func @transform_1(%arg0: i32) -> (i32, i32) {
    %c0_i32 = arith.constant 0 : i32
    %c0_i32_0 = arith.constant 0 : i32
    %c0_i32_1 = arith.constant 0 : i32
    return %c0_i32, %c0_i32_0 : i32, i32
  }
  func.func @transform_2(%arg0: i32) -> (i32, i32) {
    %c0_i32 = arith.constant 0 : i32
    %c0_i32_0 = arith.constant 0 : i32
    %c0_i32_1 = arith.constant 0 : i32
    return %c0_i32, %c0_i32_0 : i32, i32
  }
  func.func @transform_3(%arg0: i32) -> (i32, i32) {
    %c0_i32 = arith.constant 0 : i32
    %c0_i32_0 = arith.constant 0 : i32
    %c0_i32_1 = arith.constant 0 : i32
    return %c0_i32, %c0_i32_0 : i32, i32
  }
  func.func @transform_4(%arg0: i32) -> (i32, i32) {
    %c0_i32 = arith.constant 0 : i32
    %c0_i32_0 = arith.constant 0 : i32
    %c0_i32_1 = arith.constant 0 : i32
    return %c0_i32, %c0_i32_0 : i32, i32
  }
  func.func @transform_5(%arg0: i32) -> (i32, i32, i32) {
    %c0_i32 = arith.constant 0 : i32
    %c0_i32_0 = arith.constant 0 : i32
    %c0_i32_1 = arith.constant 0 : i32
    %c0_i32_2 = arith.constant 0 : i32
    return %c0_i32, %c0_i32_0, %c0_i32_1 : i32, i32, i32
  }
}

module attributes {stable_mosaic.version = 11 : i64} {
  func.func @_enc_block_kernel(%arg0: i32, %arg1: memref<2x4x64xf32, #tpu.memory_space<vmem>>, %arg2: memref<64x384xbf16, #tpu.memory_space<vmem>>, %arg3: memref<128x384xbf16, #tpu.memory_space<vmem>>, %arg4: memref<128x128xf32, #tpu.memory_space<vmem>>, %arg5: memref<6x128xf32, #tpu.memory_space<vmem>>, %arg6: memref<2x4x128xf32, #tpu.memory_space<vmem>>, %arg7: memref<12x64xf32, #tpu.memory_space<vmem>>, %arg8: memref<12x128xf32, #tpu.memory_space<vmem>>) attributes {dimension_semantics = [#tpu.dimension_semantics<arbitrary>], iteration_bounds = array<i64: 1>, scalar_prefetch = 0 : i64, scratch_operands = 2 : i64, tpu.core_type = #tpu.core_type<tc>, window_params = [{pipeline_mode = #tpu.pipeline_mode<synchronous>, transform_indices = @transform_0, window_bounds = array<i64: 2, 4, 64>}, {pipeline_mode = #tpu.pipeline_mode<synchronous>, transform_indices = @transform_1, window_bounds = array<i64: 64, 384>}, {pipeline_mode = #tpu.pipeline_mode<synchronous>, transform_indices = @transform_2, window_bounds = array<i64: 128, 384>}, {pipeline_mode = #tpu.pipeline_mode<synchronous>, transform_indices = @transform_3, window_bounds = array<i64: 128, 128>}, {pipeline_mode = #tpu.pipeline_mode<synchronous>, transform_indices = @transform_4, window_bounds = array<i64: 6, 128>}, {pipeline_mode = #tpu.pipeline_mode<synchronous>, transform_indices = @transform_5, window_bounds = array<i64: 2, 4, 128>}]} {
    %c0 = arith.constant 0 : index
    %c0_0 = arith.constant 0 : index
    %0 = vector.load %arg5[%c0, %c0_0] : memref<6x128xf32, #tpu.memory_space<vmem>>, vector<6x128xf32>
    %c0_1 = arith.constant 0 : index
    %c0_2 = arith.constant 0 : index
    %1 = vector.load %arg4[%c0_1, %c0_2] : memref<128x128xf32, #tpu.memory_space<vmem>>, vector<128x128xf32>
    %cst = arith.constant 0.000000e+00 : f32
    %2 = vector.broadcast %cst : f32 to vector<1x64xf32>
    %c0_3 = arith.constant 0 : index
    %c0_4 = arith.constant 0 : index
    %3 = vector.load %arg7[%c0_3, %c0_4] : memref<12x64xf32, #tpu.memory_space<vmem>>, vector<1x64xf32>
    tpu.vector_store %arg7[%c0_3, %c0_4], %2 {strides = array<i32>} : memref<12x64xf32, #tpu.memory_space<vmem>>, vector<1x64xf32>,
    %c0_5 = arith.constant 0 : index
    %c0_6 = arith.constant 0 : index
    %c0_7 = arith.constant 0 : index
    %4 = vector.load %arg1[%c0_5, %c0_6, %c0_7] : memref<2x4x64xf32, #tpu.memory_space<vmem>>, vector<1x4x64xf32>
    %5 = vector.shape_cast %4 : vector<1x4x64xf32> to vector<4x64xf32>
    %c1 = arith.constant 1 : index
    %c0_8 = arith.constant 0 : index
    %6 = vector.load %arg7[%c1, %c0_8] : memref<12x64xf32, #tpu.memory_space<vmem>>, vector<4x64xf32>
    tpu.vector_store %arg7[%c1, %c0_8], %5 {strides = array<i32>} : memref<12x64xf32, #tpu.memory_space<vmem>>, vector<4x64xf32>,
    %c5 = arith.constant 5 : index
    %c0_9 = arith.constant 0 : index
    %7 = vector.load %arg7[%c5, %c0_9] : memref<12x64xf32, #tpu.memory_space<vmem>>, vector<1x64xf32>
    tpu.vector_store %arg7[%c5, %c0_9], %2 {strides = array<i32>} : memref<12x64xf32, #tpu.memory_space<vmem>>, vector<1x64xf32>,
    %c6 = arith.constant 6 : index
    %c0_10 = arith.constant 0 : index
    %8 = vector.load %arg7[%c6, %c0_10] : memref<12x64xf32, #tpu.memory_space<vmem>>, vector<1x64xf32>
    tpu.vector_store %arg7[%c6, %c0_10], %2 {strides = array<i32>} : memref<12x64xf32, #tpu.memory_space<vmem>>, vector<1x64xf32>,
    %c1_11 = arith.constant 1 : index
    %c0_12 = arith.constant 0 : index
    %c0_13 = arith.constant 0 : index
    %9 = vector.load %arg1[%c1_11, %c0_12, %c0_13] : memref<2x4x64xf32, #tpu.memory_space<vmem>>, vector<1x4x64xf32>
    %10 = vector.shape_cast %9 : vector<1x4x64xf32> to vector<4x64xf32>
    %c7 = arith.constant 7 : index
    %c0_14 = arith.constant 0 : index
    %11 = vector.load %arg7[%c7, %c0_14] : memref<12x64xf32, #tpu.memory_space<vmem>>, vector<4x64xf32>
    tpu.vector_store %arg7[%c7, %c0_14], %10 {strides = array<i32>} : memref<12x64xf32, #tpu.memory_space<vmem>>, vector<4x64xf32>,
    %c11 = arith.constant 11 : index
    %c0_15 = arith.constant 0 : index
    %12 = vector.load %arg7[%c11, %c0_15] : memref<12x64xf32, #tpu.memory_space<vmem>>, vector<1x64xf32>
    tpu.vector_store %arg7[%c11, %c0_15], %2 {strides = array<i32>} : memref<12x64xf32, #tpu.memory_space<vmem>>, vector<1x64xf32>,
    %c0_16 = arith.constant 0 : index
    %c0_17 = arith.constant 0 : index
    %13 = vector.load %arg7[%c0_16, %c0_17] : memref<12x64xf32, #tpu.memory_space<vmem>>, vector<12x64xf32>
    %14 = arith.truncf %13 : vector<12x64xf32> to vector<12x64xbf16>
    %c0_18 = arith.constant 0 : index
    %c0_19 = arith.constant 0 : index
    %15 = vector.load %arg2[%c0_18, %c0_19] : memref<64x384xbf16, #tpu.memory_space<vmem>>, vector<64x384xbf16>
    %cst_20 = arith.constant dense<0.000000e+00> : vector<12x384xf32>
    %16 = tpu.matmul %14, %15, %cst_20 {dimension_numbers = #tpu.dot_dimension_numbers<[1], [0], [0], [1], [0, 0, 1, 1], [], []>} : vector<12x64xbf16>, vector<64x384xbf16>, vector<12x384xf32> -> vector<12x384xf32>
    %17 = vector.extract_strided_slice %16 {offsets = [0, 0], sizes = [4, 128], strides = [1, 1]} : vector<12x384xf32> to vector<4x128xf32>
    %18 = vector.extract_strided_slice %16 {offsets = [1, 128], sizes = [4, 128], strides = [1, 1]} : vector<12x384xf32> to vector<4x128xf32>
    %19 = arith.addf %17, %18 : vector<4x128xf32>
    %20 = vector.extract_strided_slice %16 {offsets = [2, 256], sizes = [4, 128], strides = [1, 1]} : vector<12x384xf32> to vector<4x128xf32>
    %21 = arith.addf %19, %20 : vector<4x128xf32>
    %22 = vector.extract_strided_slice %16 {offsets = [6, 0], sizes = [4, 128], strides = [1, 1]} : vector<12x384xf32> to vector<4x128xf32>
    %23 = vector.extract_strided_slice %16 {offsets = [7, 128], sizes = [4, 128], strides = [1, 1]} : vector<12x384xf32> to vector<4x128xf32>
    %24 = arith.addf %22, %23 : vector<4x128xf32>
    %25 = vector.extract_strided_slice %16 {offsets = [8, 256], sizes = [4, 128], strides = [1, 1]} : vector<12x384xf32> to vector<4x128xf32>
    %26 = arith.addf %24, %25 : vector<4x128xf32>
    %27 = vector.extract_strided_slice %0 {offsets = [0, 0], sizes = [1, 128], strides = [1, 1]} : vector<6x128xf32> to vector<1x128xf32>
    %28 = vector.broadcast %27 : vector<1x128xf32> to vector<4x128xf32>
    %29 = arith.addf %21, %28 : vector<4x128xf32>
    %cst_21 = arith.constant 0.000000e+00 : f32
    %30 = vector.broadcast %cst_21 : f32 to vector<4x128xf32>
    %31 = arith.maximumf %29, %30 : vector<4x128xf32>
    %32 = vector.extract_strided_slice %0 {offsets = [0, 0], sizes = [1, 128], strides = [1, 1]} : vector<6x128xf32> to vector<1x128xf32>
    %33 = vector.broadcast %32 : vector<1x128xf32> to vector<4x128xf32>
    %34 = arith.addf %26, %33 : vector<4x128xf32>
    %cst_22 = arith.constant 0.000000e+00 : f32
    %35 = vector.broadcast %cst_22 : f32 to vector<4x128xf32>
    %36 = arith.maximumf %34, %35 : vector<4x128xf32>
    %37 = vector.extract_strided_slice %0 {offsets = [1, 0], sizes = [1, 128], strides = [1, 1]} : vector<6x128xf32> to vector<1x128xf32>
    %38 = vector.extract_strided_slice %0 {offsets = [2, 0], sizes = [1, 128], strides = [1, 1]} : vector<6x128xf32> to vector<1x128xf32>
    %cst_23 = arith.constant 0.000000e+00 : f32
    %39 = vector.broadcast %cst_23 : f32 to vector<1x128xf32>
    %cst_24 = arith.constant 0.000000e+00 : f32
    %40 = vector.broadcast %cst_24 : f32 to vector<1x128xf32>
    %cst_25 = arith.constant dense<0.000000e+00> : vector<128xf32>
    %41 = vector.multi_reduction <add>, %31, %cst_25 [0] : vector<4x128xf32> to vector<128xf32>
    %42 = vector.shape_cast %41 : vector<128xf32> to vector<1x128xf32>
    %43 = arith.addf %39, %42 : vector<1x128xf32>
    %44 = arith.mulf %31, %31 : vector<4x128xf32>
    %cst_26 = arith.constant dense<0.000000e+00> : vector<128xf32>
    %45 = vector.multi_reduction <add>, %44, %cst_26 [0] : vector<4x128xf32> to vector<128xf32>
    %46 = vector.shape_cast %45 : vector<128xf32> to vector<1x128xf32>
    %47 = arith.addf %40, %46 : vector<1x128xf32>
    %cst_27 = arith.constant dense<0.000000e+00> : vector<128xf32>
    %48 = vector.multi_reduction <add>, %36, %cst_27 [0] : vector<4x128xf32> to vector<128xf32>
    %49 = vector.shape_cast %48 : vector<128xf32> to vector<1x128xf32>
    %50 = arith.addf %43, %49 : vector<1x128xf32>
    %51 = arith.mulf %36, %36 : vector<4x128xf32>
    %cst_28 = arith.constant dense<0.000000e+00> : vector<128xf32>
    %52 = vector.multi_reduction <add>, %51, %cst_28 [0] : vector<4x128xf32> to vector<128xf32>
    %53 = vector.shape_cast %52 : vector<128xf32> to vector<1x128xf32>
    %54 = arith.addf %47, %53 : vector<1x128xf32>
    %55 = tpu.concatenate %50, %54 in 0 : vector<1x128xf32>, vector<1x128xf32> -> vector<2x128xf32>
    %cst_29 = arith.constant dense<0.000000e+00> : vector<2x128xf32>
    %56 = tpu.matmul %55, %1, %cst_29 {dimension_numbers = #tpu.dot_dimension_numbers<[1], [0], [0], [1], [0, 0, 1, 1], [], []>} : vector<2x128xf32>, vector<128x128xf32>, vector<2x128xf32> -> vector<2x128xf32>
    %cst_30 = arith.constant 3.125000e-02 : f32
    %57 = vector.broadcast %cst_30 : f32 to vector<2x128xf32>
    %58 = arith.mulf %56, %57 : vector<2x128xf32>
    %59 = vector.extract_strided_slice %58 {offsets = [0, 0], sizes = [1, 128], strides = [1, 1]} : vector<2x128xf32> to vector<1x128xf32>
    %60 = vector.extract_strided_slice %58 {offsets = [1, 0], sizes = [1, 128], strides = [1, 1]} : vector<2x128xf32> to vector<1x128xf32>
    %61 = arith.mulf %59, %59 : vector<1x128xf32>
    %62 = arith.subf %60, %61 : vector<1x128xf32>
    %cst_31 = arith.constant 0.000000e+00 : f32
    %63 = vector.broadcast %cst_31 : f32 to vector<1x128xf32>
    %64 = arith.maximumf %62, %63 : vector<1x128xf32>
    %cst_32 = arith.constant 9.99999974E-6 : f32
    %65 = vector.broadcast %cst_32 : f32 to vector<1x128xf32>
    %66 = arith.addf %64, %65 : vector<1x128xf32>
    %67 = math.rsqrt %66 : vector<1x128xf32>
    %68 = arith.mulf %37, %67 : vector<1x128xf32>
    %69 = arith.mulf %59, %68 : vector<1x128xf32>
    %70 = arith.subf %38, %69 : vector<1x128xf32>
    %cst_33 = arith.constant 0.000000e+00 : f32
    %71 = vector.broadcast %cst_33 : f32 to vector<1x128xf32>
    %c0_34 = arith.constant 0 : index
    %c0_35 = arith.constant 0 : index
    %72 = vector.load %arg8[%c0_34, %c0_35] : memref<12x128xf32, #tpu.memory_space<vmem>>, vector<1x128xf32>
    tpu.vector_store %arg8[%c0_34, %c0_35], %71 {strides = array<i32>} : memref<12x128xf32, #tpu.memory_space<vmem>>, vector<1x128xf32>,
    %73 = vector.broadcast %68 : vector<1x128xf32> to vector<4x128xf32>
    %74 = arith.mulf %31, %73 : vector<4x128xf32>
    %75 = vector.broadcast %70 : vector<1x128xf32> to vector<4x128xf32>
    %76 = arith.addf %74, %75 : vector<4x128xf32>
    %c1_36 = arith.constant 1 : index
    %c0_37 = arith.constant 0 : index
    %77 = vector.load %arg8[%c1_36, %c0_37] : memref<12x128xf32, #tpu.memory_space<vmem>>, vector<4x128xf32>
    tpu.vector_store %arg8[%c1_36, %c0_37], %76 {strides = array<i32>} : memref<12x128xf32, #tpu.memory_space<vmem>>, vector<4x128xf32>,
    %c5_38 = arith.constant 5 : index
    %c0_39 = arith.constant 0 : index
    %78 = vector.load %arg8[%c5_38, %c0_39] : memref<12x128xf32, #tpu.memory_space<vmem>>, vector<1x128xf32>
    tpu.vector_store %arg8[%c5_38, %c0_39], %71 {strides = array<i32>} : memref<12x128xf32, #tpu.memory_space<vmem>>, vector<1x128xf32>,
    %c6_40 = arith.constant 6 : index
    %c0_41 = arith.constant 0 : index
    %79 = vector.load %arg8[%c6_40, %c0_41] : memref<12x128xf32, #tpu.memory_space<vmem>>, vector<1x128xf32>
    tpu.vector_store %arg8[%c6_40, %c0_41], %71 {strides = array<i32>} : memref<12x128xf32, #tpu.memory_space<vmem>>, vector<1x128xf32>,
    %80 = vector.broadcast %68 : vector<1x128xf32> to vector<4x128xf32>
    %81 = arith.mulf %36, %80 : vector<4x128xf32>
    %82 = vector.broadcast %70 : vector<1x128xf32> to vector<4x128xf32>
    %83 = arith.addf %81, %82 : vector<4x128xf32>
    %c7_42 = arith.constant 7 : index
    %c0_43 = arith.constant 0 : index
    %84 = vector.load %arg8[%c7_42, %c0_43] : memref<12x128xf32, #tpu.memory_space<vmem>>, vector<4x128xf32>
    tpu.vector_store %arg8[%c7_42, %c0_43], %83 {strides = array<i32>} : memref<12x128xf32, #tpu.memory_space<vmem>>, vector<4x128xf32>,
    %c11_44 = arith.constant 11 : index
    %c0_45 = arith.constant 0 : index
    %85 = vector.load %arg8[%c11_44, %c0_45] : memref<12x128xf32, #tpu.memory_space<vmem>>, vector<1x128xf32>
    tpu.vector_store %arg8[%c11_44, %c0_45], %71 {strides = array<i32>} : memref<12x128xf32, #tpu.memory_space<vmem>>, vector<1x128xf32>,
    %c0_46 = arith.constant 0 : index
    %c0_47 = arith.constant 0 : index
    %86 = vector.load %arg8[%c0_46, %c0_47] : memref<12x128xf32, #tpu.memory_space<vmem>>, vector<12x128xf32>
    %87 = arith.truncf %86 : vector<12x128xf32> to vector<12x128xbf16>
    %c0_48 = arith.constant 0 : index
    %c0_49 = arith.constant 0 : index
    %88 = vector.load %arg3[%c0_48, %c0_49] : memref<128x384xbf16, #tpu.memory_space<vmem>>, vector<128x384xbf16>
    %cst_50 = arith.constant dense<0.000000e+00> : vector<12x384xf32>
    %89 = tpu.matmul %87, %88, %cst_50 {dimension_numbers = #tpu.dot_dimension_numbers<[1], [0], [0], [1], [0, 0, 1, 1], [], []>} : vector<12x128xbf16>, vector<128x384xbf16>, vector<12x384xf32> -> vector<12x384xf32>
    %90 = vector.extract_strided_slice %89 {offsets = [0, 0], sizes = [4, 128], strides = [1, 1]} : vector<12x384xf32> to vector<4x128xf32>
    %91 = vector.extract_strided_slice %89 {offsets = [1, 128], sizes = [4, 128], strides = [1, 1]} : vector<12x384xf32> to vector<4x128xf32>
    %92 = arith.addf %90, %91 : vector<4x128xf32>
    %93 = vector.extract_strided_slice %89 {offsets = [2, 256], sizes = [4, 128], strides = [1, 1]} : vector<12x384xf32> to vector<4x128xf32>
    %94 = arith.addf %92, %93 : vector<4x128xf32>
    %95 = vector.extract_strided_slice %89 {offsets = [6, 0], sizes = [4, 128], strides = [1, 1]} : vector<12x384xf32> to vector<4x128xf32>
    %96 = vector.extract_strided_slice %89 {offsets = [7, 128], sizes = [4, 128], strides = [1, 1]} : vector<12x384xf32> to vector<4x128xf32>
    %97 = arith.addf %95, %96 : vector<4x128xf32>
    %98 = vector.extract_strided_slice %89 {offsets = [8, 256], sizes = [4, 128], strides = [1, 1]} : vector<12x384xf32> to vector<4x128xf32>
    %99 = arith.addf %97, %98 : vector<4x128xf32>
    %100 = vector.extract_strided_slice %0 {offsets = [3, 0], sizes = [1, 128], strides = [1, 1]} : vector<6x128xf32> to vector<1x128xf32>
    %101 = vector.broadcast %100 : vector<1x128xf32> to vector<4x128xf32>
    %102 = arith.addf %94, %101 : vector<4x128xf32>
    %cst_51 = arith.constant 0.000000e+00 : f32
    %103 = vector.broadcast %cst_51 : f32 to vector<4x128xf32>
    %104 = arith.maximumf %102, %103 : vector<4x128xf32>
    %105 = vector.extract_strided_slice %0 {offsets = [3, 0], sizes = [1, 128], strides = [1, 1]} : vector<6x128xf32> to vector<1x128xf32>
    %106 = vector.broadcast %105 : vector<1x128xf32> to vector<4x128xf32>
    %107 = arith.addf %99, %106 : vector<4x128xf32>
    %cst_52 = arith.constant 0.000000e+00 : f32
    %108 = vector.broadcast %cst_52 : f32 to vector<4x128xf32>
    %109 = arith.maximumf %107, %108 : vector<4x128xf32>
    %110 = vector.extract_strided_slice %0 {offsets = [4, 0], sizes = [1, 128], strides = [1, 1]} : vector<6x128xf32> to vector<1x128xf32>
    %111 = vector.extract_strided_slice %0 {offsets = [5, 0], sizes = [1, 128], strides = [1, 1]} : vector<6x128xf32> to vector<1x128xf32>
    %cst_53 = arith.constant 0.000000e+00 : f32
    %112 = vector.broadcast %cst_53 : f32 to vector<1x128xf32>
    %cst_54 = arith.constant 0.000000e+00 : f32
    %113 = vector.broadcast %cst_54 : f32 to vector<1x128xf32>
    %cst_55 = arith.constant dense<0.000000e+00> : vector<128xf32>
    %114 = vector.multi_reduction <add>, %104, %cst_55 [0] : vector<4x128xf32> to vector<128xf32>
    %115 = vector.shape_cast %114 : vector<128xf32> to vector<1x128xf32>
    %116 = arith.addf %112, %115 : vector<1x128xf32>
    %117 = arith.mulf %104, %104 : vector<4x128xf32>
    %cst_56 = arith.constant dense<0.000000e+00> : vector<128xf32>
    %118 = vector.multi_reduction <add>, %117, %cst_56 [0] : vector<4x128xf32> to vector<128xf32>
    %119 = vector.shape_cast %118 : vector<128xf32> to vector<1x128xf32>
    %120 = arith.addf %113, %119 : vector<1x128xf32>
    %cst_57 = arith.constant dense<0.000000e+00> : vector<128xf32>
    %121 = vector.multi_reduction <add>, %109, %cst_57 [0] : vector<4x128xf32> to vector<128xf32>
    %122 = vector.shape_cast %121 : vector<128xf32> to vector<1x128xf32>
    %123 = arith.addf %116, %122 : vector<1x128xf32>
    %124 = arith.mulf %109, %109 : vector<4x128xf32>
    %cst_58 = arith.constant dense<0.000000e+00> : vector<128xf32>
    %125 = vector.multi_reduction <add>, %124, %cst_58 [0] : vector<4x128xf32> to vector<128xf32>
    %126 = vector.shape_cast %125 : vector<128xf32> to vector<1x128xf32>
    %127 = arith.addf %120, %126 : vector<1x128xf32>
    %128 = tpu.concatenate %123, %127 in 0 : vector<1x128xf32>, vector<1x128xf32> -> vector<2x128xf32>
    %cst_59 = arith.constant dense<0.000000e+00> : vector<2x128xf32>
    %129 = tpu.matmul %128, %1, %cst_59 {dimension_numbers = #tpu.dot_dimension_numbers<[1], [0], [0], [1], [0, 0, 1, 1], [], []>} : vector<2x128xf32>, vector<128x128xf32>, vector<2x128xf32> -> vector<2x128xf32>
    %cst_60 = arith.constant 3.125000e-02 : f32
    %130 = vector.broadcast %cst_60 : f32 to vector<2x128xf32>
    %131 = arith.mulf %129, %130 : vector<2x128xf32>
    %132 = vector.extract_strided_slice %131 {offsets = [0, 0], sizes = [1, 128], strides = [1, 1]} : vector<2x128xf32> to vector<1x128xf32>
    %133 = vector.extract_strided_slice %131 {offsets = [1, 0], sizes = [1, 128], strides = [1, 1]} : vector<2x128xf32> to vector<1x128xf32>
    %134 = arith.mulf %132, %132 : vector<1x128xf32>
    %135 = arith.subf %133, %134 : vector<1x128xf32>
    %cst_61 = arith.constant 0.000000e+00 : f32
    %136 = vector.broadcast %cst_61 : f32 to vector<1x128xf32>
    %137 = arith.maximumf %135, %136 : vector<1x128xf32>
    %cst_62 = arith.constant 9.99999974E-6 : f32
    %138 = vector.broadcast %cst_62 : f32 to vector<1x128xf32>
    %139 = arith.addf %137, %138 : vector<1x128xf32>
    %140 = math.rsqrt %139 : vector<1x128xf32>
    %141 = arith.mulf %110, %140 : vector<1x128xf32>
    %142 = arith.mulf %132, %141 : vector<1x128xf32>
    %143 = arith.subf %111, %142 : vector<1x128xf32>
    %144 = vector.broadcast %141 : vector<1x128xf32> to vector<4x128xf32>
    %145 = arith.mulf %104, %144 : vector<4x128xf32>
    %146 = vector.broadcast %143 : vector<1x128xf32> to vector<4x128xf32>
    %147 = arith.addf %145, %146 : vector<4x128xf32>
    %c0_63 = arith.constant 0 : index
    %c0_64 = arith.constant 0 : index
    %c0_65 = arith.constant 0 : index
    %148 = vector.load %arg6[%c0_63, %c0_64, %c0_65] : memref<2x4x128xf32, #tpu.memory_space<vmem>>, vector<1x4x128xf32>
    %149 = vector.shape_cast %148 : vector<1x4x128xf32> to vector<4x128xf32>
    %150 = vector.shape_cast %147 : vector<4x128xf32> to vector<1x4x128xf32>
    tpu.vector_store %arg6[%c0_63, %c0_64, %c0_65], %150 {strides = array<i32>} : memref<2x4x128xf32, #tpu.memory_space<vmem>>, vector<1x4x128xf32>,
    %151 = vector.broadcast %141 : vector<1x128xf32> to vector<4x128xf32>
    %152 = arith.mulf %109, %151 : vector<4x128xf32>
    %153 = vector.broadcast %143 : vector<1x128xf32> to vector<4x128xf32>
    %154 = arith.addf %152, %153 : vector<4x128xf32>
    %c1_66 = arith.constant 1 : index
    %c0_67 = arith.constant 0 : index
    %c0_68 = arith.constant 0 : index
    %155 = vector.load %arg6[%c1_66, %c0_67, %c0_68] : memref<2x4x128xf32, #tpu.memory_space<vmem>>, vector<1x4x128xf32>
    %156 = vector.shape_cast %155 : vector<1x4x128xf32> to vector<4x128xf32>
    %157 = vector.shape_cast %154 : vector<4x128xf32> to vector<1x4x128xf32>
    tpu.vector_store %arg6[%c1_66, %c0_67, %c0_68], %157 {strides = array<i32>} : memref<2x4x128xf32, #tpu.memory_space<vmem>>, vector<1x4x128xf32>,
    return
  }
  func.func @transform_0(%arg0: i32) -> (i32, i32, i32) {
    %c0_i32 = arith.constant 0 : i32
    %c0_i32_0 = arith.constant 0 : i32
    %c0_i32_1 = arith.constant 0 : i32
    %c0_i32_2 = arith.constant 0 : i32
    return %c0_i32, %c0_i32_0, %c0_i32_1 : i32, i32, i32
  }
  func.func @transform_1(%arg0: i32) -> (i32, i32) {
    %c0_i32 = arith.constant 0 : i32
    %c0_i32_0 = arith.constant 0 : i32
    %c0_i32_1 = arith.constant 0 : i32
    return %c0_i32, %c0_i32_0 : i32, i32
  }
  func.func @transform_2(%arg0: i32) -> (i32, i32) {
    %c0_i32 = arith.constant 0 : i32
    %c0_i32_0 = arith.constant 0 : i32
    %c0_i32_1 = arith.constant 0 : i32
    return %c0_i32, %c0_i32_0 : i32, i32
  }
  func.func @transform_3(%arg0: i32) -> (i32, i32) {
    %c0_i32 = arith.constant 0 : i32
    %c0_i32_0 = arith.constant 0 : i32
    %c0_i32_1 = arith.constant 0 : i32
    return %c0_i32, %c0_i32_0 : i32, i32
  }
  func.func @transform_4(%arg0: i32) -> (i32, i32) {
    %c0_i32 = arith.constant 0 : i32
    %c0_i32_0 = arith.constant 0 : i32
    %c0_i32_1 = arith.constant 0 : i32
    return %c0_i32, %c0_i32_0 : i32, i32
  }
  func.func @transform_5(%arg0: i32) -> (i32, i32, i32) {
    %c0_i32 = arith.constant 0 : i32
    %c0_i32_0 = arith.constant 0 : i32
    %c0_i32_1 = arith.constant 0 : i32
    %c0_i32_2 = arith.constant 0 : i32
    return %c0_i32, %c0_i32_0, %c0_i32_1 : i32, i32, i32
  }
}

module attributes {stable_mosaic.version = 11 : i64} {
  func.func @_dec_block_kernel(%arg0: i32, %arg1: memref<2x4x128xf32, #tpu.memory_space<vmem>>, %arg2: memref<1x2x4x128xf32, #tpu.memory_space<vmem>>, %arg3: memref<1x9x128xf32, #tpu.memory_space<vmem>>, %arg4: memref<1x256x384xbf16, #tpu.memory_space<vmem>>, %arg5: memref<1x128x384xbf16, #tpu.memory_space<vmem>>, %arg6: memref<128x128xf32, #tpu.memory_space<vmem>>, %arg7: memref<64x64xf32, #tpu.memory_space<vmem>>, %arg8: memref<1x3x64xf32, #tpu.memory_space<vmem>>, %arg9: memref<1x2x4x64xf32, #tpu.memory_space<vmem>>, %arg10: memref<12x256xf32, #tpu.memory_space<vmem>>, %arg11: memref<12x128xf32, #tpu.memory_space<vmem>>) attributes {dimension_semantics = [#tpu.dimension_semantics<arbitrary>], iteration_bounds = array<i64: 2>, scalar_prefetch = 0 : i64, scratch_operands = 2 : i64, tpu.core_type = #tpu.core_type<tc>, window_params = [{pipeline_mode = #tpu.pipeline_mode<synchronous>, transform_indices = @transform_0, window_bounds = array<i64: 2, 4, 128>}, {transform_indices = @transform_1, window_bounds = array<i64: 1, 2, 4, 128>}, {transform_indices = @transform_2, window_bounds = array<i64: 1, 9, 128>}, {transform_indices = @transform_3, window_bounds = array<i64: 1, 256, 384>}, {transform_indices = @transform_4, window_bounds = array<i64: 1, 128, 384>}, {pipeline_mode = #tpu.pipeline_mode<synchronous>, transform_indices = @transform_5, window_bounds = array<i64: 128, 128>}, {pipeline_mode = #tpu.pipeline_mode<synchronous>, transform_indices = @transform_6, window_bounds = array<i64: 64, 64>}, {transform_indices = @transform_7, window_bounds = array<i64: 1, 3, 64>}, {transform_indices = @transform_8, window_bounds = array<i64: 1, 2, 4, 64>}]} {
    %c0 = arith.constant 0 : index
    %c0_0 = arith.constant 0 : index
    %c0_1 = arith.constant 0 : index
    %0 = vector.load %arg3[%c0, %c0_0, %c0_1] : memref<1x9x128xf32, #tpu.memory_space<vmem>>, vector<1x9x128xf32>
    %1 = vector.shape_cast %0 : vector<1x9x128xf32> to vector<9x128xf32>
    %c0_2 = arith.constant 0 : index
    %c0_3 = arith.constant 0 : index
    %c0_4 = arith.constant 0 : index
    %2 = vector.load %arg8[%c0_2, %c0_3, %c0_4] : memref<1x3x64xf32, #tpu.memory_space<vmem>>, vector<1x3x64xf32>
    %3 = vector.shape_cast %2 : vector<1x3x64xf32> to vector<3x64xf32>
    %c0_5 = arith.constant 0 : index
    %c0_6 = arith.constant 0 : index
    %4 = vector.load %arg6[%c0_5, %c0_6] : memref<128x128xf32, #tpu.memory_space<vmem>>, vector<128x128xf32>
    %5 = vector.extract_strided_slice %1 {offsets = [4, 0], sizes = [1, 128], strides = [1, 1]} : vector<9x128xf32> to vector<1x128xf32>
    %6 = vector.extract_strided_slice %1 {offsets = [5, 0], sizes = [1, 128], strides = [1, 1]} : vector<9x128xf32> to vector<1x128xf32>
    %7 = vector.extract_strided_slice %1 {offsets = [6, 0], sizes = [1, 128], strides = [1, 1]} : vector<9x128xf32> to vector<1x128xf32>
    %8 = vector.extract_strided_slice %1 {offsets = [7, 0], sizes = [1, 128], strides = [1, 1]} : vector<9x128xf32> to vector<1x128xf32>
    %9 = vector.extract_strided_slice %1 {offsets = [8, 0], sizes = [1, 128], strides = [1, 1]} : vector<9x128xf32> to vector<1x128xf32>
    %c0_7 = arith.constant 0 : index
    %c0_8 = arith.constant 0 : index
    %c0_9 = arith.constant 0 : index
    %10 = vector.load %arg1[%c0_7, %c0_8, %c0_9] : memref<2x4x128xf32, #tpu.memory_space<vmem>>, vector<1x4x128xf32>
    %11 = vector.shape_cast %10 : vector<1x4x128xf32> to vector<4x128xf32>
    %12 = vector.extract_strided_slice %1 {offsets = [0, 0], sizes = [1, 128], strides = [1, 1]} : vector<9x128xf32> to vector<1x128xf32>
    %13 = vector.broadcast %12 : vector<1x128xf32> to vector<4x128xf32>
    %14 = arith.mulf %11, %13 : vector<4x128xf32>
    %15 = arith.addf %11, %14 : vector<4x128xf32>
    %16 = vector.extract_strided_slice %1 {offsets = [1, 0], sizes = [1, 128], strides = [1, 1]} : vector<9x128xf32> to vector<1x128xf32>
    %17 = vector.broadcast %16 : vector<1x128xf32> to vector<4x128xf32>
    %18 = arith.addf %15, %17 : vector<4x128xf32>
    %cst = arith.constant dense<0.000000e+00> : vector<128xf32>
    %19 = vector.multi_reduction <add>, %18, %cst [0] : vector<4x128xf32> to vector<128xf32>
    %20 = vector.shape_cast %19 : vector<128xf32> to vector<1x128xf32>
    %21 = arith.mulf %18, %18 : vector<4x128xf32>
    %cst_10 = arith.constant dense<0.000000e+00> : vector<128xf32>
    %22 = vector.multi_reduction <add>, %21, %cst_10 [0] : vector<4x128xf32> to vector<128xf32>
    %23 = vector.shape_cast %22 : vector<128xf32> to vector<1x128xf32>
    %c1 = arith.constant 1 : index
    %c0_11 = arith.constant 0 : index
    %c0_12 = arith.constant 0 : index
    %24 = vector.load %arg1[%c1, %c0_11, %c0_12] : memref<2x4x128xf32, #tpu.memory_space<vmem>>, vector<1x4x128xf32>
    %25 = vector.shape_cast %24 : vector<1x4x128xf32> to vector<4x128xf32>
    %26 = vector.extract_strided_slice %1 {offsets = [2, 0], sizes = [1, 128], strides = [1, 1]} : vector<9x128xf32> to vector<1x128xf32>
    %27 = vector.broadcast %26 : vector<1x128xf32> to vector<4x128xf32>
    %28 = arith.mulf %25, %27 : vector<4x128xf32>
    %29 = arith.addf %25, %28 : vector<4x128xf32>
    %30 = vector.extract_strided_slice %1 {offsets = [3, 0], sizes = [1, 128], strides = [1, 1]} : vector<9x128xf32> to vector<1x128xf32>
    %31 = vector.broadcast %30 : vector<1x128xf32> to vector<4x128xf32>
    %32 = arith.addf %29, %31 : vector<4x128xf32>
    %cst_13 = arith.constant dense<0.000000e+00> : vector<128xf32>
    %33 = vector.multi_reduction <add>, %32, %cst_13 [0] : vector<4x128xf32> to vector<128xf32>
    %34 = vector.shape_cast %33 : vector<128xf32> to vector<1x128xf32>
    %35 = arith.mulf %32, %32 : vector<4x128xf32>
    %cst_14 = arith.constant dense<0.000000e+00> : vector<128xf32>
    %36 = vector.multi_reduction <add>, %35, %cst_14 [0] : vector<4x128xf32> to vector<128xf32>
    %37 = vector.shape_cast %36 : vector<128xf32> to vector<1x128xf32>
    %38 = tpu.concatenate %20, %23, %34, %37 in 0 : vector<1x128xf32>, vector<1x128xf32>, vector<1x128xf32>, vector<1x128xf32> -> vector<4x128xf32>
    %cst_15 = arith.constant dense<0.000000e+00> : vector<4x128xf32>
    %39 = tpu.matmul %38, %4, %cst_15 {dimension_numbers = #tpu.dot_dimension_numbers<[1], [0], [0], [1], [0, 0, 1, 1], [], []>} : vector<4x128xf32>, vector<128x128xf32>, vector<4x128xf32> -> vector<4x128xf32>
    %cst_16 = arith.constant 6.250000e-02 : f32
    %40 = vector.broadcast %cst_16 : f32 to vector<4x128xf32>
    %41 = arith.mulf %39, %40 : vector<4x128xf32>
    %cst_17 = arith.constant 0.000000e+00 : f32
    %42 = vector.broadcast %cst_17 : f32 to vector<1x256xf32>
    %43 = vector.extract_strided_slice %41 {offsets = [0, 0], sizes = [1, 128], strides = [1, 1]} : vector<4x128xf32> to vector<1x128xf32>
    %44 = vector.extract_strided_slice %41 {offsets = [1, 0], sizes = [1, 128], strides = [1, 1]} : vector<4x128xf32> to vector<1x128xf32>
    %45 = arith.mulf %43, %43 : vector<1x128xf32>
    %46 = arith.subf %44, %45 : vector<1x128xf32>
    %cst_18 = arith.constant 0.000000e+00 : f32
    %47 = vector.broadcast %cst_18 : f32 to vector<1x128xf32>
    %48 = arith.maximumf %46, %47 : vector<1x128xf32>
    %49 = vector.broadcast %43 : vector<1x128xf32> to vector<4x128xf32>
    %50 = arith.subf %18, %49 : vector<4x128xf32>
    %cst_19 = arith.constant 9.99999974E-6 : f32
    %51 = vector.broadcast %cst_19 : f32 to vector<1x128xf32>
    %52 = arith.addf %48, %51 : vector<1x128xf32>
    %53 = math.rsqrt %52 : vector<1x128xf32>
    %54 = vector.broadcast %53 : vector<1x128xf32> to vector<4x128xf32>
    %55 = arith.mulf %50, %54 : vector<4x128xf32>
    %56 = vector.broadcast %5 : vector<1x128xf32> to vector<4x128xf32>
    %57 = arith.mulf %55, %56 : vector<4x128xf32>
    %58 = vector.broadcast %6 : vector<1x128xf32> to vector<4x128xf32>
    %59 = arith.addf %57, %58 : vector<4x128xf32>
    %c0_20 = arith.constant 0 : index
    %c0_21 = arith.constant 0 : index
    %60 = vector.load %arg10[%c0_20, %c0_21] : memref<12x256xf32, #tpu.memory_space<vmem>>, vector<1x256xf32>
    tpu.vector_store %arg10[%c0_20, %c0_21], %42 {strides = array<i32>} : memref<12x256xf32, #tpu.memory_space<vmem>>, vector<1x256xf32>,
    %c1_22 = arith.constant 1 : index
    %c0_23 = arith.constant 0 : index
    %61 = vector.load %arg10[%c1_22, %c0_23] : memref<12x256xf32, #tpu.memory_space<vmem>>, vector<4x128xf32>
    tpu.vector_store %arg10[%c1_22, %c0_23], %59 {strides = array<i32>} : memref<12x256xf32, #tpu.memory_space<vmem>>, vector<4x128xf32>,
    %c0_24 = arith.constant 0 : index
    %c0_25 = arith.constant 0 : index
    %c0_26 = arith.constant 0 : index
    %c0_27 = arith.constant 0 : index
    %62 = vector.load %arg2[%c0_24, %c0_25, %c0_26, %c0_27] : memref<1x2x4x128xf32, #tpu.memory_space<vmem>>, vector<1x1x4x128xf32>
    %63 = vector.shape_cast %62 : vector<1x1x4x128xf32> to vector<4x128xf32>
    %c1_28 = arith.constant 1 : index
    %c128 = arith.constant 128 : index
    %64 = vector.load %arg10[%c1_28, %c128] : memref<12x256xf32, #tpu.memory_space<vmem>>, vector<4x128xf32>
    tpu.vector_store %arg10[%c1_28, %c128], %63 {strides = array<i32>} : memref<12x256xf32, #tpu.memory_space<vmem>>, vector<4x128xf32>,
    %c5 = arith.constant 5 : index
    %c0_29 = arith.constant 0 : index
    %65 = vector.load %arg10[%c5, %c0_29] : memref<12x256xf32, #tpu.memory_space<vmem>>, vector<1x256xf32>
    tpu.vector_store %arg10[%c5, %c0_29], %42 {strides = array<i32>} : memref<12x256xf32, #tpu.memory_space<vmem>>, vector<1x256xf32>,
    %66 = vector.extract_strided_slice %41 {offsets = [2, 0], sizes = [1, 128], strides = [1, 1]} : vector<4x128xf32> to vector<1x128xf32>
    %67 = vector.extract_strided_slice %41 {offsets = [3, 0], sizes = [1, 128], strides = [1, 1]} : vector<4x128xf32> to vector<1x128xf32>
    %68 = arith.mulf %66, %66 : vector<1x128xf32>
    %69 = arith.subf %67, %68 : vector<1x128xf32>
    %cst_30 = arith.constant 0.000000e+00 : f32
    %70 = vector.broadcast %cst_30 : f32 to vector<1x128xf32>
    %71 = arith.maximumf %69, %70 : vector<1x128xf32>
    %72 = vector.broadcast %66 : vector<1x128xf32> to vector<4x128xf32>
    %73 = arith.subf %32, %72 : vector<4x128xf32>
    %cst_31 = arith.constant 9.99999974E-6 : f32
    %74 = vector.broadcast %cst_31 : f32 to vector<1x128xf32>
    %75 = arith.addf %71, %74 : vector<1x128xf32>
    %76 = math.rsqrt %75 : vector<1x128xf32>
    %77 = vector.broadcast %76 : vector<1x128xf32> to vector<4x128xf32>
    %78 = arith.mulf %73, %77 : vector<4x128xf32>
    %79 = vector.broadcast %5 : vector<1x128xf32> to vector<4x128xf32>
    %80 = arith.mulf %78, %79 : vector<4x128xf32>
    %81 = vector.broadcast %6 : vector<1x128xf32> to vector<4x128xf32>
    %82 = arith.addf %80, %81 : vector<4x128xf32>
    %c6 = arith.constant 6 : index
    %c0_32 = arith.constant 0 : index
    %83 = vector.load %arg10[%c6, %c0_32] : memref<12x256xf32, #tpu.memory_space<vmem>>, vector<1x256xf32>
    tpu.vector_store %arg10[%c6, %c0_32], %42 {strides = array<i32>} : memref<12x256xf32, #tpu.memory_space<vmem>>, vector<1x256xf32>,
    %c7 = arith.constant 7 : index
    %c0_33 = arith.constant 0 : index
    %84 = vector.load %arg10[%c7, %c0_33] : memref<12x256xf32, #tpu.memory_space<vmem>>, vector<4x128xf32>
    tpu.vector_store %arg10[%c7, %c0_33], %82 {strides = array<i32>} : memref<12x256xf32, #tpu.memory_space<vmem>>, vector<4x128xf32>,
    %c0_34 = arith.constant 0 : index
    %c1_35 = arith.constant 1 : index
    %c0_36 = arith.constant 0 : index
    %c0_37 = arith.constant 0 : index
    %85 = vector.load %arg2[%c0_34, %c1_35, %c0_36, %c0_37] : memref<1x2x4x128xf32, #tpu.memory_space<vmem>>, vector<1x1x4x128xf32>
    %86 = vector.shape_cast %85 : vector<1x1x4x128xf32> to vector<4x128xf32>
    %c7_38 = arith.constant 7 : index
    %c128_39 = arith.constant 128 : index
    %87 = vector.load %arg10[%c7_38, %c128_39] : memref<12x256xf32, #tpu.memory_space<vmem>>, vector<4x128xf32>
    tpu.vector_store %arg10[%c7_38, %c128_39], %86 {strides = array<i32>} : memref<12x256xf32, #tpu.memory_space<vmem>>, vector<4x128xf32>,
    %c11 = arith.constant 11 : index
    %c0_40 = arith.constant 0 : index
    %88 = vector.load %arg10[%c11, %c0_40] : memref<12x256xf32, #tpu.memory_space<vmem>>, vector<1x256xf32>
    tpu.vector_store %arg10[%c11, %c0_40], %42 {strides = array<i32>} : memref<12x256xf32, #tpu.memory_space<vmem>>, vector<1x256xf32>,
    %c0_41 = arith.constant 0 : index
    %c0_42 = arith.constant 0 : index
    %89 = vector.load %arg10[%c0_41, %c0_42] : memref<12x256xf32, #tpu.memory_space<vmem>>, vector<12x256xf32>
    %90 = arith.truncf %89 : vector<12x256xf32> to vector<12x256xbf16>
    %c0_43 = arith.constant 0 : index
    %c0_44 = arith.constant 0 : index
    %c0_45 = arith.constant 0 : index
    %91 = vector.load %arg4[%c0_43, %c0_44, %c0_45] : memref<1x256x384xbf16, #tpu.memory_space<vmem>>, vector<1x256x384xbf16>
    %92 = vector.shape_cast %91 : vector<1x256x384xbf16> to vector<256x384xbf16>
    %cst_46 = arith.constant dense<0.000000e+00> : vector<12x384xf32>
    %93 = tpu.matmul %90, %92, %cst_46 {dimension_numbers = #tpu.dot_dimension_numbers<[1], [0], [0], [1], [0, 0, 1, 1], [], []>} : vector<12x256xbf16>, vector<256x384xbf16>, vector<12x384xf32> -> vector<12x384xf32>
    %94 = vector.extract_strided_slice %93 {offsets = [0, 0], sizes = [4, 128], strides = [1, 1]} : vector<12x384xf32> to vector<4x128xf32>
    %95 = vector.extract_strided_slice %93 {offsets = [1, 128], sizes = [4, 128], strides = [1, 1]} : vector<12x384xf32> to vector<4x128xf32>
    %96 = arith.addf %94, %95 : vector<4x128xf32>
    %97 = vector.extract_strided_slice %93 {offsets = [2, 256], sizes = [4, 128], strides = [1, 1]} : vector<12x384xf32> to vector<4x128xf32>
    %98 = arith.addf %96, %97 : vector<4x128xf32>
    %99 = vector.extract_strided_slice %93 {offsets = [6, 0], sizes = [4, 128], strides = [1, 1]} : vector<12x384xf32> to vector<4x128xf32>
    %100 = vector.extract_strided_slice %93 {offsets = [7, 128], sizes = [4, 128], strides = [1, 1]} : vector<12x384xf32> to vector<4x128xf32>
    %101 = arith.addf %99, %100 : vector<4x128xf32>
    %102 = vector.extract_strided_slice %93 {offsets = [8, 256], sizes = [4, 128], strides = [1, 1]} : vector<12x384xf32> to vector<4x128xf32>
    %103 = arith.addf %101, %102 : vector<4x128xf32>
    %104 = vector.broadcast %7 : vector<1x128xf32> to vector<4x128xf32>
    %105 = arith.addf %98, %104 : vector<4x128xf32>
    %cst_47 = arith.constant 0.000000e+00 : f32
    %106 = vector.broadcast %cst_47 : f32 to vector<4x128xf32>
    %107 = arith.maximumf %105, %106 : vector<4x128xf32>
    %108 = vector.broadcast %7 : vector<1x128xf32> to vector<4x128xf32>
    %109 = arith.addf %103, %108 : vector<4x128xf32>
    %cst_48 = arith.constant 0.000000e+00 : f32
    %110 = vector.broadcast %cst_48 : f32 to vector<4x128xf32>
    %111 = arith.maximumf %109, %110 : vector<4x128xf32>
    %cst_49 = arith.constant 0.000000e+00 : f32
    %112 = vector.broadcast %cst_49 : f32 to vector<1x128xf32>
    %cst_50 = arith.constant 0.000000e+00 : f32
    %113 = vector.broadcast %cst_50 : f32 to vector<1x128xf32>
    %cst_51 = arith.constant dense<0.000000e+00> : vector<128xf32>
    %114 = vector.multi_reduction <add>, %107, %cst_51 [0] : vector<4x128xf32> to vector<128xf32>
    %115 = vector.shape_cast %114 : vector<128xf32> to vector<1x128xf32>
    %116 = arith.addf %112, %115 : vector<1x128xf32>
    %117 = arith.mulf %107, %107 : vector<4x128xf32>
    %cst_52 = arith.constant dense<0.000000e+00> : vector<128xf32>
    %118 = vector.multi_reduction <add>, %117, %cst_52 [0] : vector<4x128xf32> to vector<128xf32>
    %119 = vector.shape_cast %118 : vector<128xf32> to vector<1x128xf32>
    %120 = arith.addf %113, %119 : vector<1x128xf32>
    %cst_53 = arith.constant dense<0.000000e+00> : vector<128xf32>
    %121 = vector.multi_reduction <add>, %111, %cst_53 [0] : vector<4x128xf32> to vector<128xf32>
    %122 = vector.shape_cast %121 : vector<128xf32> to vector<1x128xf32>
    %123 = arith.addf %116, %122 : vector<1x128xf32>
    %124 = arith.mulf %111, %111 : vector<4x128xf32>
    %cst_54 = arith.constant dense<0.000000e+00> : vector<128xf32>
    %125 = vector.multi_reduction <add>, %124, %cst_54 [0] : vector<4x128xf32> to vector<128xf32>
    %126 = vector.shape_cast %125 : vector<128xf32> to vector<1x128xf32>
    %127 = arith.addf %120, %126 : vector<1x128xf32>
    %128 = tpu.concatenate %123, %127 in 0 : vector<1x128xf32>, vector<1x128xf32> -> vector<2x128xf32>
    %cst_55 = arith.constant dense<0.000000e+00> : vector<2x128xf32>
    %129 = tpu.matmul %128, %4, %cst_55 {dimension_numbers = #tpu.dot_dimension_numbers<[1], [0], [0], [1], [0, 0, 1, 1], [], []>} : vector<2x128xf32>, vector<128x128xf32>, vector<2x128xf32> -> vector<2x128xf32>
    %cst_56 = arith.constant 3.125000e-02 : f32
    %130 = vector.broadcast %cst_56 : f32 to vector<2x128xf32>
    %131 = arith.mulf %129, %130 : vector<2x128xf32>
    %132 = vector.extract_strided_slice %131 {offsets = [0, 0], sizes = [1, 128], strides = [1, 1]} : vector<2x128xf32> to vector<1x128xf32>
    %133 = vector.extract_strided_slice %131 {offsets = [1, 0], sizes = [1, 128], strides = [1, 1]} : vector<2x128xf32> to vector<1x128xf32>
    %134 = arith.mulf %132, %132 : vector<1x128xf32>
    %135 = arith.subf %133, %134 : vector<1x128xf32>
    %cst_57 = arith.constant 0.000000e+00 : f32
    %136 = vector.broadcast %cst_57 : f32 to vector<1x128xf32>
    %137 = arith.maximumf %135, %136 : vector<1x128xf32>
    %cst_58 = arith.constant 9.99999974E-6 : f32
    %138 = vector.broadcast %cst_58 : f32 to vector<1x128xf32>
    %139 = arith.addf %137, %138 : vector<1x128xf32>
    %140 = math.rsqrt %139 : vector<1x128xf32>
    %141 = arith.mulf %8, %140 : vector<1x128xf32>
    %142 = arith.mulf %132, %141 : vector<1x128xf32>
    %143 = arith.subf %9, %142 : vector<1x128xf32>
    %cst_59 = arith.constant 0.000000e+00 : f32
    %144 = vector.broadcast %cst_59 : f32 to vector<1x128xf32>
    %c0_60 = arith.constant 0 : index
    %c0_61 = arith.constant 0 : index
    %145 = vector.load %arg11[%c0_60, %c0_61] : memref<12x128xf32, #tpu.memory_space<vmem>>, vector<1x128xf32>
    tpu.vector_store %arg11[%c0_60, %c0_61], %144 {strides = array<i32>} : memref<12x128xf32, #tpu.memory_space<vmem>>, vector<1x128xf32>,
    %146 = vector.broadcast %141 : vector<1x128xf32> to vector<4x128xf32>
    %147 = arith.mulf %107, %146 : vector<4x128xf32>
    %148 = vector.broadcast %143 : vector<1x128xf32> to vector<4x128xf32>
    %149 = arith.addf %147, %148 : vector<4x128xf32>
    %c1_62 = arith.constant 1 : index
    %c0_63 = arith.constant 0 : index
    %150 = vector.load %arg11[%c1_62, %c0_63] : memref<12x128xf32, #tpu.memory_space<vmem>>, vector<4x128xf32>
    tpu.vector_store %arg11[%c1_62, %c0_63], %149 {strides = array<i32>} : memref<12x128xf32, #tpu.memory_space<vmem>>, vector<4x128xf32>,
    %c5_64 = arith.constant 5 : index
    %c0_65 = arith.constant 0 : index
    %151 = vector.load %arg11[%c5_64, %c0_65] : memref<12x128xf32, #tpu.memory_space<vmem>>, vector<1x128xf32>
    tpu.vector_store %arg11[%c5_64, %c0_65], %144 {strides = array<i32>} : memref<12x128xf32, #tpu.memory_space<vmem>>, vector<1x128xf32>,
    %c6_66 = arith.constant 6 : index
    %c0_67 = arith.constant 0 : index
    %152 = vector.load %arg11[%c6_66, %c0_67] : memref<12x128xf32, #tpu.memory_space<vmem>>, vector<1x128xf32>
    tpu.vector_store %arg11[%c6_66, %c0_67], %144 {strides = array<i32>} : memref<12x128xf32, #tpu.memory_space<vmem>>, vector<1x128xf32>,
    %153 = vector.broadcast %141 : vector<1x128xf32> to vector<4x128xf32>
    %154 = arith.mulf %111, %153 : vector<4x128xf32>
    %155 = vector.broadcast %143 : vector<1x128xf32> to vector<4x128xf32>
    %156 = arith.addf %154, %155 : vector<4x128xf32>
    %c7_68 = arith.constant 7 : index
    %c0_69 = arith.constant 0 : index
    %157 = vector.load %arg11[%c7_68, %c0_69] : memref<12x128xf32, #tpu.memory_space<vmem>>, vector<4x128xf32>
    tpu.vector_store %arg11[%c7_68, %c0_69], %156 {strides = array<i32>} : memref<12x128xf32, #tpu.memory_space<vmem>>, vector<4x128xf32>,
    %c11_70 = arith.constant 11 : index
    %c0_71 = arith.constant 0 : index
    %158 = vector.load %arg11[%c11_70, %c0_71] : memref<12x128xf32, #tpu.memory_space<vmem>>, vector<1x128xf32>
    tpu.vector_store %arg11[%c11_70, %c0_71], %144 {strides = array<i32>} : memref<12x128xf32, #tpu.memory_space<vmem>>, vector<1x128xf32>,
    %c0_72 = arith.constant 0 : index
    %c0_73 = arith.constant 0 : index
    %159 = vector.load %arg11[%c0_72, %c0_73] : memref<12x128xf32, #tpu.memory_space<vmem>>, vector<12x128xf32>
    %160 = arith.truncf %159 : vector<12x128xf32> to vector<12x128xbf16>
    %c0_74 = arith.constant 0 : index
    %c0_75 = arith.constant 0 : index
    %c0_76 = arith.constant 0 : index
    %161 = vector.load %arg5[%c0_74, %c0_75, %c0_76] : memref<1x128x384xbf16, #tpu.memory_space<vmem>>, vector<1x128x384xbf16>
    %162 = vector.shape_cast %161 : vector<1x128x384xbf16> to vector<128x384xbf16>
    %cst_77 = arith.constant dense<0.000000e+00> : vector<12x384xf32>
    %163 = tpu.matmul %160, %162, %cst_77 {dimension_numbers = #tpu.dot_dimension_numbers<[1], [0], [0], [1], [0, 0, 1, 1], [], []>} : vector<12x128xbf16>, vector<128x384xbf16>, vector<12x384xf32> -> vector<12x384xf32>
    %164 = vector.extract_strided_slice %163 {offsets = [0, 0], sizes = [4, 128], strides = [1, 1]} : vector<12x384xf32> to vector<4x128xf32>
    %165 = vector.extract_strided_slice %163 {offsets = [1, 128], sizes = [4, 128], strides = [1, 1]} : vector<12x384xf32> to vector<4x128xf32>
    %166 = arith.addf %164, %165 : vector<4x128xf32>
    %167 = vector.extract_strided_slice %163 {offsets = [2, 256], sizes = [4, 128], strides = [1, 1]} : vector<12x384xf32> to vector<4x128xf32>
    %168 = arith.addf %166, %167 : vector<4x128xf32>
    %169 = vector.extract_strided_slice %168 {offsets = [0, 0], sizes = [4, 64], strides = [1, 1]} : vector<4x128xf32> to vector<4x64xf32>
    %170 = vector.extract_strided_slice %163 {offsets = [6, 0], sizes = [4, 128], strides = [1, 1]} : vector<12x384xf32> to vector<4x128xf32>
    %171 = vector.extract_strided_slice %163 {offsets = [7, 128], sizes = [4, 128], strides = [1, 1]} : vector<12x384xf32> to vector<4x128xf32>
    %172 = arith.addf %170, %171 : vector<4x128xf32>
    %173 = vector.extract_strided_slice %163 {offsets = [8, 256], sizes = [4, 128], strides = [1, 1]} : vector<12x384xf32> to vector<4x128xf32>
    %174 = arith.addf %172, %173 : vector<4x128xf32>
    %175 = vector.extract_strided_slice %174 {offsets = [0, 0], sizes = [4, 64], strides = [1, 1]} : vector<4x128xf32> to vector<4x64xf32>
    %176 = vector.extract_strided_slice %3 {offsets = [0, 0], sizes = [1, 64], strides = [1, 1]} : vector<3x64xf32> to vector<1x64xf32>
    %177 = vector.broadcast %176 : vector<1x64xf32> to vector<4x64xf32>
    %178 = arith.addf %169, %177 : vector<4x64xf32>
    %cst_78 = arith.constant 0.000000e+00 : f32
    %179 = vector.broadcast %cst_78 : f32 to vector<4x64xf32>
    %180 = arith.maximumf %178, %179 : vector<4x64xf32>
    %181 = vector.extract_strided_slice %3 {offsets = [0, 0], sizes = [1, 64], strides = [1, 1]} : vector<3x64xf32> to vector<1x64xf32>
    %182 = vector.broadcast %181 : vector<1x64xf32> to vector<4x64xf32>
    %183 = arith.addf %175, %182 : vector<4x64xf32>
    %cst_79 = arith.constant 0.000000e+00 : f32
    %184 = vector.broadcast %cst_79 : f32 to vector<4x64xf32>
    %185 = arith.maximumf %183, %184 : vector<4x64xf32>
    %c0_80 = arith.constant 0 : index
    %c0_81 = arith.constant 0 : index
    %186 = vector.load %arg7[%c0_80, %c0_81] : memref<64x64xf32, #tpu.memory_space<vmem>>, vector<64x64xf32>
    %187 = vector.extract_strided_slice %3 {offsets = [1, 0], sizes = [1, 64], strides = [1, 1]} : vector<3x64xf32> to vector<1x64xf32>
    %188 = vector.extract_strided_slice %3 {offsets = [2, 0], sizes = [1, 64], strides = [1, 1]} : vector<3x64xf32> to vector<1x64xf32>
    %cst_82 = arith.constant 0.000000e+00 : f32
    %189 = vector.broadcast %cst_82 : f32 to vector<1x64xf32>
    %cst_83 = arith.constant 0.000000e+00 : f32
    %190 = vector.broadcast %cst_83 : f32 to vector<1x64xf32>
    %cst_84 = arith.constant dense<0.000000e+00> : vector<64xf32>
    %191 = vector.multi_reduction <add>, %180, %cst_84 [0] : vector<4x64xf32> to vector<64xf32>
    %192 = vector.shape_cast %191 : vector<64xf32> to vector<1x64xf32>
    %193 = arith.addf %189, %192 : vector<1x64xf32>
    %194 = arith.mulf %180, %180 : vector<4x64xf32>
    %cst_85 = arith.constant dense<0.000000e+00> : vector<64xf32>
    %195 = vector.multi_reduction <add>, %194, %cst_85 [0] : vector<4x64xf32> to vector<64xf32>
    %196 = vector.shape_cast %195 : vector<64xf32> to vector<1x64xf32>
    %197 = arith.addf %190, %196 : vector<1x64xf32>
    %cst_86 = arith.constant dense<0.000000e+00> : vector<64xf32>
    %198 = vector.multi_reduction <add>, %185, %cst_86 [0] : vector<4x64xf32> to vector<64xf32>
    %199 = vector.shape_cast %198 : vector<64xf32> to vector<1x64xf32>
    %200 = arith.addf %193, %199 : vector<1x64xf32>
    %201 = arith.mulf %185, %185 : vector<4x64xf32>
    %cst_87 = arith.constant dense<0.000000e+00> : vector<64xf32>
    %202 = vector.multi_reduction <add>, %201, %cst_87 [0] : vector<4x64xf32> to vector<64xf32>
    %203 = vector.shape_cast %202 : vector<64xf32> to vector<1x64xf32>
    %204 = arith.addf %197, %203 : vector<1x64xf32>
    %205 = tpu.concatenate %200, %204 in 0 : vector<1x64xf32>, vector<1x64xf32> -> vector<2x64xf32>
    %cst_88 = arith.constant dense<0.000000e+00> : vector<2x64xf32>
    %206 = tpu.matmul %205, %186, %cst_88 {dimension_numbers = #tpu.dot_dimension_numbers<[1], [0], [0], [1], [0, 0, 1, 1], [], []>} : vector<2x64xf32>, vector<64x64xf32>, vector<2x64xf32> -> vector<2x64xf32>
    %cst_89 = arith.constant 3.125000e-02 : f32
    %207 = vector.broadcast %cst_89 : f32 to vector<2x64xf32>
    %208 = arith.mulf %206, %207 : vector<2x64xf32>
    %209 = vector.extract_strided_slice %208 {offsets = [0, 0], sizes = [1, 64], strides = [1, 1]} : vector<2x64xf32> to vector<1x64xf32>
    %210 = vector.extract_strided_slice %208 {offsets = [1, 0], sizes = [1, 64], strides = [1, 1]} : vector<2x64xf32> to vector<1x64xf32>
    %211 = arith.mulf %209, %209 : vector<1x64xf32>
    %212 = arith.subf %210, %211 : vector<1x64xf32>
    %cst_90 = arith.constant 0.000000e+00 : f32
    %213 = vector.broadcast %cst_90 : f32 to vector<1x64xf32>
    %214 = arith.maximumf %212, %213 : vector<1x64xf32>
    %cst_91 = arith.constant 9.99999974E-6 : f32
    %215 = vector.broadcast %cst_91 : f32 to vector<1x64xf32>
    %216 = arith.addf %214, %215 : vector<1x64xf32>
    %217 = math.rsqrt %216 : vector<1x64xf32>
    %218 = arith.mulf %187, %217 : vector<1x64xf32>
    %219 = arith.mulf %209, %218 : vector<1x64xf32>
    %220 = arith.subf %188, %219 : vector<1x64xf32>
    %221 = vector.broadcast %218 : vector<1x64xf32> to vector<4x64xf32>
    %222 = arith.mulf %180, %221 : vector<4x64xf32>
    %223 = vector.broadcast %220 : vector<1x64xf32> to vector<4x64xf32>
    %224 = arith.addf %222, %223 : vector<4x64xf32>
    %c0_92 = arith.constant 0 : index
    %c0_93 = arith.constant 0 : index
    %c0_94 = arith.constant 0 : index
    %c0_95 = arith.constant 0 : index
    %225 = vector.load %arg9[%c0_92, %c0_93, %c0_94, %c0_95] : memref<1x2x4x64xf32, #tpu.memory_space<vmem>>, vector<1x1x4x64xf32>
    %226 = vector.shape_cast %225 : vector<1x1x4x64xf32> to vector<4x64xf32>
    %227 = vector.shape_cast %224 : vector<4x64xf32> to vector<1x1x4x64xf32>
    tpu.vector_store %arg9[%c0_92, %c0_93, %c0_94, %c0_95], %227 {strides = array<i32>} : memref<1x2x4x64xf32, #tpu.memory_space<vmem>>, vector<1x1x4x64xf32>,
    %228 = vector.broadcast %218 : vector<1x64xf32> to vector<4x64xf32>
    %229 = arith.mulf %185, %228 : vector<4x64xf32>
    %230 = vector.broadcast %220 : vector<1x64xf32> to vector<4x64xf32>
    %231 = arith.addf %229, %230 : vector<4x64xf32>
    %c0_96 = arith.constant 0 : index
    %c1_97 = arith.constant 1 : index
    %c0_98 = arith.constant 0 : index
    %c0_99 = arith.constant 0 : index
    %232 = vector.load %arg9[%c0_96, %c1_97, %c0_98, %c0_99] : memref<1x2x4x64xf32, #tpu.memory_space<vmem>>, vector<1x1x4x64xf32>
    %233 = vector.shape_cast %232 : vector<1x1x4x64xf32> to vector<4x64xf32>
    %234 = vector.shape_cast %231 : vector<4x64xf32> to vector<1x1x4x64xf32>
    tpu.vector_store %arg9[%c0_96, %c1_97, %c0_98, %c0_99], %234 {strides = array<i32>} : memref<1x2x4x64xf32, #tpu.memory_space<vmem>>, vector<1x1x4x64xf32>,
    return
  }
  func.func @transform_0(%arg0: i32) -> (i32, i32, i32) {
    %c0_i32 = arith.constant 0 : i32
    %c0_i32_0 = arith.constant 0 : i32
    %c0_i32_1 = arith.constant 0 : i32
    %c0_i32_2 = arith.constant 0 : i32
    return %c0_i32, %c0_i32_0, %c0_i32_1 : i32, i32, i32
  }
  func.func @transform_1(%arg0: i32) -> (i32, i32, i32, i32) {
    %c0_i32 = arith.constant 0 : i32
    %c0_i32_0 = arith.constant 0 : i32
    %c0_i32_1 = arith.constant 0 : i32
    %c0_i32_2 = arith.constant 0 : i32
    return %arg0, %c0_i32, %c0_i32_0, %c0_i32_1 : i32, i32, i32, i32
  }
  func.func @transform_2(%arg0: i32) -> (i32, i32, i32) {
    %c0_i32 = arith.constant 0 : i32
    %c0_i32_0 = arith.constant 0 : i32
    %c0_i32_1 = arith.constant 0 : i32
    return %arg0, %c0_i32, %c0_i32_0 : i32, i32, i32
  }
  func.func @transform_3(%arg0: i32) -> (i32, i32, i32) {
    %c0_i32 = arith.constant 0 : i32
    %c0_i32_0 = arith.constant 0 : i32
    %c0_i32_1 = arith.constant 0 : i32
    return %arg0, %c0_i32, %c0_i32_0 : i32, i32, i32
  }
  func.func @transform_4(%arg0: i32) -> (i32, i32, i32) {
    %c0_i32 = arith.constant 0 : i32
    %c0_i32_0 = arith.constant 0 : i32
    %c0_i32_1 = arith.constant 0 : i32
    return %arg0, %c0_i32, %c0_i32_0 : i32, i32, i32
  }
  func.func @transform_5(%arg0: i32) -> (i32, i32) {
    %c0_i32 = arith.constant 0 : i32
    %c0_i32_0 = arith.constant 0 : i32
    %c0_i32_1 = arith.constant 0 : i32
    return %c0_i32, %c0_i32_0 : i32, i32
  }
  func.func @transform_6(%arg0: i32) -> (i32, i32) {
    %c0_i32 = arith.constant 0 : i32
    %c0_i32_0 = arith.constant 0 : i32
    %c0_i32_1 = arith.constant 0 : i32
    return %c0_i32, %c0_i32_0 : i32, i32
  }
  func.func @transform_7(%arg0: i32) -> (i32, i32, i32) {
    %c0_i32 = arith.constant 0 : i32
    %c0_i32_0 = arith.constant 0 : i32
    %c0_i32_1 = arith.constant 0 : i32
    return %arg0, %c0_i32, %c0_i32_0 : i32, i32, i32
  }
  func.func @transform_8(%arg0: i32) -> (i32, i32, i32, i32) {
    %c0_i32 = arith.constant 0 : i32
    %c0_i32_0 = arith.constant 0 : i32
    %c0_i32_1 = arith.constant 0 : i32
    %c0_i32_2 = arith.constant 0 : i32
    return %arg0, %c0_i32, %c0_i32_0, %c0_i32_1 : i32, i32, i32, i32
  }
}

module attributes {stable_mosaic.version = 11 : i64} {
  func.func @_dec_block_kernel(%arg0: i32, %arg1: memref<2x8x128xf32, #tpu.memory_space<vmem>>, %arg2: memref<1x2x8x128xf32, #tpu.memory_space<vmem>>, %arg3: memref<1x9x128xf32, #tpu.memory_space<vmem>>, %arg4: memref<1x256x384xbf16, #tpu.memory_space<vmem>>, %arg5: memref<1x128x384xbf16, #tpu.memory_space<vmem>>, %arg6: memref<128x128xf32, #tpu.memory_space<vmem>>, %arg7: memref<64x64xf32, #tpu.memory_space<vmem>>, %arg8: memref<1x3x64xf32, #tpu.memory_space<vmem>>, %arg9: memref<1x2x8x64xf32, #tpu.memory_space<vmem>>, %arg10: memref<20x256xf32, #tpu.memory_space<vmem>>, %arg11: memref<20x128xf32, #tpu.memory_space<vmem>>) attributes {dimension_semantics = [#tpu.dimension_semantics<arbitrary>], iteration_bounds = array<i64: 2>, scalar_prefetch = 0 : i64, scratch_operands = 2 : i64, tpu.core_type = #tpu.core_type<tc>, window_params = [{pipeline_mode = #tpu.pipeline_mode<synchronous>, transform_indices = @transform_0, window_bounds = array<i64: 2, 8, 128>}, {transform_indices = @transform_1, window_bounds = array<i64: 1, 2, 8, 128>}, {transform_indices = @transform_2, window_bounds = array<i64: 1, 9, 128>}, {transform_indices = @transform_3, window_bounds = array<i64: 1, 256, 384>}, {transform_indices = @transform_4, window_bounds = array<i64: 1, 128, 384>}, {pipeline_mode = #tpu.pipeline_mode<synchronous>, transform_indices = @transform_5, window_bounds = array<i64: 128, 128>}, {pipeline_mode = #tpu.pipeline_mode<synchronous>, transform_indices = @transform_6, window_bounds = array<i64: 64, 64>}, {transform_indices = @transform_7, window_bounds = array<i64: 1, 3, 64>}, {transform_indices = @transform_8, window_bounds = array<i64: 1, 2, 8, 64>}]} {
    %c0 = arith.constant 0 : index
    %c0_0 = arith.constant 0 : index
    %c0_1 = arith.constant 0 : index
    %0 = vector.load %arg3[%c0, %c0_0, %c0_1] : memref<1x9x128xf32, #tpu.memory_space<vmem>>, vector<1x9x128xf32>
    %1 = vector.shape_cast %0 : vector<1x9x128xf32> to vector<9x128xf32>
    %c0_2 = arith.constant 0 : index
    %c0_3 = arith.constant 0 : index
    %c0_4 = arith.constant 0 : index
    %2 = vector.load %arg8[%c0_2, %c0_3, %c0_4] : memref<1x3x64xf32, #tpu.memory_space<vmem>>, vector<1x3x64xf32>
    %3 = vector.shape_cast %2 : vector<1x3x64xf32> to vector<3x64xf32>
    %c0_5 = arith.constant 0 : index
    %c0_6 = arith.constant 0 : index
    %4 = vector.load %arg6[%c0_5, %c0_6] : memref<128x128xf32, #tpu.memory_space<vmem>>, vector<128x128xf32>
    %5 = vector.extract_strided_slice %1 {offsets = [4, 0], sizes = [1, 128], strides = [1, 1]} : vector<9x128xf32> to vector<1x128xf32>
    %6 = vector.extract_strided_slice %1 {offsets = [5, 0], sizes = [1, 128], strides = [1, 1]} : vector<9x128xf32> to vector<1x128xf32>
    %7 = vector.extract_strided_slice %1 {offsets = [6, 0], sizes = [1, 128], strides = [1, 1]} : vector<9x128xf32> to vector<1x128xf32>
    %8 = vector.extract_strided_slice %1 {offsets = [7, 0], sizes = [1, 128], strides = [1, 1]} : vector<9x128xf32> to vector<1x128xf32>
    %9 = vector.extract_strided_slice %1 {offsets = [8, 0], sizes = [1, 128], strides = [1, 1]} : vector<9x128xf32> to vector<1x128xf32>
    %c0_7 = arith.constant 0 : index
    %c0_8 = arith.constant 0 : index
    %c0_9 = arith.constant 0 : index
    %10 = vector.load %arg1[%c0_7, %c0_8, %c0_9] : memref<2x8x128xf32, #tpu.memory_space<vmem>>, vector<1x8x128xf32>
    %11 = vector.shape_cast %10 : vector<1x8x128xf32> to vector<8x128xf32>
    %12 = vector.extract_strided_slice %1 {offsets = [0, 0], sizes = [1, 128], strides = [1, 1]} : vector<9x128xf32> to vector<1x128xf32>
    %13 = vector.broadcast %12 : vector<1x128xf32> to vector<8x128xf32>
    %14 = arith.mulf %11, %13 : vector<8x128xf32>
    %15 = arith.addf %11, %14 : vector<8x128xf32>
    %16 = vector.extract_strided_slice %1 {offsets = [1, 0], sizes = [1, 128], strides = [1, 1]} : vector<9x128xf32> to vector<1x128xf32>
    %17 = vector.broadcast %16 : vector<1x128xf32> to vector<8x128xf32>
    %18 = arith.addf %15, %17 : vector<8x128xf32>
    %cst = arith.constant dense<0.000000e+00> : vector<128xf32>
    %19 = vector.multi_reduction <add>, %18, %cst [0] : vector<8x128xf32> to vector<128xf32>
    %20 = vector.shape_cast %19 : vector<128xf32> to vector<1x128xf32>
    %21 = arith.mulf %18, %18 : vector<8x128xf32>
    %cst_10 = arith.constant dense<0.000000e+00> : vector<128xf32>
    %22 = vector.multi_reduction <add>, %21, %cst_10 [0] : vector<8x128xf32> to vector<128xf32>
    %23 = vector.shape_cast %22 : vector<128xf32> to vector<1x128xf32>
    %c1 = arith.constant 1 : index
    %c0_11 = arith.constant 0 : index
    %c0_12 = arith.constant 0 : index
    %24 = vector.load %arg1[%c1, %c0_11, %c0_12] : memref<2x8x128xf32, #tpu.memory_space<vmem>>, vector<1x8x128xf32>
    %25 = vector.shape_cast %24 : vector<1x8x128xf32> to vector<8x128xf32>
    %26 = vector.extract_strided_slice %1 {offsets = [2, 0], sizes = [1, 128], strides = [1, 1]} : vector<9x128xf32> to vector<1x128xf32>
    %27 = vector.broadcast %26 : vector<1x128xf32> to vector<8x128xf32>
    %28 = arith.mulf %25, %27 : vector<8x128xf32>
    %29 = arith.addf %25, %28 : vector<8x128xf32>
    %30 = vector.extract_strided_slice %1 {offsets = [3, 0], sizes = [1, 128], strides = [1, 1]} : vector<9x128xf32> to vector<1x128xf32>
    %31 = vector.broadcast %30 : vector<1x128xf32> to vector<8x128xf32>
    %32 = arith.addf %29, %31 : vector<8x128xf32>
    %cst_13 = arith.constant dense<0.000000e+00> : vector<128xf32>
    %33 = vector.multi_reduction <add>, %32, %cst_13 [0] : vector<8x128xf32> to vector<128xf32>
    %34 = vector.shape_cast %33 : vector<128xf32> to vector<1x128xf32>
    %35 = arith.mulf %32, %32 : vector<8x128xf32>
    %cst_14 = arith.constant dense<0.000000e+00> : vector<128xf32>
    %36 = vector.multi_reduction <add>, %35, %cst_14 [0] : vector<8x128xf32> to vector<128xf32>
    %37 = vector.shape_cast %36 : vector<128xf32> to vector<1x128xf32>
    %38 = tpu.concatenate %20, %23, %34, %37 in 0 : vector<1x128xf32>, vector<1x128xf32>, vector<1x128xf32>, vector<1x128xf32> -> vector<4x128xf32>
    %cst_15 = arith.constant dense<0.000000e+00> : vector<4x128xf32>
    %39 = tpu.matmul %38, %4, %cst_15 {dimension_numbers = #tpu.dot_dimension_numbers<[1], [0], [0], [1], [0, 0, 1, 1], [], []>} : vector<4x128xf32>, vector<128x128xf32>, vector<4x128xf32> -> vector<4x128xf32>
    %cst_16 = arith.constant 1.562500e-02 : f32
    %40 = vector.broadcast %cst_16 : f32 to vector<4x128xf32>
    %41 = arith.mulf %39, %40 : vector<4x128xf32>
    %cst_17 = arith.constant 0.000000e+00 : f32
    %42 = vector.broadcast %cst_17 : f32 to vector<1x256xf32>
    %43 = vector.extract_strided_slice %41 {offsets = [0, 0], sizes = [1, 128], strides = [1, 1]} : vector<4x128xf32> to vector<1x128xf32>
    %44 = vector.extract_strided_slice %41 {offsets = [1, 0], sizes = [1, 128], strides = [1, 1]} : vector<4x128xf32> to vector<1x128xf32>
    %45 = arith.mulf %43, %43 : vector<1x128xf32>
    %46 = arith.subf %44, %45 : vector<1x128xf32>
    %cst_18 = arith.constant 0.000000e+00 : f32
    %47 = vector.broadcast %cst_18 : f32 to vector<1x128xf32>
    %48 = arith.maximumf %46, %47 : vector<1x128xf32>
    %49 = vector.broadcast %43 : vector<1x128xf32> to vector<8x128xf32>
    %50 = arith.subf %18, %49 : vector<8x128xf32>
    %cst_19 = arith.constant 9.99999974E-6 : f32
    %51 = vector.broadcast %cst_19 : f32 to vector<1x128xf32>
    %52 = arith.addf %48, %51 : vector<1x128xf32>
    %53 = math.rsqrt %52 : vector<1x128xf32>
    %54 = vector.broadcast %53 : vector<1x128xf32> to vector<8x128xf32>
    %55 = arith.mulf %50, %54 : vector<8x128xf32>
    %56 = vector.broadcast %5 : vector<1x128xf32> to vector<8x128xf32>
    %57 = arith.mulf %55, %56 : vector<8x128xf32>
    %58 = vector.broadcast %6 : vector<1x128xf32> to vector<8x128xf32>
    %59 = arith.addf %57, %58 : vector<8x128xf32>
    %c0_20 = arith.constant 0 : index
    %c0_21 = arith.constant 0 : index
    %60 = vector.load %arg10[%c0_20, %c0_21] : memref<20x256xf32, #tpu.memory_space<vmem>>, vector<1x256xf32>
    tpu.vector_store %arg10[%c0_20, %c0_21], %42 {strides = array<i32>} : memref<20x256xf32, #tpu.memory_space<vmem>>, vector<1x256xf32>,
    %c1_22 = arith.constant 1 : index
    %c0_23 = arith.constant 0 : index
    %61 = vector.load %arg10[%c1_22, %c0_23] : memref<20x256xf32, #tpu.memory_space<vmem>>, vector<8x128xf32>
    tpu.vector_store %arg10[%c1_22, %c0_23], %59 {strides = array<i32>} : memref<20x256xf32, #tpu.memory_space<vmem>>, vector<8x128xf32>,
    %c0_24 = arith.constant 0 : index
    %c0_25 = arith.constant 0 : index
    %c0_26 = arith.constant 0 : index
    %c0_27 = arith.constant 0 : index
    %62 = vector.load %arg2[%c0_24, %c0_25, %c0_26, %c0_27] : memref<1x2x8x128xf32, #tpu.memory_space<vmem>>, vector<1x1x8x128xf32>
    %63 = vector.shape_cast %62 : vector<1x1x8x128xf32> to vector<8x128xf32>
    %c1_28 = arith.constant 1 : index
    %c128 = arith.constant 128 : index
    %64 = vector.load %arg10[%c1_28, %c128] : memref<20x256xf32, #tpu.memory_space<vmem>>, vector<8x128xf32>
    tpu.vector_store %arg10[%c1_28, %c128], %63 {strides = array<i32>} : memref<20x256xf32, #tpu.memory_space<vmem>>, vector<8x128xf32>,
    %c9 = arith.constant 9 : index
    %c0_29 = arith.constant 0 : index
    %65 = vector.load %arg10[%c9, %c0_29] : memref<20x256xf32, #tpu.memory_space<vmem>>, vector<1x256xf32>
    tpu.vector_store %arg10[%c9, %c0_29], %42 {strides = array<i32>} : memref<20x256xf32, #tpu.memory_space<vmem>>, vector<1x256xf32>,
    %66 = vector.extract_strided_slice %41 {offsets = [2, 0], sizes = [1, 128], strides = [1, 1]} : vector<4x128xf32> to vector<1x128xf32>
    %67 = vector.extract_strided_slice %41 {offsets = [3, 0], sizes = [1, 128], strides = [1, 1]} : vector<4x128xf32> to vector<1x128xf32>
    %68 = arith.mulf %66, %66 : vector<1x128xf32>
    %69 = arith.subf %67, %68 : vector<1x128xf32>
    %cst_30 = arith.constant 0.000000e+00 : f32
    %70 = vector.broadcast %cst_30 : f32 to vector<1x128xf32>
    %71 = arith.maximumf %69, %70 : vector<1x128xf32>
    %72 = vector.broadcast %66 : vector<1x128xf32> to vector<8x128xf32>
    %73 = arith.subf %32, %72 : vector<8x128xf32>
    %cst_31 = arith.constant 9.99999974E-6 : f32
    %74 = vector.broadcast %cst_31 : f32 to vector<1x128xf32>
    %75 = arith.addf %71, %74 : vector<1x128xf32>
    %76 = math.rsqrt %75 : vector<1x128xf32>
    %77 = vector.broadcast %76 : vector<1x128xf32> to vector<8x128xf32>
    %78 = arith.mulf %73, %77 : vector<8x128xf32>
    %79 = vector.broadcast %5 : vector<1x128xf32> to vector<8x128xf32>
    %80 = arith.mulf %78, %79 : vector<8x128xf32>
    %81 = vector.broadcast %6 : vector<1x128xf32> to vector<8x128xf32>
    %82 = arith.addf %80, %81 : vector<8x128xf32>
    %c10 = arith.constant 10 : index
    %c0_32 = arith.constant 0 : index
    %83 = vector.load %arg10[%c10, %c0_32] : memref<20x256xf32, #tpu.memory_space<vmem>>, vector<1x256xf32>
    tpu.vector_store %arg10[%c10, %c0_32], %42 {strides = array<i32>} : memref<20x256xf32, #tpu.memory_space<vmem>>, vector<1x256xf32>,
    %c11 = arith.constant 11 : index
    %c0_33 = arith.constant 0 : index
    %84 = vector.load %arg10[%c11, %c0_33] : memref<20x256xf32, #tpu.memory_space<vmem>>, vector<8x128xf32>
    tpu.vector_store %arg10[%c11, %c0_33], %82 {strides = array<i32>} : memref<20x256xf32, #tpu.memory_space<vmem>>, vector<8x128xf32>,
    %c0_34 = arith.constant 0 : index
    %c1_35 = arith.constant 1 : index
    %c0_36 = arith.constant 0 : index
    %c0_37 = arith.constant 0 : index
    %85 = vector.load %arg2[%c0_34, %c1_35, %c0_36, %c0_37] : memref<1x2x8x128xf32, #tpu.memory_space<vmem>>, vector<1x1x8x128xf32>
    %86 = vector.shape_cast %85 : vector<1x1x8x128xf32> to vector<8x128xf32>
    %c11_38 = arith.constant 11 : index
    %c128_39 = arith.constant 128 : index
    %87 = vector.load %arg10[%c11_38, %c128_39] : memref<20x256xf32, #tpu.memory_space<vmem>>, vector<8x128xf32>
    tpu.vector_store %arg10[%c11_38, %c128_39], %86 {strides = array<i32>} : memref<20x256xf32, #tpu.memory_space<vmem>>, vector<8x128xf32>,
    %c19 = arith.constant 19 : index
    %c0_40 = arith.constant 0 : index
    %88 = vector.load %arg10[%c19, %c0_40] : memref<20x256xf32, #tpu.memory_space<vmem>>, vector<1x256xf32>
    tpu.vector_store %arg10[%c19, %c0_40], %42 {strides = array<i32>} : memref<20x256xf32, #tpu.memory_space<vmem>>, vector<1x256xf32>,
    %c0_41 = arith.constant 0 : index
    %c0_42 = arith.constant 0 : index
    %89 = vector.load %arg10[%c0_41, %c0_42] : memref<20x256xf32, #tpu.memory_space<vmem>>, vector<20x256xf32>
    %90 = arith.truncf %89 : vector<20x256xf32> to vector<20x256xbf16>
    %c0_43 = arith.constant 0 : index
    %c0_44 = arith.constant 0 : index
    %c0_45 = arith.constant 0 : index
    %91 = vector.load %arg4[%c0_43, %c0_44, %c0_45] : memref<1x256x384xbf16, #tpu.memory_space<vmem>>, vector<1x256x384xbf16>
    %92 = vector.shape_cast %91 : vector<1x256x384xbf16> to vector<256x384xbf16>
    %cst_46 = arith.constant dense<0.000000e+00> : vector<20x384xf32>
    %93 = tpu.matmul %90, %92, %cst_46 {dimension_numbers = #tpu.dot_dimension_numbers<[1], [0], [0], [1], [0, 0, 1, 1], [], []>} : vector<20x256xbf16>, vector<256x384xbf16>, vector<20x384xf32> -> vector<20x384xf32>
    %94 = vector.extract_strided_slice %93 {offsets = [0, 0], sizes = [8, 128], strides = [1, 1]} : vector<20x384xf32> to vector<8x128xf32>
    %95 = vector.extract_strided_slice %93 {offsets = [1, 128], sizes = [8, 128], strides = [1, 1]} : vector<20x384xf32> to vector<8x128xf32>
    %96 = arith.addf %94, %95 : vector<8x128xf32>
    %97 = vector.extract_strided_slice %93 {offsets = [2, 256], sizes = [8, 128], strides = [1, 1]} : vector<20x384xf32> to vector<8x128xf32>
    %98 = arith.addf %96, %97 : vector<8x128xf32>
    %99 = vector.extract_strided_slice %93 {offsets = [10, 0], sizes = [8, 128], strides = [1, 1]} : vector<20x384xf32> to vector<8x128xf32>
    %100 = vector.extract_strided_slice %93 {offsets = [11, 128], sizes = [8, 128], strides = [1, 1]} : vector<20x384xf32> to vector<8x128xf32>
    %101 = arith.addf %99, %100 : vector<8x128xf32>
    %102 = vector.extract_strided_slice %93 {offsets = [12, 256], sizes = [8, 128], strides = [1, 1]} : vector<20x384xf32> to vector<8x128xf32>
    %103 = arith.addf %101, %102 : vector<8x128xf32>
    %104 = vector.broadcast %7 : vector<1x128xf32> to vector<8x128xf32>
    %105 = arith.addf %98, %104 : vector<8x128xf32>
    %cst_47 = arith.constant 0.000000e+00 : f32
    %106 = vector.broadcast %cst_47 : f32 to vector<8x128xf32>
    %107 = arith.maximumf %105, %106 : vector<8x128xf32>
    %108 = vector.broadcast %7 : vector<1x128xf32> to vector<8x128xf32>
    %109 = arith.addf %103, %108 : vector<8x128xf32>
    %cst_48 = arith.constant 0.000000e+00 : f32
    %110 = vector.broadcast %cst_48 : f32 to vector<8x128xf32>
    %111 = arith.maximumf %109, %110 : vector<8x128xf32>
    %cst_49 = arith.constant 0.000000e+00 : f32
    %112 = vector.broadcast %cst_49 : f32 to vector<1x128xf32>
    %cst_50 = arith.constant 0.000000e+00 : f32
    %113 = vector.broadcast %cst_50 : f32 to vector<1x128xf32>
    %cst_51 = arith.constant dense<0.000000e+00> : vector<128xf32>
    %114 = vector.multi_reduction <add>, %107, %cst_51 [0] : vector<8x128xf32> to vector<128xf32>
    %115 = vector.shape_cast %114 : vector<128xf32> to vector<1x128xf32>
    %116 = arith.addf %112, %115 : vector<1x128xf32>
    %117 = arith.mulf %107, %107 : vector<8x128xf32>
    %cst_52 = arith.constant dense<0.000000e+00> : vector<128xf32>
    %118 = vector.multi_reduction <add>, %117, %cst_52 [0] : vector<8x128xf32> to vector<128xf32>
    %119 = vector.shape_cast %118 : vector<128xf32> to vector<1x128xf32>
    %120 = arith.addf %113, %119 : vector<1x128xf32>
    %cst_53 = arith.constant dense<0.000000e+00> : vector<128xf32>
    %121 = vector.multi_reduction <add>, %111, %cst_53 [0] : vector<8x128xf32> to vector<128xf32>
    %122 = vector.shape_cast %121 : vector<128xf32> to vector<1x128xf32>
    %123 = arith.addf %116, %122 : vector<1x128xf32>
    %124 = arith.mulf %111, %111 : vector<8x128xf32>
    %cst_54 = arith.constant dense<0.000000e+00> : vector<128xf32>
    %125 = vector.multi_reduction <add>, %124, %cst_54 [0] : vector<8x128xf32> to vector<128xf32>
    %126 = vector.shape_cast %125 : vector<128xf32> to vector<1x128xf32>
    %127 = arith.addf %120, %126 : vector<1x128xf32>
    %128 = tpu.concatenate %123, %127 in 0 : vector<1x128xf32>, vector<1x128xf32> -> vector<2x128xf32>
    %cst_55 = arith.constant dense<0.000000e+00> : vector<2x128xf32>
    %129 = tpu.matmul %128, %4, %cst_55 {dimension_numbers = #tpu.dot_dimension_numbers<[1], [0], [0], [1], [0, 0, 1, 1], [], []>} : vector<2x128xf32>, vector<128x128xf32>, vector<2x128xf32> -> vector<2x128xf32>
    %cst_56 = arith.constant 7.812500e-03 : f32
    %130 = vector.broadcast %cst_56 : f32 to vector<2x128xf32>
    %131 = arith.mulf %129, %130 : vector<2x128xf32>
    %132 = vector.extract_strided_slice %131 {offsets = [0, 0], sizes = [1, 128], strides = [1, 1]} : vector<2x128xf32> to vector<1x128xf32>
    %133 = vector.extract_strided_slice %131 {offsets = [1, 0], sizes = [1, 128], strides = [1, 1]} : vector<2x128xf32> to vector<1x128xf32>
    %134 = arith.mulf %132, %132 : vector<1x128xf32>
    %135 = arith.subf %133, %134 : vector<1x128xf32>
    %cst_57 = arith.constant 0.000000e+00 : f32
    %136 = vector.broadcast %cst_57 : f32 to vector<1x128xf32>
    %137 = arith.maximumf %135, %136 : vector<1x128xf32>
    %cst_58 = arith.constant 9.99999974E-6 : f32
    %138 = vector.broadcast %cst_58 : f32 to vector<1x128xf32>
    %139 = arith.addf %137, %138 : vector<1x128xf32>
    %140 = math.rsqrt %139 : vector<1x128xf32>
    %141 = arith.mulf %8, %140 : vector<1x128xf32>
    %142 = arith.mulf %132, %141 : vector<1x128xf32>
    %143 = arith.subf %9, %142 : vector<1x128xf32>
    %cst_59 = arith.constant 0.000000e+00 : f32
    %144 = vector.broadcast %cst_59 : f32 to vector<1x128xf32>
    %c0_60 = arith.constant 0 : index
    %c0_61 = arith.constant 0 : index
    %145 = vector.load %arg11[%c0_60, %c0_61] : memref<20x128xf32, #tpu.memory_space<vmem>>, vector<1x128xf32>
    tpu.vector_store %arg11[%c0_60, %c0_61], %144 {strides = array<i32>} : memref<20x128xf32, #tpu.memory_space<vmem>>, vector<1x128xf32>,
    %146 = vector.broadcast %141 : vector<1x128xf32> to vector<8x128xf32>
    %147 = arith.mulf %107, %146 : vector<8x128xf32>
    %148 = vector.broadcast %143 : vector<1x128xf32> to vector<8x128xf32>
    %149 = arith.addf %147, %148 : vector<8x128xf32>
    %c1_62 = arith.constant 1 : index
    %c0_63 = arith.constant 0 : index
    %150 = vector.load %arg11[%c1_62, %c0_63] : memref<20x128xf32, #tpu.memory_space<vmem>>, vector<8x128xf32>
    tpu.vector_store %arg11[%c1_62, %c0_63], %149 {strides = array<i32>} : memref<20x128xf32, #tpu.memory_space<vmem>>, vector<8x128xf32>,
    %c9_64 = arith.constant 9 : index
    %c0_65 = arith.constant 0 : index
    %151 = vector.load %arg11[%c9_64, %c0_65] : memref<20x128xf32, #tpu.memory_space<vmem>>, vector<1x128xf32>
    tpu.vector_store %arg11[%c9_64, %c0_65], %144 {strides = array<i32>} : memref<20x128xf32, #tpu.memory_space<vmem>>, vector<1x128xf32>,
    %c10_66 = arith.constant 10 : index
    %c0_67 = arith.constant 0 : index
    %152 = vector.load %arg11[%c10_66, %c0_67] : memref<20x128xf32, #tpu.memory_space<vmem>>, vector<1x128xf32>
    tpu.vector_store %arg11[%c10_66, %c0_67], %144 {strides = array<i32>} : memref<20x128xf32, #tpu.memory_space<vmem>>, vector<1x128xf32>,
    %153 = vector.broadcast %141 : vector<1x128xf32> to vector<8x128xf32>
    %154 = arith.mulf %111, %153 : vector<8x128xf32>
    %155 = vector.broadcast %143 : vector<1x128xf32> to vector<8x128xf32>
    %156 = arith.addf %154, %155 : vector<8x128xf32>
    %c11_68 = arith.constant 11 : index
    %c0_69 = arith.constant 0 : index
    %157 = vector.load %arg11[%c11_68, %c0_69] : memref<20x128xf32, #tpu.memory_space<vmem>>, vector<8x128xf32>
    tpu.vector_store %arg11[%c11_68, %c0_69], %156 {strides = array<i32>} : memref<20x128xf32, #tpu.memory_space<vmem>>, vector<8x128xf32>,
    %c19_70 = arith.constant 19 : index
    %c0_71 = arith.constant 0 : index
    %158 = vector.load %arg11[%c19_70, %c0_71] : memref<20x128xf32, #tpu.memory_space<vmem>>, vector<1x128xf32>
    tpu.vector_store %arg11[%c19_70, %c0_71], %144 {strides = array<i32>} : memref<20x128xf32, #tpu.memory_space<vmem>>, vector<1x128xf32>,
    %c0_72 = arith.constant 0 : index
    %c0_73 = arith.constant 0 : index
    %159 = vector.load %arg11[%c0_72, %c0_73] : memref<20x128xf32, #tpu.memory_space<vmem>>, vector<20x128xf32>
    %160 = arith.truncf %159 : vector<20x128xf32> to vector<20x128xbf16>
    %c0_74 = arith.constant 0 : index
    %c0_75 = arith.constant 0 : index
    %c0_76 = arith.constant 0 : index
    %161 = vector.load %arg5[%c0_74, %c0_75, %c0_76] : memref<1x128x384xbf16, #tpu.memory_space<vmem>>, vector<1x128x384xbf16>
    %162 = vector.shape_cast %161 : vector<1x128x384xbf16> to vector<128x384xbf16>
    %cst_77 = arith.constant dense<0.000000e+00> : vector<20x384xf32>
    %163 = tpu.matmul %160, %162, %cst_77 {dimension_numbers = #tpu.dot_dimension_numbers<[1], [0], [0], [1], [0, 0, 1, 1], [], []>} : vector<20x128xbf16>, vector<128x384xbf16>, vector<20x384xf32> -> vector<20x384xf32>
    %164 = vector.extract_strided_slice %163 {offsets = [0, 0], sizes = [8, 128], strides = [1, 1]} : vector<20x384xf32> to vector<8x128xf32>
    %165 = vector.extract_strided_slice %163 {offsets = [1, 128], sizes = [8, 128], strides = [1, 1]} : vector<20x384xf32> to vector<8x128xf32>
    %166 = arith.addf %164, %165 : vector<8x128xf32>
    %167 = vector.extract_strided_slice %163 {offsets = [2, 256], sizes = [8, 128], strides = [1, 1]} : vector<20x384xf32> to vector<8x128xf32>
    %168 = arith.addf %166, %167 : vector<8x128xf32>
    %169 = vector.extract_strided_slice %168 {offsets = [0, 0], sizes = [8, 64], strides = [1, 1]} : vector<8x128xf32> to vector<8x64xf32>
    %170 = vector.extract_strided_slice %163 {offsets = [10, 0], sizes = [8, 128], strides = [1, 1]} : vector<20x384xf32> to vector<8x128xf32>
    %171 = vector.extract_strided_slice %163 {offsets = [11, 128], sizes = [8, 128], strides = [1, 1]} : vector<20x384xf32> to vector<8x128xf32>
    %172 = arith.addf %170, %171 : vector<8x128xf32>
    %173 = vector.extract_strided_slice %163 {offsets = [12, 256], sizes = [8, 128], strides = [1, 1]} : vector<20x384xf32> to vector<8x128xf32>
    %174 = arith.addf %172, %173 : vector<8x128xf32>
    %175 = vector.extract_strided_slice %174 {offsets = [0, 0], sizes = [8, 64], strides = [1, 1]} : vector<8x128xf32> to vector<8x64xf32>
    %176 = vector.extract_strided_slice %3 {offsets = [0, 0], sizes = [1, 64], strides = [1, 1]} : vector<3x64xf32> to vector<1x64xf32>
    %177 = vector.broadcast %176 : vector<1x64xf32> to vector<8x64xf32>
    %178 = arith.addf %169, %177 : vector<8x64xf32>
    %cst_78 = arith.constant 0.000000e+00 : f32
    %179 = vector.broadcast %cst_78 : f32 to vector<8x64xf32>
    %180 = arith.maximumf %178, %179 : vector<8x64xf32>
    %181 = vector.extract_strided_slice %3 {offsets = [0, 0], sizes = [1, 64], strides = [1, 1]} : vector<3x64xf32> to vector<1x64xf32>
    %182 = vector.broadcast %181 : vector<1x64xf32> to vector<8x64xf32>
    %183 = arith.addf %175, %182 : vector<8x64xf32>
    %cst_79 = arith.constant 0.000000e+00 : f32
    %184 = vector.broadcast %cst_79 : f32 to vector<8x64xf32>
    %185 = arith.maximumf %183, %184 : vector<8x64xf32>
    %c0_80 = arith.constant 0 : index
    %c0_81 = arith.constant 0 : index
    %186 = vector.load %arg7[%c0_80, %c0_81] : memref<64x64xf32, #tpu.memory_space<vmem>>, vector<64x64xf32>
    %187 = vector.extract_strided_slice %3 {offsets = [1, 0], sizes = [1, 64], strides = [1, 1]} : vector<3x64xf32> to vector<1x64xf32>
    %188 = vector.extract_strided_slice %3 {offsets = [2, 0], sizes = [1, 64], strides = [1, 1]} : vector<3x64xf32> to vector<1x64xf32>
    %cst_82 = arith.constant 0.000000e+00 : f32
    %189 = vector.broadcast %cst_82 : f32 to vector<1x64xf32>
    %cst_83 = arith.constant 0.000000e+00 : f32
    %190 = vector.broadcast %cst_83 : f32 to vector<1x64xf32>
    %cst_84 = arith.constant dense<0.000000e+00> : vector<64xf32>
    %191 = vector.multi_reduction <add>, %180, %cst_84 [0] : vector<8x64xf32> to vector<64xf32>
    %192 = vector.shape_cast %191 : vector<64xf32> to vector<1x64xf32>
    %193 = arith.addf %189, %192 : vector<1x64xf32>
    %194 = arith.mulf %180, %180 : vector<8x64xf32>
    %cst_85 = arith.constant dense<0.000000e+00> : vector<64xf32>
    %195 = vector.multi_reduction <add>, %194, %cst_85 [0] : vector<8x64xf32> to vector<64xf32>
    %196 = vector.shape_cast %195 : vector<64xf32> to vector<1x64xf32>
    %197 = arith.addf %190, %196 : vector<1x64xf32>
    %cst_86 = arith.constant dense<0.000000e+00> : vector<64xf32>
    %198 = vector.multi_reduction <add>, %185, %cst_86 [0] : vector<8x64xf32> to vector<64xf32>
    %199 = vector.shape_cast %198 : vector<64xf32> to vector<1x64xf32>
    %200 = arith.addf %193, %199 : vector<1x64xf32>
    %201 = arith.mulf %185, %185 : vector<8x64xf32>
    %cst_87 = arith.constant dense<0.000000e+00> : vector<64xf32>
    %202 = vector.multi_reduction <add>, %201, %cst_87 [0] : vector<8x64xf32> to vector<64xf32>
    %203 = vector.shape_cast %202 : vector<64xf32> to vector<1x64xf32>
    %204 = arith.addf %197, %203 : vector<1x64xf32>
    %205 = tpu.concatenate %200, %204 in 0 : vector<1x64xf32>, vector<1x64xf32> -> vector<2x64xf32>
    %cst_88 = arith.constant dense<0.000000e+00> : vector<2x64xf32>
    %206 = tpu.matmul %205, %186, %cst_88 {dimension_numbers = #tpu.dot_dimension_numbers<[1], [0], [0], [1], [0, 0, 1, 1], [], []>} : vector<2x64xf32>, vector<64x64xf32>, vector<2x64xf32> -> vector<2x64xf32>
    %cst_89 = arith.constant 7.812500e-03 : f32
    %207 = vector.broadcast %cst_89 : f32 to vector<2x64xf32>
    %208 = arith.mulf %206, %207 : vector<2x64xf32>
    %209 = vector.extract_strided_slice %208 {offsets = [0, 0], sizes = [1, 64], strides = [1, 1]} : vector<2x64xf32> to vector<1x64xf32>
    %210 = vector.extract_strided_slice %208 {offsets = [1, 0], sizes = [1, 64], strides = [1, 1]} : vector<2x64xf32> to vector<1x64xf32>
    %211 = arith.mulf %209, %209 : vector<1x64xf32>
    %212 = arith.subf %210, %211 : vector<1x64xf32>
    %cst_90 = arith.constant 0.000000e+00 : f32
    %213 = vector.broadcast %cst_90 : f32 to vector<1x64xf32>
    %214 = arith.maximumf %212, %213 : vector<1x64xf32>
    %cst_91 = arith.constant 9.99999974E-6 : f32
    %215 = vector.broadcast %cst_91 : f32 to vector<1x64xf32>
    %216 = arith.addf %214, %215 : vector<1x64xf32>
    %217 = math.rsqrt %216 : vector<1x64xf32>
    %218 = arith.mulf %187, %217 : vector<1x64xf32>
    %219 = arith.mulf %209, %218 : vector<1x64xf32>
    %220 = arith.subf %188, %219 : vector<1x64xf32>
    %221 = vector.broadcast %218 : vector<1x64xf32> to vector<8x64xf32>
    %222 = arith.mulf %180, %221 : vector<8x64xf32>
    %223 = vector.broadcast %220 : vector<1x64xf32> to vector<8x64xf32>
    %224 = arith.addf %222, %223 : vector<8x64xf32>
    %c0_92 = arith.constant 0 : index
    %c0_93 = arith.constant 0 : index
    %c0_94 = arith.constant 0 : index
    %c0_95 = arith.constant 0 : index
    %225 = vector.load %arg9[%c0_92, %c0_93, %c0_94, %c0_95] : memref<1x2x8x64xf32, #tpu.memory_space<vmem>>, vector<1x1x8x64xf32>
    %226 = vector.shape_cast %225 : vector<1x1x8x64xf32> to vector<8x64xf32>
    %227 = vector.shape_cast %224 : vector<8x64xf32> to vector<1x1x8x64xf32>
    tpu.vector_store %arg9[%c0_92, %c0_93, %c0_94, %c0_95], %227 {strides = array<i32>} : memref<1x2x8x64xf32, #tpu.memory_space<vmem>>, vector<1x1x8x64xf32>,
    %228 = vector.broadcast %218 : vector<1x64xf32> to vector<8x64xf32>
    %229 = arith.mulf %185, %228 : vector<8x64xf32>
    %230 = vector.broadcast %220 : vector<1x64xf32> to vector<8x64xf32>
    %231 = arith.addf %229, %230 : vector<8x64xf32>
    %c0_96 = arith.constant 0 : index
    %c1_97 = arith.constant 1 : index
    %c0_98 = arith.constant 0 : index
    %c0_99 = arith.constant 0 : index
    %232 = vector.load %arg9[%c0_96, %c1_97, %c0_98, %c0_99] : memref<1x2x8x64xf32, #tpu.memory_space<vmem>>, vector<1x1x8x64xf32>
    %233 = vector.shape_cast %232 : vector<1x1x8x64xf32> to vector<8x64xf32>
    %234 = vector.shape_cast %231 : vector<8x64xf32> to vector<1x1x8x64xf32>
    tpu.vector_store %arg9[%c0_96, %c1_97, %c0_98, %c0_99], %234 {strides = array<i32>} : memref<1x2x8x64xf32, #tpu.memory_space<vmem>>, vector<1x1x8x64xf32>,
    return
  }
  func.func @transform_0(%arg0: i32) -> (i32, i32, i32) {
    %c0_i32 = arith.constant 0 : i32
    %c0_i32_0 = arith.constant 0 : i32
    %c0_i32_1 = arith.constant 0 : i32
    %c0_i32_2 = arith.constant 0 : i32
    return %c0_i32, %c0_i32_0, %c0_i32_1 : i32, i32, i32
  }
  func.func @transform_1(%arg0: i32) -> (i32, i32, i32, i32) {
    %c0_i32 = arith.constant 0 : i32
    %c0_i32_0 = arith.constant 0 : i32
    %c0_i32_1 = arith.constant 0 : i32
    %c0_i32_2 = arith.constant 0 : i32
    return %arg0, %c0_i32, %c0_i32_0, %c0_i32_1 : i32, i32, i32, i32
  }
  func.func @transform_2(%arg0: i32) -> (i32, i32, i32) {
    %c0_i32 = arith.constant 0 : i32
    %c0_i32_0 = arith.constant 0 : i32
    %c0_i32_1 = arith.constant 0 : i32
    return %arg0, %c0_i32, %c0_i32_0 : i32, i32, i32
  }
  func.func @transform_3(%arg0: i32) -> (i32, i32, i32) {
    %c0_i32 = arith.constant 0 : i32
    %c0_i32_0 = arith.constant 0 : i32
    %c0_i32_1 = arith.constant 0 : i32
    return %arg0, %c0_i32, %c0_i32_0 : i32, i32, i32
  }
  func.func @transform_4(%arg0: i32) -> (i32, i32, i32) {
    %c0_i32 = arith.constant 0 : i32
    %c0_i32_0 = arith.constant 0 : i32
    %c0_i32_1 = arith.constant 0 : i32
    return %arg0, %c0_i32, %c0_i32_0 : i32, i32, i32
  }
  func.func @transform_5(%arg0: i32) -> (i32, i32) {
    %c0_i32 = arith.constant 0 : i32
    %c0_i32_0 = arith.constant 0 : i32
    %c0_i32_1 = arith.constant 0 : i32
    return %c0_i32, %c0_i32_0 : i32, i32
  }
  func.func @transform_6(%arg0: i32) -> (i32, i32) {
    %c0_i32 = arith.constant 0 : i32
    %c0_i32_0 = arith.constant 0 : i32
    %c0_i32_1 = arith.constant 0 : i32
    return %c0_i32, %c0_i32_0 : i32, i32
  }
  func.func @transform_7(%arg0: i32) -> (i32, i32, i32) {
    %c0_i32 = arith.constant 0 : i32
    %c0_i32_0 = arith.constant 0 : i32
    %c0_i32_1 = arith.constant 0 : i32
    return %arg0, %c0_i32, %c0_i32_0 : i32, i32, i32
  }
  func.func @transform_8(%arg0: i32) -> (i32, i32, i32, i32) {
    %c0_i32 = arith.constant 0 : i32
    %c0_i32_0 = arith.constant 0 : i32
    %c0_i32_1 = arith.constant 0 : i32
    %c0_i32_2 = arith.constant 0 : i32
    return %arg0, %c0_i32, %c0_i32_0, %c0_i32_1 : i32, i32, i32, i32
  }
}

module attributes {stable_mosaic.version = 11 : i64} {
  func.func @_dec_block_kernel(%arg0: i32, %arg1: memref<2x16x128xf32, #tpu.memory_space<vmem>>, %arg2: memref<1x2x16x128xf32, #tpu.memory_space<vmem>>, %arg3: memref<1x9x128xf32, #tpu.memory_space<vmem>>, %arg4: memref<1x256x384xbf16, #tpu.memory_space<vmem>>, %arg5: memref<1x128x384xbf16, #tpu.memory_space<vmem>>, %arg6: memref<128x128xf32, #tpu.memory_space<vmem>>, %arg7: memref<1x1x16xf32, #tpu.memory_space<vmem>>, %arg8: memref<1x2x16x16xf32, #tpu.memory_space<vmem>>, %arg9: memref<36x256xf32, #tpu.memory_space<vmem>>, %arg10: memref<36x128xf32, #tpu.memory_space<vmem>>) attributes {dimension_semantics = [#tpu.dimension_semantics<arbitrary>], iteration_bounds = array<i64: 2>, scalar_prefetch = 0 : i64, scratch_operands = 2 : i64, tpu.core_type = #tpu.core_type<tc>, window_params = [{pipeline_mode = #tpu.pipeline_mode<synchronous>, transform_indices = @transform_0, window_bounds = array<i64: 2, 16, 128>}, {transform_indices = @transform_1, window_bounds = array<i64: 1, 2, 16, 128>}, {transform_indices = @transform_2, window_bounds = array<i64: 1, 9, 128>}, {transform_indices = @transform_3, window_bounds = array<i64: 1, 256, 384>}, {transform_indices = @transform_4, window_bounds = array<i64: 1, 128, 384>}, {pipeline_mode = #tpu.pipeline_mode<synchronous>, transform_indices = @transform_5, window_bounds = array<i64: 128, 128>}, {transform_indices = @transform_6, window_bounds = array<i64: 1, 1, 16>}, {transform_indices = @transform_7, window_bounds = array<i64: 1, 2, 16, 16>}]} {
    %c0 = arith.constant 0 : index
    %c0_0 = arith.constant 0 : index
    %c0_1 = arith.constant 0 : index
    %0 = vector.load %arg3[%c0, %c0_0, %c0_1] : memref<1x9x128xf32, #tpu.memory_space<vmem>>, vector<1x9x128xf32>
    %1 = vector.shape_cast %0 : vector<1x9x128xf32> to vector<9x128xf32>
    %c0_2 = arith.constant 0 : index
    %c0_3 = arith.constant 0 : index
    %c0_4 = arith.constant 0 : index
    %2 = vector.load %arg7[%c0_2, %c0_3, %c0_4] : memref<1x1x16xf32, #tpu.memory_space<vmem>>, vector<1x1x16xf32>
    %3 = vector.shape_cast %2 : vector<1x1x16xf32> to vector<1x16xf32>
    %c0_5 = arith.constant 0 : index
    %c0_6 = arith.constant 0 : index
    %4 = vector.load %arg6[%c0_5, %c0_6] : memref<128x128xf32, #tpu.memory_space<vmem>>, vector<128x128xf32>
    %5 = vector.extract_strided_slice %1 {offsets = [4, 0], sizes = [1, 128], strides = [1, 1]} : vector<9x128xf32> to vector<1x128xf32>
    %6 = vector.extract_strided_slice %1 {offsets = [5, 0], sizes = [1, 128], strides = [1, 1]} : vector<9x128xf32> to vector<1x128xf32>
    %7 = vector.extract_strided_slice %1 {offsets = [6, 0], sizes = [1, 128], strides = [1, 1]} : vector<9x128xf32> to vector<1x128xf32>
    %8 = vector.extract_strided_slice %1 {offsets = [7, 0], sizes = [1, 128], strides = [1, 1]} : vector<9x128xf32> to vector<1x128xf32>
    %9 = vector.extract_strided_slice %1 {offsets = [8, 0], sizes = [1, 128], strides = [1, 1]} : vector<9x128xf32> to vector<1x128xf32>
    %c0_7 = arith.constant 0 : index
    %c0_8 = arith.constant 0 : index
    %c0_9 = arith.constant 0 : index
    %10 = vector.load %arg1[%c0_7, %c0_8, %c0_9] : memref<2x16x128xf32, #tpu.memory_space<vmem>>, vector<1x16x128xf32>
    %11 = vector.shape_cast %10 : vector<1x16x128xf32> to vector<16x128xf32>
    %12 = vector.extract_strided_slice %1 {offsets = [0, 0], sizes = [1, 128], strides = [1, 1]} : vector<9x128xf32> to vector<1x128xf32>
    %13 = vector.broadcast %12 : vector<1x128xf32> to vector<16x128xf32>
    %14 = arith.mulf %11, %13 : vector<16x128xf32>
    %15 = arith.addf %11, %14 : vector<16x128xf32>
    %16 = vector.extract_strided_slice %1 {offsets = [1, 0], sizes = [1, 128], strides = [1, 1]} : vector<9x128xf32> to vector<1x128xf32>
    %17 = vector.broadcast %16 : vector<1x128xf32> to vector<16x128xf32>
    %18 = arith.addf %15, %17 : vector<16x128xf32>
    %cst = arith.constant dense<0.000000e+00> : vector<128xf32>
    %19 = vector.multi_reduction <add>, %18, %cst [0] : vector<16x128xf32> to vector<128xf32>
    %20 = vector.shape_cast %19 : vector<128xf32> to vector<1x128xf32>
    %21 = arith.mulf %18, %18 : vector<16x128xf32>
    %cst_10 = arith.constant dense<0.000000e+00> : vector<128xf32>
    %22 = vector.multi_reduction <add>, %21, %cst_10 [0] : vector<16x128xf32> to vector<128xf32>
    %23 = vector.shape_cast %22 : vector<128xf32> to vector<1x128xf32>
    %c1 = arith.constant 1 : index
    %c0_11 = arith.constant 0 : index
    %c0_12 = arith.constant 0 : index
    %24 = vector.load %arg1[%c1, %c0_11, %c0_12] : memref<2x16x128xf32, #tpu.memory_space<vmem>>, vector<1x16x128xf32>
    %25 = vector.shape_cast %24 : vector<1x16x128xf32> to vector<16x128xf32>
    %26 = vector.extract_strided_slice %1 {offsets = [2, 0], sizes = [1, 128], strides = [1, 1]} : vector<9x128xf32> to vector<1x128xf32>
    %27 = vector.broadcast %26 : vector<1x128xf32> to vector<16x128xf32>
    %28 = arith.mulf %25, %27 : vector<16x128xf32>
    %29 = arith.addf %25, %28 : vector<16x128xf32>
    %30 = vector.extract_strided_slice %1 {offsets = [3, 0], sizes = [1, 128], strides = [1, 1]} : vector<9x128xf32> to vector<1x128xf32>
    %31 = vector.broadcast %30 : vector<1x128xf32> to vector<16x128xf32>
    %32 = arith.addf %29, %31 : vector<16x128xf32>
    %cst_13 = arith.constant dense<0.000000e+00> : vector<128xf32>
    %33 = vector.multi_reduction <add>, %32, %cst_13 [0] : vector<16x128xf32> to vector<128xf32>
    %34 = vector.shape_cast %33 : vector<128xf32> to vector<1x128xf32>
    %35 = arith.mulf %32, %32 : vector<16x128xf32>
    %cst_14 = arith.constant dense<0.000000e+00> : vector<128xf32>
    %36 = vector.multi_reduction <add>, %35, %cst_14 [0] : vector<16x128xf32> to vector<128xf32>
    %37 = vector.shape_cast %36 : vector<128xf32> to vector<1x128xf32>
    %38 = tpu.concatenate %20, %23, %34, %37 in 0 : vector<1x128xf32>, vector<1x128xf32>, vector<1x128xf32>, vector<1x128xf32> -> vector<4x128xf32>
    %cst_15 = arith.constant dense<0.000000e+00> : vector<4x128xf32>
    %39 = tpu.matmul %38, %4, %cst_15 {dimension_numbers = #tpu.dot_dimension_numbers<[1], [0], [0], [1], [0, 0, 1, 1], [], []>} : vector<4x128xf32>, vector<128x128xf32>, vector<4x128xf32> -> vector<4x128xf32>
    %cst_16 = arith.constant 3.906250e-03 : f32
    %40 = vector.broadcast %cst_16 : f32 to vector<4x128xf32>
    %41 = arith.mulf %39, %40 : vector<4x128xf32>
    %cst_17 = arith.constant 0.000000e+00 : f32
    %42 = vector.broadcast %cst_17 : f32 to vector<1x256xf32>
    %43 = vector.extract_strided_slice %41 {offsets = [0, 0], sizes = [1, 128], strides = [1, 1]} : vector<4x128xf32> to vector<1x128xf32>
    %44 = vector.extract_strided_slice %41 {offsets = [1, 0], sizes = [1, 128], strides = [1, 1]} : vector<4x128xf32> to vector<1x128xf32>
    %45 = arith.mulf %43, %43 : vector<1x128xf32>
    %46 = arith.subf %44, %45 : vector<1x128xf32>
    %cst_18 = arith.constant 0.000000e+00 : f32
    %47 = vector.broadcast %cst_18 : f32 to vector<1x128xf32>
    %48 = arith.maximumf %46, %47 : vector<1x128xf32>
    %49 = vector.broadcast %43 : vector<1x128xf32> to vector<16x128xf32>
    %50 = arith.subf %18, %49 : vector<16x128xf32>
    %cst_19 = arith.constant 9.99999974E-6 : f32
    %51 = vector.broadcast %cst_19 : f32 to vector<1x128xf32>
    %52 = arith.addf %48, %51 : vector<1x128xf32>
    %53 = math.rsqrt %52 : vector<1x128xf32>
    %54 = vector.broadcast %53 : vector<1x128xf32> to vector<16x128xf32>
    %55 = arith.mulf %50, %54 : vector<16x128xf32>
    %56 = vector.broadcast %5 : vector<1x128xf32> to vector<16x128xf32>
    %57 = arith.mulf %55, %56 : vector<16x128xf32>
    %58 = vector.broadcast %6 : vector<1x128xf32> to vector<16x128xf32>
    %59 = arith.addf %57, %58 : vector<16x128xf32>
    %c0_20 = arith.constant 0 : index
    %c0_21 = arith.constant 0 : index
    %60 = vector.load %arg9[%c0_20, %c0_21] : memref<36x256xf32, #tpu.memory_space<vmem>>, vector<1x256xf32>
    tpu.vector_store %arg9[%c0_20, %c0_21], %42 {strides = array<i32>} : memref<36x256xf32, #tpu.memory_space<vmem>>, vector<1x256xf32>,
    %c1_22 = arith.constant 1 : index
    %c0_23 = arith.constant 0 : index
    %61 = vector.load %arg9[%c1_22, %c0_23] : memref<36x256xf32, #tpu.memory_space<vmem>>, vector<16x128xf32>
    tpu.vector_store %arg9[%c1_22, %c0_23], %59 {strides = array<i32>} : memref<36x256xf32, #tpu.memory_space<vmem>>, vector<16x128xf32>,
    %c0_24 = arith.constant 0 : index
    %c0_25 = arith.constant 0 : index
    %c0_26 = arith.constant 0 : index
    %c0_27 = arith.constant 0 : index
    %62 = vector.load %arg2[%c0_24, %c0_25, %c0_26, %c0_27] : memref<1x2x16x128xf32, #tpu.memory_space<vmem>>, vector<1x1x16x128xf32>
    %63 = vector.shape_cast %62 : vector<1x1x16x128xf32> to vector<16x128xf32>
    %c1_28 = arith.constant 1 : index
    %c128 = arith.constant 128 : index
    %64 = vector.load %arg9[%c1_28, %c128] : memref<36x256xf32, #tpu.memory_space<vmem>>, vector<16x128xf32>
    tpu.vector_store %arg9[%c1_28, %c128], %63 {strides = array<i32>} : memref<36x256xf32, #tpu.memory_space<vmem>>, vector<16x128xf32>,
    %c17 = arith.constant 17 : index
    %c0_29 = arith.constant 0 : index
    %65 = vector.load %arg9[%c17, %c0_29] : memref<36x256xf32, #tpu.memory_space<vmem>>, vector<1x256xf32>
    tpu.vector_store %arg9[%c17, %c0_29], %42 {strides = array<i32>} : memref<36x256xf32, #tpu.memory_space<vmem>>, vector<1x256xf32>,
    %66 = vector.extract_strided_slice %41 {offsets = [2, 0], sizes = [1, 128], strides = [1, 1]} : vector<4x128xf32> to vector<1x128xf32>
    %67 = vector.extract_strided_slice %41 {offsets = [3, 0], sizes = [1, 128], strides = [1, 1]} : vector<4x128xf32> to vector<1x128xf32>
    %68 = arith.mulf %66, %66 : vector<1x128xf32>
    %69 = arith.subf %67, %68 : vector<1x128xf32>
    %cst_30 = arith.constant 0.000000e+00 : f32
    %70 = vector.broadcast %cst_30 : f32 to vector<1x128xf32>
    %71 = arith.maximumf %69, %70 : vector<1x128xf32>
    %72 = vector.broadcast %66 : vector<1x128xf32> to vector<16x128xf32>
    %73 = arith.subf %32, %72 : vector<16x128xf32>
    %cst_31 = arith.constant 9.99999974E-6 : f32
    %74 = vector.broadcast %cst_31 : f32 to vector<1x128xf32>
    %75 = arith.addf %71, %74 : vector<1x128xf32>
    %76 = math.rsqrt %75 : vector<1x128xf32>
    %77 = vector.broadcast %76 : vector<1x128xf32> to vector<16x128xf32>
    %78 = arith.mulf %73, %77 : vector<16x128xf32>
    %79 = vector.broadcast %5 : vector<1x128xf32> to vector<16x128xf32>
    %80 = arith.mulf %78, %79 : vector<16x128xf32>
    %81 = vector.broadcast %6 : vector<1x128xf32> to vector<16x128xf32>
    %82 = arith.addf %80, %81 : vector<16x128xf32>
    %c18 = arith.constant 18 : index
    %c0_32 = arith.constant 0 : index
    %83 = vector.load %arg9[%c18, %c0_32] : memref<36x256xf32, #tpu.memory_space<vmem>>, vector<1x256xf32>
    tpu.vector_store %arg9[%c18, %c0_32], %42 {strides = array<i32>} : memref<36x256xf32, #tpu.memory_space<vmem>>, vector<1x256xf32>,
    %c19 = arith.constant 19 : index
    %c0_33 = arith.constant 0 : index
    %84 = vector.load %arg9[%c19, %c0_33] : memref<36x256xf32, #tpu.memory_space<vmem>>, vector<16x128xf32>
    tpu.vector_store %arg9[%c19, %c0_33], %82 {strides = array<i32>} : memref<36x256xf32, #tpu.memory_space<vmem>>, vector<16x128xf32>,
    %c0_34 = arith.constant 0 : index
    %c1_35 = arith.constant 1 : index
    %c0_36 = arith.constant 0 : index
    %c0_37 = arith.constant 0 : index
    %85 = vector.load %arg2[%c0_34, %c1_35, %c0_36, %c0_37] : memref<1x2x16x128xf32, #tpu.memory_space<vmem>>, vector<1x1x16x128xf32>
    %86 = vector.shape_cast %85 : vector<1x1x16x128xf32> to vector<16x128xf32>
    %c19_38 = arith.constant 19 : index
    %c128_39 = arith.constant 128 : index
    %87 = vector.load %arg9[%c19_38, %c128_39] : memref<36x256xf32, #tpu.memory_space<vmem>>, vector<16x128xf32>
    tpu.vector_store %arg9[%c19_38, %c128_39], %86 {strides = array<i32>} : memref<36x256xf32, #tpu.memory_space<vmem>>, vector<16x128xf32>,
    %c35 = arith.constant 35 : index
    %c0_40 = arith.constant 0 : index
    %88 = vector.load %arg9[%c35, %c0_40] : memref<36x256xf32, #tpu.memory_space<vmem>>, vector<1x256xf32>
    tpu.vector_store %arg9[%c35, %c0_40], %42 {strides = array<i32>} : memref<36x256xf32, #tpu.memory_space<vmem>>, vector<1x256xf32>,
    %c0_41 = arith.constant 0 : index
    %c0_42 = arith.constant 0 : index
    %89 = vector.load %arg9[%c0_41, %c0_42] : memref<36x256xf32, #tpu.memory_space<vmem>>, vector<36x256xf32>
    %90 = arith.truncf %89 : vector<36x256xf32> to vector<36x256xbf16>
    %c0_43 = arith.constant 0 : index
    %c0_44 = arith.constant 0 : index
    %c0_45 = arith.constant 0 : index
    %91 = vector.load %arg4[%c0_43, %c0_44, %c0_45] : memref<1x256x384xbf16, #tpu.memory_space<vmem>>, vector<1x256x384xbf16>
    %92 = vector.shape_cast %91 : vector<1x256x384xbf16> to vector<256x384xbf16>
    %cst_46 = arith.constant dense<0.000000e+00> : vector<36x384xf32>
    %93 = tpu.matmul %90, %92, %cst_46 {dimension_numbers = #tpu.dot_dimension_numbers<[1], [0], [0], [1], [0, 0, 1, 1], [], []>} : vector<36x256xbf16>, vector<256x384xbf16>, vector<36x384xf32> -> vector<36x384xf32>
    %94 = vector.extract_strided_slice %93 {offsets = [0, 0], sizes = [16, 128], strides = [1, 1]} : vector<36x384xf32> to vector<16x128xf32>
    %95 = vector.extract_strided_slice %93 {offsets = [1, 128], sizes = [16, 128], strides = [1, 1]} : vector<36x384xf32> to vector<16x128xf32>
    %96 = arith.addf %94, %95 : vector<16x128xf32>
    %97 = vector.extract_strided_slice %93 {offsets = [2, 256], sizes = [16, 128], strides = [1, 1]} : vector<36x384xf32> to vector<16x128xf32>
    %98 = arith.addf %96, %97 : vector<16x128xf32>
    %99 = vector.extract_strided_slice %93 {offsets = [18, 0], sizes = [16, 128], strides = [1, 1]} : vector<36x384xf32> to vector<16x128xf32>
    %100 = vector.extract_strided_slice %93 {offsets = [19, 128], sizes = [16, 128], strides = [1, 1]} : vector<36x384xf32> to vector<16x128xf32>
    %101 = arith.addf %99, %100 : vector<16x128xf32>
    %102 = vector.extract_strided_slice %93 {offsets = [20, 256], sizes = [16, 128], strides = [1, 1]} : vector<36x384xf32> to vector<16x128xf32>
    %103 = arith.addf %101, %102 : vector<16x128xf32>
    %104 = vector.broadcast %7 : vector<1x128xf32> to vector<16x128xf32>
    %105 = arith.addf %98, %104 : vector<16x128xf32>
    %cst_47 = arith.constant 0.000000e+00 : f32
    %106 = vector.broadcast %cst_47 : f32 to vector<16x128xf32>
    %107 = arith.maximumf %105, %106 : vector<16x128xf32>
    %108 = vector.broadcast %7 : vector<1x128xf32> to vector<16x128xf32>
    %109 = arith.addf %103, %108 : vector<16x128xf32>
    %cst_48 = arith.constant 0.000000e+00 : f32
    %110 = vector.broadcast %cst_48 : f32 to vector<16x128xf32>
    %111 = arith.maximumf %109, %110 : vector<16x128xf32>
    %cst_49 = arith.constant 0.000000e+00 : f32
    %112 = vector.broadcast %cst_49 : f32 to vector<1x128xf32>
    %cst_50 = arith.constant 0.000000e+00 : f32
    %113 = vector.broadcast %cst_50 : f32 to vector<1x128xf32>
    %cst_51 = arith.constant dense<0.000000e+00> : vector<128xf32>
    %114 = vector.multi_reduction <add>, %107, %cst_51 [0] : vector<16x128xf32> to vector<128xf32>
    %115 = vector.shape_cast %114 : vector<128xf32> to vector<1x128xf32>
    %116 = arith.addf %112, %115 : vector<1x128xf32>
    %117 = arith.mulf %107, %107 : vector<16x128xf32>
    %cst_52 = arith.constant dense<0.000000e+00> : vector<128xf32>
    %118 = vector.multi_reduction <add>, %117, %cst_52 [0] : vector<16x128xf32> to vector<128xf32>
    %119 = vector.shape_cast %118 : vector<128xf32> to vector<1x128xf32>
    %120 = arith.addf %113, %119 : vector<1x128xf32>
    %cst_53 = arith.constant dense<0.000000e+00> : vector<128xf32>
    %121 = vector.multi_reduction <add>, %111, %cst_53 [0] : vector<16x128xf32> to vector<128xf32>
    %122 = vector.shape_cast %121 : vector<128xf32> to vector<1x128xf32>
    %123 = arith.addf %116, %122 : vector<1x128xf32>
    %124 = arith.mulf %111, %111 : vector<16x128xf32>
    %cst_54 = arith.constant dense<0.000000e+00> : vector<128xf32>
    %125 = vector.multi_reduction <add>, %124, %cst_54 [0] : vector<16x128xf32> to vector<128xf32>
    %126 = vector.shape_cast %125 : vector<128xf32> to vector<1x128xf32>
    %127 = arith.addf %120, %126 : vector<1x128xf32>
    %128 = tpu.concatenate %123, %127 in 0 : vector<1x128xf32>, vector<1x128xf32> -> vector<2x128xf32>
    %cst_55 = arith.constant dense<0.000000e+00> : vector<2x128xf32>
    %129 = tpu.matmul %128, %4, %cst_55 {dimension_numbers = #tpu.dot_dimension_numbers<[1], [0], [0], [1], [0, 0, 1, 1], [], []>} : vector<2x128xf32>, vector<128x128xf32>, vector<2x128xf32> -> vector<2x128xf32>
    %cst_56 = arith.constant 0.001953125 : f32
    %130 = vector.broadcast %cst_56 : f32 to vector<2x128xf32>
    %131 = arith.mulf %129, %130 : vector<2x128xf32>
    %132 = vector.extract_strided_slice %131 {offsets = [0, 0], sizes = [1, 128], strides = [1, 1]} : vector<2x128xf32> to vector<1x128xf32>
    %133 = vector.extract_strided_slice %131 {offsets = [1, 0], sizes = [1, 128], strides = [1, 1]} : vector<2x128xf32> to vector<1x128xf32>
    %134 = arith.mulf %132, %132 : vector<1x128xf32>
    %135 = arith.subf %133, %134 : vector<1x128xf32>
    %cst_57 = arith.constant 0.000000e+00 : f32
    %136 = vector.broadcast %cst_57 : f32 to vector<1x128xf32>
    %137 = arith.maximumf %135, %136 : vector<1x128xf32>
    %cst_58 = arith.constant 9.99999974E-6 : f32
    %138 = vector.broadcast %cst_58 : f32 to vector<1x128xf32>
    %139 = arith.addf %137, %138 : vector<1x128xf32>
    %140 = math.rsqrt %139 : vector<1x128xf32>
    %141 = arith.mulf %8, %140 : vector<1x128xf32>
    %142 = arith.mulf %132, %141 : vector<1x128xf32>
    %143 = arith.subf %9, %142 : vector<1x128xf32>
    %cst_59 = arith.constant 0.000000e+00 : f32
    %144 = vector.broadcast %cst_59 : f32 to vector<1x128xf32>
    %c0_60 = arith.constant 0 : index
    %c0_61 = arith.constant 0 : index
    %145 = vector.load %arg10[%c0_60, %c0_61] : memref<36x128xf32, #tpu.memory_space<vmem>>, vector<1x128xf32>
    tpu.vector_store %arg10[%c0_60, %c0_61], %144 {strides = array<i32>} : memref<36x128xf32, #tpu.memory_space<vmem>>, vector<1x128xf32>,
    %146 = vector.broadcast %141 : vector<1x128xf32> to vector<16x128xf32>
    %147 = arith.mulf %107, %146 : vector<16x128xf32>
    %148 = vector.broadcast %143 : vector<1x128xf32> to vector<16x128xf32>
    %149 = arith.addf %147, %148 : vector<16x128xf32>
    %c1_62 = arith.constant 1 : index
    %c0_63 = arith.constant 0 : index
    %150 = vector.load %arg10[%c1_62, %c0_63] : memref<36x128xf32, #tpu.memory_space<vmem>>, vector<16x128xf32>
    tpu.vector_store %arg10[%c1_62, %c0_63], %149 {strides = array<i32>} : memref<36x128xf32, #tpu.memory_space<vmem>>, vector<16x128xf32>,
    %c17_64 = arith.constant 17 : index
    %c0_65 = arith.constant 0 : index
    %151 = vector.load %arg10[%c17_64, %c0_65] : memref<36x128xf32, #tpu.memory_space<vmem>>, vector<1x128xf32>
    tpu.vector_store %arg10[%c17_64, %c0_65], %144 {strides = array<i32>} : memref<36x128xf32, #tpu.memory_space<vmem>>, vector<1x128xf32>,
    %c18_66 = arith.constant 18 : index
    %c0_67 = arith.constant 0 : index
    %152 = vector.load %arg10[%c18_66, %c0_67] : memref<36x128xf32, #tpu.memory_space<vmem>>, vector<1x128xf32>
    tpu.vector_store %arg10[%c18_66, %c0_67], %144 {strides = array<i32>} : memref<36x128xf32, #tpu.memory_space<vmem>>, vector<1x128xf32>,
    %153 = vector.broadcast %141 : vector<1x128xf32> to vector<16x128xf32>
    %154 = arith.mulf %111, %153 : vector<16x128xf32>
    %155 = vector.broadcast %143 : vector<1x128xf32> to vector<16x128xf32>
    %156 = arith.addf %154, %155 : vector<16x128xf32>
    %c19_68 = arith.constant 19 : index
    %c0_69 = arith.constant 0 : index
    %157 = vector.load %arg10[%c19_68, %c0_69] : memref<36x128xf32, #tpu.memory_space<vmem>>, vector<16x128xf32>
    tpu.vector_store %arg10[%c19_68, %c0_69], %156 {strides = array<i32>} : memref<36x128xf32, #tpu.memory_space<vmem>>, vector<16x128xf32>,
    %c35_70 = arith.constant 35 : index
    %c0_71 = arith.constant 0 : index
    %158 = vector.load %arg10[%c35_70, %c0_71] : memref<36x128xf32, #tpu.memory_space<vmem>>, vector<1x128xf32>
    tpu.vector_store %arg10[%c35_70, %c0_71], %144 {strides = array<i32>} : memref<36x128xf32, #tpu.memory_space<vmem>>, vector<1x128xf32>,
    %c0_72 = arith.constant 0 : index
    %c0_73 = arith.constant 0 : index
    %159 = vector.load %arg10[%c0_72, %c0_73] : memref<36x128xf32, #tpu.memory_space<vmem>>, vector<36x128xf32>
    %160 = arith.truncf %159 : vector<36x128xf32> to vector<36x128xbf16>
    %c0_74 = arith.constant 0 : index
    %c0_75 = arith.constant 0 : index
    %c0_76 = arith.constant 0 : index
    %161 = vector.load %arg5[%c0_74, %c0_75, %c0_76] : memref<1x128x384xbf16, #tpu.memory_space<vmem>>, vector<1x128x384xbf16>
    %162 = vector.shape_cast %161 : vector<1x128x384xbf16> to vector<128x384xbf16>
    %cst_77 = arith.constant dense<0.000000e+00> : vector<36x384xf32>
    %163 = tpu.matmul %160, %162, %cst_77 {dimension_numbers = #tpu.dot_dimension_numbers<[1], [0], [0], [1], [0, 0, 1, 1], [], []>} : vector<36x128xbf16>, vector<128x384xbf16>, vector<36x384xf32> -> vector<36x384xf32>
    %164 = vector.extract_strided_slice %163 {offsets = [0, 0], sizes = [16, 128], strides = [1, 1]} : vector<36x384xf32> to vector<16x128xf32>
    %165 = vector.extract_strided_slice %163 {offsets = [1, 128], sizes = [16, 128], strides = [1, 1]} : vector<36x384xf32> to vector<16x128xf32>
    %166 = arith.addf %164, %165 : vector<16x128xf32>
    %167 = vector.extract_strided_slice %163 {offsets = [2, 256], sizes = [16, 128], strides = [1, 1]} : vector<36x384xf32> to vector<16x128xf32>
    %168 = arith.addf %166, %167 : vector<16x128xf32>
    %169 = vector.extract_strided_slice %168 {offsets = [0, 0], sizes = [16, 16], strides = [1, 1]} : vector<16x128xf32> to vector<16x16xf32>
    %170 = vector.extract_strided_slice %163 {offsets = [18, 0], sizes = [16, 128], strides = [1, 1]} : vector<36x384xf32> to vector<16x128xf32>
    %171 = vector.extract_strided_slice %163 {offsets = [19, 128], sizes = [16, 128], strides = [1, 1]} : vector<36x384xf32> to vector<16x128xf32>
    %172 = arith.addf %170, %171 : vector<16x128xf32>
    %173 = vector.extract_strided_slice %163 {offsets = [20, 256], sizes = [16, 128], strides = [1, 1]} : vector<36x384xf32> to vector<16x128xf32>
    %174 = arith.addf %172, %173 : vector<16x128xf32>
    %175 = vector.extract_strided_slice %174 {offsets = [0, 0], sizes = [16, 16], strides = [1, 1]} : vector<16x128xf32> to vector<16x16xf32>
    %176 = vector.broadcast %3 : vector<1x16xf32> to vector<16x16xf32>
    %177 = arith.addf %169, %176 : vector<16x16xf32>
    %c0_78 = arith.constant 0 : index
    %c0_79 = arith.constant 0 : index
    %c0_80 = arith.constant 0 : index
    %c0_81 = arith.constant 0 : index
    %178 = vector.load %arg8[%c0_78, %c0_79, %c0_80, %c0_81] : memref<1x2x16x16xf32, #tpu.memory_space<vmem>>, vector<1x1x16x16xf32>
    %179 = vector.shape_cast %178 : vector<1x1x16x16xf32> to vector<16x16xf32>
    %180 = vector.shape_cast %177 : vector<16x16xf32> to vector<1x1x16x16xf32>
    tpu.vector_store %arg8[%c0_78, %c0_79, %c0_80, %c0_81], %180 {strides = array<i32>} : memref<1x2x16x16xf32, #tpu.memory_space<vmem>>, vector<1x1x16x16xf32>,
    %181 = vector.broadcast %3 : vector<1x16xf32> to vector<16x16xf32>
    %182 = arith.addf %175, %181 : vector<16x16xf32>
    %c0_82 = arith.constant 0 : index
    %c1_83 = arith.constant 1 : index
    %c0_84 = arith.constant 0 : index
    %c0_85 = arith.constant 0 : index
    %183 = vector.load %arg8[%c0_82, %c1_83, %c0_84, %c0_85] : memref<1x2x16x16xf32, #tpu.memory_space<vmem>>, vector<1x1x16x16xf32>
    %184 = vector.shape_cast %183 : vector<1x1x16x16xf32> to vector<16x16xf32>
    %185 = vector.shape_cast %182 : vector<16x16xf32> to vector<1x1x16x16xf32>
    tpu.vector_store %arg8[%c0_82, %c1_83, %c0_84, %c0_85], %185 {strides = array<i32>} : memref<1x2x16x16xf32, #tpu.memory_space<vmem>>, vector<1x1x16x16xf32>,
    return
  }
  func.func @transform_0(%arg0: i32) -> (i32, i32, i32) {
    %c0_i32 = arith.constant 0 : i32
    %c0_i32_0 = arith.constant 0 : i32
    %c0_i32_1 = arith.constant 0 : i32
    %c0_i32_2 = arith.constant 0 : i32
    return %c0_i32, %c0_i32_0, %c0_i32_1 : i32, i32, i32
  }
  func.func @transform_1(%arg0: i32) -> (i32, i32, i32, i32) {
    %c0_i32 = arith.constant 0 : i32
    %c0_i32_0 = arith.constant 0 : i32
    %c0_i32_1 = arith.constant 0 : i32
    %c0_i32_2 = arith.constant 0 : i32
    return %arg0, %c0_i32, %c0_i32_0, %c0_i32_1 : i32, i32, i32, i32
  }
  func.func @transform_2(%arg0: i32) -> (i32, i32, i32) {
    %c0_i32 = arith.constant 0 : i32
    %c0_i32_0 = arith.constant 0 : i32
    %c0_i32_1 = arith.constant 0 : i32
    return %arg0, %c0_i32, %c0_i32_0 : i32, i32, i32
  }
  func.func @transform_3(%arg0: i32) -> (i32, i32, i32) {
    %c0_i32 = arith.constant 0 : i32
    %c0_i32_0 = arith.constant 0 : i32
    %c0_i32_1 = arith.constant 0 : i32
    return %arg0, %c0_i32, %c0_i32_0 : i32, i32, i32
  }
  func.func @transform_4(%arg0: i32) -> (i32, i32, i32) {
    %c0_i32 = arith.constant 0 : i32
    %c0_i32_0 = arith.constant 0 : i32
    %c0_i32_1 = arith.constant 0 : i32
    return %arg0, %c0_i32, %c0_i32_0 : i32, i32, i32
  }
  func.func @transform_5(%arg0: i32) -> (i32, i32) {
    %c0_i32 = arith.constant 0 : i32
    %c0_i32_0 = arith.constant 0 : i32
    %c0_i32_1 = arith.constant 0 : i32
    return %c0_i32, %c0_i32_0 : i32, i32
  }
  func.func @transform_6(%arg0: i32) -> (i32, i32, i32) {
    %c0_i32 = arith.constant 0 : i32
    %c0_i32_0 = arith.constant 0 : i32
    %c0_i32_1 = arith.constant 0 : i32
    return %arg0, %c0_i32, %c0_i32_0 : i32, i32, i32
  }
  func.func @transform_7(%arg0: i32) -> (i32, i32, i32, i32) {
    %c0_i32 = arith.constant 0 : i32
    %c0_i32_0 = arith.constant 0 : i32
    %c0_i32_1 = arith.constant 0 : i32
    %c0_i32_2 = arith.constant 0 : i32
    return %arg0, %c0_i32, %c0_i32_0, %c0_i32_1 : i32, i32, i32, i32
  }
}

</mosaic_0001>

<bundles_post_ra>
// kernel: enhanced_unet_film_forward.6
= control target key start
LH: loop header
LB: loop body
LE: loop exit
PB: predicated region body
PF: predicated region fallthrough
CT: control target
= control target key end

     0   :  { %vm38_vm0 = vcmask 385024   ;;  %v1320_v0 = vmov 0.0   ;;  %vm1321_vm1 = vmmov 0   ;;  %v1322_v3 = vmov 0   ;;  %s1732_s1 = inlined_call_operand.vmem [shape: bf16[48,384], index: 1, kind: input, shape index: {}]   ;;  %s1733_s0 = inlined_call_operand.vmem [shape: f32[2,16,48], index: 0, kind: input, shape index: {}]   ;;  %s1734_s3 = inlined_call_operand.vmem [shape: f32[128,128], index: 3, kind: input, shape index: {}]   ;;  %s1735_s4 = inlined_call_operand.vmem [shape: f32[6,128], index: 4, kind: input, shape index: {}]   ;;  %s1736_s2 = inlined_call_operand.vmem [shape: bf16[128,384], index: 2, kind: input, shape index: {}]   ;;  %s1737_s5 = inlined_call_operand.vmem [shape: f32[2,16,128], index: 5, kind: output, shape index: {}]  }
   0x1   :  { %1104 = vmatprep.subr.bf16.mxu1 %v1320_v0  ;;  %458 = vst [vmem:[#allocation3] sm:$0x1] %v1320_v0  ;;  %473 = vst [vmem:[#allocation3 + $0x11] sm:$0x1] %v1320_v0  ;;  %v1272_v1 = vld [vmem:[%s1732_s1 + $0x4] ss:$12 sps:$4 sm:$0xff]   ;;  %1110 = vmatprep.mubr.msk.bf16.mxu1 %vm1321_vm1, %v1320_v0  ;;  %v297_v48 = vlaneseq }
   0x2   :  { %474 = vst [vmem:[#allocation3 + $0x12] sm:$0x1] %v1320_v0  ;;  %484 = vst [vmem:[#allocation3 + $0x23] sm:$0x1] %v1320_v0  ;;  %v1274_v2 = vld [vmem:[%s1732_s1 + $0x8] ss:$12 sps:$4 sm:$0xff]   ;;  %162 = vmatprep.mubr.bf16.mxu0 %v1322_v3  ;;  %130 = vmatprep.subr.bf16.mxu0 %v1272_v1 }
   0x3   :  { %39 = vst.msk [vmem:[#allocation2] sm:$0x1] %vm38_vm0, %v1320_v0  ;;  %45 = vst.msk [vmem:[#allocation2 + $0x11] sm:$0x1] %vm38_vm0, %v1320_v0  ;;  %v1275_v4 = vld [vmem:[%s1732_s1] ss:$12 sps:$4 sm:$0xff]   ;;  %1105 = vmatpush3.bf16.msra.mxu1 %v1274_v2 }
   0x4   :  { %46 = vst.msk [vmem:[#allocation2 + $0x12] sm:$0x1] %vm38_vm0, %v1320_v0  ;;  %52 = vst.msk [vmem:[#allocation2 + $0x23] sm:$0x1] %vm38_vm0, %v1320_v0  ;;  %v1276_v5 = vld [vmem:[%s1732_s1 + $0x1c] ss:$12 sps:$4 sm:$0xff]   ;;  %131 = vmatpush1.bf16.msra.mxu0 %v1275_v4  ;;  %1106 = vmatprep.subr.bf16.mxu1 %v1320_v0 }
   0x5   :  { %v1278_v6 = vld [vmem:[%s1732_s1 + $0x20] ss:$12 sps:$4 sm:$0xff]   ;;  %v1279_v7 = vld [vmem:[%s1732_s1 + $0x18] ss:$12 sps:$4 sm:$0xff]   ;;  %132 = vmatprep.subr.bf16.mxu0 %v1276_v5  ;;  %vm42_vm2 = vcmask 392192   ;;  %v1009_v12 = vld [vmem:[%s1733_s0 + $0x10] sm:$0xff] }
   0x6   :  { %v1280_v8 = vld [vmem:[%s1732_s1 + $0x34] ss:$12 sps:$4 sm:$0xff]   ;;  %v1282_v9 = vld [vmem:[%s1732_s1 + $0x38] ss:$12 sps:$4 sm:$0xff]   ;;  %v41_v11 = vld [vmem:[%s1733_s0 + $0x8] sm:$0xff]  ;;  %50 = vst.msk [vmem:[#allocation2 + $0x13] sm:$0xff] %vm42_vm2, %v1009_v12 }
   0x7   :  { %1107 = vmatpush3.bf16.msra.mxu1 %v1278_v6  ;;  %v40_v10 = vld [vmem:[%s1733_s0] sm:$0xff]  ;;  %v1283_v13 = vld [vmem:[%s1732_s1 + $0x30] ss:$12 sps:$4 sm:$0xff]   ;;  %44 = vst.msk [vmem:[#allocation2 + $0x9] sm:$0xff] %vm42_vm2, %v41_v11  ;;  %v23_v24 = vld [vmem:[%s1734_s3 + $0x8] sm:$0xff]  ;;  %v1323_v26 = vmov 0.0|0.0  }
   0x8   :  { %133 = vmatpush1.bf16.msra.mxu0 %v1279_v7  ;;  %1108 = vmatprep.subr.bf16.mxu1 %v1320_v0  ;;  %43 = vst.msk [vmem:[#allocation2 + $0x1] sm:$0xff] %vm42_vm2, %v40_v10  ;;  %v1010_v14 = vld [vmem:[%s1733_s0 + $0x18] sm:$0xff]  ;;  %v22_v23 = vld [vmem:[%s1734_s3] sm:$0xff]  ;;  %v24_v27 = vld [vmem:[%s1734_s3 + $0x10] sm:$0xff]  ;;  %v1507_v54 = vshrl.u32 %v297_v48, 7  ;;  %vm263_vm3 = vcmask 1045504  }
   0x9   :  { %134 = vmatprep.subr.bf16.mxu0 %v1280_v8  ;;  %51 = vst.msk [vmem:[#allocation2 + $0x1b] sm:$0xff] %vm42_vm2, %v1010_v14  ;;  %v1432_v25 = vpack.c.bf16 %v23_v24, %v22_v23  ;;  %v25_v28 = vld [vmem:[%s1734_s3 + $0x18] sm:$0xff]  ;;  %v26_v30 = vld [vmem:[%s1734_s3 + $0x20] sm:$0xff]  ;;  %v27_v31 = vld [vmem:[%s1734_s3 + $0x28] sm:$0xff]  ;;  %vm250_vm4 = vcmask 1046528   ;;  %vm368_vm5 = vcmask 1040384  }
   0xa   :  { %v1443_v29 = vpack.c.bf16 %v25_v28, %v24_v27  ;;  %v1453_v32 = vpack.c.bf16 %v27_v31, %v26_v30  ;;  %v28_v33 = vld [vmem:[%s1734_s3 + $0x30] sm:$0xff]  ;;  %v29_v34 = vld [vmem:[%s1734_s3 + $0x38] sm:$0xff]  ;;  %v30_v36 = vld [vmem:[%s1734_s3 + $0x40] sm:$0xff]  ;;  %v299_v63 = vsub.s32 0, %v1507_v54 }
   0xb   :  { %1109 = vmatpush3.bf16.msra.mxu1 %v1282_v9  ;;  %v1463_v35 = vpack.c.bf16 %v29_v34, %v28_v33  ;;  %v31_v37 = vld [vmem:[%s1734_s3 + $0x48] sm:$0xff]  ;;  %v32_v39 = vld [vmem:[%s1734_s3 + $0x50] sm:$0xff]  ;;  %v33_v40 = vld [vmem:[%s1734_s3 + $0x58] sm:$0xff] }
   0xc   :  { %135 = vmatpush1.bf16.msra.mxu0 %v1283_v13  ;;  %v1473_v38 = vpack.c.bf16 %v31_v37, %v30_v36  ;;  %v1482_v41 = vpack.c.bf16 %v33_v40, %v32_v39  ;;  %v34_v42 = vld [vmem:[%s1734_s3 + $0x60] sm:$0xff]  ;;  %v35_v43 = vld [vmem:[%s1734_s3 + $0x68] sm:$0xff]  ;;  %v36_v45 = vld [vmem:[%s1734_s3 + $0x70] sm:$0xff] }
   0xd   :  { %1220 = vmatprep.subr.bf16.mxu0 %v1323_v26  ;;  %v1492_v44 = vpack.c.bf16 %v35_v43, %v34_v42  ;;  %v37_v46 = vld [vmem:[%s1734_s3 + $0x78] sm:$0xff]  ;;  %v1514_v1 = vld [vmem:[%s1735_s4] sm:$0x3f] }
   0xe   :  { %v55_v18 = vld [vmem:[#allocation2 + $0x10] sm:$0xff]  ;;  %v1502_v47 = vpack.c.bf16 %v37_v46, %v36_v45  ;;  %v300_v8 = vrot.slane %v1514_v1, %v299_v63 }
   0xf   :  { %v53_v15 = vld [vmem:[#allocation2] sm:$0xff]  ;;  %v54_v16 = vld [vmem:[#allocation2 + $0x8] sm:$0xff] }
  0x10   :  { %v58_v17 = vpack.c.bf16 %v54_v16, %v53_v15  ;;  %v56_v19 = vld [vmem:[#allocation2 + $0x18] sm:$0xff]  ;;  %v57_v21 = vld [vmem:[#allocation2 + $0x20] sm:$0xf] }
  0x11   :  { %v59_v20 = vpack.c.bf16 %v56_v19, %v55_v18  ;;  %v60_v22 = vpack.c.bf16 %v57_v21, %v57_v21 }
  0x12   :  { %1111 = vmatmul.mubr.msk.bf16.vlgmr.msra.gmra.mrb[0].mxu1 %vm42_vm2, %v58_v17  ;;  %1020 = vmatmul.mubr.msk.bf16.vlgmr.msra.gmra.mrb[0].mxu0 %vm42_vm2, %v58_v17 }
  0x13   :  { %1114 = vmatprep.mubr.msk.bf16.mxu1 %vm1321_vm1, %v1320_v0  ;;  %172 = vmatprep.mubr.bf16.mxu0 %v1322_v3 }
  0x14   :  { %1222 = vmatpush3.bf16.msra.mxu0 %v1432_v25 }
  0x15   :  { %1223 = vmatprep.subr.bf16.mxu0 %v1323_v26 }
  0x18   :  { %1225 = vmatpush3.bf16.msra.mxu0 %v1443_v29 }
  0x19   :  { %1226 = vmatprep.subr.bf16.mxu0 %v1323_v26 }
  0x1a   :  { %1115 = vmatmul.mubr.msk.bf16.gmra.mrb[4].mxu1 %vm42_vm2, %v59_v20  ;;  %1021 = vmatmul.mubr.msk.bf16.gmra.mrb[4].mxu0 %vm42_vm2, %v59_v20 }
  0x1b   :  { %1118 = vmatprep.mubr.msk.bf16.mxu1 %vm1321_vm1, %v1320_v0  ;;  %182 = vmatprep.mubr.bf16.mxu0 %v1322_v3 }
  0x1c   :  { %1228 = vmatpush3.bf16.msra.mxu0 %v1453_v32 }
  0x1d   :  { %1229 = vmatprep.subr.bf16.mxu0 %v1323_v26 }
  0x20   :  { %1231 = vmatpush3.bf16.msra.mxu0 %v1463_v35 }
  0x21   :  { %1232 = vmatprep.subr.bf16.mxu0 %v1323_v26 }
  0x22   :  { %1119 = vmatmul.mubr.msk.bf16.gmra.mrb[8].mxu1 %vm42_vm2, %v60_v22  ;;  %1022 = vmatmul.mubr.msk.bf16.gmra.mrb[8].mxu0 %vm42_vm2, %v60_v22 }
  0x23   :  { %1154 = vmatprep.mubr.msk.f32.mxu0 %vm1321_vm1, %v1320_v0  ;;  %685 = vmatprep.mubr.bf16.mxu1 %v1322_v3 }
  0x24   :  { %1234 = vmatpush3.bf16.msra.mxu0 %v1473_v38 }
  0x25   :  { %1235 = vmatprep.subr.bf16.mxu0 %v1323_v26 }
  0x28   :  { %1237 = vmatpush3.bf16.msra.mxu0 %v1482_v41 }
  0x29   :  { %1238 = vmatprep.subr.bf16.mxu0 %v1323_v26 }
  0x2c   :  { %1240 = vmatpush3.bf16.msra.mxu0 %v1492_v44 }
  0x2d   :  { %1241 = vmatprep.subr.bf16.mxu0 %v1323_v26 }
  0x30   :  { %1243 = vmatpush3.bf16.msra.mxu0 %v1502_v47 }
  0x31   :  { %1157 = vmatprep.subr.bf16.mxu0 %v1320_v0 }
  0xe5   :  { %v164_v49 = vpop.f32.mrb[0].mxu0  ;;  %v225_v50 = vpop.f32.mrb[0].mxu1 }
  0xe6   :  { %v264_v51 = vrot.slane %v225_v50, 2  ;;  %v166_v52 = vpop.f32.mrb[1].mxu0  ;;  %v1112_v53 = vpop.f32.mrb[1].mxu1 }
  0xe7   :  { %v168_v55 = vpop.f32.mrb[2].mxu0  ;;  %v228_v56 = vpop.f32.mrb[2].mxu1  ;;  %v251_v60 = vrot.slane %v166_v52, 1 }
  0xe8   :  { %v265_v57 = vrot.slane %v228_v56, 2  ;;  %v170_v58 = vpop.f32.mrb[3].mxu0  ;;  %v1113_v59 = vpop.f32.mrb[3].mxu1 }
  0xe9   :  { %v252_v61 = vrot.slane %v170_v58, 1 }
  0xea   :  { %v266_v62 = vsel %vm263_vm3, %v264_v51, %v265_v57 }
  0xeb   :  { %v253_v2 = vsel %vm250_vm4, %v251_v60, %v252_v61 }
  0xec   :  { %v258_v4 = vadd.f32 %v253_v2, %v164_v49 }
  0xed   :  { %v233_v5 = vpop.f32.mrb[4].mxu1  ;;  %v174_v6 = vpop.f32.mrb[4].mxu0 }
  0xee   :  { %v271_v7 = vadd.f32 %v266_v62, %v258_v4  ;;  %v267_v9 = vrot.slane %v233_v5, 2  ;;  %v176_v10 = vpop.f32.mrb[5].mxu0  ;;  %v1116_v11 = vpop.f32.mrb[5].mxu1 }
  0xef   :  { %v254_v12 = vrot.slane %v176_v10, 1  ;;  %v178_v13 = vpop.f32.mrb[6].mxu0  ;;  %v236_v14 = vpop.f32.mrb[6].mxu1 }
  0xf0   :  { %v268_v15 = vsel %vm263_vm3, %v265_v57, %v267_v9  ;;  %v287_v16 = vrot.slane %v236_v14, 2  ;;  %v180_v17 = vpop.f32.mrb[7].mxu0  ;;  %v1117_v18 = vpop.f32.mrb[7].mxu1  ;;  %v301_v21 = vadd.f32 %v300_v8, %v271_v7 }
  0xf1   :  { %v255_v19 = vsel %vm250_vm4, %v252_v61, %v254_v12  ;;  %v275_v20 = vrot.slane %v180_v17, 1 }
  0xf2   :  { %v259_v22 = vadd.f32 %v255_v19, %v168_v55  ;;  %v288_v23 = vsel %vm263_vm3, %v267_v9, %v287_v16  ;;  %v1522_v33 = vmax.f32 %v301_v21, 0.0 }
  0xf3   :  { %v276_v24 = vsel %vm250_vm4, %v254_v12, %v275_v20 }
  0xf4   :  { %v272_v27 = vadd.f32 %v268_v15, %v259_v22  ;;  %v282_v28 = vadd.f32 %v276_v24, %v174_v6  ;;  %v319_v55 = vmul.f32 %v1522_v33, %v1522_v33 }
  0xf5   :  { %v241_v30 = vpop.f32.mrb[8].mxu1  ;;  %v184_v31 = vpop.f32.mrb[8].mxu0 }
  0xf6   :  { %v302_v34 = vadd.f32 %v300_v8, %v272_v27  ;;  %v294_v36 = vadd.f32 %v288_v23, %v282_v28  ;;  %v289_v37 = vrot.slane %v241_v30, 2  ;;  %v186_v39 = vpop.f32.mrb[9].mxu0  ;;  %v1120_v40 = vpop.f32.mrb[9].mxu1 }
  0xf7   :  { %v277_v42 = vrot.slane %v186_v39, 1  ;;  %v188_v43 = vpop.f32.mrb[10].mxu0  ;;  %v244_v45 = vpop.f32.mrb[10].mxu1 }
  0xf8   :  { %v1524_v46 = vmax.f32 %v302_v34, 0.0  ;;  %v290_v48 = vsel %vm263_vm3, %v287_v16, %v289_v37  ;;  %v189_v49 = vpop.f32.mrb[11].mxu0  ;;  %v1121_v50 = vpop.f32.mrb[11].mxu1  ;;  %v305_v51 = vadd.f32 %v300_v8, %v294_v36 }
  0xf9   :  { %v278_v52 = vsel %vm250_vm4, %v275_v20, %v277_v42  ;;  %v284_v53 = vadd.f32 %v277_v42, %v184_v31 }
  0xfa   :  { %v320_v56 = vmul.f32 %v1524_v46, %v1524_v46  ;;  %v283_v57 = vadd.f32 %v278_v52, %v178_v13  ;;  %v311_v59 = vadd.f32 %v1524_v46, %v1522_v33  ;;  %v1534_v61 = vmax.f32 %v305_v51, 0.0 }
  0xfb   :  { %v296_v58 = vadd.f32 %v289_v37, %v284_v53 }
  0xfc   :  { %v321_v60 = vadd.f32 %v320_v56, %v319_v55  ;;  %v295_v62 = vadd.f32 %v290_v48, %v283_v57  ;;  %v312_v5 = vrot.slane %v311_v59, 4  ;;  %v347_v7 = vmul.f32 %v1534_v61, %v1534_v61 }
  0xfd   :  { %v307_v63 = vadd.f32 %v300_v8, %v296_v58  ;;  %v332_v12 = vrot.slane %v1534_v61, 2 }
  0xfe   :  { %v306_v2 = vadd.f32 %v300_v8, %v295_v62  ;;  %v322_v6 = vrot.slane %v321_v60, 4  ;;  %v313_v15 = vadd.f32 %v312_v5, %v311_v59  ;;  %v353_v17 = vrot.slane %v347_v7, 2  ;;  %v1284_v62 = vld [vmem:[%s1736_s2] ss:$12 sps:$4 sm:$0xff]   ;;  %v1288_v5 = vld [vmem:[%s1736_s2 + $0x18] ss:$12 sps:$4 sm:$0xff]  }
  0xff   :  { %v1536_v4 = vmax.f32 %v307_v63, 0.0  ;;  %v1287_v63 = vld [vmem:[%s1736_s2 + $0x8] ss:$12 sps:$4 sm:$0xff]  }
 0x100   :  { %v1540_v9 = vmax.f32 %v306_v2, 0.0  ;;  %v323_v16 = vadd.f32 %v322_v6, %v321_v60  ;;  %v314_v27 = vrot.slane %v313_v15, 2  ;;  %v1286_v60 = vld [vmem:[%s1736_s2 + $0x4] ss:$12 sps:$4 sm:$0xff]   ;;  %v1290_v2 = vld [vmem:[%s1736_s2 + $0x1c] ss:$12 sps:$4 sm:$0xff]  }
 0x101   :  { %v335_v10 = vrot.slane %v1536_v4, 2  ;;  %v349_v11 = vmul.f32 %v1536_v4, %v1536_v4  ;;  %653 = vmatprep.subr.bf16.mxu1 %v1286_v60  ;;  %v1291_v6 = vld [vmem:[%s1736_s2 + $0x20] ss:$12 sps:$4 sm:$0xff]  }
 0x102   :  { %v333_v13 = vrot.slane %v1540_v9, 2  ;;  %v348_v8 = vmul.f32 %v1540_v9, %v1540_v9  ;;  %v324_v28 = vrot.slane %v323_v16, 2  ;;  %v315_v36 = vadd.f32 %v314_v27, %v313_v15  ;;  %654 = vmatpush1.bf16.msra.mxu1 %v1284_v62  ;;  %v1294_v7 = vld [vmem:[%s1736_s2 + $0x34] ss:$12 sps:$4 sm:$0xff]   ;;  %v1315_v27 = vld [vmem:[%s1736_s2 + $0xb0] ss:$12 sps:$4 sm:$0xff]  }
 0x103   :  { %v356_v14 = vrot.slane %v349_v11, 2  ;;  %655 = vmatprep.subr.bf16.mxu1 %v1290_v2  ;;  %v1295_v11 = vld [vmem:[%s1736_s2 + $0x38] ss:$12 sps:$4 sm:$0xff]   ;;  %v1300_v15 = vld [vmem:[%s1736_s2 + $0x60] ss:$12 sps:$4 sm:$0xff]  }
 0x104   :  { %v334_v18 = vsel %vm263_vm3, %v332_v12, %v333_v13  ;;  %v336_v19 = vsel %vm263_vm3, %v333_v13, %v335_v10  ;;  %v354_v20 = vrot.slane %v348_v8, 2  ;;  %v325_v37 = vadd.f32 %v324_v28, %v323_v16  ;;  %v1292_v10 = vld [vmem:[%s1736_s2 + $0x30] ss:$12 sps:$4 sm:$0xff]   ;;  %v1298_v12 = vld [vmem:[%s1736_s2 + $0x4c] ss:$12 sps:$4 sm:$0xff]  }
 0x105   :  { %v339_v21 = vadd.f32 %v336_v19, %v334_v18  ;;  %v316_v45 = vrot.slane %v315_v36, 1  ;;  %v1296_v13 = vld [vmem:[%s1736_s2 + $0x48] ss:$12 sps:$4 sm:$0xff]   ;;  %v1299_v8 = vld [vmem:[%s1736_s2 + $0x50] ss:$12 sps:$4 sm:$0xff]  }
 0x106   :  { %v355_v22 = vsel %vm263_vm3, %v353_v17, %v354_v20  ;;  %v357_v23 = vsel %vm263_vm3, %v354_v20, %v356_v14  ;;  %v326_v48 = vrot.slane %v325_v37, 1  ;;  %656 = vmatpush1.bf16.msra.mxu1 %v1288_v5  ;;  %v1302_v14 = vld [vmem:[%s1736_s2 + $0x64] ss:$12 sps:$4 sm:$0xff]   ;;  %v1303_v16 = vld [vmem:[%s1736_s2 + $0x68] ss:$12 sps:$4 sm:$0xff]  }
 0x107   :  { %v360_v24 = vadd.f32 %v357_v23, %v355_v22  ;;  %v340_v30 = vrot.slane %v339_v21, 4  ;;  %v317_v53 = vadd.f32 %v316_v45, %v315_v36  ;;  %657 = vmatprep.subr.bf16.mxu1 %v1294_v7  ;;  %v1306_v17 = vld [vmem:[%s1736_s2 + $0x7c] ss:$12 sps:$4 sm:$0xff]   ;;  %v1304_v18 = vld [vmem:[%s1736_s2 + $0x78] ss:$12 sps:$4 sm:$0xff]   ;;  %v461_v45 = vsub.s32 1, %v1507_v54 }
 0x108   :  { %v327_v55 = vadd.f32 %v326_v48, %v325_v37  ;;  %v1307_v19 = vld [vmem:[%s1736_s2 + $0x80] ss:$12 sps:$4 sm:$0xff]   ;;  %v1308_v20 = vld [vmem:[%s1736_s2 + $0x90] ss:$12 sps:$4 sm:$0xff]   ;;  %v1311_v22 = vld [vmem:[%s1736_s2 + $0x98] ss:$12 sps:$4 sm:$0xff]  }
 0x109   :  { %v341_v31 = vadd.f32 %v340_v30, %v339_v21  ;;  %v361_v34 = vrot.slane %v360_v24, 4  ;;  %v1310_v21 = vld [vmem:[%s1736_s2 + $0x94] ss:$12 sps:$4 sm:$0xff]   ;;  %v1314_v23 = vld [vmem:[%s1736_s2 + $0xac] ss:$12 sps:$4 sm:$0xff]  }
 0x10a   :  { %658 = vmatpush1.bf16.msra.mxu1 %v1292_v10 }
 0x10b   :  { %v342_v39 = vrot.slane %v341_v31, 2  ;;  %v362_v40 = vadd.f32 %v361_v34, %v360_v24  ;;  %659 = vmatprep.subr.bf16.mxu1 %v1298_v12  ;;  %v1312_v24 = vld [vmem:[%s1736_s2 + $0xa8] ss:$12 sps:$4 sm:$0xff]  }
 0x10d   :  { %v343_v42 = vadd.f32 %v342_v39, %v341_v31  ;;  %v363_v43 = vrot.slane %v362_v40, 2 }
 0x10e   :  { %660 = vmatpush1.bf16.msra.mxu1 %v1296_v13 }
 0x10f   :  { %v344_v49 = vrot.slane %v343_v42, 1  ;;  %v364_v50 = vadd.f32 %v363_v43, %v362_v40  ;;  %661 = vmatprep.subr.bf16.mxu1 %v1302_v14 }
 0x111   :  { %v345_v51 = vadd.f32 %v344_v49, %v343_v42  ;;  %v365_v52 = vrot.slane %v364_v50, 1 }
 0x112   :  { %662 = vmatpush1.bf16.msra.mxu1 %v1300_v15 }
 0x113   :  { %v366_v56 = vadd.f32 %v365_v52, %v364_v50  ;;  %v346_v57 = vadd.f32 %v345_v51, %v317_v53  ;;  %663 = vmatprep.subr.bf16.mxu1 %v1306_v17  ;;  %v467_v52 = vsub.s32 2, %v1507_v54 }
 0x115   :  { %v367_v58 = vadd.f32 %v366_v56, %v327_v55 }
 0x116   :  { %664 = vmatpush1.bf16.msra.mxu1 %v1304_v18 }
 0x117   :  { %v369_v59 = vsel %vm368_vm5, %v346_v57, %v367_v58  ;;  %665 = vmatprep.subr.bf16.mxu1 %v1310_v21 }
 0x118   :  { %1155 = vmatmul.mubr.f32.vlgmr.msra.gmra.mrb[12].mxu0 %v369_v59 }
 0x119   :  { %1173 = vmatprep.mubr.msk.bf16.mxu0 %vm1321_vm1, %v1320_v0  ;;  %1158 = vmatpush3.bf16.msra.mxu0 %v1287_v63 }
 0x11a   :  { %1159 = vmatprep.subr.bf16.mxu0 %v1320_v0  ;;  %666 = vmatpush1.bf16.msra.mxu1 %v1308_v20 }
 0x11b   :  { %667 = vmatprep.subr.bf16.mxu1 %v1314_v23 }
 0x11d   :  { %1160 = vmatpush3.bf16.msra.mxu0 %v1291_v6 }
 0x11e   :  { %1161 = vmatprep.subr.bf16.mxu0 %v1320_v0  ;;  %668 = vmatpush1.bf16.msra.mxu1 %v1312_v24 }
 0x11f   :  { %1244 = vmatprep.subr.bf16.mxu1 %v1323_v26 }
 0x121   :  { %1162 = vmatpush3.bf16.msra.mxu0 %v1295_v11 }
 0x122   :  { %1163 = vmatprep.subr.bf16.mxu0 %v1320_v0 }
 0x125   :  { %1164 = vmatpush3.bf16.msra.mxu0 %v1299_v8 }
 0x126   :  { %1165 = vmatprep.subr.bf16.mxu0 %v1320_v0 }
 0x129   :  { %1166 = vmatpush3.bf16.msra.mxu0 %v1303_v16 }
 0x12a   :  { %1167 = vmatprep.subr.bf16.mxu0 %v1320_v0 }
 0x12d   :  { %1168 = vmatpush3.bf16.msra.mxu0 %v1307_v19 }
 0x12e   :  { %1169 = vmatprep.subr.bf16.mxu0 %v1320_v0 }
 0x131   :  { %1170 = vmatpush3.bf16.msra.mxu0 %v1311_v22 }
 0x132   :  { %1171 = vmatprep.subr.bf16.mxu0 %v1320_v0 }
 0x135   :  { %1172 = vmatpush3.bf16.msra.mxu0 %v1315_v27 }
 0x1eb   :  { %v436_v28 = vpop.f32.mrb[12].mxu0 }
 0x1ec   :  { %v440_v30 = vmul.f32 0.001953125, %v436_v28  ;;  %v1156_v31 = vpop.f32.mrb[13].mxu0 }
 0x1ee   :  { %v441_v34 = vmul.f32 %v440_v30, %v440_v30 }
 0x1f0   :  { %v443_v36 = vrot.slane %v441_v34, 7 }
 0x1f2   :  { %v445_v37 = vsub.f32 %v440_v30, %v443_v36 }
 0x1f4   :  { %v446_v39 = vmax.f32 %v445_v37, 0.0 }
 0x1f6   :  { %v447_v40 = vadd.f32 1e-05, %v446_v39 }
 0x1f8   :  { %1316 = vrsqrt.f32 %v447_v40 }
 0x202   :  { %v1317_v42 = vpop.eup %1316 }
 0x203   :  { %v449_v43 = vmul.f32 %v1317_v42, %v1514_v1 }
 0x205   :  { %v451_v48 = vrot.slane %v449_v43, 1  ;;  %v462_v50 = vrot.slane %v449_v43, %v461_v45 }
 0x207   :  { %v453_v49 = vmul.f32 %v451_v48, %v440_v30  ;;  %v463_v55 = vmul.f32 %v462_v50, %v1522_v33  ;;  %v464_v56 = vmul.f32 %v462_v50, %v1524_v46  ;;  %v475_v58 = vmul.f32 %v462_v50, %v1534_v61 }
 0x208   :  { %v476_v59 = vmul.f32 %v462_v50, %v1540_v9  ;;  %v477_v60 = vmul.f32 %v462_v50, %v1536_v4 }
 0x209   :  { %v455_v51 = vrot.slane %v453_v49, 6 }
 0x20b   :  { %v457_v53 = vsub.f32 %v1514_v1, %v455_v51 }
 0x20d   :  { %v468_v57 = vrot.slane %v457_v53, %v467_v52 }
 0x20f   :  { %v469_v62 = vadd.f32 %v468_v57, %v463_v55  ;;  %v470_v63 = vadd.f32 %v468_v57, %v464_v56  ;;  %v478_v2 = vadd.f32 %v475_v58, %v468_v57  ;;  %v479_v5 = vadd.f32 %v476_v59, %v468_v57 }
 0x210   :  { %v480_v6 = vadd.f32 %v477_v60, %v468_v57 }
 0x211   :  { %471 = vst [vmem:[#allocation3 + $0x1] sm:$0xff] %v469_v62  ;;  %472 = vst [vmem:[#allocation3 + $0x9] sm:$0xff] %v470_v63 }
 0x212   :  { %481 = vst [vmem:[#allocation3 + $0x11] sm:$0xfc] %v478_v2  ;;  %482 = vst [vmem:[#allocation3 + $0x19] sm:$0xff] %v479_v5 }
 0x213   :  { %483 = vst [vmem:[#allocation3 + $0x21] sm:$0x3] %v480_v6 }
 0x218   :  { %v485_v33 = vld [vmem:[#allocation3] sm:$0xff]  ;;  %v486_v7 = vld [vmem:[#allocation3 + $0x8] sm:$0xff] }
 0x219   :  { %v490_v46 = vpack.c.bf16 %v486_v7, %v485_v33  ;;  %v487_v61 = vld [vmem:[#allocation3 + $0x10] sm:$0xff]  ;;  %v488_v4 = vld [vmem:[#allocation3 + $0x18] sm:$0xff] }
 0x21a   :  { %v491_v9 = vpack.c.bf16 %v488_v4, %v487_v61  ;;  %v489_v10 = vld [vmem:[#allocation3 + $0x20] sm:$0xf] }
 0x21b   :  { %686 = vmatmul.mubr.bf16.vlgmr.msra.gmra.mrb[12].mxu1 %v490_v46  ;;  %1174 = vmatmul.mubr.bf16.vlgmr.msra.gmra.mrb[16].mxu0 %v490_v46 }
 0x21c   :  { %695 = vmatprep.mubr.bf16.mxu1 %v1322_v3  ;;  %1177 = vmatprep.mubr.msk.bf16.mxu0 %vm1321_vm1, %v1320_v0 }
 0x21d   :  { %1246 = vmatpush3.bf16.msra.mxu1 %v1432_v25  ;;  %v492_v25 = vpack.c.bf16 %v489_v10, %v489_v10 }
 0x21e   :  { %1247 = vmatprep.subr.bf16.mxu1 %v1323_v26 }
 0x221   :  { %1249 = vmatpush3.bf16.msra.mxu1 %v1443_v29 }
 0x222   :  { %1250 = vmatprep.subr.bf16.mxu1 %v1323_v26 }
 0x223   :  { %696 = vmatmul.mubr.bf16.gmra.mrb[16].mxu1 %v491_v9  ;;  %1178 = vmatmul.mubr.bf16.gmra.mrb[20].mxu0 %v491_v9 }
 0x224   :  { %705 = vmatprep.mubr.bf16.mxu1 %v1322_v3  ;;  %1181 = vmatprep.mubr.msk.bf16.mxu0 %vm1321_vm1, %v1320_v0 }
 0x225   :  { %1252 = vmatpush3.bf16.msra.mxu1 %v1453_v32 }
 0x226   :  { %1253 = vmatprep.subr.bf16.mxu1 %v1323_v26 }
 0x229   :  { %1255 = vmatpush3.bf16.msra.mxu1 %v1463_v35 }
 0x22a   :  { %1256 = vmatprep.subr.bf16.mxu1 %v1323_v26 }
 0x22b   :  { %706 = vmatmul.mubr.bf16.gmra.mrb[20].mxu1 %v492_v25  ;;  %1182 = vmatmul.mubr.bf16.gmra.mrb[24].mxu0 %v492_v25 }
 0x22c   :  { %1217 = vmatprep.mubr.msk.f32.mxu1 %vm1321_vm1, %v1320_v0 }
 0x22d   :  { %1258 = vmatpush3.bf16.msra.mxu1 %v1473_v38 }
 0x22e   :  { %1259 = vmatprep.subr.bf16.mxu1 %v1323_v26 }
 0x231   :  { %1261 = vmatpush3.bf16.msra.mxu1 %v1482_v41 }
 0x232   :  { %1262 = vmatprep.subr.bf16.mxu1 %v1323_v26 }
 0x235   :  { %1264 = vmatpush3.bf16.msra.mxu1 %v1492_v44  ;;  %v820_v44 = vsub.s32 3, %v1507_v54 }
 0x236   :  { %1265 = vmatprep.subr.bf16.mxu1 %v1323_v26 }
 0x237   :  { %v821_v19 = vrot.slane %v1514_v1, %v820_v44 }
 0x239   :  { %1267 = vmatpush3.bf16.msra.mxu1 %v1502_v47 }
 0x2ee   :  { %v687_v3 = vpop.f32.mrb[12].mxu1  ;;  %v748_v29 = vpop.f32.mrb[16].mxu0 }
 0x2ef   :  { %v689_v32 = vpop.f32.mrb[13].mxu1  ;;  %v1175_v35 = vpop.f32.mrb[17].mxu0  ;;  %v785_v12 = vrot.slane %v748_v29, 2 }
 0x2f0   :  { %v691_v11 = vpop.f32.mrb[14].mxu1  ;;  %v751_v0 = vpop.f32.mrb[18].mxu0  ;;  %v773_v14 = vrot.slane %v689_v32, 1 }
 0x2f1   :  { %v786_v38 = vrot.slane %v751_v0, 2  ;;  %v693_v13 = vpop.f32.mrb[15].mxu1  ;;  %v1176_v8 = vpop.f32.mrb[19].mxu0 }
 0x2f2   :  { %v774_v41 = vrot.slane %v693_v13, 1 }
 0x2f3   :  { %v787_v15 = vsel %vm263_vm3, %v785_v12, %v786_v38 }
 0x2f4   :  { %v775_v26 = vsel %vm250_vm4, %v773_v14, %v774_v41 }
 0x2f5   :  { %v780_v16 = vadd.f32 %v775_v26, %v687_v3 }
 0x2f6   :  { %v697_v47 = vpop.f32.mrb[16].mxu1  ;;  %v756_v17 = vpop.f32.mrb[20].mxu0 }
 0x2f7   :  { %v792_v18 = vadd.f32 %v787_v15, %v780_v16  ;;  %v788_v20 = vrot.slane %v756_v17, 2  ;;  %v699_v21 = vpop.f32.mrb[17].mxu1  ;;  %v1179_v22 = vpop.f32.mrb[21].mxu0 }
 0x2f8   :  { %v776_v23 = vrot.slane %v699_v21, 1  ;;  %v701_v24 = vpop.f32.mrb[18].mxu1  ;;  %v759_v27 = vpop.f32.mrb[22].mxu0 }
 0x2f9   :  { %v789_v28 = vsel %vm263_vm3, %v786_v38, %v788_v20  ;;  %v808_v30 = vrot.slane %v759_v27, 2  ;;  %v703_v31 = vpop.f32.mrb[19].mxu1  ;;  %v1180_v34 = vpop.f32.mrb[23].mxu0  ;;  %v822_v39 = vadd.f32 %v821_v19, %v792_v18 }
 0x2fa   :  { %v777_v36 = vsel %vm250_vm4, %v774_v41, %v776_v23  ;;  %v796_v37 = vrot.slane %v703_v31, 1 }
 0x2fb   :  { %v781_v40 = vadd.f32 %v777_v36, %v691_v11  ;;  %v809_v42 = vsel %vm263_vm3, %v788_v20, %v808_v30  ;;  %v1676_v51 = vmax.f32 %v822_v39, 0.0 }
 0x2fc   :  { %v797_v43 = vsel %vm250_vm4, %v776_v23, %v796_v37 }
 0x2fd   :  { %v793_v45 = vadd.f32 %v789_v28, %v781_v40  ;;  %v803_v48 = vadd.f32 %v797_v43, %v697_v47  ;;  %v840_v46 = vmul.f32 %v1676_v51, %v1676_v51 }
 0x2fe   :  { %v707_v49 = vpop.f32.mrb[20].mxu1  ;;  %v764_v50 = vpop.f32.mrb[24].mxu0 }
 0x2ff   :  { %v823_v52 = vadd.f32 %v821_v19, %v793_v45  ;;  %v815_v53 = vadd.f32 %v809_v42, %v803_v48  ;;  %v810_v55 = vrot.slane %v764_v50, 2  ;;  %v709_v56 = vpop.f32.mrb[21].mxu1  ;;  %v1183_v57 = vpop.f32.mrb[25].mxu0 }
 0x300   :  { %v798_v58 = vrot.slane %v709_v56, 1  ;;  %v711_v59 = vpop.f32.mrb[22].mxu1  ;;  %v767_v60 = vpop.f32.mrb[26].mxu0 }
 0x301   :  { %v1678_v62 = vmax.f32 %v823_v52, 0.0  ;;  %v811_v63 = vsel %vm263_vm3, %v808_v30, %v810_v55  ;;  %v712_v2 = vpop.f32.mrb[23].mxu1  ;;  %v1184_v5 = vpop.f32.mrb[27].mxu0  ;;  %v826_v6 = vadd.f32 %v821_v19, %v815_v53 }
 0x302   :  { %v799_v33 = vsel %vm250_vm4, %v796_v37, %v798_v58  ;;  %v805_v7 = vadd.f32 %v798_v58, %v707_v49 }
 0x303   :  { %v841_v61 = vmul.f32 %v1678_v62, %v1678_v62  ;;  %v804_v4 = vadd.f32 %v799_v33, %v701_v24  ;;  %v832_v10 = vadd.f32 %v1678_v62, %v1676_v51  ;;  %v1688_v3 = vmax.f32 %v826_v6, 0.0 }
 0x304   :  { %v817_v9 = vadd.f32 %v810_v55, %v805_v7 }
 0x305   :  { %v842_v25 = vadd.f32 %v841_v61, %v840_v46  ;;  %v816_v29 = vadd.f32 %v811_v63, %v804_v4  ;;  %v833_v0 = vrot.slane %v832_v10, 4  ;;  %v868_v38 = vmul.f32 %v1688_v3, %v1688_v3 }
 0x306   :  { %v828_v32 = vadd.f32 %v821_v19, %v817_v9  ;;  %v853_v41 = vrot.slane %v1688_v3, 2 }
 0x307   :  { %v827_v35 = vadd.f32 %v821_v19, %v816_v29  ;;  %v843_v12 = vrot.slane %v842_v25, 4  ;;  %v834_v16 = vadd.f32 %v833_v0, %v832_v10  ;;  %v874_v17 = vrot.slane %v868_v38, 2 }
 0x308   :  { %v1690_v11 = vmax.f32 %v828_v32, 0.0 }
 0x309   :  { %v1694_v13 = vmax.f32 %v827_v35, 0.0  ;;  %v844_v47 = vadd.f32 %v843_v12, %v842_v25  ;;  %v835_v27 = vrot.slane %v834_v16, 2  ;;  %v983_v25 = vsub.s32 4, %v1507_v54 }
 0x30a   :  { %v856_v8 = vrot.slane %v1690_v11, 2  ;;  %v870_v14 = vmul.f32 %v1690_v11, %v1690_v11  ;;  %v989_v12 = vsub.s32 5, %v1507_v54 }
 0x30b   :  { %v854_v15 = vrot.slane %v1694_v13, 2  ;;  %v869_v44 = vmul.f32 %v1694_v13, %v1694_v13  ;;  %v845_v28 = vrot.slane %v844_v47, 2  ;;  %v836_v36 = vadd.f32 %v835_v27, %v834_v16 }
 0x30c   :  { %v877_v26 = vrot.slane %v870_v14, 2 }
 0x30d   :  { %v855_v18 = vsel %vm263_vm3, %v853_v41, %v854_v15  ;;  %v857_v19 = vsel %vm263_vm3, %v854_v15, %v856_v8  ;;  %v875_v20 = vrot.slane %v869_v44, 2  ;;  %v846_v37 = vadd.f32 %v845_v28, %v844_v47 }
 0x30e   :  { %v860_v21 = vadd.f32 %v857_v19, %v855_v18  ;;  %v837_v45 = vrot.slane %v836_v36, 1 }
 0x30f   :  { %v876_v22 = vsel %vm263_vm3, %v874_v17, %v875_v20  ;;  %v878_v23 = vsel %vm263_vm3, %v875_v20, %v877_v26  ;;  %v847_v48 = vrot.slane %v846_v37, 1 }
 0x310   :  { %v881_v24 = vadd.f32 %v878_v23, %v876_v22  ;;  %v861_v30 = vrot.slane %v860_v21, 4  ;;  %v838_v55 = vadd.f32 %v837_v45, %v836_v36 }
 0x311   :  { %v848_v56 = vadd.f32 %v847_v48, %v846_v37 }
 0x312   :  { %v862_v31 = vadd.f32 %v861_v30, %v860_v21  ;;  %v882_v34 = vrot.slane %v881_v24, 4 }
 0x314   :  { %v863_v39 = vrot.slane %v862_v31, 2  ;;  %v883_v40 = vadd.f32 %v882_v34, %v881_v24 }
 0x316   :  { %v864_v42 = vadd.f32 %v863_v39, %v862_v31  ;;  %v884_v43 = vrot.slane %v883_v40, 2 }
 0x318   :  { %v865_v49 = vrot.slane %v864_v42, 1  ;;  %v885_v50 = vadd.f32 %v884_v43, %v883_v40 }
 0x31a   :  { %v866_v52 = vadd.f32 %v865_v49, %v864_v42  ;;  %v886_v53 = vrot.slane %v885_v50, 1 }
 0x31c   :  { %v887_v57 = vadd.f32 %v886_v53, %v885_v50  ;;  %v867_v58 = vadd.f32 %v866_v52, %v838_v55 }
 0x31e   :  { %v888_v59 = vadd.f32 %v887_v57, %v848_v56 }
 0x320   :  { %v889_v60 = vsel %vm368_vm5, %v867_v58, %v888_v59 }
 0x321   :  { %1218 = vmatmul.mubr.f32.vlgmr.msra.gmra.mrb[24].mxu1 %v889_v60 }
 0x3f4   :  { %v956_v63 = vpop.f32.mrb[24].mxu1 }
 0x3f5   :  { %v960_v2 = vmul.f32 0.001953125, %v956_v63  ;;  %v1219_v5 = vpop.f32.mrb[25].mxu1 }
 0x3f7   :  { %v961_v6 = vmul.f32 %v960_v2, %v960_v2 }
 0x3f9   :  { %v963_v33 = vrot.slane %v961_v6, 7 }
 0x3fb   :  { %v965_v7 = vsub.f32 %v960_v2, %v963_v33 }
 0x3fd   :  { %v966_v46 = vmax.f32 %v965_v7, 0.0 }
 0x3ff   :  { %v967_v61 = vadd.f32 1e-05, %v966_v46 }
 0x401   :  { %1318 = vrsqrt.f32 %v967_v61 }
 0x40b   :  { %v1319_v4 = vpop.eup %1318 }
 0x40c   :  { %v970_v9 = vrot.slane %v1319_v4, 5 }
 0x40e   :  { %v972_v10 = vmul.f32 %v970_v9, %v1514_v1 }
 0x410   :  { %v974_v29 = vrot.slane %v972_v10, 4  ;;  %v984_v35 = vrot.slane %v972_v10, %v983_v25 }
 0x412   :  { %v976_v32 = vmul.f32 %v974_v29, %v960_v2  ;;  %v985_v8 = vmul.f32 %v984_v35, %v1676_v51  ;;  %v986_v14 = vmul.f32 %v984_v35, %v1678_v62  ;;  %v995_v15 = vmul.f32 %v984_v35, %v1688_v3 }
 0x413   :  { %v996_v44 = vmul.f32 %v984_v35, %v1694_v13  ;;  %v997_v26 = vmul.f32 %v984_v35, %v1690_v11 }
 0x414   :  { %v978_v0 = vrot.slane %v976_v32, 3 }
 0x416   :  { %v980_v38 = vsub.f32 %v1514_v1, %v978_v0 }
 0x418   :  { %v990_v41 = vrot.slane %v980_v38, %v989_v12 }
 0x41a   :  { %v991_v16 = vadd.f32 %v990_v41, %v985_v8  ;;  %v992_v47 = vadd.f32 %v990_v41, %v986_v14  ;;  %v998_v17 = vadd.f32 %v995_v15, %v990_v41  ;;  %v999_v18 = vadd.f32 %v996_v44, %v990_v41 }
 0x41b   :  { %v1000_v19 = vadd.f32 %v997_v26, %v990_v41 }
 0x41c   :  { %993 = vst [vmem:[%s1737_s5] sm:$0xff] %v991_v16  ;;  %994 = vst [vmem:[%s1737_s5 + $0x8] sm:$0xff] %v992_v47 }
 0x41d   :  { %1050 = vst [vmem:[%s1737_s5 + $0xe] sm:$0xfc] %v998_v17  ;;  %1051 = vst [vmem:[%s1737_s5 + $0x16] sm:$0xff] %v999_v18 }
 0x41e   :  { %1052 = vst [vmem:[%s1737_s5 + $0x1e] sm:$0x3] %v1000_v19 }

// kernel: enhanced_unet_film_forward.7
= control target key start
LH: loop header
LB: loop body
LE: loop exit
PB: predicated region body
PF: predicated region fallthrough
CT: control target
= control target key end

     0   :  { %vm38_vm0 = vcmask 516096   ;;  %v1191_v1 = vmov 0   ;;  %v1192_v2 = vmov 0.0   ;;  %vm41_vm1 = vcmask 523264   ;;  %s1525_s1 = inlined_call_operand.vmem [shape: bf16[64,384], index: 1, kind: input, shape index: {}]   ;;  %s1526_s0 = inlined_call_operand.vmem [shape: f32[2,8,64], index: 0, kind: input, shape index: {}]   ;;  %s1527_s3 = inlined_call_operand.vmem [shape: f32[128,128], index: 3, kind: input, shape index: {}]   ;;  %s1528_s4 = inlined_call_operand.vmem [shape: f32[6,128], index: 4, kind: input, shape index: {}]   ;;  %s1529_s2 = inlined_call_operand.vmem [shape: bf16[128,384], index: 2, kind: input, shape index: {}]   ;;  %s1530_s5 = inlined_call_operand.vmem [shape: f32[2,8,128], index: 5, kind: output, shape index: {}]  }
   0x1   :  { %v1139_v0 = vld [vmem:[%s1525_s1 + $0x4] ss:$12 sps:$4 sm:$0xff]   ;;  %172 = vmatprep.mubr.bf16.mxu0 %v1191_v1  ;;  %39 = vst.msk [vmem:[#allocation2] sm:$0x1] %vm38_vm0, %v1192_v2  ;;  %43 = vst.msk [vmem:[#allocation2 + $0x9] sm:$0x1] %vm38_vm0, %v1192_v2  ;;  %v269_v46 = vlaneseq }
   0x2   :  { %44 = vst.msk [vmem:[#allocation2 + $0xa] sm:$0x1] %vm38_vm0, %v1192_v2  ;;  %48 = vst.msk [vmem:[#allocation2 + $0x13] sm:$0x1] %vm38_vm0, %v1192_v2  ;;  %v1141_v3 = vld [vmem:[%s1525_s1] ss:$12 sps:$4 sm:$0xff]   ;;  %140 = vmatprep.subr.bf16.mxu0 %v1139_v0 }
   0x3   :  { %412 = vst [vmem:[#allocation3] sm:$0x1] %v1192_v2  ;;  %424 = vst [vmem:[#allocation3 + $0x9] sm:$0x1] %v1192_v2  ;;  %v1142_v4 = vld [vmem:[%s1525_s1 + $0x8] ss:$12 sps:$4 sm:$0xff]   ;;  %141 = vmatpush1.bf16.msra.mxu0 %v1141_v3 }
   0x4   :  { %425 = vst [vmem:[#allocation3 + $0xa] sm:$0x1] %v1192_v2  ;;  %432 = vst [vmem:[#allocation3 + $0x13] sm:$0x1] %v1192_v2  ;;  %v1143_v5 = vld [vmem:[%s1525_s1 + $0x1c] ss:$12 sps:$4 sm:$0xff]   ;;  %985 = vmatprep.subr.bf16.mxu1 %v1142_v4 }
   0x5   :  { %v1145_v6 = vld [vmem:[%s1525_s1 + $0x18] ss:$12 sps:$4 sm:$0xff]   ;;  %v1146_v7 = vld [vmem:[%s1525_s1 + $0x20] ss:$12 sps:$4 sm:$0xff]   ;;  %986 = vmatpush3.bf16.msra.mxu1 %v1142_v4  ;;  %142 = vmatprep.subr.bf16.mxu0 %v1143_v5  ;;  %v1149_v10 = vld [vmem:[%s1525_s1 + $0x30] ss:$12 sps:$4 sm:$0xff]  }
   0x6   :  { %v1147_v8 = vld [vmem:[%s1525_s1 + $0x34] ss:$12 sps:$4 sm:$0xff]   ;;  %987 = vmatprep.subr.bf16.mxu1 %v1146_v7  ;;  %v1150_v9 = vld [vmem:[%s1525_s1 + $0x38] ss:$12 sps:$4 sm:$0xff]   ;;  %v892_v13 = vld [vmem:[%s1526_s0 + $0x8] sm:$0xff]  ;;  %v1193_v24 = vmov 0.0|0.0  }
   0x7   :  { %143 = vmatpush1.bf16.msra.mxu0 %v1145_v6  ;;  %v1151_v11 = vld [vmem:[%s1525_s1 + $0x4c] ss:$12 sps:$4 sm:$0xff]   ;;  %v40_v12 = vld [vmem:[%s1526_s0] sm:$0xff]  ;;  %v1154_v14 = vld [vmem:[%s1525_s1 + $0x50] ss:$12 sps:$4 sm:$0xff]   ;;  %47 = vst.msk [vmem:[#allocation2 + $0xb] sm:$0xff] %vm41_vm1, %v892_v13 }
   0x8   :  { %144 = vmatprep.subr.bf16.mxu0 %v1147_v8  ;;  %42 = vst.msk [vmem:[#allocation2 + $0x1] sm:$0xff] %vm41_vm1, %v40_v12  ;;  %v1153_v15 = vld [vmem:[%s1525_s1 + $0x48] ss:$12 sps:$4 sm:$0xff]   ;;  %v22_v21 = vld [vmem:[%s1527_s3] sm:$0xff]  ;;  %v25_v26 = vld [vmem:[%s1527_s3 + $0x18] sm:$0xff]  ;;  %vm1194_vm2 = vmmov 0  }
   0x9   :  { %988 = vmatpush3.bf16.msra.mxu1 %v1146_v7  ;;  %v23_v22 = vld [vmem:[%s1527_s3 + $0x8] sm:$0xff]  ;;  %v24_v25 = vld [vmem:[%s1527_s3 + $0x10] sm:$0xff]  ;;  %v26_v28 = vld [vmem:[%s1527_s3 + $0x20] sm:$0xff]  ;;  %v1366_v47 = vshrl.u32 %v269_v46, 7  ;;  %vm241_vm3 = vcmask 1046528   ;;  %vm249_vm4 = vcmask 1045504  }
   0xa   :  { %989 = vmatprep.subr.bf16.mxu1 %v1150_v9  ;;  %v1290_v23 = vpack.c.bf16 %v23_v22, %v22_v21  ;;  %v1301_v27 = vpack.c.bf16 %v25_v26, %v24_v25  ;;  %v27_v29 = vld [vmem:[%s1527_s3 + $0x28] sm:$0xff]  ;;  %v28_v31 = vld [vmem:[%s1527_s3 + $0x30] sm:$0xff]  ;;  %v29_v32 = vld [vmem:[%s1527_s3 + $0x38] sm:$0xff]  ;;  %vm322_vm5 = vcmask 1040384  }
   0xb   :  { %145 = vmatpush1.bf16.msra.mxu0 %v1149_v10  ;;  %v1311_v30 = vpack.c.bf16 %v27_v29, %v26_v28  ;;  %v1321_v33 = vpack.c.bf16 %v29_v32, %v28_v31  ;;  %v30_v34 = vld [vmem:[%s1527_s3 + $0x40] sm:$0xff]  ;;  %v31_v35 = vld [vmem:[%s1527_s3 + $0x48] sm:$0xff]  ;;  %v32_v37 = vld [vmem:[%s1527_s3 + $0x50] sm:$0xff]  ;;  %v271_v57 = vsub.s32 0, %v1366_v47 }
   0xc   :  { %146 = vmatprep.subr.bf16.mxu0 %v1151_v11  ;;  %v1331_v36 = vpack.c.bf16 %v31_v35, %v30_v34  ;;  %v33_v38 = vld [vmem:[%s1527_s3 + $0x58] sm:$0xff]  ;;  %v34_v40 = vld [vmem:[%s1527_s3 + $0x60] sm:$0xff]  ;;  %v35_v41 = vld [vmem:[%s1527_s3 + $0x68] sm:$0xff] }
   0xd   :  { %990 = vmatpush3.bf16.msra.mxu1 %v1150_v9  ;;  %v1341_v39 = vpack.c.bf16 %v33_v38, %v32_v37  ;;  %v1352_v42 = vpack.c.bf16 %v35_v41, %v34_v40  ;;  %v36_v43 = vld [vmem:[%s1527_s3 + $0x70] sm:$0xff]  ;;  %v37_v44 = vld [vmem:[%s1527_s3 + $0x78] sm:$0xff]  ;;  %v1372_v60 = vld [vmem:[%s1528_s4] sm:$0x3f] }
   0xe   :  { %991 = vmatprep.subr.bf16.mxu1 %v1154_v14  ;;  %v51_v18 = vld [vmem:[#allocation2 + $0x10] sm:$0xf]  ;;  %v1362_v45 = vpack.c.bf16 %v37_v44, %v36_v43  ;;  %v272_v5 = vrot.slane %v1372_v60, %v271_v57 }
   0xf   :  { %147 = vmatpush1.bf16.msra.mxu0 %v1153_v15  ;;  %v49_v16 = vld [vmem:[#allocation2] sm:$0xff]  ;;  %v50_v17 = vld [vmem:[#allocation2 + $0x8] sm:$0xff]  ;;  %v53_v20 = vpack.c.bf16 %v51_v18, %v51_v18 }
  0x10   :  { %v52_v19 = vpack.c.bf16 %v50_v17, %v49_v16  ;;  %1087 = vmatprep.subr.bf16.mxu0 %v1193_v24 }
  0x11   :  { %992 = vmatpush3.bf16.msra.mxu1 %v1154_v14 }
  0x12   :  { %905 = vmatmul.mubr.msk.bf16.vlgmr.msra.gmra.mrb[0].mxu0 %vm41_vm1, %v52_v19  ;;  %993 = vmatprep.mubr.msk.bf16.mxu1 %vm41_vm1, %v52_v19 }
  0x13   :  { %182 = vmatprep.mubr.bf16.mxu0 %v1191_v1  ;;  %1089 = vmatpush3.bf16.msra.mxu0 %v1290_v23 }
  0x14   :  { %994 = vmatmul.mubr.msk.bf16.vlgmr.msra.gmra.mrb[0].mxu1 %vm41_vm1, %v53_v20  ;;  %1090 = vmatprep.subr.bf16.mxu0 %v1193_v24 }
  0x15   :  { %630 = vmatprep.mubr.bf16.mxu1 %v1191_v1 }
  0x17   :  { %1092 = vmatpush3.bf16.msra.mxu0 %v1301_v27 }
  0x18   :  { %1093 = vmatprep.subr.bf16.mxu0 %v1193_v24 }
  0x1a   :  { %906 = vmatmul.mubr.msk.bf16.gmra.mrb[4].mxu0 %vm41_vm1, %v53_v20 }
  0x1b   :  { %1095 = vmatpush3.bf16.msra.mxu0 %v1311_v30  ;;  %1029 = vmatprep.mubr.msk.f32.mxu0 %vm1194_vm2, %v1192_v2 }
  0x1c   :  { %1096 = vmatprep.subr.bf16.mxu0 %v1193_v24 }
  0x1f   :  { %1098 = vmatpush3.bf16.msra.mxu0 %v1321_v33 }
  0x20   :  { %1099 = vmatprep.subr.bf16.mxu0 %v1193_v24 }
  0x23   :  { %1101 = vmatpush3.bf16.msra.mxu0 %v1331_v36 }
  0x24   :  { %1102 = vmatprep.subr.bf16.mxu0 %v1193_v24 }
  0x27   :  { %1104 = vmatpush3.bf16.msra.mxu0 %v1341_v39 }
  0x28   :  { %1105 = vmatprep.subr.bf16.mxu0 %v1193_v24 }
  0x2b   :  { %1107 = vmatpush3.bf16.msra.mxu0 %v1352_v42 }
  0x2c   :  { %1108 = vmatprep.subr.bf16.mxu0 %v1193_v24 }
  0x2f   :  { %1110 = vmatpush3.bf16.msra.mxu0 %v1362_v45 }
  0xe5   :  { %v174_v48 = vpop.f32.mrb[0].mxu0 }
  0xe6   :  { %v176_v49 = vpop.f32.mrb[1].mxu0 }
  0xe7   :  { %v995_v50 = vpop.f32.mrb[0].mxu1  ;;  %v178_v51 = vpop.f32.mrb[2].mxu0  ;;  %v242_v58 = vrot.slane %v176_v49, 1 }
  0xe8   :  { %v225_v52 = vpop.f32.mrb[1].mxu1  ;;  %v263_v53 = vrot.slane %v995_v50, 2  ;;  %v180_v54 = vpop.f32.mrb[3].mxu0 }
  0xe9   :  { %v250_v55 = vrot.slane %v225_v52, 2  ;;  %v996_v56 = vpop.f32.mrb[2].mxu1  ;;  %v243_v59 = vrot.slane %v180_v54, 1 }
  0xea   :  { %v228_v61 = vpop.f32.mrb[3].mxu1 }
  0xeb   :  { %v251_v62 = vrot.slane %v228_v61, 2  ;;  %v244_v63 = vsel %vm241_vm3, %v242_v58, %v243_v59 }
  0xec   :  { %v246_v0 = vadd.f32 %v244_v63, %v174_v48 }
  0xed   :  { %v252_v3 = vsel %vm249_vm4, %v250_v55, %v251_v62  ;;  %v264_v4 = vsel %vm249_vm4, %v251_v62, %v263_v53  ;;  %v184_v6 = vpop.f32.mrb[4].mxu0 }
  0xee   :  { %v254_v7 = vadd.f32 %v252_v3, %v246_v0  ;;  %v186_v8 = vpop.f32.mrb[5].mxu0 }
  0xef   :  { %v256_v9 = vrot.slane %v186_v8, 1  ;;  %v188_v10 = vpop.f32.mrb[6].mxu0  ;;  %v1157_v8 = vld [vmem:[%s1529_s2 + $0x4] ss:$12 sps:$4 sm:$0xff]  }
  0xf0   :  { %v273_v11 = vadd.f32 %v272_v5, %v254_v7  ;;  %v189_v12 = vpop.f32.mrb[7].mxu0  ;;  %598 = vmatprep.subr.bf16.mxu1 %v1157_v8  ;;  %v1158_v10 = vld [vmem:[%s1529_s2 + $0x8] ss:$12 sps:$4 sm:$0xff]  }
  0xf1   :  { %v257_v13 = vsel %vm241_vm3, %v243_v59, %v256_v9  ;;  %v261_v14 = vadd.f32 %v256_v9, %v184_v6  ;;  %v1155_v9 = vld [vmem:[%s1529_s2] ss:$12 sps:$4 sm:$0xff]   ;;  %1032 = vmatprep.subr.bf16.mxu0 %v1158_v10  ;;  %v1159_v12 = vld [vmem:[%s1529_s2 + $0x18] ss:$12 sps:$4 sm:$0xff]  }
  0xf2   :  { %v1379_v15 = vmax.f32 %v273_v11, 0.0  ;;  %v260_v16 = vadd.f32 %v257_v13, %v178_v51  ;;  %599 = vmatpush1.bf16.msra.mxu1 %v1155_v9  ;;  %v1161_v11 = vld [vmem:[%s1529_s2 + $0x1c] ss:$12 sps:$4 sm:$0xff]   ;;  %v1162_v13 = vld [vmem:[%s1529_s2 + $0x20] ss:$12 sps:$4 sm:$0xff]  }
  0xf3   :  { %v268_v17 = vadd.f32 %v263_v53, %v261_v14  ;;  %600 = vmatprep.subr.bf16.mxu1 %v1161_v11  ;;  %v1165_v14 = vld [vmem:[%s1529_s2 + $0x34] ss:$12 sps:$4 sm:$0xff]  }
  0xf4   :  { %v286_v18 = vmul.f32 %v1379_v15, %v1379_v15  ;;  %v267_v19 = vadd.f32 %v264_v4, %v260_v16  ;;  %v279_v20 = vrot.slane %v1379_v15, 4  ;;  %v1163_v16 = vld [vmem:[%s1529_s2 + $0x30] ss:$12 sps:$4 sm:$0xff]  }
  0xf5   :  { %v276_v21 = vadd.f32 %v272_v5, %v268_v17  ;;  %v1166_v17 = vld [vmem:[%s1529_s2 + $0x38] ss:$12 sps:$4 sm:$0xff]  }
  0xf6   :  { %v275_v22 = vadd.f32 %v272_v5, %v267_v19  ;;  %v287_v25 = vrot.slane %v286_v18, 4  ;;  %v280_v32 = vadd.f32 %v279_v20, %v1379_v15  ;;  %601 = vmatpush1.bf16.msra.mxu1 %v1159_v12  ;;  %v1167_v19 = vld [vmem:[%s1529_s2 + $0x48] ss:$12 sps:$4 sm:$0xff]   ;;  %v1170_v20 = vld [vmem:[%s1529_s2 + $0x50] ss:$12 sps:$4 sm:$0xff]  }
  0xf7   :  { %v1384_v26 = vmax.f32 %v276_v21, 0.0  ;;  %602 = vmatprep.subr.bf16.mxu1 %v1165_v14  ;;  %v1173_v21 = vld [vmem:[%s1529_s2 + $0x64] ss:$12 sps:$4 sm:$0xff]  }
  0xf8   :  { %v1386_v28 = vmax.f32 %v275_v22, 0.0  ;;  %v288_v34 = vadd.f32 %v287_v25, %v286_v18  ;;  %v281_v44 = vrot.slane %v280_v32, 2  ;;  %v1169_v18 = vld [vmem:[%s1529_s2 + $0x4c] ss:$12 sps:$4 sm:$0xff]   ;;  %v1174_v25 = vld [vmem:[%s1529_s2 + $0x68] ss:$12 sps:$4 sm:$0xff]  }
  0xf9   :  { %v297_v29 = vrot.slane %v1384_v26, 2  ;;  %v308_v31 = vmul.f32 %v1384_v26, %v1384_v26  ;;  %v1171_v22 = vld [vmem:[%s1529_s2 + $0x60] ss:$12 sps:$4 sm:$0xff]  }
  0xfa   :  { %v296_v35 = vrot.slane %v1386_v28, 2  ;;  %v307_v37 = vmul.f32 %v1386_v28, %v1386_v28  ;;  %v289_v46 = vrot.slane %v288_v34, 2  ;;  %v282_v51 = vadd.f32 %v281_v44, %v280_v32  ;;  %603 = vmatpush1.bf16.msra.mxu1 %v1163_v16  ;;  %v1178_v32 = vld [vmem:[%s1529_s2 + $0x80] ss:$12 sps:$4 sm:$0xff]  }
  0xfb   :  { %v312_v38 = vrot.slane %v308_v31, 2  ;;  %604 = vmatprep.subr.bf16.mxu1 %v1169_v18  ;;  %v1175_v31 = vld [vmem:[%s1529_s2 + $0x78] ss:$12 sps:$4 sm:$0xff]  }
  0xfc   :  { %v298_v40 = vsel %vm249_vm4, %v296_v35, %v297_v29  ;;  %v311_v41 = vrot.slane %v307_v37, 2  ;;  %v290_v52 = vadd.f32 %v289_v46, %v288_v34  ;;  %v283_v57 = vrot.slane %v282_v51, 1  ;;  %v1177_v29 = vld [vmem:[%s1529_s2 + $0x7c] ss:$12 sps:$4 sm:$0xff]   ;;  %v1181_v35 = vld [vmem:[%s1529_s2 + $0x94] ss:$12 sps:$4 sm:$0xff]  }
  0xfd   :  { %v300_v43 = vrot.slane %v298_v40, 4  ;;  %v1179_v34 = vld [vmem:[%s1529_s2 + $0x90] ss:$12 sps:$4 sm:$0xff]   ;;  %v1182_v37 = vld [vmem:[%s1529_s2 + $0x98] ss:$12 sps:$4 sm:$0xff]  }
  0xfe   :  { %v313_v48 = vsel %vm249_vm4, %v311_v41, %v312_v38  ;;  %v291_v58 = vrot.slane %v290_v52, 1  ;;  %v284_v0 = vadd.f32 %v283_v57, %v282_v51  ;;  %605 = vmatpush1.bf16.msra.mxu1 %v1167_v19  ;;  %v1185_v38 = vld [vmem:[%s1529_s2 + $0xac] ss:$12 sps:$4 sm:$0xff]   ;;  %v1183_v41 = vld [vmem:[%s1529_s2 + $0xa8] ss:$12 sps:$4 sm:$0xff]  }
  0xff   :  { %v315_v49 = vrot.slane %v313_v48, 4  ;;  %v301_v50 = vadd.f32 %v300_v43, %v298_v40  ;;  %606 = vmatprep.subr.bf16.mxu1 %v1173_v21  ;;  %v1186_v40 = vld [vmem:[%s1529_s2 + $0xb0] ss:$12 sps:$4 sm:$0xff]  }
 0x100   :  { %v292_v3 = vadd.f32 %v291_v58, %v290_v52 }
 0x101   :  { %v302_v53 = vrot.slane %v301_v50, 2  ;;  %v316_v54 = vadd.f32 %v315_v49, %v313_v48 }
 0x102   :  { %607 = vmatpush1.bf16.msra.mxu1 %v1171_v22 }
 0x103   :  { %v303_v55 = vadd.f32 %v302_v53, %v301_v50  ;;  %v317_v56 = vrot.slane %v316_v54, 2  ;;  %608 = vmatprep.subr.bf16.mxu1 %v1177_v29 }
 0x105   :  { %v304_v59 = vrot.slane %v303_v55, 1  ;;  %v318_v61 = vadd.f32 %v317_v56, %v316_v54  ;;  %v415_v56 = vsub.s32 1, %v1366_v47 }
 0x106   :  { %609 = vmatpush1.bf16.msra.mxu1 %v1175_v31 }
 0x107   :  { %v305_v62 = vadd.f32 %v304_v59, %v303_v55  ;;  %v319_v63 = vrot.slane %v318_v61, 1  ;;  %610 = vmatprep.subr.bf16.mxu1 %v1181_v35 }
 0x109   :  { %v320_v4 = vadd.f32 %v319_v63, %v318_v61  ;;  %v306_v5 = vadd.f32 %v305_v62, %v284_v0  ;;  %v420_v61 = vsub.s32 2, %v1366_v47 }
 0x10a   :  { %611 = vmatpush1.bf16.msra.mxu1 %v1179_v34 }
 0x10b   :  { %v321_v6 = vadd.f32 %v320_v4, %v292_v3  ;;  %612 = vmatprep.subr.bf16.mxu1 %v1185_v38 }
 0x10d   :  { %v323_v7 = vsel %vm322_vm5, %v306_v5, %v321_v6 }
 0x10e   :  { %1030 = vmatmul.mubr.f32.vlgmr.msra.gmra.mrb[8].mxu0 %v323_v7  ;;  %613 = vmatpush1.bf16.msra.mxu1 %v1183_v41 }
 0x10f   :  { %1033 = vmatpush3.bf16.msra.mxu0 %v1158_v10  ;;  %1111 = vmatprep.subr.bf16.mxu1 %v1193_v24 }
 0x110   :  { %1034 = vmatprep.subr.bf16.mxu0 %v1162_v13 }
 0x113   :  { %1035 = vmatpush3.bf16.msra.mxu0 %v1162_v13 }
 0x114   :  { %1036 = vmatprep.subr.bf16.mxu0 %v1166_v17 }
 0x117   :  { %1037 = vmatpush3.bf16.msra.mxu0 %v1166_v17 }
 0x118   :  { %1038 = vmatprep.subr.bf16.mxu0 %v1170_v20 }
 0x11b   :  { %1039 = vmatpush3.bf16.msra.mxu0 %v1170_v20 }
 0x11c   :  { %1040 = vmatprep.subr.bf16.mxu0 %v1174_v25 }
 0x11f   :  { %1041 = vmatpush3.bf16.msra.mxu0 %v1174_v25 }
 0x120   :  { %1042 = vmatprep.subr.bf16.mxu0 %v1178_v32 }
 0x123   :  { %1043 = vmatpush3.bf16.msra.mxu0 %v1178_v32 }
 0x124   :  { %1044 = vmatprep.subr.bf16.mxu0 %v1182_v37 }
 0x127   :  { %1045 = vmatpush3.bf16.msra.mxu0 %v1182_v37 }
 0x128   :  { %1046 = vmatprep.subr.bf16.mxu0 %v1186_v40 }
 0x12b   :  { %1047 = vmatpush3.bf16.msra.mxu0 %v1186_v40 }
 0x1e1   :  { %v390_v43 = vpop.f32.mrb[8].mxu0 }
 0x1e2   :  { %v394_v44 = vmul.f32 0.0078125, %v390_v43  ;;  %v1031_v46 = vpop.f32.mrb[9].mxu0 }
 0x1e4   :  { %v395_v48 = vmul.f32 %v394_v44, %v394_v44 }
 0x1e6   :  { %v397_v49 = vrot.slane %v395_v48, 7 }
 0x1e8   :  { %v399_v50 = vsub.f32 %v394_v44, %v397_v49 }
 0x1ea   :  { %v400_v51 = vmax.f32 %v399_v50, 0.0 }
 0x1ec   :  { %v401_v52 = vadd.f32 1e-05, %v400_v51 }
 0x1ee   :  { %1187 = vrsqrt.f32 %v401_v52 }
 0x1f8   :  { %v1188_v53 = vpop.eup %1187 }
 0x1f9   :  { %v403_v54 = vmul.f32 %v1188_v53, %v1372_v60 }
 0x1fb   :  { %v405_v55 = vrot.slane %v403_v54, 1  ;;  %v416_v59 = vrot.slane %v403_v54, %v415_v56 }
 0x1fd   :  { %v407_v57 = vmul.f32 %v405_v55, %v394_v44  ;;  %v417_v63 = vmul.f32 %v416_v59, %v1379_v15  ;;  %v426_v3 = vmul.f32 %v416_v59, %v1386_v28  ;;  %v427_v4 = vmul.f32 %v416_v59, %v1384_v26 }
 0x1ff   :  { %v409_v58 = vrot.slane %v407_v57, 6 }
 0x201   :  { %v411_v62 = vsub.f32 %v1372_v60, %v409_v58 }
 0x203   :  { %v421_v0 = vrot.slane %v411_v62, %v420_v61 }
 0x205   :  { %v422_v5 = vadd.f32 %v421_v0, %v417_v63  ;;  %v428_v6 = vadd.f32 %v426_v3, %v421_v0  ;;  %v429_v7 = vadd.f32 %v427_v4, %v421_v0 }
 0x207   :  { %423 = vst [vmem:[#allocation3 + $0x1] sm:$0xff] %v422_v5  ;;  %430 = vst [vmem:[#allocation3 + $0x9] sm:$0xfc] %v428_v6 }
 0x208   :  { %431 = vst [vmem:[#allocation3 + $0x11] sm:$0x3] %v429_v7 }
 0x20e   :  { %v433_v8 = vld [vmem:[#allocation3] sm:$0xff]  ;;  %v434_v9 = vld [vmem:[#allocation3 + $0x8] sm:$0xff] }
 0x20f   :  { %v435_v10 = vld [vmem:[#allocation3 + $0x10] sm:$0xf]  ;;  %v436_v11 = vpack.c.bf16 %v434_v9, %v433_v8 }
 0x210   :  { %v437_v12 = vpack.c.bf16 %v435_v10, %v435_v10 }
 0x211   :  { %631 = vmatmul.mubr.bf16.vlgmr.msra.gmra.mrb[4].mxu1 %v436_v11  ;;  %1048 = vmatprep.mubr.bf16.mxu0 %v436_v11 }
 0x212   :  { %1049 = vmatmul.mubr.bf16.vlgmr.msra.gmra.mrb[12].mxu0 %v437_v12  ;;  %640 = vmatprep.mubr.bf16.mxu1 %v1191_v1 }
 0x213   :  { %1113 = vmatpush3.bf16.msra.mxu1 %v1290_v23 }
 0x214   :  { %1114 = vmatprep.subr.bf16.mxu1 %v1193_v24 }
 0x217   :  { %1116 = vmatpush3.bf16.msra.mxu1 %v1301_v27 }
 0x218   :  { %1117 = vmatprep.subr.bf16.mxu1 %v1193_v24 }
 0x219   :  { %641 = vmatmul.mubr.bf16.gmra.mrb[8].mxu1 %v437_v12 }
 0x21a   :  { %1084 = vmatprep.mubr.msk.f32.mxu1 %vm1194_vm2, %v1192_v2 }
 0x21b   :  { %1119 = vmatpush3.bf16.msra.mxu1 %v1311_v30 }
 0x21c   :  { %1120 = vmatprep.subr.bf16.mxu1 %v1193_v24 }
 0x21f   :  { %1122 = vmatpush3.bf16.msra.mxu1 %v1321_v33 }
 0x220   :  { %1123 = vmatprep.subr.bf16.mxu1 %v1193_v24 }
 0x223   :  { %1125 = vmatpush3.bf16.msra.mxu1 %v1331_v36  ;;  %v727_v36 = vsub.s32 3, %v1366_v47 }
 0x224   :  { %1126 = vmatprep.subr.bf16.mxu1 %v1193_v24 }
 0x225   :  { %v728_v18 = vrot.slane %v1372_v60, %v727_v36 }
 0x227   :  { %1128 = vmatpush3.bf16.msra.mxu1 %v1341_v39 }
 0x228   :  { %1129 = vmatprep.subr.bf16.mxu1 %v1193_v24 }
 0x22b   :  { %1131 = vmatpush3.bf16.msra.mxu1 %v1352_v42 }
 0x22c   :  { %1132 = vmatprep.subr.bf16.mxu1 %v1193_v24 }
 0x22f   :  { %1134 = vmatpush3.bf16.msra.mxu1 %v1362_v45 }
 0x2e4   :  { %v632_v1 = vpop.f32.mrb[4].mxu1 }
 0x2e5   :  { %v634_v2 = vpop.f32.mrb[5].mxu1  ;;  %v1050_v23 = vpop.f32.mrb[12].mxu0 }
 0x2e6   :  { %v636_v27 = vpop.f32.mrb[6].mxu1  ;;  %v683_v30 = vpop.f32.mrb[13].mxu0  ;;  %v699_v26 = vrot.slane %v634_v2, 1  ;;  %v719_v13 = vrot.slane %v1050_v23, 2 }
 0x2e7   :  { %v638_v33 = vpop.f32.mrb[7].mxu1  ;;  %v1051_v15 = vpop.f32.mrb[14].mxu0  ;;  %v706_v14 = vrot.slane %v683_v30, 2 }
 0x2e8   :  { %v700_v28 = vrot.slane %v638_v33, 1  ;;  %v686_v39 = vpop.f32.mrb[15].mxu0 }
 0x2e9   :  { %v707_v16 = vrot.slane %v686_v39, 2 }
 0x2ea   :  { %v701_v42 = vsel %vm241_vm3, %v699_v26, %v700_v28 }
 0x2eb   :  { %v703_v24 = vadd.f32 %v701_v42, %v632_v1  ;;  %v708_v45 = vsel %vm249_vm4, %v706_v14, %v707_v16  ;;  %v720_v17 = vsel %vm249_vm4, %v707_v16, %v719_v13 }
 0x2ec   :  { %v642_v19 = vpop.f32.mrb[8].mxu1 }
 0x2ed   :  { %v710_v20 = vadd.f32 %v708_v45, %v703_v24  ;;  %v644_v21 = vpop.f32.mrb[9].mxu1 }
 0x2ee   :  { %v712_v22 = vrot.slane %v644_v21, 1  ;;  %v646_v25 = vpop.f32.mrb[10].mxu1 }
 0x2ef   :  { %v729_v29 = vadd.f32 %v728_v18, %v710_v20  ;;  %v647_v31 = vpop.f32.mrb[11].mxu1 }
 0x2f0   :  { %v713_v32 = vsel %vm241_vm3, %v700_v28, %v712_v22  ;;  %v717_v34 = vadd.f32 %v712_v22, %v642_v19  ;;  %v872_v22 = vsub.s32 4, %v1366_v47 }
 0x2f1   :  { %v1502_v35 = vmax.f32 %v729_v29, 0.0  ;;  %v716_v37 = vadd.f32 %v713_v32, %v636_v27  ;;  %v877_v32 = vsub.s32 5, %v1366_v47 }
 0x2f2   :  { %v724_v38 = vadd.f32 %v719_v13, %v717_v34 }
 0x2f3   :  { %v742_v40 = vmul.f32 %v1502_v35, %v1502_v35  ;;  %v723_v41 = vadd.f32 %v720_v17, %v716_v37  ;;  %v735_v43 = vrot.slane %v1502_v35, 4 }
 0x2f4   :  { %v732_v44 = vadd.f32 %v728_v18, %v724_v38 }
 0x2f5   :  { %v743_v46 = vrot.slane %v742_v40, 4  ;;  %v731_v48 = vadd.f32 %v728_v18, %v723_v41  ;;  %v736_v51 = vadd.f32 %v735_v43, %v1502_v35 }
 0x2f6   :  { %v734_v49 = vmax.f32 %v732_v44, 0.0 }
 0x2f7   :  { %v733_v50 = vmax.f32 %v731_v48, 0.0  ;;  %v744_v54 = vadd.f32 %v743_v46, %v742_v40  ;;  %v737_v62 = vrot.slane %v736_v51, 2 }
 0x2f8   :  { %v753_v52 = vrot.slane %v734_v49, 2  ;;  %v764_v53 = vmul.f32 %v734_v49, %v734_v49 }
 0x2f9   :  { %v752_v55 = vrot.slane %v733_v50, 2  ;;  %v763_v56 = vmul.f32 %v733_v50, %v733_v50  ;;  %v745_v63 = vrot.slane %v744_v54, 2  ;;  %v738_v5 = vadd.f32 %v737_v62, %v736_v51 }
 0x2fa   :  { %v768_v57 = vrot.slane %v764_v53, 2 }
 0x2fb   :  { %v754_v58 = vsel %vm249_vm4, %v752_v55, %v753_v52  ;;  %v767_v59 = vrot.slane %v763_v56, 2  ;;  %v746_v6 = vadd.f32 %v745_v63, %v744_v54  ;;  %v739_v11 = vrot.slane %v738_v5, 1 }
 0x2fc   :  { %v756_v61 = vrot.slane %v754_v58, 4 }
 0x2fd   :  { %v769_v0 = vsel %vm249_vm4, %v767_v59, %v768_v57  ;;  %v747_v12 = vrot.slane %v746_v6, 1  ;;  %v740_v30 = vadd.f32 %v739_v11, %v738_v5 }
 0x2fe   :  { %v771_v3 = vrot.slane %v769_v0, 4  ;;  %v757_v4 = vadd.f32 %v756_v61, %v754_v58 }
 0x2ff   :  { %v748_v33 = vadd.f32 %v747_v12, %v746_v6 }
 0x300   :  { %v758_v7 = vrot.slane %v757_v4, 2  ;;  %v772_v8 = vadd.f32 %v771_v3, %v769_v0 }
 0x302   :  { %v759_v9 = vadd.f32 %v758_v7, %v757_v4  ;;  %v773_v10 = vrot.slane %v772_v8, 2 }
 0x304   :  { %v760_v1 = vrot.slane %v759_v9, 1  ;;  %v774_v2 = vadd.f32 %v773_v10, %v772_v8 }
 0x306   :  { %v761_v23 = vadd.f32 %v760_v1, %v759_v9  ;;  %v775_v27 = vrot.slane %v774_v2, 1 }
 0x308   :  { %v776_v15 = vadd.f32 %v775_v27, %v774_v2  ;;  %v762_v36 = vadd.f32 %v761_v23, %v740_v30 }
 0x30a   :  { %v777_v26 = vadd.f32 %v776_v15, %v748_v33 }
 0x30c   :  { %v778_v28 = vsel %vm322_vm5, %v762_v36, %v777_v26 }
 0x30d   :  { %1085 = vmatmul.mubr.f32.vlgmr.msra.gmra.mrb[12].mxu1 %v778_v28 }
 0x3e0   :  { %v845_v39 = vpop.f32.mrb[12].mxu1 }
 0x3e1   :  { %v849_v13 = vmul.f32 0.0078125, %v845_v39  ;;  %v1086_v14 = vpop.f32.mrb[13].mxu1 }
 0x3e3   :  { %v850_v16 = vmul.f32 %v849_v13, %v849_v13 }
 0x3e5   :  { %v852_v42 = vrot.slane %v850_v16, 7 }
 0x3e7   :  { %v854_v24 = vsub.f32 %v849_v13, %v852_v42 }
 0x3e9   :  { %v855_v45 = vmax.f32 %v854_v24, 0.0 }
 0x3eb   :  { %v856_v17 = vadd.f32 1e-05, %v855_v45 }
 0x3ed   :  { %1189 = vrsqrt.f32 %v856_v17 }
 0x3f7   :  { %v1190_v18 = vpop.eup %1189 }
 0x3f8   :  { %v859_v19 = vrot.slane %v1190_v18, 5 }
 0x3fa   :  { %v861_v20 = vmul.f32 %v859_v19, %v1372_v60 }
 0x3fc   :  { %v863_v21 = vrot.slane %v861_v20, 4  ;;  %v873_v31 = vrot.slane %v861_v20, %v872_v22 }
 0x3fe   :  { %v865_v25 = vmul.f32 %v863_v21, %v849_v13  ;;  %v874_v37 = vmul.f32 %v873_v31, %v1502_v35  ;;  %v881_v40 = vmul.f32 %v873_v31, %v733_v50  ;;  %v882_v41 = vmul.f32 %v873_v31, %v734_v49 }
 0x400   :  { %v867_v29 = vrot.slane %v865_v25, 3 }
 0x402   :  { %v869_v34 = vsub.f32 %v1372_v60, %v867_v29 }
 0x404   :  { %v878_v38 = vrot.slane %v869_v34, %v877_v32 }
 0x406   :  { %v879_v43 = vadd.f32 %v878_v38, %v874_v37  ;;  %v883_v44 = vadd.f32 %v881_v40, %v878_v38  ;;  %v884_v46 = vadd.f32 %v882_v41, %v878_v38 }
 0x408   :  { %880 = vst [vmem:[%s1530_s5] sm:$0xff] %v879_v43  ;;  %933 = vst [vmem:[%s1530_s5 + $0x6] sm:$0xfc] %v883_v44 }
 0x409   :  { %934 = vst [vmem:[%s1530_s5 + $0xe] sm:$0x3] %v884_v46 }

// kernel: mul.29
= control target key start
LH: loop header
LB: loop body
LE: loop exit
PB: predicated region body
PF: predicated region fallthrough
CT: control target
= control target key end

     0   :  { %vm21_vm0 = vcmask 130048   ;;  %s222_s14 = smov 112   ;;  %s223_s15 = smov 80   ;;  %s310_s0 = inlined_call_operand.vmem [shape: f32[2,2,4,64], index: 0, kind: input, shape index: {}]   ;;  %s311_s1 = inlined_call_operand.vmem [shape: f32[2,2,4,4,16], index: 1, kind: output, shape index: {}]  }
   0x1   :  { %v202_v0 = vld [vmem:[%s310_s0 + $0x4] sm:$0xf]  ;;  %v18_v1 = vld [vmem:[%s310_s0] sm:$0xf]  ;;  %v200_v2 = vld [vmem:[%s310_s0 + $0xc] sm:$0xf] }
   0x2   :  { %17 = vst [vmem:[#allocation1 + $0x8] sm:$0xf] %v202_v0  ;;  %19 = vst [vmem:[#allocation1] sm:$0xf] %v18_v1  ;;  %v201_v3 = vld [vmem:[%s310_s0 + $0x8] sm:$0xf] }
   0x3   :  { %8 = vst [vmem:[#allocation1 + $0x18] sm:$0xf] %v200_v2  ;;  %13 = vst [vmem:[#allocation1 + $0x10] sm:$0xf] %v201_v3  ;;  %s221_s0 = smov 96  }
   0x9   :  { %v55_v4 = vld.sshfl [vmem:[#allocation1] sm:$0xff pattern:$0xba983210]  }
   0xa   :  { %v20_v5 = vld [vmem:[#allocation1] sm:$0xf]   ;;  %56 = vrot.lane.b32.xlu1 %v55_v4, %s221_s0  ;;  %39 = vrot.lane.b32.xlu0 %v55_v4, %s222_s14  ;;  %v24_v6 = vld [vmem:[#allocation1 + $0x8] sm:$0xf]   ;;  %v29_v8 = vld [vmem:[#allocation1 + $0x10] sm:$0xf]  }
   0xb   :  { %v64_v7 = vld.sshfl [vmem:[#allocation1 + $0x10] sm:$0xff pattern:$0xba983210]   ;;  %22 = vst.msk [vmem:[#allocation0] ss:$8 sm:$0xf] %vm21_vm0, %v20_v5  }
   0xc   :  { %27 = vst.msk [vmem:[#allocation0 + $0x20] ss:$8 sm:$0xf] %vm21_vm0, %v24_v6   ;;  %v34_v9 = vld [vmem:[#allocation1 + $0x18] sm:$0xf]  }
   0xd   :  { %32 = vst.msk [vmem:[#allocation0 + $0x40] ss:$8 sm:$0xf] %vm21_vm0, %v29_v8   ;;  %37 = vst.msk [vmem:[#allocation0 + $0x60] ss:$8 sm:$0xf] %vm21_vm0, %v34_v9  }
   0xe   :  { %65 = vrot.lane.b32.xlu1 %v64_v7, %s221_s0  ;;  %48 = vrot.lane.b32.xlu0 %v64_v7, %s222_s14 }
  0x12   :  { %82 = vrot.lane.b32.xlu1 %v64_v7, %s223_s15  ;;  %73 = vrot.lane.b32.xlu0 %v55_v4, %s223_s15 }
  0x7c   :  { %v57_v10 = vpop.permute.xlu1 %56   ;;  %v40_v11 = vpop.permute.xlu0 %39  }
  0x7d   :  { %60 = vst.msk [vmem:[#allocation0 + $0x2] ss:$8 sm:$0xf] %vm21_vm0, %v57_v10   ;;  %62 = vst.msk [vmem:[#allocation0 + $0x2] ss:$8 sm:$0xf0] %vm21_vm0, %v57_v10  }
  0x7e   :  { %43 = vst.msk [vmem:[#allocation0 + $0x1] ss:$8 sm:$0xf] %vm21_vm0, %v40_v11   ;;  %45 = vst.msk [vmem:[#allocation0 + $0x1] ss:$8 sm:$0xf0] %vm21_vm0, %v40_v11  }
  0x80   :  { %v66_v12 = vpop.permute.xlu1 %65   ;;  %v49_v13 = vpop.permute.xlu0 %48  }
  0x81   :  { %69 = vst.msk [vmem:[#allocation0 + $0x42] ss:$8 sm:$0xf] %vm21_vm0, %v66_v12   ;;  %71 = vst.msk [vmem:[#allocation0 + $0x42] ss:$8 sm:$0xf0] %vm21_vm0, %v66_v12  }
  0x82   :  { %52 = vst.msk [vmem:[#allocation0 + $0x41] ss:$8 sm:$0xf] %vm21_vm0, %v49_v13   ;;  %54 = vst.msk [vmem:[#allocation0 + $0x41] ss:$8 sm:$0xf0] %vm21_vm0, %v49_v13  }
  0x84   :  { %v83_v14 = vpop.permute.xlu1 %82   ;;  %v74_v15 = vpop.permute.xlu0 %73  }
  0x85   :  { %86 = vst.msk [vmem:[#allocation0 + $0x43] ss:$8 sm:$0xf] %vm21_vm0, %v83_v14   ;;  %88 = vst.msk [vmem:[#allocation0 + $0x43] ss:$8 sm:$0xf0] %vm21_vm0, %v83_v14  }
  0x86   :  { %77 = vst.msk [vmem:[#allocation0 + $0x3] ss:$8 sm:$0xf] %vm21_vm0, %v74_v15   ;;  %79 = vst.msk [vmem:[#allocation0 + $0x3] ss:$8 sm:$0xf0] %vm21_vm0, %v74_v15  }
  0x8c   :  { %v137_v16 = vld [vmem:[#allocation0 + $0x40] sm:$0xf]  ;;  %v143_v17 = vld [vmem:[#allocation0 + $0x48] sm:$0xf]  ;;  %v149_v18 = vld [vmem:[#allocation0 + $0x50] sm:$0xf] }
  0x8d   :  { %210 = vst [vmem:[%s311_s1 + $0x20] sm:$0xf] %v137_v16  ;;  %211 = vst [vmem:[%s311_s1 + $0x24] sm:$0xf] %v143_v17  ;;  %v155_v19 = vld [vmem:[#allocation0 + $0x58] sm:$0xf] }
  0x8e   :  { %212 = vst [vmem:[%s311_s1 + $0x28] sm:$0xf] %v149_v18  ;;  %v161_v20 = vld [vmem:[#allocation0 + $0x60] sm:$0xf]  ;;  %v167_v21 = vld [vmem:[#allocation0 + $0x68] sm:$0xf] }
  0x8f   :  { %213 = vst [vmem:[%s311_s1 + $0x2c] sm:$0xf] %v155_v19  ;;  %214 = vst [vmem:[%s311_s1 + $0x30] sm:$0xf] %v161_v20  ;;  %v173_v22 = vld [vmem:[#allocation0 + $0x70] sm:$0xf] }
  0x90   :  { %215 = vst [vmem:[%s311_s1 + $0x34] sm:$0xf] %v167_v21  ;;  %v179_v23 = vld [vmem:[#allocation0 + $0x78] sm:$0xf]  ;;  %v92_v24 = vld [vmem:[#allocation0] sm:$0xf] }
  0x91   :  { %216 = vst [vmem:[%s311_s1 + $0x38] sm:$0xf] %v173_v22  ;;  %217 = vst [vmem:[%s311_s1 + $0x3c] sm:$0xf] %v179_v23  ;;  %v96_v25 = vld [vmem:[#allocation0 + $0x8] sm:$0xf] }
  0x92   :  { %94 = vst [vmem:[%s311_s1] sm:$0xf] %v92_v24  ;;  %v101_v26 = vld [vmem:[#allocation0 + $0x10] sm:$0xf]  ;;  %v107_v27 = vld [vmem:[#allocation0 + $0x18] sm:$0xf] }
  0x93   :  { %203 = vst [vmem:[%s311_s1 + $0x4] sm:$0xf] %v96_v25  ;;  %204 = vst [vmem:[%s311_s1 + $0x8] sm:$0xf] %v101_v26  ;;  %v113_v28 = vld [vmem:[#allocation0 + $0x20] sm:$0xf] }
  0x94   :  { %205 = vst [vmem:[%s311_s1 + $0xc] sm:$0xf] %v107_v27  ;;  %v119_v29 = vld [vmem:[#allocation0 + $0x28] sm:$0xf]  ;;  %v125_v30 = vld [vmem:[#allocation0 + $0x30] sm:$0xf] }
  0x95   :  { %206 = vst [vmem:[%s311_s1 + $0x10] sm:$0xf] %v113_v28  ;;  %207 = vst [vmem:[%s311_s1 + $0x14] sm:$0xf] %v119_v29  ;;  %v131_v31 = vld [vmem:[#allocation0 + $0x38] sm:$0xf] }
  0x96   :  { %208 = vst [vmem:[%s311_s1 + $0x18] sm:$0xf] %v125_v30  ;;  %209 = vst [vmem:[%s311_s1 + $0x1c] sm:$0xf] %v131_v31 }

// kernel: enhanced_unet_film_forward.8
= control target key start
LH: loop header
LB: loop body
LE: loop exit
PB: predicated region body
PF: predicated region fallthrough
CT: control target
= control target key end

     0   :  { %vm38_vm0 = vcmask 516096   ;;  %v1144_v1 = vmov 0.0   ;;  %v1145_v2 = vmov 0   ;;  %vm1146_vm1 = vmmov 0   ;;  %s1490_s1 = inlined_call_operand.vmem [shape: bf16[64,384], index: 1, kind: input, shape index: {}]   ;;  %s1491_s0 = inlined_call_operand.vmem [shape: f32[2,4,64], index: 0, kind: input, shape index: {}]   ;;  %s1492_s3 = inlined_call_operand.vmem [shape: f32[128,128], index: 3, kind: input, shape index: {}]   ;;  %s1493_s4 = inlined_call_operand.vmem [shape: f32[6,128], index: 4, kind: input, shape index: {}]   ;;  %s1494_s2 = inlined_call_operand.vmem [shape: bf16[128,384], index: 2, kind: input, shape index: {}]   ;;  %s1495_s5 = inlined_call_operand.vmem [shape: f32[2,4,128], index: 5, kind: output, shape index: {}]  }
   0x1   :  { %v1092_v0 = vld [vmem:[%s1490_s1 + $0x4] ss:$12 sps:$4 sm:$0xff]   ;;  %938 = vmatprep.subr.bf16.mxu1 %v1144_v1  ;;  %390 = vst [vmem:[#allocation3] sm:$0x1] %v1144_v1  ;;  %402 = vst [vmem:[#allocation3 + $0x5] sm:$0x1] %v1144_v1  ;;  %168 = vmatprep.mubr.bf16.mxu0 %v1145_v2  ;;  %v241_v44 = vlaneseq }
   0x2   :  { %403 = vst [vmem:[#allocation3 + $0x6] sm:$0x1] %v1144_v1  ;;  %410 = vst [vmem:[#allocation3 + $0xb] sm:$0x1] %v1144_v1  ;;  %v1094_v3 = vld [vmem:[%s1490_s1] ss:$12 sps:$4 sm:$0xff]   ;;  %946 = vmatprep.mubr.msk.bf16.mxu1 %vm1146_vm1, %v1144_v1  ;;  %136 = vmatprep.subr.bf16.mxu0 %v1092_v0 }
   0x3   :  { %39 = vst.msk [vmem:[#allocation2] sm:$0x1] %vm38_vm0, %v1144_v1  ;;  %43 = vst.msk [vmem:[#allocation2 + $0x5] sm:$0x1] %vm38_vm0, %v1144_v1  ;;  %v1095_v4 = vld [vmem:[%s1490_s1 + $0x8] ss:$12 sps:$4 sm:$0xff]   ;;  %137 = vmatpush1.bf16.msra.mxu0 %v1094_v3 }
   0x4   :  { %44 = vst.msk [vmem:[#allocation2 + $0x6] sm:$0x1] %vm38_vm0, %v1144_v1  ;;  %48 = vst.msk [vmem:[#allocation2 + $0xb] sm:$0x1] %vm38_vm0, %v1144_v1  ;;  %v1096_v5 = vld [vmem:[%s1490_s1 + $0x1c] ss:$12 sps:$4 sm:$0xff]   ;;  %939 = vmatpush3.bf16.msra.mxu1 %v1095_v4 }
   0x5   :  { %v1098_v6 = vld [vmem:[%s1490_s1 + $0x18] ss:$12 sps:$4 sm:$0xff]   ;;  %v1099_v7 = vld [vmem:[%s1490_s1 + $0x20] ss:$12 sps:$4 sm:$0xff]   ;;  %138 = vmatprep.subr.bf16.mxu0 %v1096_v5  ;;  %940 = vmatprep.subr.bf16.mxu1 %v1144_v1  ;;  %v1102_v9 = vld [vmem:[%s1490_s1 + $0x30] ss:$12 sps:$4 sm:$0xff]  }
   0x6   :  { %v1100_v8 = vld [vmem:[%s1490_s1 + $0x34] ss:$12 sps:$4 sm:$0xff]   ;;  %v1103_v10 = vld [vmem:[%s1490_s1 + $0x38] ss:$12 sps:$4 sm:$0xff]   ;;  %vm41_vm2 = vcmask 519168   ;;  %vm132_vm3 = vcmask 523264  }
   0x7   :  { %139 = vmatpush1.bf16.msra.mxu0 %v1098_v6  ;;  %v1104_v11 = vld [vmem:[%s1490_s1 + $0x4c] ss:$12 sps:$4 sm:$0xff]   ;;  %v40_v12 = vld [vmem:[%s1491_s0] sm:$0xf]  ;;  %v849_v13 = vld [vmem:[%s1491_s0 + $0x4] sm:$0xf] }
   0x8   :  { %941 = vmatpush3.bf16.msra.mxu1 %v1099_v7  ;;  %140 = vmatprep.subr.bf16.mxu0 %v1100_v8  ;;  %42 = vst.msk [vmem:[#allocation2 + $0x1] sm:$0xf] %vm41_vm2, %v40_v12  ;;  %47 = vst.msk [vmem:[#allocation2 + $0x7] sm:$0xf] %vm41_vm2, %v849_v13  ;;  %v1106_v14 = vld [vmem:[%s1490_s1 + $0x48] ss:$12 sps:$4 sm:$0xff]  }
   0x9   :  { %942 = vmatprep.subr.bf16.mxu1 %v1144_v1  ;;  %v1107_v15 = vld [vmem:[%s1490_s1 + $0x50] ss:$12 sps:$4 sm:$0xff]   ;;  %v22_v19 = vld [vmem:[%s1492_s3] sm:$0xff]  ;;  %v23_v20 = vld [vmem:[%s1492_s3 + $0x8] sm:$0xff]  ;;  %v1147_v22 = vmov 0.0|0.0   ;;  %v1317_v45 = vshrl.u32 %v241_v44, 7 }
   0xa   :  { %v1242_v21 = vpack.c.bf16 %v23_v20, %v22_v19  ;;  %v24_v23 = vld [vmem:[%s1492_s3 + $0x10] sm:$0xff]  ;;  %v25_v24 = vld [vmem:[%s1492_s3 + $0x18] sm:$0xff]  ;;  %v26_v26 = vld [vmem:[%s1492_s3 + $0x20] sm:$0xff]  ;;  %vm229_vm4 = vcmask 1046528   ;;  %vm251_vm5 = vcmask 1043456   ;;  %vm271_vm6 = vcmask 1041408  }
   0xb   :  { %141 = vmatpush1.bf16.msra.mxu0 %v1102_v9  ;;  %v1253_v25 = vpack.c.bf16 %v25_v24, %v24_v23  ;;  %v27_v27 = vld [vmem:[%s1492_s3 + $0x28] sm:$0xff]  ;;  %v28_v29 = vld [vmem:[%s1492_s3 + $0x30] sm:$0xff]  ;;  %v29_v30 = vld [vmem:[%s1492_s3 + $0x38] sm:$0xff]  ;;  %v243_v48 = vsub.s32 0, %v1317_v45  ;;  %vm300_vm7 = vcmask 1040384  }
   0xc   :  { %943 = vmatpush3.bf16.msra.mxu1 %v1103_v10  ;;  %142 = vmatprep.subr.bf16.mxu0 %v1104_v11  ;;  %v1263_v28 = vpack.c.bf16 %v27_v27, %v26_v26  ;;  %v1273_v31 = vpack.c.bf16 %v29_v30, %v28_v29  ;;  %v30_v32 = vld [vmem:[%s1492_s3 + $0x40] sm:$0xff]  ;;  %v31_v33 = vld [vmem:[%s1492_s3 + $0x48] sm:$0xff]  ;;  %v32_v35 = vld [vmem:[%s1492_s3 + $0x50] sm:$0xff] }
   0xd   :  { %944 = vmatprep.subr.bf16.mxu1 %v1144_v1  ;;  %v1283_v34 = vpack.c.bf16 %v31_v33, %v30_v32  ;;  %v33_v36 = vld [vmem:[%s1492_s3 + $0x58] sm:$0xff]  ;;  %v34_v38 = vld [vmem:[%s1492_s3 + $0x60] sm:$0xff]  ;;  %v35_v39 = vld [vmem:[%s1492_s3 + $0x68] sm:$0xff] }
   0xe   :  { %v1292_v37 = vpack.c.bf16 %v33_v36, %v32_v35  ;;  %v1302_v40 = vpack.c.bf16 %v35_v39, %v34_v38  ;;  %v36_v41 = vld [vmem:[%s1492_s3 + $0x70] sm:$0xff]  ;;  %v37_v42 = vld [vmem:[%s1492_s3 + $0x78] sm:$0xff]  ;;  %v1323_v50 = vld [vmem:[%s1493_s4] sm:$0x3f] }
   0xf   :  { %143 = vmatpush1.bf16.msra.mxu0 %v1106_v14  ;;  %v49_v16 = vld [vmem:[#allocation2] sm:$0xff]  ;;  %v50_v17 = vld [vmem:[#allocation2 + $0x8] sm:$0xf]  ;;  %v1312_v43 = vpack.c.bf16 %v37_v42, %v36_v41  ;;  %v244_v59 = vrot.slane %v1323_v50, %v243_v48 }
  0x10   :  { %945 = vmatpush3.bf16.msra.mxu1 %v1107_v15  ;;  %v51_v18 = vpack.c.bf16 %v50_v17, %v49_v16  ;;  %1040 = vmatprep.subr.bf16.mxu0 %v1147_v22 }
  0x12   :  { %862 = vmatmul.mubr.msk.bf16.vlgmr.msra.gmra.mrb[0].mxu0 %vm132_vm3, %v51_v18 }
  0x13   :  { %947 = vmatmul.mubr.msk.bf16.vlgmr.msra.gmra.mrb[0].mxu1 %vm132_vm3, %v51_v18  ;;  %982 = vmatprep.mubr.msk.f32.mxu0 %vm1146_vm1, %v1144_v1 }
  0x14   :  { %606 = vmatprep.mubr.bf16.mxu1 %v1145_v2  ;;  %1042 = vmatpush3.bf16.msra.mxu0 %v1242_v21 }
  0x15   :  { %1043 = vmatprep.subr.bf16.mxu0 %v1147_v22 }
  0x18   :  { %1045 = vmatpush3.bf16.msra.mxu0 %v1253_v25 }
  0x19   :  { %1046 = vmatprep.subr.bf16.mxu0 %v1147_v22 }
  0x1c   :  { %1048 = vmatpush3.bf16.msra.mxu0 %v1263_v28 }
  0x1d   :  { %1049 = vmatprep.subr.bf16.mxu0 %v1147_v22 }
  0x20   :  { %1051 = vmatpush3.bf16.msra.mxu0 %v1273_v31 }
  0x21   :  { %1052 = vmatprep.subr.bf16.mxu0 %v1147_v22 }
  0x24   :  { %1054 = vmatpush3.bf16.msra.mxu0 %v1283_v34 }
  0x25   :  { %1055 = vmatprep.subr.bf16.mxu0 %v1147_v22 }
  0x28   :  { %1057 = vmatpush3.bf16.msra.mxu0 %v1292_v37 }
  0x29   :  { %1058 = vmatprep.subr.bf16.mxu0 %v1147_v22 }
  0x2c   :  { %1060 = vmatpush3.bf16.msra.mxu0 %v1302_v40 }
  0x2d   :  { %1061 = vmatprep.subr.bf16.mxu0 %v1147_v22 }
  0x30   :  { %1063 = vmatpush3.bf16.msra.mxu0 %v1312_v43 }
  0x31   :  { %985 = vmatprep.subr.bf16.mxu0 %v1144_v1 }
  0xe5   :  { %v170_v46 = vpop.f32.mrb[0].mxu0 }
  0xe6   :  { %v213_v47 = vpop.f32.mrb[0].mxu1  ;;  %v172_v49 = vpop.f32.mrb[1].mxu0 }
  0xe7   :  { %v948_v51 = vpop.f32.mrb[1].mxu1  ;;  %v221_v52 = vrot.slane %v172_v49, 1  ;;  %v225_v53 = vrot.slane %v213_v47, 2  ;;  %v174_v54 = vpop.f32.mrb[2].mxu0 }
  0xe8   :  { %v216_v55 = vpop.f32.mrb[2].mxu1  ;;  %v176_v56 = vpop.f32.mrb[3].mxu0 }
  0xe9   :  { %v949_v57 = vpop.f32.mrb[3].mxu1  ;;  %v223_v58 = vadd.f32 %v221_v52, %v170_v46  ;;  %v230_v60 = vrot.slane %v176_v56, 1  ;;  %v237_v61 = vrot.slane %v216_v55, 2 }
  0xeb   :  { %v227_v62 = vadd.f32 %v225_v53, %v223_v58  ;;  %v231_v63 = vsel %vm229_vm4, %v221_v52, %v230_v60  ;;  %v235_v0 = vadd.f32 %v230_v60, %v174_v54 }
  0xec   :  { %v234_v2 = vadd.f32 %v231_v63, %v170_v46  ;;  %v1108_v63 = vld [vmem:[%s1494_s2] ss:$12 sps:$4 sm:$0xff]  }
  0xed   :  { %v245_v3 = vadd.f32 %v244_v59, %v227_v62  ;;  %v240_v4 = vadd.f32 %v237_v61, %v235_v0  ;;  %v1110_v62 = vld [vmem:[%s1494_s2 + $0x4] ss:$12 sps:$4 sm:$0xff]   ;;  %v1111_v0 = vld [vmem:[%s1494_s2 + $0x8] ss:$12 sps:$4 sm:$0xff]  }
  0xee   :  { %v239_v5 = vadd.f32 %v237_v61, %v234_v2  ;;  %574 = vmatprep.subr.bf16.mxu1 %v1110_v62  ;;  %v1114_v2 = vld [vmem:[%s1494_s2 + $0x1c] ss:$12 sps:$4 sm:$0xff]  }
  0xef   :  { %v1327_v6 = vmax.f32 %v245_v3, 0.0  ;;  %v248_v7 = vadd.f32 %v244_v59, %v240_v4  ;;  %575 = vmatpush1.bf16.msra.mxu1 %v1108_v63  ;;  %v1112_v3 = vld [vmem:[%s1494_s2 + $0x18] ss:$12 sps:$4 sm:$0xff]   ;;  %v1115_v4 = vld [vmem:[%s1494_s2 + $0x20] ss:$12 sps:$4 sm:$0xff]  }
  0xf0   :  { %v247_v8 = vadd.f32 %v244_v59, %v239_v5  ;;  %576 = vmatprep.subr.bf16.mxu1 %v1114_v2  ;;  %v1118_v5 = vld [vmem:[%s1494_s2 + $0x34] ss:$12 sps:$4 sm:$0xff]  }
  0xf1   :  { %v252_v9 = vsel %vm251_vm5, %v1327_v6, 0.0  ;;  %v260_v10 = vmul.f32 %v1327_v6, %v1327_v6  ;;  %v1333_v11 = vmax.f32 %v248_v7, 0.0  ;;  %v1116_v7 = vld [vmem:[%s1494_s2 + $0x30] ss:$12 sps:$4 sm:$0xff]  }
  0xf2   :  { %v253_v12 = vrot.slane %v252_v9, 4  ;;  %v1335_v13 = vmax.f32 %v247_v8, 0.0  ;;  %v1119_v8 = vld [vmem:[%s1494_s2 + $0x38] ss:$12 sps:$4 sm:$0xff]  }
  0xf3   :  { %v261_v14 = vsel %vm251_vm5, %v260_v10, 0.0  ;;  %v273_v15 = vrot.slane %v1333_v11, 6  ;;  %v285_v16 = vmul.f32 %v1333_v11, %v1333_v11  ;;  %577 = vmatpush1.bf16.msra.mxu1 %v1112_v3  ;;  %v1120_v10 = vld [vmem:[%s1494_s2 + $0x48] ss:$12 sps:$4 sm:$0xff]  }
  0xf4   :  { %v254_v17 = vadd.f32 %v253_v12, %v252_v9  ;;  %v262_v18 = vrot.slane %v261_v14, 4  ;;  %v272_v19 = vrot.slane %v1335_v13, 6  ;;  %v284_v20 = vmul.f32 %v1335_v13, %v1335_v13  ;;  %578 = vmatprep.subr.bf16.mxu1 %v1118_v5  ;;  %v1122_v9 = vld [vmem:[%s1494_s2 + $0x4c] ss:$12 sps:$4 sm:$0xff]   ;;  %v1123_v12 = vld [vmem:[%s1494_s2 + $0x50] ss:$12 sps:$4 sm:$0xff]  }
  0xf5   :  { %v289_v23 = vrot.slane %v285_v16, 6  ;;  %v1127_v16 = vld [vmem:[%s1494_s2 + $0x68] ss:$12 sps:$4 sm:$0xff]  }
  0xf6   :  { %v263_v24 = vadd.f32 %v262_v18, %v261_v14  ;;  %v274_v26 = vsel %vm271_vm6, %v272_v19, %v273_v15  ;;  %v288_v27 = vrot.slane %v284_v20, 6  ;;  %v255_v30 = vrot.slane %v254_v17, 2  ;;  %v1126_v14 = vld [vmem:[%s1494_s2 + $0x64] ss:$12 sps:$4 sm:$0xff]   ;;  %v1124_v15 = vld [vmem:[%s1494_s2 + $0x60] ss:$12 sps:$4 sm:$0xff]  }
  0xf7   :  { %v276_v29 = vsel %vm251_vm5, %v274_v26, 0.0  ;;  %579 = vmatpush1.bf16.msra.mxu1 %v1116_v7  ;;  %v1128_v18 = vld [vmem:[%s1494_s2 + $0x78] ss:$12 sps:$4 sm:$0xff]   ;;  %v1131_v19 = vld [vmem:[%s1494_s2 + $0x80] ss:$12 sps:$4 sm:$0xff]  }
  0xf8   :  { %v290_v32 = vsel %vm271_vm6, %v288_v27, %v289_v23  ;;  %v264_v33 = vrot.slane %v263_v24, 2  ;;  %v277_v35 = vrot.slane %v276_v29, 4  ;;  %v256_v41 = vadd.f32 %v255_v30, %v254_v17  ;;  %580 = vmatprep.subr.bf16.mxu1 %v1122_v9  ;;  %v1130_v17 = vld [vmem:[%s1494_s2 + $0x7c] ss:$12 sps:$4 sm:$0xff]   ;;  %v1134_v23 = vld [vmem:[%s1494_s2 + $0x94] ss:$12 sps:$4 sm:$0xff]  }
  0xf9   :  { %v292_v36 = vsel %vm251_vm5, %v290_v32, 0.0  ;;  %v1132_v20 = vld [vmem:[%s1494_s2 + $0x90] ss:$12 sps:$4 sm:$0xff]   ;;  %v1138_v26 = vld [vmem:[%s1494_s2 + $0xac] ss:$12 sps:$4 sm:$0xff]  }
  0xfa   :  { %v278_v38 = vadd.f32 %v277_v35, %v276_v29  ;;  %v293_v39 = vrot.slane %v292_v36, 4  ;;  %v265_v42 = vadd.f32 %v264_v33, %v263_v24  ;;  %v257_v49 = vrot.slane %v256_v41, 1  ;;  %v1135_v24 = vld [vmem:[%s1494_s2 + $0x98] ss:$12 sps:$4 sm:$0xff]   ;;  %v1136_v27 = vld [vmem:[%s1494_s2 + $0xa8] ss:$12 sps:$4 sm:$0xff]  }
  0xfb   :  { %581 = vmatpush1.bf16.msra.mxu1 %v1120_v10  ;;  %v1139_v29 = vld [vmem:[%s1494_s2 + $0xb0] ss:$12 sps:$4 sm:$0xff]  }
  0xfc   :  { %v279_v44 = vrot.slane %v278_v38, 2  ;;  %v294_v46 = vadd.f32 %v293_v39, %v292_v36  ;;  %v266_v51 = vrot.slane %v265_v42, 1  ;;  %v258_v56 = vadd.f32 %v257_v49, %v256_v41  ;;  %582 = vmatprep.subr.bf16.mxu1 %v1126_v14 }
  0xfe   :  { %v280_v47 = vadd.f32 %v279_v44, %v278_v38  ;;  %v295_v48 = vrot.slane %v294_v46, 2  ;;  %v267_v57 = vadd.f32 %v266_v51, %v265_v42 }
  0xff   :  { %583 = vmatpush1.bf16.msra.mxu1 %v1124_v15 }
 0x100   :  { %v281_v52 = vrot.slane %v280_v47, 1  ;;  %v296_v53 = vadd.f32 %v295_v48, %v294_v46  ;;  %584 = vmatprep.subr.bf16.mxu1 %v1130_v17 }
 0x102   :  { %v282_v54 = vadd.f32 %v281_v52, %v280_v47  ;;  %v297_v55 = vrot.slane %v296_v53, 1  ;;  %v393_v47 = vsub.s32 1, %v1317_v45  ;;  %v398_v52 = vsub.s32 2, %v1317_v45 }
 0x103   :  { %585 = vmatpush1.bf16.msra.mxu1 %v1128_v18 }
 0x104   :  { %v298_v58 = vadd.f32 %v297_v55, %v296_v53  ;;  %v283_v59 = vadd.f32 %v282_v54, %v258_v56  ;;  %586 = vmatprep.subr.bf16.mxu1 %v1134_v23 }
 0x106   :  { %v299_v60 = vadd.f32 %v298_v58, %v267_v57 }
 0x107   :  { %587 = vmatpush1.bf16.msra.mxu1 %v1132_v20 }
 0x108   :  { %v301_v61 = vsel %vm300_vm7, %v283_v59, %v299_v60  ;;  %588 = vmatprep.subr.bf16.mxu1 %v1138_v26 }
 0x109   :  { %983 = vmatmul.mubr.f32.vlgmr.msra.gmra.mrb[4].mxu0 %v301_v61 }
 0x10a   :  { %1001 = vmatprep.mubr.msk.bf16.mxu0 %vm1146_vm1, %v1144_v1  ;;  %986 = vmatpush3.bf16.msra.mxu0 %v1111_v0 }
 0x10b   :  { %987 = vmatprep.subr.bf16.mxu0 %v1144_v1  ;;  %589 = vmatpush1.bf16.msra.mxu1 %v1136_v27 }
 0x10c   :  { %1064 = vmatprep.subr.bf16.mxu1 %v1147_v22 }
 0x10e   :  { %988 = vmatpush3.bf16.msra.mxu0 %v1115_v4 }
 0x10f   :  { %989 = vmatprep.subr.bf16.mxu0 %v1144_v1 }
 0x112   :  { %990 = vmatpush3.bf16.msra.mxu0 %v1119_v8 }
 0x113   :  { %991 = vmatprep.subr.bf16.mxu0 %v1144_v1 }
 0x116   :  { %992 = vmatpush3.bf16.msra.mxu0 %v1123_v12 }
 0x117   :  { %993 = vmatprep.subr.bf16.mxu0 %v1144_v1 }
 0x11a   :  { %994 = vmatpush3.bf16.msra.mxu0 %v1127_v16 }
 0x11b   :  { %995 = vmatprep.subr.bf16.mxu0 %v1144_v1 }
 0x11e   :  { %996 = vmatpush3.bf16.msra.mxu0 %v1131_v19 }
 0x11f   :  { %997 = vmatprep.subr.bf16.mxu0 %v1144_v1 }
 0x122   :  { %998 = vmatpush3.bf16.msra.mxu0 %v1135_v24 }
 0x123   :  { %999 = vmatprep.subr.bf16.mxu0 %v1144_v1 }
 0x126   :  { %1000 = vmatpush3.bf16.msra.mxu0 %v1139_v29 }
 0x1dc   :  { %v368_v30 = vpop.f32.mrb[4].mxu0 }
 0x1dd   :  { %v372_v32 = vmul.f32 0.03125, %v368_v30  ;;  %v984_v33 = vpop.f32.mrb[5].mxu0 }
 0x1df   :  { %v373_v35 = vmul.f32 %v372_v32, %v372_v32 }
 0x1e1   :  { %v375_v36 = vrot.slane %v373_v35, 7 }
 0x1e3   :  { %v377_v38 = vsub.f32 %v372_v32, %v375_v36 }
 0x1e5   :  { %v378_v39 = vmax.f32 %v377_v38, 0.0 }
 0x1e7   :  { %v379_v41 = vadd.f32 1e-05, %v378_v39 }
 0x1e9   :  { %1140 = vrsqrt.f32 %v379_v41 }
 0x1f3   :  { %v1141_v42 = vpop.eup %1140 }
 0x1f4   :  { %v381_v44 = vmul.f32 %v1141_v42, %v1323_v50 }
 0x1f6   :  { %v383_v46 = vrot.slane %v381_v44, 1  ;;  %v394_v51 = vrot.slane %v381_v44, %v393_v47 }
 0x1f8   :  { %v385_v48 = vmul.f32 %v383_v46, %v372_v32  ;;  %v395_v54 = vmul.f32 %v394_v51, %v1327_v6  ;;  %v404_v56 = vmul.f32 %v394_v51, %v1335_v13  ;;  %v405_v57 = vmul.f32 %v394_v51, %v1333_v11 }
 0x1fa   :  { %v387_v49 = vrot.slane %v385_v48, 6 }
 0x1fc   :  { %v389_v53 = vsub.f32 %v1323_v50, %v387_v49 }
 0x1fe   :  { %v399_v55 = vrot.slane %v389_v53, %v398_v52 }
 0x200   :  { %v400_v58 = vadd.f32 %v399_v55, %v395_v54  ;;  %v406_v59 = vadd.f32 %v404_v56, %v399_v55  ;;  %v407_v60 = vadd.f32 %v405_v57, %v399_v55 }
 0x202   :  { %401 = vst [vmem:[#allocation3 + $0x1] sm:$0xf] %v400_v58  ;;  %408 = vst [vmem:[#allocation3 + $0x1] sm:$0xc0] %v406_v59 }
 0x203   :  { %409 = vst [vmem:[#allocation3 + $0x9] sm:$0x3] %v407_v60 }
 0x209   :  { %v411_v61 = vld [vmem:[#allocation3] sm:$0xff] }
 0x20a   :  { %v412_v62 = vld [vmem:[#allocation3 + $0x8] sm:$0xf] }
 0x20b   :  { %v413_v63 = vpack.c.bf16 %v412_v62, %v411_v61 }
 0x20d   :  { %607 = vmatmul.mubr.bf16.vlgmr.msra.gmra.mrb[4].mxu1 %v413_v63  ;;  %1002 = vmatmul.mubr.bf16.vlgmr.msra.gmra.mrb[8].mxu0 %v413_v63 }
 0x20e   :  { %1066 = vmatpush3.bf16.msra.mxu1 %v1242_v21  ;;  %1037 = vmatprep.mubr.msk.f32.mxu1 %vm1146_vm1, %v1144_v1 }
 0x20f   :  { %1067 = vmatprep.subr.bf16.mxu1 %v1147_v22 }
 0x212   :  { %1069 = vmatpush3.bf16.msra.mxu1 %v1253_v25  ;;  %v680_v25 = vsub.s32 3, %v1317_v45 }
 0x213   :  { %1070 = vmatprep.subr.bf16.mxu1 %v1147_v22 }
 0x214   :  { %v681_v3 = vrot.slane %v1323_v50, %v680_v25 }
 0x216   :  { %1072 = vmatpush3.bf16.msra.mxu1 %v1263_v28 }
 0x217   :  { %1073 = vmatprep.subr.bf16.mxu1 %v1147_v22 }
 0x21a   :  { %1075 = vmatpush3.bf16.msra.mxu1 %v1273_v31 }
 0x21b   :  { %1076 = vmatprep.subr.bf16.mxu1 %v1147_v22 }
 0x21e   :  { %1078 = vmatpush3.bf16.msra.mxu1 %v1283_v34 }
 0x21f   :  { %1079 = vmatprep.subr.bf16.mxu1 %v1147_v22 }
 0x222   :  { %1081 = vmatpush3.bf16.msra.mxu1 %v1292_v37 }
 0x223   :  { %1082 = vmatprep.subr.bf16.mxu1 %v1147_v22 }
 0x226   :  { %1084 = vmatpush3.bf16.msra.mxu1 %v1302_v40 }
 0x227   :  { %1085 = vmatprep.subr.bf16.mxu1 %v1147_v22 }
 0x22a   :  { %1087 = vmatpush3.bf16.msra.mxu1 %v1312_v43 }
 0x2e0   :  { %v608_v1 = vpop.f32.mrb[4].mxu1  ;;  %v651_v21 = vpop.f32.mrb[8].mxu0 }
 0x2e1   :  { %v610_v28 = vpop.f32.mrb[5].mxu1  ;;  %v1003_v31 = vpop.f32.mrb[9].mxu0  ;;  %v663_v37 = vrot.slane %v651_v21, 2 }
 0x2e2   :  { %v659_v6 = vrot.slane %v610_v28, 1  ;;  %v612_v34 = vpop.f32.mrb[6].mxu1  ;;  %v654_v11 = vpop.f32.mrb[10].mxu0 }
 0x2e3   :  { %v614_v13 = vpop.f32.mrb[7].mxu1  ;;  %v1004_v0 = vpop.f32.mrb[11].mxu0  ;;  %v674_v22 = vrot.slane %v654_v11, 2 }
 0x2e4   :  { %v661_v2 = vadd.f32 %v659_v6, %v608_v1  ;;  %v667_v40 = vrot.slane %v614_v13, 1 }
 0x2e6   :  { %v665_v4 = vadd.f32 %v663_v37, %v661_v2  ;;  %v668_v43 = vsel %vm229_vm4, %v659_v6, %v667_v40  ;;  %v672_v5 = vadd.f32 %v667_v40, %v612_v34 }
 0x2e7   :  { %v671_v7 = vadd.f32 %v668_v43, %v608_v1 }
 0x2e8   :  { %v682_v8 = vadd.f32 %v681_v3, %v665_v4  ;;  %v677_v9 = vadd.f32 %v674_v22, %v672_v5  ;;  %v829_v5 = vsub.s32 4, %v1317_v45 }
 0x2e9   :  { %v676_v10 = vadd.f32 %v674_v22, %v671_v7 }
 0x2ea   :  { %v1458_v12 = vmax.f32 %v682_v8, 0.0  ;;  %v685_v14 = vadd.f32 %v681_v3, %v677_v9 }
 0x2eb   :  { %v684_v15 = vadd.f32 %v681_v3, %v676_v10  ;;  %v834_v10 = vsub.s32 5, %v1317_v45 }
 0x2ec   :  { %v688_v16 = vsel %vm251_vm5, %v1458_v12, 0.0  ;;  %v696_v17 = vmul.f32 %v1458_v12, %v1458_v12  ;;  %v1464_v18 = vmax.f32 %v685_v14, 0.0 }
 0x2ed   :  { %v689_v19 = vrot.slane %v688_v16, 4  ;;  %v686_v20 = vmax.f32 %v684_v15, 0.0 }
 0x2ee   :  { %v697_v23 = vsel %vm251_vm5, %v696_v17, 0.0  ;;  %v708_v24 = vrot.slane %v1464_v18, 6  ;;  %v720_v26 = vmul.f32 %v1464_v18, %v1464_v18 }
 0x2ef   :  { %v690_v27 = vadd.f32 %v689_v19, %v688_v16  ;;  %v698_v29 = vrot.slane %v697_v23, 4  ;;  %v707_v30 = vrot.slane %v686_v20, 6  ;;  %v719_v32 = vmul.f32 %v686_v20, %v686_v20 }
 0x2f0   :  { %v724_v33 = vrot.slane %v720_v26, 6 }
 0x2f1   :  { %v723_v35 = vrot.slane %v719_v32, 6  ;;  %v699_v36 = vadd.f32 %v698_v29, %v697_v23  ;;  %v709_v38 = vsel %vm271_vm6, %v707_v30, %v708_v24  ;;  %v691_v41 = vrot.slane %v690_v27, 2 }
 0x2f2   :  { %v711_v39 = vsel %vm251_vm5, %v709_v38, 0.0 }
 0x2f3   :  { %v700_v42 = vrot.slane %v699_v36, 2  ;;  %v712_v44 = vrot.slane %v711_v39, 4  ;;  %v725_v46 = vsel %vm271_vm6, %v723_v35, %v724_v33  ;;  %v692_v51 = vadd.f32 %v691_v41, %v690_v27 }
 0x2f4   :  { %v727_v47 = vsel %vm251_vm5, %v725_v46, 0.0 }
 0x2f5   :  { %v713_v48 = vadd.f32 %v712_v44, %v711_v39  ;;  %v728_v49 = vrot.slane %v727_v47, 4  ;;  %v701_v52 = vadd.f32 %v700_v42, %v699_v36  ;;  %v693_v57 = vrot.slane %v692_v51, 1 }
 0x2f7   :  { %v714_v53 = vrot.slane %v713_v48, 2  ;;  %v729_v54 = vadd.f32 %v728_v49, %v727_v47  ;;  %v702_v58 = vrot.slane %v701_v52, 1  ;;  %v694_v63 = vadd.f32 %v693_v57, %v692_v51 }
 0x2f9   :  { %v715_v55 = vadd.f32 %v714_v53, %v713_v48  ;;  %v730_v56 = vrot.slane %v729_v54, 2  ;;  %v703_v1 = vadd.f32 %v702_v58, %v701_v52 }
 0x2fb   :  { %v716_v59 = vrot.slane %v715_v55, 1  ;;  %v731_v60 = vadd.f32 %v730_v56, %v729_v54 }
 0x2fd   :  { %v717_v61 = vadd.f32 %v716_v59, %v715_v55  ;;  %v732_v62 = vrot.slane %v731_v60, 1 }
 0x2ff   :  { %v733_v21 = vadd.f32 %v732_v62, %v731_v60  ;;  %v718_v25 = vadd.f32 %v717_v61, %v694_v63 }
 0x301   :  { %v734_v28 = vadd.f32 %v733_v21, %v703_v1 }
 0x303   :  { %v735_v31 = vsel %vm300_vm7, %v718_v25, %v734_v28 }
 0x304   :  { %1038 = vmatmul.mubr.f32.vlgmr.msra.gmra.mrb[8].mxu1 %v735_v31 }
 0x3d7   :  { %v802_v6 = vpop.f32.mrb[8].mxu1 }
 0x3d8   :  { %v806_v34 = vmul.f32 0.03125, %v802_v6  ;;  %v1039_v11 = vpop.f32.mrb[9].mxu1 }
 0x3da   :  { %v807_v13 = vmul.f32 %v806_v34, %v806_v34 }
 0x3dc   :  { %v809_v0 = vrot.slane %v807_v13, 7 }
 0x3de   :  { %v811_v37 = vsub.f32 %v806_v34, %v809_v0 }
 0x3e0   :  { %v812_v2 = vmax.f32 %v811_v37, 0.0 }
 0x3e2   :  { %v813_v3 = vadd.f32 1e-05, %v812_v2 }
 0x3e4   :  { %1142 = vrsqrt.f32 %v813_v3 }
 0x3ee   :  { %v1143_v40 = vpop.eup %1142 }
 0x3ef   :  { %v816_v4 = vrot.slane %v1143_v40, 5 }
 0x3f1   :  { %v818_v22 = vmul.f32 %v816_v4, %v1323_v50 }
 0x3f3   :  { %v820_v43 = vrot.slane %v818_v22, 4  ;;  %v830_v9 = vrot.slane %v818_v22, %v829_v5 }
 0x3f5   :  { %v822_v7 = vmul.f32 %v820_v43, %v806_v34  ;;  %v831_v15 = vmul.f32 %v830_v9, %v1458_v12  ;;  %v838_v17 = vmul.f32 %v830_v9, %v686_v20  ;;  %v839_v19 = vmul.f32 %v830_v9, %v1464_v18 }
 0x3f7   :  { %v824_v8 = vrot.slane %v822_v7, 3 }
 0x3f9   :  { %v826_v14 = vsub.f32 %v1323_v50, %v824_v8 }
 0x3fb   :  { %v835_v16 = vrot.slane %v826_v14, %v834_v10 }
 0x3fd   :  { %v836_v23 = vadd.f32 %v835_v16, %v831_v15  ;;  %v840_v24 = vadd.f32 %v838_v17, %v835_v16  ;;  %v841_v26 = vadd.f32 %v839_v19, %v835_v16 }
 0x3ff   :  { %837 = vst [vmem:[%s1495_s5] sm:$0xf] %v836_v23  ;;  %888 = vst [vmem:[%s1495_s5 - $0x2] sm:$0xc0] %v840_v24 }
 0x400   :  { %889 = vst [vmem:[%s1495_s5 + $0x6] sm:$0x3] %v841_v26 }

// kernel: mul.36
= control target key start
LH: loop header
LB: loop body
LE: loop exit
PB: predicated region body
PF: predicated region fallthrough
CT: control target
= control target key end

     0   :  { %vm3_vm0 = vcmask 64512   ;;  %s365_s12 = smov 120   ;;  %s366_s30 = smov 112   ;;  %s650_s0 = inlined_call_operand.vmem [shape: f32[2,2,8,64], index: 0, kind: input, shape index: {}]   ;;  %s651_s1 = inlined_call_operand.vmem [shape: f32[2,2,8,8,8], index: 1, kind: output, shape index: {}]  }
   0x1   :  { %v286_v0 = vld [vmem:[%s650_s0 + $0x10] sm:$0xff]   ;;  %v27_v1 = vld [vmem:[%s650_s0] sm:$0xff]   ;;  %v289_v2 = vld [vmem:[%s650_s0 + $0x18] sm:$0xff]   ;;  %s367_s2 = smov 104   ;;  %s368_s3 = smov 96  }
   0x2   :  { %46 = vrot.lane.b32.xlu1 %v286_v0, %s365_s12  ;;  %28 = vrot.lane.b32.xlu0 %v27_v1, %s365_s12  ;;  %v283_v3 = vld [vmem:[%s650_s0 + $0x8] sm:$0xff]   ;;  %4 = vst.msk [vmem:[%s651_s1] ss:$8 sm:$0xf] %vm3_vm0, %v27_v1   ;;  %s369_s4 = smov 88   ;;  %s370_s5 = smov 80  }
   0x3   :  { %5 = vst.msk [vmem:[%s651_s1] ss:$8 sm:$0xf0] %vm3_vm0, %v27_v1   ;;  %276 = vst.msk [vmem:[%s651_s1 + $0x80] ss:$8 sm:$0xf] %vm3_vm0, %v286_v0  }
   0x4   :  { %277 = vst.msk [vmem:[%s651_s1 + $0x80] ss:$8 sm:$0xf0] %vm3_vm0, %v286_v0   ;;  %279 = vst.msk [vmem:[%s651_s1 + $0xc0] ss:$8 sm:$0xf] %vm3_vm0, %v289_v2  }
   0x5   :  { %280 = vst.msk [vmem:[%s651_s1 + $0xc0] ss:$8 sm:$0xf0] %vm3_vm0, %v289_v2   ;;  %273 = vst.msk [vmem:[%s651_s1 + $0x40] ss:$8 sm:$0xf] %vm3_vm0, %v283_v3  }
   0x6   :  { %274 = vst.msk [vmem:[%s651_s1 + $0x40] ss:$8 sm:$0xf0] %vm3_vm0, %v283_v3   ;;  %55 = vrot.lane.b32.xlu1 %v289_v2, %s365_s12  ;;  %37 = vrot.lane.b32.xlu0 %v283_v3, %s365_s12  ;;  %s371_s6 = smov 72  }
   0xa   :  { %72 = vrot.lane.b32.xlu1 %v283_v3, %s366_s30  ;;  %63 = vrot.lane.b32.xlu0 %v27_v1, %s366_s30 }
   0xe   :  { %90 = vrot.lane.b32.xlu1 %v289_v2, %s366_s30  ;;  %81 = vrot.lane.b32.xlu0 %v286_v0, %s366_s30 }
  0x12   :  { %107 = vrot.lane.b32.xlu1 %v283_v3, %s367_s2  ;;  %98 = vrot.lane.b32.xlu0 %v27_v1, %s367_s2 }
  0x16   :  { %125 = vrot.lane.b32.xlu1 %v289_v2, %s367_s2  ;;  %116 = vrot.lane.b32.xlu0 %v286_v0, %s367_s2 }
  0x1a   :  { %142 = vrot.lane.b32.xlu1 %v283_v3, %s368_s3  ;;  %133 = vrot.lane.b32.xlu0 %v27_v1, %s368_s3 }
  0x1e   :  { %160 = vrot.lane.b32.xlu1 %v289_v2, %s368_s3  ;;  %151 = vrot.lane.b32.xlu0 %v286_v0, %s368_s3 }
  0x22   :  { %177 = vrot.lane.b32.xlu1 %v283_v3, %s369_s4  ;;  %168 = vrot.lane.b32.xlu0 %v27_v1, %s369_s4 }
  0x26   :  { %195 = vrot.lane.b32.xlu1 %v289_v2, %s369_s4  ;;  %186 = vrot.lane.b32.xlu0 %v286_v0, %s369_s4 }
  0x2a   :  { %212 = vrot.lane.b32.xlu1 %v283_v3, %s370_s5  ;;  %203 = vrot.lane.b32.xlu0 %v27_v1, %s370_s5 }
  0x2e   :  { %230 = vrot.lane.b32.xlu1 %v289_v2, %s370_s5  ;;  %221 = vrot.lane.b32.xlu0 %v286_v0, %s370_s5 }
  0x32   :  { %247 = vrot.lane.b32.xlu1 %v283_v3, %s371_s6  ;;  %238 = vrot.lane.b32.xlu0 %v27_v1, %s371_s6 }
  0x36   :  { %265 = vrot.lane.b32.xlu1 %v289_v2, %s371_s6  ;;  %256 = vrot.lane.b32.xlu0 %v286_v0, %s371_s6 }
  0x74   :  { %v47_v4 = vpop.permute.xlu1 %46   ;;  %v29_v5 = vpop.permute.xlu0 %28  }
  0x75   :  { %287 = vst.msk [vmem:[%s651_s1 + $0x81] ss:$8 sm:$0xf] %vm3_vm0, %v47_v4   ;;  %288 = vst.msk [vmem:[%s651_s1 + $0x81] ss:$8 sm:$0xf0] %vm3_vm0, %v47_v4  }
  0x76   :  { %281 = vst.msk [vmem:[%s651_s1 + $0x1] ss:$8 sm:$0xf] %vm3_vm0, %v29_v5   ;;  %282 = vst.msk [vmem:[%s651_s1 + $0x1] ss:$8 sm:$0xf0] %vm3_vm0, %v29_v5  }
  0x78   :  { %v56_v6 = vpop.permute.xlu1 %55   ;;  %v38_v7 = vpop.permute.xlu0 %37  }
  0x79   :  { %290 = vst.msk [vmem:[%s651_s1 + $0xc1] ss:$8 sm:$0xf] %vm3_vm0, %v56_v6   ;;  %291 = vst.msk [vmem:[%s651_s1 + $0xc1] ss:$8 sm:$0xf0] %vm3_vm0, %v56_v6  }
  0x7a   :  { %284 = vst.msk [vmem:[%s651_s1 + $0x41] ss:$8 sm:$0xf] %vm3_vm0, %v38_v7   ;;  %285 = vst.msk [vmem:[%s651_s1 + $0x41] ss:$8 sm:$0xf0] %vm3_vm0, %v38_v7  }
  0x7c   :  { %v73_v8 = vpop.permute.xlu1 %72   ;;  %v64_v9 = vpop.permute.xlu0 %63  }
  0x7d   :  { %295 = vst.msk [vmem:[%s651_s1 + $0x42] ss:$8 sm:$0xf] %vm3_vm0, %v73_v8   ;;  %296 = vst.msk [vmem:[%s651_s1 + $0x42] ss:$8 sm:$0xf0] %vm3_vm0, %v73_v8  }
  0x7e   :  { %292 = vst.msk [vmem:[%s651_s1 + $0x2] ss:$8 sm:$0xf] %vm3_vm0, %v64_v9   ;;  %293 = vst.msk [vmem:[%s651_s1 + $0x2] ss:$8 sm:$0xf0] %vm3_vm0, %v64_v9  }
  0x80   :  { %v91_v10 = vpop.permute.xlu1 %90   ;;  %v82_v11 = vpop.permute.xlu0 %81  }
  0x81   :  { %301 = vst.msk [vmem:[%s651_s1 + $0xc2] ss:$8 sm:$0xf] %vm3_vm0, %v91_v10   ;;  %302 = vst.msk [vmem:[%s651_s1 + $0xc2] ss:$8 sm:$0xf0] %vm3_vm0, %v91_v10  }
  0x82   :  { %298 = vst.msk [vmem:[%s651_s1 + $0x82] ss:$8 sm:$0xf] %vm3_vm0, %v82_v11   ;;  %299 = vst.msk [vmem:[%s651_s1 + $0x82] ss:$8 sm:$0xf0] %vm3_vm0, %v82_v11  }
  0x84   :  { %v108_v12 = vpop.permute.xlu1 %107   ;;  %v99_v13 = vpop.permute.xlu0 %98  }
  0x85   :  { %306 = vst.msk [vmem:[%s651_s1 + $0x43] ss:$8 sm:$0xf] %vm3_vm0, %v108_v12   ;;  %307 = vst.msk [vmem:[%s651_s1 + $0x43] ss:$8 sm:$0xf0] %vm3_vm0, %v108_v12  }
  0x86   :  { %303 = vst.msk [vmem:[%s651_s1 + $0x3] ss:$8 sm:$0xf] %vm3_vm0, %v99_v13   ;;  %304 = vst.msk [vmem:[%s651_s1 + $0x3] ss:$8 sm:$0xf0] %vm3_vm0, %v99_v13  }
  0x88   :  { %v126_v14 = vpop.permute.xlu1 %125   ;;  %v117_v15 = vpop.permute.xlu0 %116  }
  0x89   :  { %312 = vst.msk [vmem:[%s651_s1 + $0xc3] ss:$8 sm:$0xf] %vm3_vm0, %v126_v14   ;;  %313 = vst.msk [vmem:[%s651_s1 + $0xc3] ss:$8 sm:$0xf0] %vm3_vm0, %v126_v14  }
  0x8a   :  { %309 = vst.msk [vmem:[%s651_s1 + $0x83] ss:$8 sm:$0xf] %vm3_vm0, %v117_v15   ;;  %310 = vst.msk [vmem:[%s651_s1 + $0x83] ss:$8 sm:$0xf0] %vm3_vm0, %v117_v15  }
  0x8c   :  { %v143_v16 = vpop.permute.xlu1 %142   ;;  %v134_v17 = vpop.permute.xlu0 %133  }
  0x8d   :  { %317 = vst.msk [vmem:[%s651_s1 + $0x44] ss:$8 sm:$0xf] %vm3_vm0, %v143_v16   ;;  %318 = vst.msk [vmem:[%s651_s1 + $0x44] ss:$8 sm:$0xf0] %vm3_vm0, %v143_v16  }
  0x8e   :  { %314 = vst.msk [vmem:[%s651_s1 + $0x4] ss:$8 sm:$0xf] %vm3_vm0, %v134_v17   ;;  %315 = vst.msk [vmem:[%s651_s1 + $0x4] ss:$8 sm:$0xf0] %vm3_vm0, %v134_v17  }
  0x90   :  { %v161_v18 = vpop.permute.xlu1 %160   ;;  %v152_v19 = vpop.permute.xlu0 %151  }
  0x91   :  { %323 = vst.msk [vmem:[%s651_s1 + $0xc4] ss:$8 sm:$0xf] %vm3_vm0, %v161_v18   ;;  %324 = vst.msk [vmem:[%s651_s1 + $0xc4] ss:$8 sm:$0xf0] %vm3_vm0, %v161_v18  }
  0x92   :  { %320 = vst.msk [vmem:[%s651_s1 + $0x84] ss:$8 sm:$0xf] %vm3_vm0, %v152_v19   ;;  %321 = vst.msk [vmem:[%s651_s1 + $0x84] ss:$8 sm:$0xf0] %vm3_vm0, %v152_v19  }
  0x94   :  { %v178_v20 = vpop.permute.xlu1 %177   ;;  %v169_v21 = vpop.permute.xlu0 %168  }
  0x95   :  { %328 = vst.msk [vmem:[%s651_s1 + $0x45] ss:$8 sm:$0xf] %vm3_vm0, %v178_v20   ;;  %329 = vst.msk [vmem:[%s651_s1 + $0x45] ss:$8 sm:$0xf0] %vm3_vm0, %v178_v20  }
  0x96   :  { %325 = vst.msk [vmem:[%s651_s1 + $0x5] ss:$8 sm:$0xf] %vm3_vm0, %v169_v21   ;;  %326 = vst.msk [vmem:[%s651_s1 + $0x5] ss:$8 sm:$0xf0] %vm3_vm0, %v169_v21  }
  0x98   :  { %v196_v22 = vpop.permute.xlu1 %195   ;;  %v187_v23 = vpop.permute.xlu0 %186  }
  0x99   :  { %334 = vst.msk [vmem:[%s651_s1 + $0xc5] ss:$8 sm:$0xf] %vm3_vm0, %v196_v22   ;;  %335 = vst.msk [vmem:[%s651_s1 + $0xc5] ss:$8 sm:$0xf0] %vm3_vm0, %v196_v22  }
  0x9a   :  { %331 = vst.msk [vmem:[%s651_s1 + $0x85] ss:$8 sm:$0xf] %vm3_vm0, %v187_v23   ;;  %332 = vst.msk [vmem:[%s651_s1 + $0x85] ss:$8 sm:$0xf0] %vm3_vm0, %v187_v23  }
  0x9c   :  { %v213_v24 = vpop.permute.xlu1 %212   ;;  %v204_v25 = vpop.permute.xlu0 %203  }
  0x9d   :  { %339 = vst.msk [vmem:[%s651_s1 + $0x46] ss:$8 sm:$0xf] %vm3_vm0, %v213_v24   ;;  %340 = vst.msk [vmem:[%s651_s1 + $0x46] ss:$8 sm:$0xf0] %vm3_vm0, %v213_v24  }
  0x9e   :  { %336 = vst.msk [vmem:[%s651_s1 + $0x6] ss:$8 sm:$0xf] %vm3_vm0, %v204_v25   ;;  %337 = vst.msk [vmem:[%s651_s1 + $0x6] ss:$8 sm:$0xf0] %vm3_vm0, %v204_v25  }
  0xa0   :  { %v231_v26 = vpop.permute.xlu1 %230   ;;  %v222_v27 = vpop.permute.xlu0 %221  }
  0xa1   :  { %345 = vst.msk [vmem:[%s651_s1 + $0xc6] ss:$8 sm:$0xf] %vm3_vm0, %v231_v26   ;;  %346 = vst.msk [vmem:[%s651_s1 + $0xc6] ss:$8 sm:$0xf0] %vm3_vm0, %v231_v26  }
  0xa2   :  { %342 = vst.msk [vmem:[%s651_s1 + $0x86] ss:$8 sm:$0xf] %vm3_vm0, %v222_v27   ;;  %343 = vst.msk [vmem:[%s651_s1 + $0x86] ss:$8 sm:$0xf0] %vm3_vm0, %v222_v27  }
  0xa4   :  { %v248_v28 = vpop.permute.xlu1 %247   ;;  %v239_v29 = vpop.permute.xlu0 %238  }
  0xa5   :  { %350 = vst.msk [vmem:[%s651_s1 + $0x47] ss:$8 sm:$0xf] %vm3_vm0, %v248_v28   ;;  %351 = vst.msk [vmem:[%s651_s1 + $0x47] ss:$8 sm:$0xf0] %vm3_vm0, %v248_v28  }
  0xa6   :  { %347 = vst.msk [vmem:[%s651_s1 + $0x7] ss:$8 sm:$0xf] %vm3_vm0, %v239_v29   ;;  %348 = vst.msk [vmem:[%s651_s1 + $0x7] ss:$8 sm:$0xf0] %vm3_vm0, %v239_v29  }
  0xa8   :  { %v266_v30 = vpop.permute.xlu1 %265   ;;  %v257_v31 = vpop.permute.xlu0 %256  }
  0xa9   :  { %356 = vst.msk [vmem:[%s651_s1 + $0xc7] ss:$8 sm:$0xf] %vm3_vm0, %v266_v30   ;;  %357 = vst.msk [vmem:[%s651_s1 + $0xc7] ss:$8 sm:$0xf0] %vm3_vm0, %v266_v30  }
  0xaa   :  { %353 = vst.msk [vmem:[%s651_s1 + $0x87] ss:$8 sm:$0xf] %vm3_vm0, %v257_v31   ;;  %354 = vst.msk [vmem:[%s651_s1 + $0x87] ss:$8 sm:$0xf0] %vm3_vm0, %v257_v31  }

// kernel: enhanced_unet_film_forward.9
= control target key start
LH: loop header
LB: loop body
LE: loop exit
PB: predicated region body
PF: predicated region fallthrough
CT: control target
= control target key end

     0   :  { %s2271_s27 = smov 0   ;;  %s2653_s0 = inlined_call_operand.vmem [shape: f32[2,4,128], index: 0, kind: input, shape index: {}]   ;;  %s2654_s1 = inlined_call_operand.vmem [shape: f32[2,2,4,128], index: 1, kind: input, shape index: {}]   ;;  %s2655_s2 = inlined_call_operand.vmem [shape: f32[2,9,128], index: 2, kind: input, shape index: {}]   ;;  %s2656_s3 = inlined_call_operand.vmem [shape: bf16[2,256,384], index: 3, kind: input, shape index: {}]   ;;  %s2657_s4 = inlined_call_operand.vmem [shape: bf16[2,128,384], index: 4, kind: input, shape index: {}]   ;;  %s2658_s5 = inlined_call_operand.vmem [shape: f32[128,128], index: 5, kind: input, shape index: {}]   ;;  %s2659_s6 = inlined_call_operand.vmem [shape: f32[64,64], index: 6, kind: input, shape index: {}]   ;;  %s2660_s7 = inlined_call_operand.vmem [shape: f32[2,3,64], index: 7, kind: input, shape index: {}]   ;;  %s2661_s8 = inlined_call_operand.vmem [shape: f32[2,2,4,64], index: 8, kind: output, shape index: {}]  }
   0x1 LB: > { %s1759_s28 = sadd.s32 4294967295, %s2220_s27   ;;  %p1763_p0 = scmp.ge.s32.totalorder %s2220_s27, 1  ;;  %s2220_s27 = sphi %s2271_s27, %s18_s27  }
   0x2   : > { %p301_p1 = scmp.lt.s32.totalorder %s2220_s27, 3 }
   0x4   : > { %p302_p2 = pnand %p1763_p0, %p301_p1 }
   0x5   : > { %v387_v0 = vld [vmem:[%s2658_s5] sm:$0xff] (!%p302_p2)  ;;  %v388_v1 = vld [vmem:[%s2658_s5 + $0x8] sm:$0xff] (!%p302_p2)  ;;  %v389_v2 = vld [vmem:[%s2658_s5 + $0x10] sm:$0xff] (!%p302_p2)  ;;  %v404_v3 = vlaneseq (!%p302_p2)  ;;  %v2222_v4 = vmov (!%p302_p2), 0.0|0.0   ;;  %vm2223_vm0 = vmmov (!%p302_p2), 0   ;;  %v2224_v7 = vmov (!%p302_p2), 0.0  }
   0x6   : > { %305 = sbr.rel (%p302_p2) target bundleno = 1304 (0x518), region = 52  ;;  %2038 = vmatprep.subr.bf16.mxu0 (!%p302_p2), %v2222_v4  ;;  %v2289_v5 = vpack.c.bf16 (!%p302_p2), %v388_v1, %v387_v0  ;;  %v390_v6 = vld [vmem:[%s2658_s5 + $0x18] sm:$0xff] (!%p302_p2)  ;;  %1961 = vmatprep.mubr.msk.f32.mxu0 (!%p302_p2), %vm2223_vm0, %v2224_v7  ;;  %1189 = vst [vmem:[#allocation3] sm:$0x1] (!%p302_p2), %v2224_v7  ;;  %1201 = vst [vmem:[#allocation3 + $0x5] sm:$0x1] (!%p302_p2), %v2224_v7 }
   0x7   : > { %1202 = vst [vmem:[#allocation3 + $0x6] sm:$0x1] (!%p302_p2), %v2224_v7  ;;  %1209 = vst [vmem:[#allocation3 + $0xb] sm:$0x1] (!%p302_p2), %v2224_v7  ;;  %p354_p3 = scmp.lt.s32.totalorder (!%p302_p2), %s1759_s28, 1  ;;  %v2301_v8 = vshrl.u32 (!%p302_p2), %v404_v3, 7  ;;  %v2304_v9 = vpack.c.bf16 (!%p302_p2), %v390_v6, %v389_v2 }
   0x8   : > { %2040 = vmatpush3.bf16.msra.mxu0 (!%p302_p2), %v2289_v5  ;;  %v391_v10 = vld [vmem:[%s2658_s5 + $0x20] sm:$0xff] (!%p302_p2)  ;;  %v392_v11 = vld [vmem:[%s2658_s5 + $0x28] sm:$0xff] (!%p302_p2)  ;;  %v393_v14 = vld [vmem:[%s2658_s5 + $0x30] sm:$0xff] (!%p302_p2)  ;;  %vm415_vm1 = vcmask (!%p302_p2), 1043456   ;;  %vm459_vm2 = vcmask (!%p302_p2), 1040384   ;;  %vm461_vm3 = vcmask (!%p302_p2), 1041408  }
   0x9   : > { %2041 = vmatprep.subr.bf16.mxu0 (!%p302_p2), %v2222_v4  ;;  %v2316_v12 = vsub.s32 (!%p302_p2), 0, %v2301_v8  ;;  %v2321_v13 = vsub.s32 (!%p302_p2), 2, %v2301_v8  ;;  %v394_v15 = vld [vmem:[%s2658_s5 + $0x38] sm:$0xff] (!%p302_p2)  ;;  %v2335_v16 = vsub.s32 (!%p302_p2), 1, %v2301_v8  ;;  %v441_v17 = vsub.s32 (!%p302_p2), 3, %v2301_v8  ;;  %v395_v26 = vld [vmem:[%s2658_s5 + $0x40] sm:$0xff] (!%p302_p2) }
   0xa   : > { %v2339_v18 = vpack.c.bf16 (!%p302_p2), %v392_v11, %v391_v10  ;;  %v403_v20 = vld [vmem:[%s2653_s0] sm:$0xf] (!%p302_p2)  ;;  %v1773_v21 = vld [vmem:[%s2653_s0 + $0x4] sm:$0xf] (!%p302_p2)  ;;  %v2372_v32 = vpack.c.bf16 (!%p302_p2), %v394_v15, %v393_v14  ;;  %v396_v33 = vld [vmem:[%s2658_s5 + $0x48] sm:$0xff] (!%p302_p2)  ;;  %vm463_vm4 = vcmask (!%p302_p2), 1042432  }
   0xb   : > { %v397_v38 = vld [vmem:[%s2658_s5 + $0x50] sm:$0xff] (!%p302_p2)  ;;  %v398_v39 = vld [vmem:[%s2658_s5 + $0x58] sm:$0xff] (!%p302_p2)  ;;  %v2393_v44 = vpack.c.bf16 (!%p302_p2), %v396_v33, %v395_v26  ;;  %v399_v49 = vld [vmem:[%s2658_s5 + $0x60] sm:$0xff] (!%p302_p2)  ;;  %vm566_vm5 = vcmp.lt.s32.totalorder (!%p302_p2), %v404_v3, 256  ;;  %vm1031_vm6 = vcmask (!%p302_p2), 1046528   ;;  %vm1495_vm7 = vcmask (!%p302_p2), 519168  }
   0xc   : > { %2043 = vmatpush3.bf16.msra.mxu0 (!%p302_p2), %v2304_v9  ;;  %v400_v50 = vld [vmem:[%s2658_s5 + $0x68] sm:$0xff] (!%p302_p2)  ;;  %v2412_v54 = vpack.c.bf16 (!%p302_p2), %v398_v39, %v397_v38  ;;  %v401_v10 = vld [vmem:[%s2658_s5 + $0x70] sm:$0xff] (!%p302_p2)  ;;  %v402_v11 = vld [vmem:[%s2658_s5 + $0x78] sm:$0xff] (!%p302_p2)  ;;  %568 = vst.msk [vmem:[#allocation2] ss:$8 sm:$0x3] (!%p302_p2), %vm566_vm5, %v2224_v7 }
   0xd   : > { %s2663_s28 = smov (!%p354_p3, %s1759_s28), 1  ;;  %2044 = vmatprep.subr.bf16.mxu0 %v2222_v4  ;;  %v2420_v6 = vpack.c.bf16 %v400_v50, %v399_v49  ;;  %v2431_v26 = vpack.c.bf16 %v402_v11, %v401_v10  ;;  %580 = vst.msk [vmem:[#allocation2 + $0x5] ss:$8 sm:$0x3] %vm566_vm5, %v2224_v7  ;;  %vm1544_vm8 = vcmask 523264   ;;  %vm1652_vm9 = vcmask 523270  }
   0xe   : > { %s1853_s19 = sshll.u32 %s2663_s28, 4  ;;  %s2098_s20 = smul.u32 384, %s2663_s28  ;;  %595 = vst.msk [vmem:[#allocation2 + $0x6] ss:$8 sm:$0x3] %vm566_vm5, %v2224_v7  ;;  %vm1654_vm10 = vcmask 517120  }
   0xf   : > { %s2332_s29 = scalar_lea.vmem %s2655_s2, %s1853_s19  ;;  %s2099_s23 = smul.u32 192, %s2663_s28  ;;  %610 = vst.msk [vmem:[#allocation2 + $0x13] ss:$8 sm:$0x3] %vm566_vm5, %v2224_v7 }
  0x10   : > { %s2344_s10 = scalar_lea.vmem %s2656_s3, %s2098_s20  ;;  %v2347_v19 = vld [vmem:[%s2332_s29] sm:$0xff]  ;;  %2046 = vmatpush3.bf16.msra.mxu0 %v2339_v18  ;;  %s1852_s17 = sshll.u32 %s2663_s28, 3 }
  0x11   : > { %v407_v22 = vrot.slane %v2347_v19, %v2316_v12  ;;  %v436_v23 = vrot.slane %v2347_v19, %v2321_v13  ;;  %v2112_v24 = vld [vmem:[%s2344_s10 + $0x4] ss:$12 sps:$4 sm:$0xff]   ;;  %v2114_v25 = vld [vmem:[%s2344_s10] ss:$12 sps:$4 sm:$0xff]   ;;  %v413_v28 = vrot.slane %v2347_v19, %v2335_v16  ;;  %v442_v30 = vrot.slane %v2347_v19, %v441_v17  ;;  %v2115_v31 = vld [vmem:[%s2344_s10 + $0x1c] ss:$12 sps:$4 sm:$0xff]   ;;  %2047 = vmatprep.subr.bf16.mxu0 %v2222_v4  ;;  %s2441_s16 = scalar_lea.vmem %s2657_s4, %s2099_s23  ;;  %s358_s20 = scalar_lea.vmem %s2654_s1, %s1852_s17 }
  0x12   : > { %938 = vmatprep.subr.bf16.mxu1 %v2112_v24  ;;  %v2117_v34 = vld [vmem:[%s2344_s10 + $0x18] ss:$12 sps:$4 sm:$0xff]   ;;  %v2118_v37 = vld [vmem:[%s2344_s10 + $0x34] ss:$12 sps:$4 sm:$0xff]   ;;  %v2120_v42 = vld [vmem:[%s2344_s10 + $0x30] ss:$12 sps:$4 sm:$0xff]   ;;  %s382_s22 = scalar_lea.vmem %s2661_s8, %s1852_s17 }
  0x13   : > { %v408_v27 = vmul.f32 %v407_v22, %v403_v20  ;;  %v437_v29 = vmul.f32 %v1773_v21, %v436_v23  ;;  %939 = vmatpush1.bf16.msra.mxu1 %v2114_v25  ;;  %v2121_v43 = vld [vmem:[%s2344_s10 + $0x4c] ss:$12 sps:$4 sm:$0xff]   ;;  %v2123_v53 = vld [vmem:[%s2344_s10 + $0x48] ss:$12 sps:$4 sm:$0xff]   ;;  %v2124_v57 = vld [vmem:[%s2344_s10 + $0x64] ss:$12 sps:$4 sm:$0xff]  }
  0x14   : > { %940 = vmatprep.subr.bf16.mxu1 %v2115_v31  ;;  %2049 = vmatpush3.bf16.msra.mxu0 %v2372_v32  ;;  %v2126_v2 = vld [vmem:[%s2344_s10 + $0x60] ss:$12 sps:$4 sm:$0xff]   ;;  %v2129_v38 = vld [vmem:[%s2344_s10 + $0x78] ss:$12 sps:$4 sm:$0xff]   ;;  %v2140_v49 = vld [vmem:[%s2344_s10 + $0x8] ss:$12 sps:$4 sm:$0xff]  }
  0x15   : > { %v409_v35 = vadd.f32 %v408_v27, %v403_v20  ;;  %v438_v36 = vadd.f32 %v1773_v21, %v437_v29  ;;  %2050 = vmatprep.subr.bf16.mxu0 %v2222_v4  ;;  %v2130_v39 = vld [vmem:[%s2344_s10 + $0x94] ss:$12 sps:$4 sm:$0xff]   ;;  %v2141_v50 = vld [vmem:[%s2344_s10 + $0xdc] ss:$12 sps:$4 sm:$0xff]   ;;  %v2171_v3 = vld [vmem:[%s2344_s10 + $0x16c] ss:$12 sps:$4 sm:$0xff]  }
  0x16   : > { %v2161_v10 = vld [vmem:[%s2344_s10 + $0x13c] ss:$12 sps:$4 sm:$0xff]   ;;  %v2163_v11 = vld [vmem:[%s2344_s10 + $0x140] ss:$12 sps:$4 sm:$0xff]   ;;  %s1770_s18 = sshll.u32 %s2663_s28, 2 }
  0x17   : > { %v2386_v40 = vadd.f32 %v413_v28, %v409_v35  ;;  %v2388_v41 = vadd.f32 %v442_v30, %v438_v36  ;;  %941 = vmatpush1.bf16.msra.mxu1 %v2117_v34 }
  0x18   : > { %942 = vmatprep.subr.bf16.mxu1 %v2118_v37  ;;  %2052 = vmatpush3.bf16.msra.mxu0 %v2393_v44  ;;  %v2127_v37 = vld [vmem:[%s2344_s10 + $0x7c] ss:$12 sps:$4 sm:$0xff]  }
  0x19   : > { %v416_v45 = vsel %vm415_vm1, %v2386_v40, 0.0  ;;  %v423_v46 = vmul.f32 %v2386_v40, %v2386_v40  ;;  %v444_v47 = vsel %vm415_vm1, %v2388_v41, 0.0  ;;  %v451_v48 = vmul.f32 %v2388_v41, %v2388_v41  ;;  %2053 = vmatprep.subr.bf16.mxu0 %v2222_v4 }
  0x1a   : > { %v417_v51 = vrot.slane %v416_v45, 4  ;;  %v445_v52 = vrot.slane %v444_v47, 4 }
  0x1b   : > { %v424_v55 = vsel %vm415_vm1, %v423_v46, 0.0  ;;  %v452_v56 = vsel %vm415_vm1, %v451_v48, 0.0  ;;  %943 = vmatpush1.bf16.msra.mxu1 %v2120_v42  ;;  %v2132_v42 = vld [vmem:[%s2344_s10 + $0x90] ss:$12 sps:$4 sm:$0xff]   ;;  %v2139_v48 = vld [vmem:[%s2344_s10 + $0xc0] ss:$12 sps:$4 sm:$0xff]  }
  0x1c   : > { %v418_v58 = vadd.f32 %v417_v51, %v416_v45  ;;  %v425_v59 = vrot.slane %v424_v55, 4  ;;  %v446_v60 = vadd.f32 %v445_v52, %v444_v47  ;;  %v453_v61 = vrot.slane %v452_v56, 4  ;;  %944 = vmatprep.subr.bf16.mxu1 %v2121_v43  ;;  %2055 = vmatpush3.bf16.msra.mxu0 %v2412_v54  ;;  %v2133_v43 = vld [vmem:[%s2344_s10 + $0xac] ss:$12 sps:$4 sm:$0xff]   ;;  %v2135_v45 = vld [vmem:[%s2344_s10 + $0xa8] ss:$12 sps:$4 sm:$0xff]  }
  0x1d   : > { %2056 = vmatprep.subr.bf16.mxu0 %v2222_v4  ;;  %v2136_v46 = vld [vmem:[%s2344_s10 + $0xc4] ss:$12 sps:$4 sm:$0xff]   ;;  %v2138_v47 = vld [vmem:[%s2344_s10 + $0xc8] ss:$12 sps:$4 sm:$0xff]   ;;  %v2143_v51 = vld [vmem:[%s2344_s10 + $0xe0] ss:$12 sps:$4 sm:$0xff]  }
  0x1e   : > { %v419_v62 = vrot.slane %v418_v58, 2  ;;  %v426_v63 = vadd.f32 %v425_v59, %v424_v55  ;;  %v447_v0 = vrot.slane %v446_v60, 2  ;;  %v454_v1 = vadd.f32 %v453_v61, %v452_v56  ;;  %v2144_v52 = vld [vmem:[%s2344_s10 + $0xd8] ss:$12 sps:$4 sm:$0xff]   ;;  %v2146_v55 = vld [vmem:[%s2344_s10 + $0xf4] ss:$12 sps:$4 sm:$0xff]  }
  0x1f   : > { %945 = vmatpush1.bf16.msra.mxu1 %v2123_v53  ;;  %v2145_v53 = vld [vmem:[%s2344_s10 + $0x20] ss:$12 sps:$4 sm:$0xff]   ;;  %v2148_v56 = vld [vmem:[%s2344_s10 + $0xf8] ss:$12 sps:$4 sm:$0xff]   ;;  %v2154_v61 = vld [vmem:[%s2344_s10 + $0x108] ss:$12 sps:$4 sm:$0xff]  }
  0x20   : > { %v420_v14 = vadd.f32 %v419_v62, %v418_v58  ;;  %v427_v15 = vrot.slane %v426_v63, 2  ;;  %v448_v20 = vadd.f32 %v447_v0, %v446_v60  ;;  %v455_v21 = vrot.slane %v454_v1, 2  ;;  %946 = vmatprep.subr.bf16.mxu1 %v2124_v57  ;;  %2058 = vmatpush3.bf16.msra.mxu0 %v2420_v6  ;;  %v2149_v57 = vld [vmem:[%s2344_s10 + $0xf0] ss:$12 sps:$4 sm:$0xff]   ;;  %v2150_v58 = vld [vmem:[%s2344_s10 + $0x38] ss:$12 sps:$4 sm:$0xff]  }
  0x21   : > { %2059 = vmatprep.subr.bf16.mxu0 %v2222_v4  ;;  %v2151_v59 = vld [vmem:[%s2344_s10 + $0x10c] ss:$12 sps:$4 sm:$0xff]   ;;  %v2153_v60 = vld [vmem:[%s2344_s10 + $0x110] ss:$12 sps:$4 sm:$0xff]   ;;  %v2158_v0 = vld [vmem:[%s2344_s10 + $0x128] ss:$12 sps:$4 sm:$0xff]  }
  0x22   : > { %v421_v22 = vrot.slane %v420_v14, 1  ;;  %v428_v23 = vadd.f32 %v427_v15, %v426_v63  ;;  %v449_v24 = vrot.slane %v448_v20, 1  ;;  %v456_v25 = vadd.f32 %v455_v21, %v454_v1  ;;  %v2155_v62 = vld [vmem:[%s2344_s10 + $0x50] ss:$12 sps:$4 sm:$0xff]   ;;  %v2159_v1 = vld [vmem:[%s2344_s10 + $0x120] ss:$12 sps:$4 sm:$0xff]  }
  0x23   : > { %947 = vmatpush1.bf16.msra.mxu1 %v2126_v2  ;;  %v2156_v63 = vld [vmem:[%s2344_s10 + $0x124] ss:$12 sps:$4 sm:$0xff]   ;;  %v2160_v2 = vld [vmem:[%s2344_s10 + $0x68] ss:$12 sps:$4 sm:$0xff]  }
  0x24   : > { %v422_v27 = vadd.f32 %v421_v22, %v420_v14  ;;  %v429_v28 = vrot.slane %v428_v23, 1  ;;  %v457_v29 = vrot.slane %v456_v25, 1  ;;  %v450_v30 = vadd.f32 %v449_v24, %v448_v20  ;;  %2061 = vmatpush3.bf16.msra.mxu0 %v2431_v26  ;;  %948 = vmatprep.subr.bf16.mxu1 %v2127_v37  ;;  %v574_v14 = vld [vmem:[%s358_s20] sm:$0xf]  ;;  %v2164_v15 = vld [vmem:[%s2344_s10 + $0x138] ss:$12 sps:$4 sm:$0xff]  }
  0x25   : > { %1872 = vmatprep.subr.bf16.mxu0 %v2138_v47  ;;  %v2165_v20 = vld [vmem:[%s2344_s10 + $0x80] ss:$12 sps:$4 sm:$0xff]   ;;  %v576_v21 = vrot.slane %v574_v14, 7  ;;  %v1774_v22 = vld [vmem:[%s358_s20 + $0x4] sm:$0xf]  ;;  %v556_v47 = vsub.s32 4, %v2301_v8 }
  0x26   : > { %v430_v31 = vadd.f32 %v429_v28, %v428_v23  ;;  %v458_v33 = vadd.f32 %v457_v29, %v456_v25  ;;  %v605_v23 = vrot.slane %v1774_v22, 1  ;;  %v2166_v24 = vld [vmem:[%s2344_s10 + $0x154] ss:$12 sps:$4 sm:$0xff]   ;;  %v2168_v25 = vld [vmem:[%s2344_s10 + $0x158] ss:$12 sps:$4 sm:$0xff]  }
  0x27   : > { %949 = vmatpush1.bf16.msra.mxu1 %v2129_v38  ;;  %578 = vst [vmem:[#allocation2 + $0x8] sm:$0x1e] %v576_v21  ;;  %v2170_v28 = vld [vmem:[%s2344_s10 + $0x98] ss:$12 sps:$4 sm:$0xff]   ;;  %v2173_v29 = vld [vmem:[%s2344_s10 + $0x170] ss:$12 sps:$4 sm:$0xff]  }
  0x28   : > { %v460_v34 = vsel %vm459_vm2, %v422_v27, %v430_v31  ;;  %950 = vmatprep.subr.bf16.mxu1 %v2130_v39  ;;  %v2169_v27 = vld [vmem:[%s2344_s10 + $0x150] ss:$12 sps:$4 sm:$0xff]   ;;  %607 = vst [vmem:[#allocation2 + $0x18] ss:$-12 sps:$4 sm:$0x87] %v605_v23  }
  0x29   : > { %v462_v35 = vsel %vm461_vm3, %v460_v34, %v450_v30  ;;  %v2174_v30 = vld [vmem:[%s2344_s10 + $0x168] ss:$12 sps:$4 sm:$0xff]   ;;  %v2175_v31 = vld [vmem:[%s2344_s10 + $0xb0] ss:$12 sps:$4 sm:$0xff]  }
  0x2a   : > { %v464_v36 = vsel %vm463_vm4, %v462_v35, %v458_v33 }
  0x2b   : > { %1962 = vmatmul.mubr.f32.vlgmr.msra.gmra.mrb[0].mxu0 %v464_v36  ;;  %951 = vmatpush1.bf16.msra.mxu1 %v2132_v42 }
  0x2c   : > { %952 = vmatprep.subr.bf16.mxu1 %v2133_v43  ;;  %1873 = vmatpush3.bf16.msra.mxu0 %v2140_v49 }
  0x2d   : > { %1874 = vmatprep.subr.bf16.mxu0 %v2143_v51 }
  0x2f   : > { %953 = vmatpush1.bf16.msra.mxu1 %v2135_v45  ;;  %v613_v33 = vld [vmem:[#allocation2 + $0x8] sm:$0xff]  ;;  %v615_v34 = vld [vmem:[#allocation2 + $0x18] sm:$0xf] }
  0x30   : > { %954 = vmatprep.subr.bf16.mxu1 %v2136_v46  ;;  %1875 = vmatpush3.bf16.msra.mxu0 %v2145_v53  ;;  %v617_v35 = vpack.c.bf16 %v615_v34, %v613_v33 }
  0x31   : > { %1876 = vmatprep.subr.bf16.mxu0 %v2148_v56 }
  0x32   : > { %970 = vmatprep.mubr.bf16.mxu1 %v617_v35  ;;  %1013 = vmatprep.mubr.bf16.mxu0 %v617_v35 }
  0x33   : > { %955 = vmatpush1.bf16.msra.mxu1 %v2139_v48 }
  0x34   : > { %956 = vmatprep.subr.bf16.mxu1 %v2141_v50  ;;  %1877 = vmatpush3.bf16.msra.mxu0 %v2150_v58  ;;  %v561_v50 = vsub.s32 5, %v2301_v8 }
  0x35   : > { %1878 = vmatprep.subr.bf16.mxu0 %v2153_v60 }
  0x37   : > { %957 = vmatpush1.bf16.msra.mxu1 %v2144_v52  ;;  %v557_v52 = vrot.slane %v2347_v19, %v556_v47 }
  0x38   : > { %958 = vmatprep.subr.bf16.mxu1 %v2146_v55  ;;  %1879 = vmatpush3.bf16.msra.mxu0 %v2155_v62 }
  0x39   : > { %1880 = vmatprep.subr.bf16.mxu0 %v2158_v0 }
  0x3b   : > { %959 = vmatpush1.bf16.msra.mxu1 %v2149_v57 }
  0x3c   : > { %960 = vmatprep.subr.bf16.mxu1 %v2151_v59  ;;  %1881 = vmatpush3.bf16.msra.mxu0 %v2160_v2  ;;  %v562_v59 = vrot.slane %v2347_v19, %v561_v50 }
  0x3d   : > { %1882 = vmatprep.subr.bf16.mxu0 %v2163_v11 }
  0x3f   : > { %961 = vmatpush1.bf16.msra.mxu1 %v2154_v61 }
  0x40   : > { %962 = vmatprep.subr.bf16.mxu1 %v2156_v63  ;;  %1883 = vmatpush3.bf16.msra.mxu0 %v2165_v20 }
  0x41   : > { %1884 = vmatprep.subr.bf16.mxu0 %v2168_v25 }
  0x43   : > { %963 = vmatpush1.bf16.msra.mxu1 %v2159_v1 }
  0x44   : > { %964 = vmatprep.subr.bf16.mxu1 %v2161_v10  ;;  %1885 = vmatpush3.bf16.msra.mxu0 %v2170_v28 }
  0x45   : > { %1886 = vmatprep.subr.bf16.mxu0 %v2173_v29 }
  0x47   : > { %965 = vmatpush1.bf16.msra.mxu1 %v2164_v15 }
  0x48   : > { %966 = vmatprep.subr.bf16.mxu1 %v2166_v24  ;;  %1887 = vmatpush3.bf16.msra.mxu0 %v2175_v31 }
  0x49   : > { %2062 = vmatprep.subr.bf16.mxu0 %v2222_v4 }
  0x4b   : > { %967 = vmatpush1.bf16.msra.mxu1 %v2169_v27 }
  0x4c   : > { %968 = vmatprep.subr.bf16.mxu1 %v2171_v3 }
  0x4f   : > { %969 = vmatpush1.bf16.msra.mxu1 %v2174_v30 }
  0xfe   : > { %v531_v36 = vpop.f32.mrb[0].mxu0 }
  0xff   : > { %v535_v37 = vmul.f32 0.0625, %v531_v36  ;;  %v1963_v38 = vpop.f32.mrb[1].mxu0 }
 0x101   : > { %v536_v39 = vmul.f32 %v535_v37, %v535_v37  ;;  %v545_v48 = vrot.slane %v535_v37, %v2316_v12  ;;  %v585_v49 = vrot.slane %v535_v37, %v2321_v13 }
 0x103   : > { %v538_v42 = vrot.slane %v536_v39, 7  ;;  %v546_v53 = vsub.f32 %v2386_v40, %v545_v48  ;;  %v586_v56 = vsub.f32 %v2388_v41, %v585_v49 }
 0x105   : > { %v540_v43 = vsub.f32 %v535_v37, %v538_v42 }
 0x107   : > { %v541_v45 = vmax.f32 %v540_v43, 0.0 }
 0x109   : > { %v547_v46 = vadd.f32 1e-05, %v541_v45 }
 0x10b   : > { %2208 = vrsqrt.f32 %v547_v46 }
 0x115   : > { %v2209_v51 = vpop.eup %2208 }
 0x116   : > { %v552_v55 = vrot.slane %v2209_v51, %v2335_v16  ;;  %v590_v57 = vrot.slane %v2209_v51, %v441_v17 }
 0x118   : > { %v553_v58 = vmul.f32 %v552_v55, %v546_v53  ;;  %v591_v60 = vmul.f32 %v590_v57, %v586_v56 }
 0x11a   : > { %v558_v61 = vmul.f32 %v557_v52, %v553_v58  ;;  %v592_v62 = vmul.f32 %v591_v60, %v557_v52 }
 0x11c   : > { %v563_v63 = vadd.f32 %v562_v59, %v558_v61  ;;  %v593_v0 = vadd.f32 %v592_v62, %v562_v59 }
 0x11e   : > { %v571_v1 = vrot.slane %v563_v63, 7  ;;  %v598_v2 = vrot.slane %v593_v0, 1 }
 0x120   : > { %573 = vst [vmem:[#allocation2] sm:$0x1e] %v571_v1  ;;  %600 = vst [vmem:[#allocation2 + $0x10] ss:$-12 sps:$4 sm:$0x87] %v598_v2  }
 0x127   : > { %v612_v40 = vld [vmem:[#allocation2] sm:$0xff]  ;;  %v614_v10 = vld [vmem:[#allocation2 + $0x10] sm:$0xf] }
 0x128   : > { %v616_v11 = vpack.c.bf16 %v614_v10, %v612_v40 }
 0x12a   : > { %971 = vmatmul.mubr.bf16.vlgmr.msra.gmra.mrb[0].mxu1 %v616_v11  ;;  %1014 = vmatmul.mubr.bf16.vlgmr.msra.gmra.mrb[4].mxu0 %v616_v11 }
 0x12b   : > { %2064 = vmatpush3.bf16.msra.mxu0 %v2289_v5  ;;  %1996 = vmatprep.mubr.msk.f32.mxu0 %vm2223_vm0, %v2224_v7  ;;  %v1045_v5 = vsub.s32 6, %v2301_v8 }
 0x12c   : > { %2065 = vmatprep.subr.bf16.mxu0 %v2222_v4 }
 0x12d   : > { %v1046_v15 = vrot.slane %v2347_v19, %v1045_v5 }
 0x12f   : > { %2067 = vmatpush3.bf16.msra.mxu0 %v2304_v9 }
 0x130   : > { %2068 = vmatprep.subr.bf16.mxu0 %v2222_v4 }
 0x133   : > { %2070 = vmatpush3.bf16.msra.mxu0 %v2339_v18 }
 0x134   : > { %2071 = vmatprep.subr.bf16.mxu0 %v2222_v4 }
 0x137   : > { %2073 = vmatpush3.bf16.msra.mxu0 %v2372_v32 }
 0x138   : > { %2074 = vmatprep.subr.bf16.mxu0 %v2222_v4 }
 0x13b   : > { %2076 = vmatpush3.bf16.msra.mxu0 %v2393_v44 }
 0x13c   : > { %2077 = vmatprep.subr.bf16.mxu0 %v2222_v4 }
 0x13f   : > { %2079 = vmatpush3.bf16.msra.mxu0 %v2412_v54 }
 0x140   : > { %2080 = vmatprep.subr.bf16.mxu0 %v2222_v4 }
 0x143   : > { %2082 = vmatpush3.bf16.msra.mxu0 %v2420_v6 }
 0x144   : > { %2083 = vmatprep.subr.bf16.mxu0 %v2222_v4 }
 0x147   : > { %2085 = vmatpush3.bf16.msra.mxu0 %v2431_v26 }
 0x148   : > { %1999 = vmatprep.subr.bf16.mxu0 %v2224_v7 }
 0x1fd   : > { %v972_v9 = vpop.f32.mrb[0].mxu1  ;;  %v1888_v17 = vpop.f32.mrb[4].mxu0 }
 0x1fe   : > { %v974_v18 = vpop.f32.mrb[1].mxu1  ;;  %v1889_v32 = vpop.f32.mrb[5].mxu0 }
 0x1ff   : > { %v1023_v41 = vrot.slane %v974_v18, 1  ;;  %v1890_v44 = vadd.f32 %v1889_v32, %v1888_v17  ;;  %v976_v14 = vpop.f32.mrb[2].mxu1  ;;  %v1891_v54 = vpop.f32.mrb[6].mxu0 }
 0x200   : > { %v978_v20 = vpop.f32.mrb[3].mxu1  ;;  %v1892_v6 = vpop.f32.mrb[7].mxu0 }
 0x201   : > { %v1025_v21 = vadd.f32 %v1023_v41, %v972_v9  ;;  %v1027_v22 = vrot.slane %v1890_v44, 2  ;;  %v1032_v26 = vrot.slane %v978_v20, 1  ;;  %v1893_v23 = vadd.f32 %v1892_v6, %v1891_v54 }
 0x203   : > { %v1029_v24 = vadd.f32 %v1027_v22, %v1025_v21  ;;  %v1033_v25 = vsel %vm1031_vm6, %v1023_v41, %v1032_v26  ;;  %v1037_v27 = vadd.f32 %v1032_v26, %v976_v14  ;;  %v1039_v28 = vrot.slane %v1893_v23, 2  ;;  %v2178_v21 = vld [vmem:[%s2441_s16 + $0x4] ss:$12 sps:$4 sm:$0xff]   ;;  %v2176_v22 = vld [vmem:[%s2441_s16] ss:$12 sps:$4 sm:$0xff]  }
 0x204   : > { %v1036_v3 = vadd.f32 %v1033_v25, %v972_v9  ;;  %v2179_v26 = vld [vmem:[%s2441_s16 + $0x8] ss:$12 sps:$4 sm:$0xff]   ;;  %1373 = vmatprep.subr.bf16.mxu1 %v2178_v21  ;;  %v2183_v25 = vld [vmem:[%s2441_s16 + $0x20] ss:$12 sps:$4 sm:$0xff]  }
 0x205   : > { %v1047_v29 = vadd.f32 %v1046_v15, %v1029_v24  ;;  %v1042_v30 = vadd.f32 %v1039_v28, %v1037_v27  ;;  %1374 = vmatpush1.bf16.msra.mxu1 %v2176_v22  ;;  %v2182_v23 = vld [vmem:[%s2441_s16 + $0x1c] ss:$12 sps:$4 sm:$0xff]   ;;  %v2180_v24 = vld [vmem:[%s2441_s16 + $0x18] ss:$12 sps:$4 sm:$0xff]   ;;  %v2186_v27 = vld [vmem:[%s2441_s16 + $0x34] ss:$12 sps:$4 sm:$0xff]  }
 0x206   : > { %v1041_v31 = vadd.f32 %v1039_v28, %v1036_v3  ;;  %1375 = vmatprep.subr.bf16.mxu1 %v2182_v23  ;;  %v2184_v28 = vld [vmem:[%s2441_s16 + $0x30] ss:$12 sps:$4 sm:$0xff]   ;;  %v2187_v3 = vld [vmem:[%s2441_s16 + $0x38] ss:$12 sps:$4 sm:$0xff]  }
 0x207   : > { %v2526_v33 = vmax.f32 %v1047_v29, 0.0  ;;  %v1050_v34 = vadd.f32 %v1046_v15, %v1042_v30  ;;  %v2190_v29 = vld [vmem:[%s2441_s16 + $0x4c] ss:$12 sps:$4 sm:$0xff]   ;;  %v2188_v30 = vld [vmem:[%s2441_s16 + $0x48] ss:$12 sps:$4 sm:$0xff]  }
 0x208   : > { %v1049_v35 = vadd.f32 %v1046_v15, %v1041_v31  ;;  %v2191_v31 = vld [vmem:[%s2441_s16 + $0x50] ss:$12 sps:$4 sm:$0xff]  }
 0x209   : > { %v1053_v36 = vsel %vm415_vm1, %v2526_v33, 0.0  ;;  %v1061_v37 = vmul.f32 %v2526_v33, %v2526_v33  ;;  %v2532_v38 = vmax.f32 %v1050_v34, 0.0  ;;  %1376 = vmatpush1.bf16.msra.mxu1 %v2180_v24  ;;  %v2194_v34 = vld [vmem:[%s2441_s16 + $0x64] ss:$12 sps:$4 sm:$0xff]  }
 0x20a   : > { %v1054_v39 = vrot.slane %v1053_v36, 4  ;;  %v2534_v42 = vmax.f32 %v1049_v35, 0.0  ;;  %1377 = vmatprep.subr.bf16.mxu1 %v2186_v27  ;;  %v2192_v35 = vld [vmem:[%s2441_s16 + $0x60] ss:$12 sps:$4 sm:$0xff]   ;;  %v1493_v22 = vld [vmem:[%s2659_s6 + $0x30] sm:$0xff] }
 0x20b   : > { %v1062_v43 = vsel %vm415_vm1, %v1061_v37, 0.0  ;;  %v1073_v45 = vrot.slane %v2532_v38, 6  ;;  %v1085_v46 = vmul.f32 %v2532_v38, %v2532_v38  ;;  %v2198_v37 = vld [vmem:[%s2441_s16 + $0x7c] ss:$12 sps:$4 sm:$0xff]  }
 0x20c   : > { %v1055_v47 = vadd.f32 %v1054_v39, %v1053_v36  ;;  %v1063_v48 = vrot.slane %v1062_v43, 4  ;;  %v1072_v49 = vrot.slane %v2534_v42, 6  ;;  %v1084_v50 = vmul.f32 %v2534_v42, %v2534_v42  ;;  %v2195_v36 = vld [vmem:[%s2441_s16 + $0x68] ss:$12 sps:$4 sm:$0xff]   ;;  %v2196_v39 = vld [vmem:[%s2441_s16 + $0x78] ss:$12 sps:$4 sm:$0xff]  }
 0x20d   : > { %v1089_v51 = vrot.slane %v1085_v46, 6  ;;  %1378 = vmatpush1.bf16.msra.mxu1 %v2184_v28  ;;  %v2202_v46 = vld [vmem:[%s2441_s16 + $0x94] ss:$12 sps:$4 sm:$0xff]  }
 0x20e   : > { %v1064_v52 = vadd.f32 %v1063_v48, %v1062_v43  ;;  %v1074_v53 = vsel %vm461_vm3, %v1072_v49, %v1073_v45  ;;  %v1088_v55 = vrot.slane %v1084_v50, 6  ;;  %v1056_v57 = vrot.slane %v1055_v47, 2  ;;  %1379 = vmatprep.subr.bf16.mxu1 %v2190_v29  ;;  %v2199_v43 = vld [vmem:[%s2441_s16 + $0x80] ss:$12 sps:$4 sm:$0xff]   ;;  %v2200_v45 = vld [vmem:[%s2441_s16 + $0x90] ss:$12 sps:$4 sm:$0xff]  }
 0x20f   : > { %v1076_v56 = vsel %vm415_vm1, %v1074_v53, 0.0  ;;  %v2206_v48 = vld [vmem:[%s2441_s16 + $0xac] ss:$12 sps:$4 sm:$0xff]   ;;  %v2204_v49 = vld [vmem:[%s2441_s16 + $0xa8] ss:$12 sps:$4 sm:$0xff]  }
 0x210   : > { %v1090_v58 = vsel %vm461_vm3, %v1088_v55, %v1089_v51  ;;  %v1065_v59 = vrot.slane %v1064_v52, 2  ;;  %v1077_v60 = vrot.slane %v1076_v56, 4  ;;  %v1057_v0 = vadd.f32 %v1056_v57, %v1055_v47  ;;  %v2203_v47 = vld [vmem:[%s2441_s16 + $0x98] ss:$12 sps:$4 sm:$0xff]   ;;  %v2207_v50 = vld [vmem:[%s2441_s16 + $0xb0] ss:$12 sps:$4 sm:$0xff]  }
 0x211   : > { %v1092_v61 = vsel %vm415_vm1, %v1090_v58, 0.0  ;;  %1380 = vmatpush1.bf16.msra.mxu1 %v2188_v30  ;;  %v2225_v51 = vmov 0  }
 0x212   : > { %v1078_v62 = vadd.f32 %v1077_v60, %v1076_v56  ;;  %v1093_v63 = vrot.slane %v1092_v61, 4  ;;  %v1066_v1 = vadd.f32 %v1065_v59, %v1064_v52  ;;  %v1058_v5 = vrot.slane %v1057_v0, 1  ;;  %1381 = vmatprep.subr.bf16.mxu1 %v2194_v34  ;;  %1405 = vmatprep.mubr.bf16.mxu1 %v2225_v51 }
 0x214   : > { %v1079_v2 = vrot.slane %v1078_v62, 2  ;;  %v1094_v40 = vadd.f32 %v1093_v63, %v1092_v61  ;;  %v1067_v9 = vrot.slane %v1066_v1, 1  ;;  %v1059_v44 = vadd.f32 %v1058_v5, %v1057_v0 }
 0x215   : > { %1382 = vmatpush1.bf16.msra.mxu1 %v2192_v35  ;;  %v1192_v0 = vsub.s32 7, %v2301_v8 }
 0x216   : > { %v1080_v10 = vadd.f32 %v1079_v2, %v1078_v62  ;;  %v1095_v11 = vrot.slane %v1094_v40, 2  ;;  %v1068_v14 = vadd.f32 %v1067_v9, %v1066_v1  ;;  %1383 = vmatprep.subr.bf16.mxu1 %v2198_v37  ;;  %v385_v2 = vld [vmem:[%s2332_s29 + $0x8] sm:$0x1]  ;;  %s377_s29 = scalar_lea.vmem %s2660_s7, %s1770_s18 }
 0x217   : > { %v2622_v27 = vld [vmem:[%s377_s29] sm:$0x7] }
 0x218   : > { %v1081_v17 = vrot.slane %v1080_v10, 1  ;;  %v1096_v18 = vadd.f32 %v1095_v11, %v1094_v40 }
 0x219   : > { %1384 = vmatpush1.bf16.msra.mxu1 %v2196_v39 }
 0x21a   : > { %v1082_v32 = vadd.f32 %v1081_v17, %v1080_v10  ;;  %v1097_v41 = vrot.slane %v1096_v18, 1  ;;  %1385 = vmatprep.subr.bf16.mxu1 %v2202_v46 }
 0x21c   : > { %v1098_v54 = vadd.f32 %v1097_v41, %v1096_v18  ;;  %v1083_v15 = vadd.f32 %v1082_v32, %v1059_v44 }
 0x21d   : > { %1386 = vmatpush1.bf16.msra.mxu1 %v2200_v45 }
 0x21e   : > { %v1099_v20 = vadd.f32 %v1098_v54, %v1068_v14  ;;  %1387 = vmatprep.subr.bf16.mxu1 %v2206_v48  ;;  %v1489_v54 = vld [vmem:[%s2659_s6 + $0x10] sm:$0xff] }
 0x220   : > { %v1100_v6 = vsel %vm459_vm2, %v1083_v15, %v1099_v20  ;;  %v1490_v15 = vld [vmem:[%s2659_s6 + $0x18] sm:$0xff]  ;;  %v1491_v20 = vld [vmem:[%s2659_s6 + $0x20] sm:$0xff] }
 0x221   : > { %1997 = vmatmul.mubr.f32.vlgmr.msra.gmra.mrb[2].mxu0 %v1100_v6  ;;  %1388 = vmatpush1.bf16.msra.mxu1 %v2204_v49  ;;  %v1492_v6 = vld [vmem:[%s2659_s6 + $0x28] sm:$0xff] }
 0x222   : > { %2015 = vmatprep.mubr.msk.bf16.mxu0 %vm2223_vm0, %v2224_v7  ;;  %2000 = vmatpush3.bf16.msra.mxu0 %v2179_v26  ;;  %v2093_v21 = vpack.c.bf16 %v1492_v6, %v1491_v20  ;;  %v1494_v26 = vld [vmem:[%s2659_s6 + $0x38] sm:$0xff] }
 0x223   : > { %2001 = vmatprep.subr.bf16.mxu0 %v2224_v7  ;;  %2086 = vmatprep.subr.bf16.mxu1 %v2222_v4  ;;  %v2096_v23 = vpack.c.bf16 %v1494_v26, %v1493_v22 }
 0x226   : > { %2002 = vmatpush3.bf16.msra.mxu0 %v2183_v25 }
 0x227   : > { %2003 = vmatprep.subr.bf16.mxu0 %v2224_v7 }
 0x22a   : > { %2004 = vmatpush3.bf16.msra.mxu0 %v2187_v3 }
 0x22b   : > { %2005 = vmatprep.subr.bf16.mxu0 %v2224_v7 }
 0x22e   : > { %2006 = vmatpush3.bf16.msra.mxu0 %v2191_v31 }
 0x22f   : > { %2007 = vmatprep.subr.bf16.mxu0 %v2224_v7 }
 0x232   : > { %2008 = vmatpush3.bf16.msra.mxu0 %v2195_v36 }
 0x233   : > { %2009 = vmatprep.subr.bf16.mxu0 %v2224_v7 }
 0x236   : > { %2010 = vmatpush3.bf16.msra.mxu0 %v2199_v43 }
 0x237   : > { %2011 = vmatprep.subr.bf16.mxu0 %v2224_v7 }
 0x23a   : > { %2012 = vmatpush3.bf16.msra.mxu0 %v2203_v47 }
 0x23b   : > { %2013 = vmatprep.subr.bf16.mxu0 %v2224_v7 }
 0x23e   : > { %2014 = vmatpush3.bf16.msra.mxu0 %v2207_v50 }
 0x2f4   : > { %v1167_v52 = vpop.f32.mrb[2].mxu0 }
 0x2f5   : > { %v1171_v53 = vmul.f32 0.03125, %v1167_v52  ;;  %v1998_v55 = vpop.f32.mrb[3].mxu0 }
 0x2f7   : > { %v1172_v56 = vmul.f32 %v1171_v53, %v1171_v53 }
 0x2f9   : > { %v1174_v57 = vrot.slane %v1172_v56, 7 }
 0x2fb   : > { %v1176_v58 = vsub.f32 %v1171_v53, %v1174_v57 }
 0x2fd   : > { %v1177_v59 = vmax.f32 %v1176_v58, 0.0 }
 0x2ff   : > { %v1178_v60 = vadd.f32 1e-05, %v1177_v59 }
 0x301   : > { %2210 = vrsqrt.f32 %v1178_v60 }
 0x30b   : > { %v2211_v61 = vpop.eup %2210 }
 0x30c   : > { %v1181_v62 = vrot.slane %v2211_v61, 2 }
 0x30e   : > { %v1183_v63 = vmul.f32 %v1181_v62, %v2347_v19 }
 0x310   : > { %v1185_v1 = vrot.slane %v1183_v63, 7  ;;  %v1193_v10 = vrot.slane %v1183_v63, %v1192_v0 }
 0x312   : > { %v1187_v40 = vmul.f32 %v1185_v1, %v1171_v53  ;;  %v1194_v5 = vmul.f32 %v1193_v10, %v2526_v33  ;;  %v1203_v17 = vmul.f32 %v1193_v10, %v2534_v42  ;;  %v1204_v18 = vmul.f32 %v1193_v10, %v2532_v38  ;;  %v1487_v33 = vld [vmem:[%s2659_s6] sm:$0xff]  ;;  %v1488_v38 = vld [vmem:[%s2659_s6 + $0x8] sm:$0xff] }
 0x313   : > { %v2087_v42 = vpack.c.bf16 %v1488_v38, %v1487_v33 }
 0x314   : > { %v1188_v11 = vsub.f32 %v385_v2, %v1187_v40 }
 0x316   : > { %v1198_v9 = vrot.slane %v1188_v11, %v2316_v12 }
 0x318   : > { %v1199_v32 = vadd.f32 %v1198_v9, %v1194_v5  ;;  %v1205_v41 = vadd.f32 %v1203_v17, %v1198_v9  ;;  %v1206_v44 = vadd.f32 %v1204_v18, %v1198_v9 }
 0x31a   : > { %1200 = vst [vmem:[#allocation3 + $0x1] sm:$0xf] %v1199_v32  ;;  %1207 = vst [vmem:[#allocation3 + $0x1] sm:$0xc0] %v1205_v41 }
 0x31b   : > { %1208 = vst [vmem:[#allocation3 + $0x9] sm:$0x3] %v1206_v44 }
 0x321   : > { %v1210_v8 = vld [vmem:[#allocation3] sm:$0xff] }
 0x322   : > { %v1211_v19 = vld [vmem:[#allocation3 + $0x8] sm:$0xf] }
 0x323   : > { %v1212_v14 = vpack.c.bf16 %v1211_v19, %v1210_v8 }
 0x325   : > { %1406 = vmatmul.mubr.bf16.vlgmr.msra.gmra.mrb[4].mxu1 %v1212_v14  ;;  %2016 = vmatmul.mubr.bf16.vlgmr.msra.gmra.mrb[8].mxu0 %v1212_v14 }
 0x326   : > { %2035 = vmatprep.mubr.msk.f32.mxu1 %vm2223_vm0, %v2224_v7  ;;  %2088 = vmatpush3.bf16.msra.mxu1 %v2087_v42  ;;  %v2090_v7 = vpack.c.bf16 %v1490_v15, %v1489_v54 }
 0x327   : > { %2089 = vmatprep.subr.bf16.mxu1 %v2222_v4 }
 0x32a   : > { %2091 = vmatpush3.bf16.msra.mxu1 %v2090_v7 }
 0x32b   : > { %2092 = vmatprep.subr.bf16.mxu1 %v2222_v4 }
 0x32e   : > { %2094 = vmatpush3.bf16.msra.mxu1 %v2093_v21 }
 0x32f   : > { %2095 = vmatprep.subr.bf16.mxu1 %v2222_v4  ;;  %v1480_v4 = vrot.slane %v2622_v27, %v2316_v12 }
 0x332   : > { %2097 = vmatpush3.bf16.msra.mxu1 %v2096_v23 }
 0x3f8   : > { %v1407_v24 = vpop.f32.mrb[4].mxu1  ;;  %v1450_v25 = vpop.f32.mrb[8].mxu0 }
 0x3f9   : > { %v1409_v28 = vpop.f32.mrb[5].mxu1  ;;  %v2017_v3 = vpop.f32.mrb[9].mxu0  ;;  %v1462_v36 = vrot.slane %v1450_v25, 2 }
 0x3fa   : > { %v1458_v29 = vrot.slane %v1409_v28, 1  ;;  %v1411_v30 = vpop.f32.mrb[6].mxu1  ;;  %v1453_v31 = vpop.f32.mrb[10].mxu0 }
 0x3fb   : > { %v1413_v34 = vpop.f32.mrb[7].mxu1  ;;  %v2018_v35 = vpop.f32.mrb[11].mxu0  ;;  %v1473_v45 = vrot.slane %v1453_v31, 2 }
 0x3fc   : > { %v1460_v37 = vadd.f32 %v1458_v29, %v1407_v24  ;;  %v1466_v39 = vrot.slane %v1413_v34, 1 }
 0x3fe   : > { %v1464_v43 = vadd.f32 %v1462_v36, %v1460_v37  ;;  %v1467_v46 = vsel %vm1031_vm6, %v1458_v29, %v1466_v39  ;;  %v1471_v47 = vadd.f32 %v1466_v39, %v1411_v30 }
 0x3ff   : > { %v1470_v48 = vadd.f32 %v1467_v46, %v1407_v24 }
 0x400   : > { %v1481_v49 = vadd.f32 %v1480_v4, %v1464_v43  ;;  %v1476_v50 = vadd.f32 %v1473_v45, %v1471_v47 }
 0x401   : > { %v1475_v51 = vadd.f32 %v1473_v45, %v1470_v48 }
 0x402   : > { %v2627_v52 = vmax.f32 %v1481_v49, 0.0  ;;  %v1484_v53 = vadd.f32 %v1480_v4, %v1476_v50 }
 0x403   : > { %v1483_v55 = vadd.f32 %v1480_v4, %v1475_v51 }
 0x404   : > { %v1496_v56 = vsel %vm1495_vm7, %v2627_v52, 0.0  ;;  %v1504_v12 = vmul.f32 %v2627_v52, %v2627_v52  ;;  %v1486_v57 = vmax.f32 %v1484_v53, 0.0 }
 0x405   : > { %v1497_v58 = vrot.slane %v1496_v56, 4  ;;  %v1485_v59 = vmax.f32 %v1483_v55, 0.0 }
 0x406   : > { %v1505_v60 = vsel %vm1495_vm7, %v1504_v12, 0.0  ;;  %v1516_v61 = vrot.slane %v1486_v57, 6  ;;  %v1528_v62 = vmul.f32 %v1486_v57, %v1486_v57 }
 0x407   : > { %v1498_v63 = vadd.f32 %v1497_v58, %v1496_v56  ;;  %v1506_v0 = vrot.slane %v1505_v60, 4  ;;  %v1515_v1 = vrot.slane %v1485_v59, 6  ;;  %v1527_v2 = vmul.f32 %v1485_v59, %v1485_v59 }
 0x408   : > { %v1532_v40 = vrot.slane %v1528_v62, 6 }
 0x409   : > { %v1507_v10 = vadd.f32 %v1506_v0, %v1505_v60  ;;  %v1517_v11 = vsel %vm461_vm3, %v1515_v1, %v1516_v61  ;;  %v1531_v5 = vrot.slane %v1527_v2, 6  ;;  %v1499_v17 = vrot.slane %v1498_v63, 2 }
 0x40a   : > { %v1519_v9 = vsel %vm1495_vm7, %v1517_v11, 0.0 }
 0x40b   : > { %v1520_v18 = vrot.slane %v1519_v9, 4  ;;  %v1533_v32 = vsel %vm461_vm3, %v1531_v5, %v1532_v40  ;;  %v1508_v41 = vrot.slane %v1507_v10, 2  ;;  %v1500_v14 = vadd.f32 %v1499_v17, %v1498_v63 }
 0x40c   : > { %v1535_v44 = vsel %vm1495_vm7, %v1533_v32, 0.0 }
 0x40d   : > { %v1521_v8 = vadd.f32 %v1520_v18, %v1519_v9  ;;  %v1536_v19 = vrot.slane %v1535_v44, 4  ;;  %v1509_v33 = vadd.f32 %v1508_v41, %v1507_v10  ;;  %v1501_v7 = vrot.slane %v1500_v14, 1 }
 0x40f   : > { %v1522_v38 = vrot.slane %v1521_v8, 2  ;;  %v1537_v42 = vadd.f32 %v1536_v19, %v1535_v44  ;;  %v1510_v20 = vrot.slane %v1509_v33, 1  ;;  %v1502_v23 = vadd.f32 %v1501_v7, %v1500_v14 }
 0x411   : > { %v1523_v54 = vadd.f32 %v1522_v38, %v1521_v8  ;;  %v1538_v15 = vrot.slane %v1537_v42, 2  ;;  %v1511_v24 = vadd.f32 %v1510_v20, %v1509_v33 }
 0x413   : > { %v1524_v6 = vrot.slane %v1523_v54, 1  ;;  %v1539_v21 = vadd.f32 %v1538_v15, %v1537_v42 }
 0x415   : > { %v1525_v22 = vadd.f32 %v1524_v6, %v1523_v54  ;;  %v1540_v26 = vrot.slane %v1539_v21, 1 }
 0x417   : > { %v1541_v25 = vadd.f32 %v1540_v26, %v1539_v21  ;;  %v1526_v28 = vadd.f32 %v1525_v22, %v1502_v23 }
 0x419   : > { %v1542_v3 = vadd.f32 %v1541_v25, %v1511_v24 }
 0x41b   : > { %v1543_v29 = vsel %vm459_vm2, %v1526_v28, %v1542_v3 }
 0x41c   : > { %2036 = vmatmul.mubr.msk.f32.vlgmr.msra.gmra.mrb[8].mxu1 %vm1544_vm8, %v1543_v29 }
 0x4ef   : > { %v1614_v30 = vpop.f32.mrb[8].mxu1 }
 0x4f0   : > { %v1618_v31 = vmul.f32 0.03125, %v1614_v30  ;;  %v2037_v34 = vpop.f32.mrb[9].mxu1 }
 0x4f2   : > { %v1619_v35 = vmul.f32 %v1618_v31, %v1618_v31 }
 0x4f4   : > { %v1621_v36 = vrot.slane %v1619_v35, 7 }
 0x4f6   : > { %v1623_v37 = vsub.f32 %v1618_v31, %v1621_v36 }
 0x4f8   : > { %v1624_v4 = vmax.f32 %v1623_v37, 0.0 }
 0x4fa   : > { %v1625_v39 = vadd.f32 1e-05, %v1624_v4 }
 0x4fc   : > { %2212 = vrsqrt.f32 %v1625_v39 }
 0x506   : > { %v2213_v43 = vpop.eup %2212 }
 0x507   : > { %v1627_v45 = vmul.f32 %v2213_v43, %v2622_v27 }
 0x509   : > { %v1629_v46 = vrot.slane %v1627_v45, 1  ;;  %v1639_v49 = vrot.slane %v1627_v45, %v2335_v16 }
 0x50b   : > { %v1631_v47 = vmul.f32 %v1629_v46, %v1618_v31  ;;  %v1640_v51 = vmul.f32 %v1639_v49, %v2627_v52  ;;  %v1647_v55 = vmul.f32 %v1639_v49, %v1485_v59  ;;  %v1648_v56 = vmul.f32 %v1639_v49, %v1486_v57 }
 0x50d   : > { %v1633_v48 = vrot.slane %v1631_v47, 6 }
 0x50f   : > { %v1635_v50 = vsub.f32 %v2622_v27, %v1633_v48 }
 0x511   : > { %v1644_v53 = vrot.slane %v1635_v50, %v2321_v13 }
 0x513   : > { %v1645_v12 = vadd.f32 %v1644_v53, %v1640_v51  ;;  %v1649_v58 = vadd.f32 %v1647_v55, %v1644_v53  ;;  %v1650_v60 = vadd.f32 %v1648_v56, %v1644_v53 }
 0x515   : > { %1646 = vst.msk [vmem:[%s382_s22] sm:$0xf] %vm1495_vm7, %v1645_v12 }
 0x516   : > { %1848 = vst.msk [vmem:[%s382_s22 - $0x2] sm:$0xc0] %vm1652_vm9, %v1649_v58 }
 0x517   : > { %1849 = vst.msk [vmem:[%s382_s22 + $0x6] sm:$0x3] %vm1654_vm10, %v1650_v60 }
 0x518 PF: > { %s18_s27 = sadd.s32 1, %s2220_s27  }
 0x519   : > { %p15_p4 = scmp.ge.s32.totalorder %s18_s27, 4  }
 0x51b   :  { %17 = sbr.rel (!%p15_p4) target bundleno = 1 (0x1), region = 100 }

// kernel: enhanced_unet_film_forward.10
= control target key start
LH: loop header
LB: loop body
LE: loop exit
PB: predicated region body
PF: predicated region fallthrough
CT: control target
= control target key end

     0   :  { %s2323_s27 = smov 0   ;;  %s2695_s0 = inlined_call_operand.vmem [shape: f32[2,8,128], index: 0, kind: input, shape index: {}]   ;;  %s2696_s1 = inlined_call_operand.vmem [shape: f32[2,2,8,128], index: 1, kind: input, shape index: {}]   ;;  %s2697_s2 = inlined_call_operand.vmem [shape: f32[2,9,128], index: 2, kind: input, shape index: {}]   ;;  %s2698_s3 = inlined_call_operand.vmem [shape: bf16[2,256,384], index: 3, kind: input, shape index: {}]   ;;  %s2699_s4 = inlined_call_operand.vmem [shape: bf16[2,128,384], index: 4, kind: input, shape index: {}]   ;;  %s2700_s5 = inlined_call_operand.vmem [shape: f32[128,128], index: 5, kind: input, shape index: {}]   ;;  %s2701_s6 = inlined_call_operand.vmem [shape: f32[64,64], index: 6, kind: input, shape index: {}]   ;;  %s2702_s7 = inlined_call_operand.vmem [shape: f32[2,3,64], index: 7, kind: input, shape index: {}]   ;;  %s2703_s8 = inlined_call_operand.vmem [shape: f32[2,2,8,64], index: 8, kind: output, shape index: {}]  }
   0x1 LB: > { %s1804_s28 = sadd.s32 4294967295, %s2272_s27   ;;  %p1808_p0 = scmp.ge.s32.totalorder %s2272_s27, 1  ;;  %s2272_s27 = sphi %s2323_s27, %s18_s27  }
   0x2   : > { %p301_p1 = scmp.lt.s32.totalorder %s2272_s27, 3 }
   0x4   : > { %p302_p2 = pnand %p1808_p0, %p301_p1 }
   0x5   : > { %v387_v0 = vld [vmem:[%s2700_s5] sm:$0xff] (!%p302_p2)  ;;  %v388_v1 = vld [vmem:[%s2700_s5 + $0x8] sm:$0xff] (!%p302_p2)  ;;  %v389_v2 = vld [vmem:[%s2700_s5 + $0x10] sm:$0xff] (!%p302_p2)  ;;  %v404_v3 = vlaneseq (!%p302_p2)  ;;  %v2274_v4 = vmov (!%p302_p2), 0.0|0.0   ;;  %vm2275_vm0 = vmmov (!%p302_p2), 0   ;;  %v2276_v7 = vmov (!%p302_p2), 0.0  }
   0x6   : > { %305 = sbr.rel (%p302_p2) target bundleno = 1314 (0x522), region = 52  ;;  %2090 = vmatprep.subr.bf16.mxu0 (!%p302_p2), %v2274_v4  ;;  %v2341_v5 = vpack.c.bf16 (!%p302_p2), %v388_v1, %v387_v0  ;;  %v390_v6 = vld [vmem:[%s2700_s5 + $0x18] sm:$0xff] (!%p302_p2)  ;;  %2013 = vmatprep.mubr.msk.f32.mxu0 (!%p302_p2), %vm2275_vm0, %v2276_v7  ;;  %1210 = vst [vmem:[#allocation3] sm:$0x1] (!%p302_p2), %v2276_v7  ;;  %1222 = vst [vmem:[#allocation3 + $0x9] sm:$0x1] (!%p302_p2), %v2276_v7 }
   0x7   : > { %1223 = vst [vmem:[#allocation3 + $0xa] sm:$0x1] (!%p302_p2), %v2276_v7  ;;  %1230 = vst [vmem:[#allocation3 + $0x13] sm:$0x1] (!%p302_p2), %v2276_v7  ;;  %p354_p3 = scmp.lt.s32.totalorder (!%p302_p2), %s1804_s28, 1  ;;  %v2353_v8 = vshrl.u32 (!%p302_p2), %v404_v3, 7  ;;  %v2356_v9 = vpack.c.bf16 (!%p302_p2), %v390_v6, %v389_v2 }
   0x8   : > { %2092 = vmatpush3.bf16.msra.mxu0 (!%p302_p2), %v2341_v5  ;;  %v391_v10 = vld [vmem:[%s2700_s5 + $0x20] sm:$0xff] (!%p302_p2)  ;;  %v392_v11 = vld [vmem:[%s2700_s5 + $0x28] sm:$0xff] (!%p302_p2)  ;;  %v393_v14 = vld [vmem:[%s2700_s5 + $0x30] sm:$0xff] (!%p302_p2)  ;;  %vm454_vm1 = vcmask (!%p302_p2), 1040384   ;;  %vm456_vm2 = vcmask (!%p302_p2), 1041408   ;;  %vm458_vm3 = vcmask (!%p302_p2), 1042432  }
   0x9   : > { %2093 = vmatprep.subr.bf16.mxu0 (!%p302_p2), %v2274_v4  ;;  %v2368_v12 = vsub.s32 (!%p302_p2), 0, %v2353_v8  ;;  %v2375_v13 = vsub.s32 (!%p302_p2), 2, %v2353_v8  ;;  %v394_v15 = vld [vmem:[%s2700_s5 + $0x38] sm:$0xff] (!%p302_p2)  ;;  %v2390_v16 = vsub.s32 (!%p302_p2), 1, %v2353_v8  ;;  %v438_v17 = vsub.s32 (!%p302_p2), 3, %v2353_v8  ;;  %v403_v20 = vld [vmem:[%s2695_s0] sm:$0xff] (!%p302_p2) }
   0xa   : > { %v2394_v18 = vpack.c.bf16 (!%p302_p2), %v392_v11, %v391_v10  ;;  %v1818_v21 = vld [vmem:[%s2695_s0 + $0x8] sm:$0xff] (!%p302_p2)  ;;  %v395_v26 = vld [vmem:[%s2700_s5 + $0x40] sm:$0xff] (!%p302_p2)  ;;  %v2427_v32 = vpack.c.bf16 (!%p302_p2), %v394_v15, %v393_v14  ;;  %v397_v38 = vld [vmem:[%s2700_s5 + $0x50] sm:$0xff] (!%p302_p2)  ;;  %vm561_vm4 = vcmp.lt.s32.totalorder (!%p302_p2), %v404_v3, 256  ;;  %vm1040_vm5 = vcmask (!%p302_p2), 1046528  }
   0xb   : > { %v396_v33 = vld [vmem:[%s2700_s5 + $0x48] sm:$0xff] (!%p302_p2)  ;;  %v398_v39 = vld [vmem:[%s2700_s5 + $0x58] sm:$0xff] (!%p302_p2)  ;;  %v399_v50 = vld [vmem:[%s2700_s5 + $0x60] sm:$0xff] (!%p302_p2)  ;;  %563 = vst.msk [vmem:[#allocation2] ss:$8 sm:$0x3] (!%p302_p2), %vm561_vm4, %v2276_v7 }
   0xc   : > { %2095 = vmatpush3.bf16.msra.mxu0 (!%p302_p2), %v2356_v9  ;;  %v2448_v44 = vpack.c.bf16 (!%p302_p2), %v396_v33, %v395_v26  ;;  %v400_v51 = vld [vmem:[%s2700_s5 + $0x68] sm:$0xff] (!%p302_p2)  ;;  %v2468_v57 = vpack.c.bf16 (!%p302_p2), %v398_v39, %v397_v38  ;;  %v401_v63 = vld [vmem:[%s2700_s5 + $0x70] sm:$0xff] (!%p302_p2)  ;;  %v402_v0 = vld [vmem:[%s2700_s5 + $0x78] sm:$0xff] (!%p302_p2)  ;;  %577 = vst.msk [vmem:[#allocation2 + $0x11] ss:$8 sm:$0x3] (!%p302_p2), %vm561_vm4, %v2276_v7 }
   0xd   : > { %s2705_s28 = smov (!%p354_p3, %s1804_s28), 1  ;;  %2096 = vmatprep.subr.bf16.mxu0 %v2274_v4  ;;  %v2479_v11 = vpack.c.bf16 %v400_v51, %v399_v50  ;;  %592 = vst.msk [vmem:[#allocation2 + $0x12] ss:$8 sm:$0x3] %vm561_vm4, %v2276_v7  ;;  %vm1048_vm6 = vcmask 1045504   ;;  %vm1541_vm7 = vcmask 523264  }
   0xe   : > { %s2371_s19 = sshll.u32 %s2705_s28, 4  ;;  %s2150_s20 = smul.u32 384, %s2705_s28  ;;  %607 = vst.msk [vmem:[#allocation2 + $0x23] ss:$8 sm:$0x3] %vm561_vm4, %v2276_v7  ;;  %vm1697_vm8 = vcmask 523266  }
   0xf   : > { %s2387_s29 = scalar_lea.vmem %s2697_s2, %s2371_s19  ;;  %s2151_s14 = smul.u32 192, %s2705_s28  ;;  %vm1699_vm9 = vcmask 517120  }
  0x10   : > { %s2399_s10 = scalar_lea.vmem %s2698_s3, %s2150_s20  ;;  %v2402_v19 = vld [vmem:[%s2387_s29] sm:$0xff]  ;;  %2098 = vmatpush3.bf16.msra.mxu0 %v2394_v18  ;;  %s358_s21 = scalar_lea.vmem %s2696_s1, %s2371_s19 }
  0x11   : > { %v407_v22 = vrot.slane %v2402_v19, %v2368_v12  ;;  %v433_v23 = vrot.slane %v2402_v19, %v2375_v13  ;;  %v2164_v24 = vld [vmem:[%s2399_s10 + $0x4] ss:$12 sps:$4 sm:$0xff]   ;;  %v2166_v25 = vld [vmem:[%s2399_s10] ss:$12 sps:$4 sm:$0xff]   ;;  %v413_v28 = vrot.slane %v2402_v19, %v2390_v16  ;;  %v439_v30 = vrot.slane %v2402_v19, %v438_v17  ;;  %v2167_v31 = vld [vmem:[%s2399_s10 + $0x1c] ss:$12 sps:$4 sm:$0xff]   ;;  %2099 = vmatprep.subr.bf16.mxu0 %v2274_v4  ;;  %s2493_s17 = scalar_lea.vmem %s2699_s4, %s2151_s14  ;;  %s382_s22 = scalar_lea.vmem %s2703_s8, %s2371_s19 }
  0x12   : > { %939 = vmatprep.subr.bf16.mxu1 %v2164_v24  ;;  %v2169_v34 = vld [vmem:[%s2399_s10 + $0x18] ss:$12 sps:$4 sm:$0xff]   ;;  %v2170_v37 = vld [vmem:[%s2399_s10 + $0x34] ss:$12 sps:$4 sm:$0xff]   ;;  %v2172_v42 = vld [vmem:[%s2399_s10 + $0x30] ss:$12 sps:$4 sm:$0xff]  }
  0x13   : > { %v408_v27 = vmul.f32 %v407_v22, %v403_v20  ;;  %v434_v29 = vmul.f32 %v1818_v21, %v433_v23  ;;  %940 = vmatpush1.bf16.msra.mxu1 %v2166_v25  ;;  %v2173_v43 = vld [vmem:[%s2399_s10 + $0x4c] ss:$12 sps:$4 sm:$0xff]   ;;  %v2175_v49 = vld [vmem:[%s2399_s10 + $0x48] ss:$12 sps:$4 sm:$0xff]   ;;  %v2176_v56 = vld [vmem:[%s2399_s10 + $0x64] ss:$12 sps:$4 sm:$0xff]   ;;  %v2483_v25 = vpack.c.bf16 %v402_v0, %v401_v63 }
  0x14   : > { %941 = vmatprep.subr.bf16.mxu1 %v2167_v31  ;;  %2101 = vmatpush3.bf16.msra.mxu0 %v2427_v32  ;;  %v2178_v62 = vld [vmem:[%s2399_s10 + $0x60] ss:$12 sps:$4 sm:$0xff]   ;;  %v2179_v33 = vld [vmem:[%s2399_s10 + $0x7c] ss:$12 sps:$4 sm:$0xff]   ;;  %v2188_v39 = vld [vmem:[%s2399_s10 + $0xc4] ss:$12 sps:$4 sm:$0xff]  }
  0x15   : > { %v409_v35 = vadd.f32 %v408_v27, %v403_v20  ;;  %v435_v36 = vadd.f32 %v1818_v21, %v434_v29  ;;  %2102 = vmatprep.subr.bf16.mxu0 %v2274_v4  ;;  %v2187_v38 = vld [vmem:[%s2399_s10 + $0xa8] ss:$12 sps:$4 sm:$0xff]   ;;  %v2200_v51 = vld [vmem:[%s2399_s10 + $0xf8] ss:$12 sps:$4 sm:$0xff]   ;;  %v2215_v0 = vld [vmem:[%s2399_s10 + $0x140] ss:$12 sps:$4 sm:$0xff]  }
  0x16   : > { %v2198_v50 = vld [vmem:[%s2399_s10 + $0xf4] ss:$12 sps:$4 sm:$0xff]   ;;  %v2213_v63 = vld [vmem:[%s2399_s10 + $0x13c] ss:$12 sps:$4 sm:$0xff]   ;;  %s1815_s18 = sshll.u32 %s2705_s28, 2 }
  0x17   : > { %v2441_v40 = vadd.f32 %v413_v28, %v409_v35  ;;  %v2443_v41 = vadd.f32 %v439_v30, %v435_v36  ;;  %942 = vmatpush1.bf16.msra.mxu1 %v2169_v34  ;;  %v2181_v34 = vld [vmem:[%s2399_s10 + $0x78] ss:$12 sps:$4 sm:$0xff]   ;;  %v2182_v35 = vld [vmem:[%s2399_s10 + $0x94] ss:$12 sps:$4 sm:$0xff]   ;;  %v2184_v36 = vld [vmem:[%s2399_s10 + $0x90] ss:$12 sps:$4 sm:$0xff]  }
  0x18   : > { %943 = vmatprep.subr.bf16.mxu1 %v2170_v37  ;;  %2104 = vmatpush3.bf16.msra.mxu0 %v2448_v44  ;;  %v2185_v37 = vld [vmem:[%s2399_s10 + $0xac] ss:$12 sps:$4 sm:$0xff]   ;;  %v2221_v3 = vld [vmem:[%s2399_s10 + $0x150] ss:$12 sps:$4 sm:$0xff]  }
  0x19   : > { %v415_v45 = vrot.slane %v2441_v40, 4  ;;  %v421_v46 = vmul.f32 %v2441_v40, %v2441_v40  ;;  %v441_v47 = vrot.slane %v2443_v41, 4  ;;  %v447_v48 = vmul.f32 %v2443_v41, %v2443_v41  ;;  %2105 = vmatprep.subr.bf16.mxu0 %v2274_v4 }
  0x1b   : > { %v416_v52 = vadd.f32 %v415_v45, %v2441_v40  ;;  %v422_v53 = vrot.slane %v421_v46, 4  ;;  %v442_v54 = vadd.f32 %v441_v47, %v2443_v41  ;;  %v448_v55 = vrot.slane %v447_v48, 4  ;;  %944 = vmatpush1.bf16.msra.mxu1 %v2172_v42  ;;  %v2190_v42 = vld [vmem:[%s2399_s10 + $0xc8] ss:$12 sps:$4 sm:$0xff]   ;;  %v2195_v47 = vld [vmem:[%s2399_s10 + $0xe0] ss:$12 sps:$4 sm:$0xff]  }
  0x1c   : > { %945 = vmatprep.subr.bf16.mxu1 %v2173_v43  ;;  %2107 = vmatpush3.bf16.msra.mxu0 %v2468_v57  ;;  %v2191_v43 = vld [vmem:[%s2399_s10 + $0xc0] ss:$12 sps:$4 sm:$0xff]   ;;  %v2192_v45 = vld [vmem:[%s2399_s10 + $0x8] ss:$12 sps:$4 sm:$0xff]  }
  0x1d   : > { %v417_v58 = vrot.slane %v416_v52, 2  ;;  %v423_v59 = vadd.f32 %v422_v53, %v421_v46  ;;  %v443_v60 = vrot.slane %v442_v54, 2  ;;  %v449_v61 = vadd.f32 %v448_v55, %v447_v48  ;;  %2108 = vmatprep.subr.bf16.mxu0 %v2274_v4  ;;  %v2193_v46 = vld [vmem:[%s2399_s10 + $0xdc] ss:$12 sps:$4 sm:$0xff]   ;;  %v2196_v48 = vld [vmem:[%s2399_s10 + $0xd8] ss:$12 sps:$4 sm:$0xff]  }
  0x1e   : > { %v2202_v53 = vld [vmem:[%s2399_s10 + $0x38] ss:$12 sps:$4 sm:$0xff]   ;;  %v2205_v55 = vld [vmem:[%s2399_s10 + $0x110] ss:$12 sps:$4 sm:$0xff]  }
  0x1f   : > { %v418_v1 = vadd.f32 %v417_v58, %v416_v52  ;;  %v424_v2 = vrot.slane %v423_v59, 2  ;;  %v444_v6 = vadd.f32 %v443_v60, %v442_v54  ;;  %v450_v10 = vrot.slane %v449_v61, 2  ;;  %946 = vmatpush1.bf16.msra.mxu1 %v2175_v49  ;;  %v2197_v49 = vld [vmem:[%s2399_s10 + $0x20] ss:$12 sps:$4 sm:$0xff]   ;;  %v2201_v52 = vld [vmem:[%s2399_s10 + $0xf0] ss:$12 sps:$4 sm:$0xff]  }
  0x20   : > { %947 = vmatprep.subr.bf16.mxu1 %v2176_v56  ;;  %2110 = vmatpush3.bf16.msra.mxu0 %v2479_v11  ;;  %v2203_v54 = vld [vmem:[%s2399_s10 + $0x10c] ss:$12 sps:$4 sm:$0xff]   ;;  %v2206_v56 = vld [vmem:[%s2399_s10 + $0x108] ss:$12 sps:$4 sm:$0xff]   ;;  %v2207_v58 = vld [vmem:[%s2399_s10 + $0x50] ss:$12 sps:$4 sm:$0xff]  }
  0x21   : > { %v419_v14 = vrot.slane %v418_v1, 1  ;;  %v425_v15 = vadd.f32 %v424_v2, %v423_v59  ;;  %v445_v20 = vrot.slane %v444_v6, 1  ;;  %v451_v21 = vadd.f32 %v450_v10, %v449_v61  ;;  %2111 = vmatprep.subr.bf16.mxu0 %v2274_v4  ;;  %v2208_v59 = vld [vmem:[%s2399_s10 + $0x124] ss:$12 sps:$4 sm:$0xff]   ;;  %v2210_v60 = vld [vmem:[%s2399_s10 + $0x128] ss:$12 sps:$4 sm:$0xff]  }
  0x22   : > { %v2211_v61 = vld [vmem:[%s2399_s10 + $0x120] ss:$12 sps:$4 sm:$0xff]   ;;  %v2216_v2 = vld [vmem:[%s2399_s10 + $0x138] ss:$12 sps:$4 sm:$0xff]  }
  0x23   : > { %v420_v22 = vadd.f32 %v419_v14, %v418_v1  ;;  %v426_v23 = vrot.slane %v425_v15, 1  ;;  %v452_v24 = vrot.slane %v451_v21, 1  ;;  %v446_v26 = vadd.f32 %v445_v20, %v444_v6  ;;  %948 = vmatpush1.bf16.msra.mxu1 %v2178_v62  ;;  %v2212_v62 = vld [vmem:[%s2399_s10 + $0x68] ss:$12 sps:$4 sm:$0xff]   ;;  %v570_v1 = vld [vmem:[%s358_s21] sm:$0xff] }
  0x24   : > { %2113 = vmatpush3.bf16.msra.mxu0 %v2483_v25  ;;  %949 = vmatprep.subr.bf16.mxu1 %v2179_v33  ;;  %v2217_v6 = vld [vmem:[%s2399_s10 + $0x80] ss:$12 sps:$4 sm:$0xff]   ;;  %v572_v10 = vrot.slane %v570_v1, 7 }
  0x25   : > { %v427_v27 = vadd.f32 %v426_v23, %v425_v15  ;;  %v453_v28 = vadd.f32 %v452_v24, %v451_v21  ;;  %1917 = vmatprep.subr.bf16.mxu0 %v2190_v42  ;;  %v1819_v14 = vld [vmem:[%s358_s21 + $0x8] sm:$0xff]  ;;  %v2218_v20 = vld [vmem:[%s2399_s10 + $0x154] ss:$12 sps:$4 sm:$0xff]   ;;  %v2220_v21 = vld [vmem:[%s2399_s10 + $0x158] ss:$12 sps:$4 sm:$0xff]   ;;  %v551_v42 = vsub.s32 4, %v2353_v8 }
  0x26   : > { %v602_v15 = vrot.slane %v1819_v14, 5  ;;  %574 = vst [vmem:[#allocation2 + $0x8] sm:$0xfe] %v572_v10  ;;  %575 = vst [vmem:[#allocation2 + $0x18] sm:$0x1] %v572_v10 }
  0x27   : > { %v455_v29 = vsel %vm454_vm1, %v420_v22, %v427_v27  ;;  %950 = vmatpush1.bf16.msra.mxu1 %v2181_v34  ;;  %v2222_v22 = vld [vmem:[%s2399_s10 + $0x98] ss:$12 sps:$4 sm:$0xff]   ;;  %v2225_v24 = vld [vmem:[%s2399_s10 + $0x170] ss:$12 sps:$4 sm:$0xff]  }
  0x28   : > { %v457_v30 = vsel %vm456_vm2, %v455_v29, %v446_v26  ;;  %951 = vmatprep.subr.bf16.mxu1 %v2182_v35  ;;  %604 = vst [vmem:[#allocation2 + $0x18] sm:$0xf8] %v602_v15  ;;  %605 = vst [vmem:[#allocation2 + $0x28] sm:$0x7] %v602_v15  ;;  %v2223_v23 = vld [vmem:[%s2399_s10 + $0x16c] ss:$12 sps:$4 sm:$0xff]  }
  0x29   : > { %v459_v31 = vsel %vm458_vm3, %v457_v30, %v453_v28  ;;  %v2226_v26 = vld [vmem:[%s2399_s10 + $0x168] ss:$12 sps:$4 sm:$0xff]   ;;  %v2227_v27 = vld [vmem:[%s2399_s10 + $0xb0] ss:$12 sps:$4 sm:$0xff]  }
  0x2a   : > { %2014 = vmatmul.mubr.f32.vlgmr.msra.gmra.mrb[0].mxu0 %v459_v31 }
  0x2b   : > { %952 = vmatpush1.bf16.msra.mxu1 %v2184_v36  ;;  %1918 = vmatpush3.bf16.msra.mxu0 %v2192_v45 }
  0x2c   : > { %953 = vmatprep.subr.bf16.mxu1 %v2185_v37  ;;  %1919 = vmatprep.subr.bf16.mxu0 %v2195_v47 }
  0x2d   : > { %v610_v28 = vld [vmem:[#allocation2 + $0x8] sm:$0xff] }
  0x2f   : > { %954 = vmatpush1.bf16.msra.mxu1 %v2187_v38  ;;  %1920 = vmatpush3.bf16.msra.mxu0 %v2197_v49  ;;  %v612_v29 = vld [vmem:[#allocation2 + $0x18] sm:$0xff] }
  0x30   : > { %955 = vmatprep.subr.bf16.mxu1 %v2188_v39  ;;  %1921 = vmatprep.subr.bf16.mxu0 %v2200_v51  ;;  %v616_v30 = vpack.c.bf16 %v612_v29, %v610_v28 }
  0x32   : > { %971 = vmatprep.mubr.bf16.mxu1 %v616_v30  ;;  %1022 = vmatprep.mubr.bf16.mxu0 %v616_v30 }
  0x33   : > { %956 = vmatpush1.bf16.msra.mxu1 %v2191_v43  ;;  %1922 = vmatpush3.bf16.msra.mxu0 %v2202_v53 }
  0x34   : > { %957 = vmatprep.subr.bf16.mxu1 %v2193_v46  ;;  %1923 = vmatprep.subr.bf16.mxu0 %v2205_v55  ;;  %v556_v46 = vsub.s32 5, %v2353_v8 }
  0x37   : > { %958 = vmatpush1.bf16.msra.mxu1 %v2196_v48  ;;  %1924 = vmatpush3.bf16.msra.mxu0 %v2207_v58  ;;  %v552_v48 = vrot.slane %v2402_v19, %v551_v42 }
  0x38   : > { %959 = vmatprep.subr.bf16.mxu1 %v2198_v50  ;;  %1925 = vmatprep.subr.bf16.mxu0 %v2210_v60 }
  0x3b   : > { %960 = vmatpush1.bf16.msra.mxu1 %v2201_v52  ;;  %1926 = vmatpush3.bf16.msra.mxu0 %v2212_v62 }
  0x3c   : > { %961 = vmatprep.subr.bf16.mxu1 %v2203_v54  ;;  %1927 = vmatprep.subr.bf16.mxu0 %v2215_v0  ;;  %v557_v54 = vrot.slane %v2402_v19, %v556_v46 }
  0x3f   : > { %962 = vmatpush1.bf16.msra.mxu1 %v2206_v56  ;;  %1928 = vmatpush3.bf16.msra.mxu0 %v2217_v6 }
  0x40   : > { %963 = vmatprep.subr.bf16.mxu1 %v2208_v59  ;;  %1929 = vmatprep.subr.bf16.mxu0 %v2220_v21 }
  0x43   : > { %964 = vmatpush1.bf16.msra.mxu1 %v2211_v61  ;;  %1930 = vmatpush3.bf16.msra.mxu0 %v2222_v22 }
  0x44   : > { %965 = vmatprep.subr.bf16.mxu1 %v2213_v63  ;;  %1931 = vmatprep.subr.bf16.mxu0 %v2225_v24 }
  0x47   : > { %966 = vmatpush1.bf16.msra.mxu1 %v2216_v2  ;;  %1932 = vmatpush3.bf16.msra.mxu0 %v2227_v27 }
  0x48   : > { %967 = vmatprep.subr.bf16.mxu1 %v2218_v20  ;;  %2114 = vmatprep.subr.bf16.mxu0 %v2274_v4 }
  0x4b   : > { %968 = vmatpush1.bf16.msra.mxu1 %v2221_v3 }
  0x4c   : > { %969 = vmatprep.subr.bf16.mxu1 %v2223_v23 }
  0x4f   : > { %970 = vmatpush1.bf16.msra.mxu1 %v2226_v26 }
  0xfd   : > { %v526_v31 = vpop.f32.mrb[0].mxu0 }
  0xfe   : > { %v530_v33 = vmul.f32 0.015625, %v526_v31  ;;  %v2015_v34 = vpop.f32.mrb[1].mxu0 }
 0x100   : > { %v531_v35 = vmul.f32 %v530_v33, %v530_v33  ;;  %v540_v43 = vrot.slane %v530_v33, %v2368_v12  ;;  %v582_v45 = vrot.slane %v530_v33, %v2375_v13 }
 0x102   : > { %v533_v36 = vrot.slane %v531_v35, 7  ;;  %v541_v49 = vsub.f32 %v2441_v40, %v540_v43  ;;  %v583_v51 = vsub.f32 %v2443_v41, %v582_v45  ;;  %v614_v40 = vld [vmem:[#allocation2 + $0x28] sm:$0xf] }
 0x103   : > { %v618_v0 = vpack.c.bf16 %v614_v40, %v614_v40 }
 0x104   : > { %v535_v37 = vsub.f32 %v530_v33, %v533_v36 }
 0x106   : > { %v536_v38 = vmax.f32 %v535_v37, 0.0 }
 0x108   : > { %v542_v39 = vadd.f32 1e-05, %v536_v38 }
 0x10a   : > { %2260 = vrsqrt.f32 %v542_v39 }
 0x114   : > { %v2261_v47 = vpop.eup %2260 }
 0x115   : > { %v547_v50 = vrot.slane %v2261_v47, %v2390_v16  ;;  %v587_v52 = vrot.slane %v2261_v47, %v438_v17 }
 0x117   : > { %v548_v53 = vmul.f32 %v547_v50, %v541_v49  ;;  %v588_v55 = vmul.f32 %v587_v52, %v583_v51 }
 0x119   : > { %v553_v56 = vmul.f32 %v552_v48, %v548_v53  ;;  %v589_v58 = vmul.f32 %v588_v55, %v552_v48 }
 0x11b   : > { %v558_v59 = vadd.f32 %v557_v54, %v553_v56  ;;  %v590_v60 = vadd.f32 %v589_v58, %v557_v54 }
 0x11d   : > { %v566_v61 = vrot.slane %v558_v59, 7  ;;  %v595_v62 = vrot.slane %v590_v60, 5 }
 0x11f   : > { %568 = vst [vmem:[#allocation2] sm:$0xfe] %v566_v61  ;;  %569 = vst [vmem:[#allocation2 + $0x10] sm:$0x1] %v566_v61 }
 0x120   : > { %597 = vst [vmem:[#allocation2 + $0x10] sm:$0xf8] %v595_v62  ;;  %598 = vst [vmem:[#allocation2 + $0x20] sm:$0x7] %v595_v62 }
 0x126   : > { %v609_v63 = vld [vmem:[#allocation2] sm:$0xff] }
 0x127   : > { %v611_v41 = vld [vmem:[#allocation2 + $0x10] sm:$0xff]  ;;  %v613_v17 = vld [vmem:[#allocation2 + $0x20] sm:$0xf] }
 0x128   : > { %v615_v1 = vpack.c.bf16 %v611_v41, %v609_v63  ;;  %v617_v2 = vpack.c.bf16 %v613_v17, %v613_v17 }
 0x12a   : > { %972 = vmatmul.mubr.bf16.vlgmr.msra.gmra.mrb[0].mxu1 %v615_v1  ;;  %1023 = vmatmul.mubr.bf16.vlgmr.msra.gmra.mrb[4].mxu0 %v615_v1 }
 0x12b   : > { %981 = vmatprep.mubr.bf16.mxu1 %v618_v0  ;;  %1030 = vmatprep.mubr.bf16.mxu0 %v618_v0 }
 0x12c   : > { %2116 = vmatpush3.bf16.msra.mxu0 %v2341_v5 }
 0x12d   : > { %2117 = vmatprep.subr.bf16.mxu0 %v2274_v4 }
 0x130   : > { %2119 = vmatpush3.bf16.msra.mxu0 %v2356_v9 }
 0x131   : > { %2120 = vmatprep.subr.bf16.mxu0 %v2274_v4 }
 0x132   : > { %982 = vmatmul.mubr.bf16.gmra.mrb[4].mxu1 %v617_v2  ;;  %1031 = vmatmul.mubr.bf16.gmra.mrb[8].mxu0 %v617_v2 }
 0x133   : > { %2048 = vmatprep.mubr.msk.f32.mxu0 %vm2275_vm0, %v2276_v7 }
 0x134   : > { %2122 = vmatpush3.bf16.msra.mxu0 %v2394_v18 }
 0x135   : > { %2123 = vmatprep.subr.bf16.mxu0 %v2274_v4 }
 0x138   : > { %2125 = vmatpush3.bf16.msra.mxu0 %v2427_v32 }
 0x139   : > { %2126 = vmatprep.subr.bf16.mxu0 %v2274_v4 }
 0x13c   : > { %2128 = vmatpush3.bf16.msra.mxu0 %v2448_v44 }
 0x13d   : > { %2129 = vmatprep.subr.bf16.mxu0 %v2274_v4 }
 0x140   : > { %2131 = vmatpush3.bf16.msra.mxu0 %v2468_v57  ;;  %v1070_v57 = vsub.s32 6, %v2353_v8 }
 0x141   : > { %2132 = vmatprep.subr.bf16.mxu0 %v2274_v4 }
 0x142   : > { %v1071_v24 = vrot.slane %v2402_v19, %v1070_v57 }
 0x144   : > { %2134 = vmatpush3.bf16.msra.mxu0 %v2479_v11 }
 0x145   : > { %2135 = vmatprep.subr.bf16.mxu0 %v2274_v4 }
 0x148   : > { %2137 = vmatpush3.bf16.msra.mxu0 %v2483_v25 }
 0x1fd   : > { %v973_v5 = vpop.f32.mrb[0].mxu1  ;;  %v1933_v9 = vpop.f32.mrb[4].mxu0 }
 0x1fe   : > { %v975_v18 = vpop.f32.mrb[1].mxu1  ;;  %v1934_v32 = vpop.f32.mrb[5].mxu0 }
 0x1ff   : > { %v1935_v6 = vadd.f32 %v1934_v32, %v1933_v9  ;;  %v977_v10 = vpop.f32.mrb[2].mxu1  ;;  %v1936_v14 = vpop.f32.mrb[6].mxu0  ;;  %v1041_v20 = vrot.slane %v975_v18, 1 }
 0x200   : > { %v979_v44 = vpop.f32.mrb[3].mxu1  ;;  %v1937_v15 = vpop.f32.mrb[7].mxu0 }
 0x201   : > { %v1042_v21 = vrot.slane %v979_v44, 1  ;;  %v1938_v3 = vadd.f32 %v1937_v15, %v1936_v14  ;;  %v1049_v11 = vrot.slane %v1935_v6, 2 }
 0x203   : > { %v1043_v22 = vsel %vm1040_vm5, %v1041_v20, %v1042_v21  ;;  %v1050_v25 = vrot.slane %v1938_v3, 2 }
 0x204   : > { %v1045_v23 = vadd.f32 %v1043_v22, %v973_v5 }
 0x205   : > { %v1051_v26 = vsel %vm1048_vm6, %v1049_v11, %v1050_v25  ;;  %v983_v27 = vpop.f32.mrb[4].mxu1  ;;  %v1939_v28 = vpop.f32.mrb[8].mxu0 }
 0x206   : > { %v1053_v29 = vadd.f32 %v1051_v26, %v1045_v23  ;;  %v985_v30 = vpop.f32.mrb[5].mxu1  ;;  %v1940_v31 = vpop.f32.mrb[9].mxu0 }
 0x207   : > { %v1055_v33 = vrot.slane %v985_v30, 1  ;;  %v1941_v34 = vadd.f32 %v1940_v31, %v1939_v28  ;;  %v987_v35 = vpop.f32.mrb[6].mxu1  ;;  %v1942_v36 = vpop.f32.mrb[10].mxu0  ;;  %v2230_v30 = vld [vmem:[%s2493_s17 + $0x4] ss:$12 sps:$4 sm:$0xff]  }
 0x208   : > { %v1072_v37 = vadd.f32 %v1071_v24, %v1053_v29  ;;  %v988_v38 = vpop.f32.mrb[7].mxu1  ;;  %v1943_v39 = vpop.f32.mrb[11].mxu0  ;;  %v2228_v31 = vld [vmem:[%s2493_s17] ss:$12 sps:$4 sm:$0xff]   ;;  %1396 = vmatprep.subr.bf16.mxu1 %v2230_v30  ;;  %v2232_v35 = vld [vmem:[%s2493_s17 + $0x18] ss:$12 sps:$4 sm:$0xff]  }
 0x209   : > { %v1056_v42 = vsel %vm1040_vm5, %v1042_v21, %v1055_v33  ;;  %v1060_v43 = vadd.f32 %v1055_v33, %v983_v27  ;;  %v1062_v45 = vrot.slane %v1941_v34, 2  ;;  %v2231_v33 = vld [vmem:[%s2493_s17 + $0x8] ss:$12 sps:$4 sm:$0xff]   ;;  %1397 = vmatpush1.bf16.msra.mxu1 %v2228_v31  ;;  %v2235_v36 = vld [vmem:[%s2493_s17 + $0x20] ss:$12 sps:$4 sm:$0xff]  }
 0x20a   : > { %v2576_v46 = vmax.f32 %v1072_v37, 0.0  ;;  %v1059_v47 = vadd.f32 %v1056_v42, %v977_v10  ;;  %2051 = vmatprep.subr.bf16.mxu0 %v2231_v33  ;;  %v2234_v34 = vld [vmem:[%s2493_s17 + $0x1c] ss:$12 sps:$4 sm:$0xff]   ;;  %v2238_v37 = vld [vmem:[%s2493_s17 + $0x34] ss:$12 sps:$4 sm:$0xff]  }
 0x20b   : > { %v1063_v48 = vsel %vm1048_vm6, %v1050_v25, %v1062_v45  ;;  %v1067_v49 = vadd.f32 %v1062_v45, %v1060_v43  ;;  %1398 = vmatprep.subr.bf16.mxu1 %v2234_v34  ;;  %v2236_v38 = vld [vmem:[%s2493_s17 + $0x30] ss:$12 sps:$4 sm:$0xff]   ;;  %v2239_v39 = vld [vmem:[%s2493_s17 + $0x38] ss:$12 sps:$4 sm:$0xff]   ;;  %v2240_v43 = vld [vmem:[%s2493_s17 + $0x48] ss:$12 sps:$4 sm:$0xff]  }
 0x20c   : > { %v1085_v50 = vmul.f32 %v2576_v46, %v2576_v46  ;;  %v1066_v51 = vadd.f32 %v1063_v48, %v1059_v47  ;;  %v1078_v52 = vrot.slane %v2576_v46, 4  ;;  %v2242_v42 = vld [vmem:[%s2493_s17 + $0x4c] ss:$12 sps:$4 sm:$0xff]   ;;  %v2243_v45 = vld [vmem:[%s2493_s17 + $0x50] ss:$12 sps:$4 sm:$0xff]   ;;  %v1537_v30 = vld [vmem:[%s2701_s6 + $0x20] sm:$0xff] }
 0x20d   : > { %v1075_v53 = vadd.f32 %v1071_v24, %v1067_v49  ;;  %1399 = vmatpush1.bf16.msra.mxu1 %v2232_v35  ;;  %v2246_v47 = vld [vmem:[%s2493_s17 + $0x64] ss:$12 sps:$4 sm:$0xff]   ;;  %v2244_v48 = vld [vmem:[%s2493_s17 + $0x60] ss:$12 sps:$4 sm:$0xff]   ;;  %v2247_v49 = vld [vmem:[%s2493_s17 + $0x68] ss:$12 sps:$4 sm:$0xff]  }
 0x20e   : > { %v1074_v54 = vadd.f32 %v1071_v24, %v1066_v51  ;;  %v1086_v55 = vrot.slane %v1085_v50, 4  ;;  %v1079_v61 = vadd.f32 %v1078_v52, %v2576_v46  ;;  %1400 = vmatprep.subr.bf16.mxu1 %v2238_v37  ;;  %v2248_v51 = vld [vmem:[%s2493_s17 + $0x78] ss:$12 sps:$4 sm:$0xff]   ;;  %v2251_v52 = vld [vmem:[%s2493_s17 + $0x80] ss:$12 sps:$4 sm:$0xff]   ;;  %v1539_v34 = vld [vmem:[%s2701_s6 + $0x30] sm:$0xff] }
 0x20f   : > { %v2582_v56 = vmax.f32 %v1075_v53, 0.0  ;;  %v2252_v53 = vld [vmem:[%s2493_s17 + $0x90] ss:$12 sps:$4 sm:$0xff]   ;;  %v1538_v31 = vld [vmem:[%s2701_s6 + $0x28] sm:$0xff] }
 0x210   : > { %v2584_v58 = vmax.f32 %v1074_v54, 0.0  ;;  %v1087_v62 = vadd.f32 %v1086_v55, %v1085_v50  ;;  %v1080_v2 = vrot.slane %v1079_v61, 2  ;;  %v2250_v50 = vld [vmem:[%s2493_s17 + $0x7c] ss:$12 sps:$4 sm:$0xff]   ;;  %v2254_v54 = vld [vmem:[%s2493_s17 + $0x94] ss:$12 sps:$4 sm:$0xff]  }
 0x211   : > { %v1096_v59 = vrot.slane %v2582_v56, 2  ;;  %v1107_v60 = vmul.f32 %v2582_v56, %v2582_v56  ;;  %1401 = vmatpush1.bf16.msra.mxu1 %v2236_v38  ;;  %v2255_v55 = vld [vmem:[%s2493_s17 + $0x98] ss:$12 sps:$4 sm:$0xff]  }
 0x212   : > { %v1095_v40 = vrot.slane %v2584_v58, 2  ;;  %v1106_v63 = vmul.f32 %v2584_v58, %v2584_v58  ;;  %v1088_v5 = vrot.slane %v1087_v62, 2  ;;  %v1081_v10 = vadd.f32 %v1080_v2, %v1079_v61  ;;  %1402 = vmatprep.subr.bf16.mxu1 %v2242_v42  ;;  %v2256_v61 = vld [vmem:[%s2493_s17 + $0xa8] ss:$12 sps:$4 sm:$0xff]   ;;  %v1540_v35 = vld [vmem:[%s2701_s6 + $0x38] sm:$0xff] }
 0x213   : > { %v1111_v41 = vrot.slane %v1107_v60, 2  ;;  %v2259_v60 = vld [vmem:[%s2493_s17 + $0xb0] ss:$12 sps:$4 sm:$0xff]  }
 0x214   : > { %v1097_v0 = vsel %vm1048_vm6, %v1095_v40, %v1096_v59  ;;  %v1110_v1 = vrot.slane %v1106_v63, 2  ;;  %v1089_v14 = vadd.f32 %v1088_v5, %v1087_v62  ;;  %v1082_v20 = vrot.slane %v1081_v10, 1  ;;  %v2258_v59 = vld [vmem:[%s2493_s17 + $0xac] ss:$12 sps:$4 sm:$0xff]  }
 0x215   : > { %v1099_v17 = vrot.slane %v1097_v0, 4  ;;  %1403 = vmatpush1.bf16.msra.mxu1 %v2240_v43  ;;  %v2277_v62 = vmov 0  }
 0x216   : > { %v1112_v9 = vsel %vm1048_vm6, %v1110_v1, %v1111_v41  ;;  %v1090_v21 = vrot.slane %v1089_v14, 1  ;;  %v1083_v23 = vadd.f32 %v1082_v20, %v1081_v10  ;;  %1404 = vmatprep.subr.bf16.mxu1 %v2246_v47  ;;  %1428 = vmatprep.mubr.bf16.mxu1 %v2277_v62 }
 0x217   : > { %v1100_v18 = vadd.f32 %v1099_v17, %v1097_v0  ;;  %v1114_v32 = vrot.slane %v1112_v9, 4 }
 0x218   : > { %v1091_v24 = vadd.f32 %v1090_v21, %v1089_v14  ;;  %v385_v14 = vld [vmem:[%s2387_s29 + $0x8] sm:$0x1]  ;;  %s377_s29 = scalar_lea.vmem %s2702_s7, %s1815_s18 }
 0x219   : > { %v1115_v6 = vadd.f32 %v1114_v32, %v1112_v9  ;;  %v1101_v44 = vrot.slane %v1100_v18, 2  ;;  %1405 = vmatpush1.bf16.msra.mxu1 %v2244_v48 }
 0x21a   : > { %1406 = vmatprep.subr.bf16.mxu1 %v2250_v50  ;;  %v2661_v50 = vld [vmem:[%s377_s29] sm:$0x7] }
 0x21b   : > { %v1102_v15 = vadd.f32 %v1101_v44, %v1100_v18  ;;  %v1116_v57 = vrot.slane %v1115_v6, 2 }
 0x21d   : > { %v1103_v3 = vrot.slane %v1102_v15, 1  ;;  %v1117_v11 = vadd.f32 %v1116_v57, %v1115_v6  ;;  %1407 = vmatpush1.bf16.msra.mxu1 %v2248_v51  ;;  %v1213_v6 = vsub.s32 7, %v2353_v8 }
 0x21e   : > { %1408 = vmatprep.subr.bf16.mxu1 %v2254_v54 }
 0x21f   : > { %v1104_v22 = vadd.f32 %v1103_v3, %v1102_v15  ;;  %v1118_v25 = vrot.slane %v1117_v11, 1 }
 0x221   : > { %v1119_v26 = vadd.f32 %v1118_v25, %v1117_v11  ;;  %v1105_v27 = vadd.f32 %v1104_v22, %v1083_v23  ;;  %1409 = vmatpush1.bf16.msra.mxu1 %v2252_v53 }
 0x222   : > { %1410 = vmatprep.subr.bf16.mxu1 %v2258_v59 }
 0x223   : > { %v1120_v28 = vadd.f32 %v1119_v26, %v1091_v24 }
 0x225   : > { %v1121_v29 = vsel %vm454_vm1, %v1105_v27, %v1120_v28  ;;  %1411 = vmatpush1.bf16.msra.mxu1 %v2256_v61  ;;  %v1535_v28 = vld [vmem:[%s2701_s6 + $0x10] sm:$0xff]  ;;  %v1526_v61 = vrot.slane %v2661_v50, %v2368_v12 }
 0x226   : > { %2049 = vmatmul.mubr.f32.vlgmr.msra.gmra.mrb[2].mxu0 %v1121_v29  ;;  %2138 = vmatprep.subr.bf16.mxu1 %v2274_v4  ;;  %v1536_v29 = vld [vmem:[%s2701_s6 + $0x18] sm:$0xff] }
 0x227   : > { %2052 = vmatpush3.bf16.msra.mxu0 %v2231_v33  ;;  %v2145_v33 = vpack.c.bf16 %v1538_v31, %v1537_v30 }
 0x228   : > { %2053 = vmatprep.subr.bf16.mxu0 %v2235_v36 }
 0x22b   : > { %2054 = vmatpush3.bf16.msra.mxu0 %v2235_v36  ;;  %v2148_v36 = vpack.c.bf16 %v1540_v35, %v1539_v34 }
 0x22c   : > { %2055 = vmatprep.subr.bf16.mxu0 %v2239_v39 }
 0x22f   : > { %2056 = vmatpush3.bf16.msra.mxu0 %v2239_v39 }
 0x230   : > { %2057 = vmatprep.subr.bf16.mxu0 %v2243_v45 }
 0x233   : > { %2058 = vmatpush3.bf16.msra.mxu0 %v2243_v45 }
 0x234   : > { %2059 = vmatprep.subr.bf16.mxu0 %v2247_v49 }
 0x237   : > { %2060 = vmatpush3.bf16.msra.mxu0 %v2247_v49 }
 0x238   : > { %2061 = vmatprep.subr.bf16.mxu0 %v2251_v52 }
 0x23b   : > { %2062 = vmatpush3.bf16.msra.mxu0 %v2251_v52 }
 0x23c   : > { %2063 = vmatprep.subr.bf16.mxu0 %v2255_v55 }
 0x23f   : > { %2064 = vmatpush3.bf16.msra.mxu0 %v2255_v55 }
 0x240   : > { %2065 = vmatprep.subr.bf16.mxu0 %v2259_v60 }
 0x243   : > { %2066 = vmatpush3.bf16.msra.mxu0 %v2259_v60 }
 0x2f9   : > { %v1188_v40 = vpop.f32.mrb[2].mxu0 }
 0x2fa   : > { %v1192_v63 = vmul.f32 0.0078125, %v1188_v40  ;;  %v2050_v41 = vpop.f32.mrb[3].mxu0 }
 0x2fc   : > { %v1193_v0 = vmul.f32 %v1192_v63, %v1192_v63 }
 0x2fe   : > { %v1195_v1 = vrot.slane %v1193_v0, 7 }
 0x300   : > { %v1197_v17 = vsub.f32 %v1192_v63, %v1195_v1 }
 0x302   : > { %v1198_v2 = vmax.f32 %v1197_v17, 0.0 }
 0x304   : > { %v1199_v5 = vadd.f32 1e-05, %v1198_v2 }
 0x306   : > { %2262 = vrsqrt.f32 %v1199_v5 }
 0x310   : > { %v2263_v9 = vpop.eup %2262 }
 0x311   : > { %v1202_v18 = vrot.slane %v2263_v9, 2 }
 0x313   : > { %v1204_v32 = vmul.f32 %v1202_v18, %v2402_v19 }
 0x315   : > { %v1206_v10 = vrot.slane %v1204_v32, 7  ;;  %v1214_v15 = vrot.slane %v1204_v32, %v1213_v6 }
 0x317   : > { %v1208_v44 = vmul.f32 %v1206_v10, %v1192_v63  ;;  %v1215_v20 = vmul.f32 %v1214_v15, %v2576_v46  ;;  %v1224_v3 = vmul.f32 %v1214_v15, %v2584_v58  ;;  %v1225_v11 = vmul.f32 %v1214_v15, %v2582_v56  ;;  %v1533_v46 = vld [vmem:[%s2701_s6] sm:$0xff]  ;;  %v1534_v56 = vld [vmem:[%s2701_s6 + $0x8] sm:$0xff] }
 0x318   : > { %v2139_v58 = vpack.c.bf16 %v1534_v56, %v1533_v46 }
 0x319   : > { %v1209_v57 = vsub.f32 %v385_v14, %v1208_v44 }
 0x31b   : > { %v1219_v21 = vrot.slane %v1209_v57, %v2368_v12 }
 0x31d   : > { %v1220_v22 = vadd.f32 %v1219_v21, %v1215_v20  ;;  %v1226_v25 = vadd.f32 %v1224_v3, %v1219_v21  ;;  %v1227_v23 = vadd.f32 %v1225_v11, %v1219_v21 }
 0x31f   : > { %1221 = vst [vmem:[#allocation3 + $0x1] sm:$0xff] %v1220_v22  ;;  %1228 = vst [vmem:[#allocation3 + $0x9] sm:$0xfc] %v1226_v25 }
 0x320   : > { %1229 = vst [vmem:[#allocation3 + $0x11] sm:$0x3] %v1227_v23 }
 0x326   : > { %v1231_v8 = vld [vmem:[#allocation3] sm:$0xff]  ;;  %v1232_v19 = vld [vmem:[#allocation3 + $0x8] sm:$0xff] }
 0x327   : > { %v1233_v24 = vld [vmem:[#allocation3 + $0x10] sm:$0xf]  ;;  %v1234_v26 = vpack.c.bf16 %v1232_v19, %v1231_v8 }
 0x328   : > { %v1235_v27 = vpack.c.bf16 %v1233_v24, %v1233_v24 }
 0x329   : > { %1429 = vmatmul.mubr.bf16.vlgmr.msra.gmra.mrb[8].mxu1 %v1234_v26  ;;  %2067 = vmatprep.mubr.bf16.mxu0 %v1234_v26 }
 0x32a   : > { %2068 = vmatmul.mubr.bf16.vlgmr.msra.gmra.mrb[12].mxu0 %v1235_v27  ;;  %1438 = vmatprep.mubr.bf16.mxu1 %v2277_v62 }
 0x32b   : > { %2140 = vmatpush3.bf16.msra.mxu1 %v2139_v58 }
 0x32c   : > { %2141 = vmatprep.subr.bf16.mxu1 %v2274_v4 }
 0x331   : > { %1439 = vmatmul.mubr.bf16.gmra.mrb[12].mxu1 %v1235_v27 }
 0x332   : > { %2087 = vmatprep.mubr.msk.f32.mxu1 %vm2275_vm0, %v2276_v7  ;;  %v2142_v7 = vpack.c.bf16 %v1536_v29, %v1535_v28 }
 0x334   : > { %2143 = vmatpush3.bf16.msra.mxu1 %v2142_v7 }
 0x335   : > { %2144 = vmatprep.subr.bf16.mxu1 %v2274_v4 }
 0x338   : > { %2146 = vmatpush3.bf16.msra.mxu1 %v2145_v33 }
 0x339   : > { %2147 = vmatprep.subr.bf16.mxu1 %v2274_v4 }
 0x33c   : > { %2149 = vmatpush3.bf16.msra.mxu1 %v2148_v36 }
 0x3fc   : > { %v1430_v37 = vpop.f32.mrb[8].mxu1 }
 0x3fd   : > { %v1432_v38 = vpop.f32.mrb[9].mxu1  ;;  %v2069_v39 = vpop.f32.mrb[12].mxu0 }
 0x3fe   : > { %v1434_v42 = vpop.f32.mrb[10].mxu1  ;;  %v1481_v43 = vpop.f32.mrb[13].mxu0  ;;  %v1497_v48 = vrot.slane %v1432_v38, 1  ;;  %v1517_v52 = vrot.slane %v2069_v39, 2 }
 0x3ff   : > { %v1436_v45 = vpop.f32.mrb[11].mxu1  ;;  %v2070_v47 = vpop.f32.mrb[14].mxu0  ;;  %v1504_v4 = vrot.slane %v1481_v43, 2 }
 0x400   : > { %v1498_v49 = vrot.slane %v1436_v45, 1  ;;  %v1484_v51 = vpop.f32.mrb[15].mxu0 }
 0x401   : > { %v1505_v53 = vrot.slane %v1484_v51, 2 }
 0x402   : > { %v1499_v54 = vsel %vm1040_vm5, %v1497_v48, %v1498_v49 }
 0x403   : > { %v1501_v55 = vadd.f32 %v1499_v54, %v1430_v37  ;;  %v1506_v59 = vsel %vm1048_vm6, %v1504_v4, %v1505_v53  ;;  %v1518_v60 = vsel %vm1048_vm6, %v1505_v53, %v1517_v52 }
 0x404   : > { %v1440_v62 = vpop.f32.mrb[12].mxu1 }
 0x405   : > { %v1508_v40 = vadd.f32 %v1506_v59, %v1501_v55  ;;  %v1442_v63 = vpop.f32.mrb[13].mxu1 }
 0x406   : > { %v1510_v41 = vrot.slane %v1442_v63, 1  ;;  %v1444_v0 = vpop.f32.mrb[14].mxu1 }
 0x407   : > { %v1527_v1 = vadd.f32 %v1526_v61, %v1508_v40  ;;  %v1445_v17 = vpop.f32.mrb[15].mxu1 }
 0x408   : > { %v1511_v2 = vsel %vm1040_vm5, %v1498_v49, %v1510_v41  ;;  %v1515_v5 = vadd.f32 %v1510_v41, %v1440_v62 }
 0x409   : > { %v2669_v9 = vmax.f32 %v1527_v1, 0.0  ;;  %v1514_v18 = vadd.f32 %v1511_v2, %v1434_v42 }
 0x40a   : > { %v1522_v32 = vadd.f32 %v1517_v52, %v1515_v5 }
 0x40b   : > { %v1550_v6 = vmul.f32 %v2669_v9, %v2669_v9  ;;  %v1521_v10 = vadd.f32 %v1518_v60, %v1514_v18  ;;  %v1542_v12 = vsel %vm1541_vm7, %v2669_v9, 0.0 }
 0x40c   : > { %v1530_v14 = vadd.f32 %v1526_v61, %v1522_v32  ;;  %v1543_v15 = vrot.slane %v1542_v12, 4 }
 0x40d   : > { %v1529_v44 = vadd.f32 %v1526_v61, %v1521_v10  ;;  %v1551_v57 = vsel %vm1541_vm7, %v1550_v6, 0.0 }
 0x40e   : > { %v1532_v20 = vmax.f32 %v1530_v14, 0.0  ;;  %v1552_v21 = vrot.slane %v1551_v57, 4  ;;  %v1544_v8 = vadd.f32 %v1543_v15, %v1542_v12 }
 0x40f   : > { %v1531_v3 = vmax.f32 %v1529_v44, 0.0 }
 0x410   : > { %v1562_v11 = vrot.slane %v1532_v20, 2  ;;  %v1574_v22 = vmul.f32 %v1532_v20, %v1532_v20  ;;  %v1553_v19 = vadd.f32 %v1552_v21, %v1551_v57  ;;  %v1545_v58 = vrot.slane %v1544_v8, 2 }
 0x411   : > { %v1561_v25 = vrot.slane %v1531_v3, 2  ;;  %v1573_v23 = vmul.f32 %v1531_v3, %v1531_v3 }
 0x412   : > { %v1578_v24 = vrot.slane %v1574_v22, 2  ;;  %v1554_v28 = vrot.slane %v1553_v19, 2  ;;  %v1546_v33 = vadd.f32 %v1545_v58, %v1544_v8 }
 0x413   : > { %v1563_v26 = vsel %vm1048_vm6, %v1561_v25, %v1562_v11  ;;  %v1577_v27 = vrot.slane %v1573_v23, 2 }
 0x414   : > { %v1565_v46 = vsel %vm1541_vm7, %v1563_v26, 0.0  ;;  %v1555_v34 = vadd.f32 %v1554_v28, %v1553_v19  ;;  %v1547_v39 = vrot.slane %v1546_v33, 1 }
 0x415   : > { %v1579_v56 = vsel %vm1048_vm6, %v1577_v27, %v1578_v24  ;;  %v1566_v29 = vrot.slane %v1565_v46, 4 }
 0x416   : > { %v1581_v7 = vsel %vm1541_vm7, %v1579_v56, 0.0  ;;  %v1556_v42 = vrot.slane %v1555_v34, 1  ;;  %v1548_v49 = vadd.f32 %v1547_v39, %v1546_v33 }
 0x417   : > { %v1567_v30 = vadd.f32 %v1566_v29, %v1565_v46  ;;  %v1582_v31 = vrot.slane %v1581_v7, 4 }
 0x418   : > { %v1557_v51 = vadd.f32 %v1556_v42, %v1555_v34 }
 0x419   : > { %v1568_v35 = vrot.slane %v1567_v30, 2  ;;  %v1583_v36 = vadd.f32 %v1582_v31, %v1581_v7 }
 0x41b   : > { %v1569_v37 = vadd.f32 %v1568_v35, %v1567_v30  ;;  %v1584_v38 = vrot.slane %v1583_v36, 2 }
 0x41d   : > { %v1570_v43 = vrot.slane %v1569_v37, 1  ;;  %v1585_v45 = vadd.f32 %v1584_v38, %v1583_v36 }
 0x41f   : > { %v1571_v47 = vadd.f32 %v1570_v43, %v1569_v37  ;;  %v1586_v48 = vrot.slane %v1585_v45, 1 }
 0x421   : > { %v1587_v52 = vadd.f32 %v1586_v48, %v1585_v45  ;;  %v1572_v4 = vadd.f32 %v1571_v47, %v1548_v49 }
 0x423   : > { %v1588_v53 = vadd.f32 %v1587_v52, %v1557_v51 }
 0x425   : > { %v1589_v54 = vsel %vm454_vm1, %v1572_v4, %v1588_v53 }
 0x426   : > { %2088 = vmatmul.mubr.msk.f32.vlgmr.msra.gmra.mrb[16].mxu1 %vm1541_vm7, %v1589_v54 }
 0x4f9   : > { %v1659_v55 = vpop.f32.mrb[16].mxu1 }
 0x4fa   : > { %v1663_v59 = vmul.f32 0.0078125, %v1659_v55  ;;  %v2089_v60 = vpop.f32.mrb[17].mxu1 }
 0x4fc   : > { %v1664_v61 = vmul.f32 %v1663_v59, %v1663_v59 }
 0x4fe   : > { %v1666_v62 = vrot.slane %v1664_v61, 7 }
 0x500   : > { %v1668_v40 = vsub.f32 %v1663_v59, %v1666_v62 }
 0x502   : > { %v1669_v63 = vmax.f32 %v1668_v40, 0.0 }
 0x504   : > { %v1670_v41 = vadd.f32 1e-05, %v1669_v63 }
 0x506   : > { %2264 = vrsqrt.f32 %v1670_v41 }
 0x510   : > { %v2265_v0 = vpop.eup %2264 }
 0x511   : > { %v1672_v1 = vmul.f32 %v2265_v0, %v2661_v50 }
 0x513   : > { %v1674_v17 = vrot.slane %v1672_v1, 1  ;;  %v1684_v18 = vrot.slane %v1672_v1, %v2390_v16 }
 0x515   : > { %v1676_v2 = vmul.f32 %v1674_v17, %v1663_v59  ;;  %v1685_v6 = vmul.f32 %v1684_v18, %v2669_v9  ;;  %v1692_v12 = vmul.f32 %v1684_v18, %v1531_v3  ;;  %v1693_v14 = vmul.f32 %v1684_v18, %v1532_v20 }
 0x517   : > { %v1678_v5 = vrot.slane %v1676_v2, 6 }
 0x519   : > { %v1680_v32 = vsub.f32 %v2661_v50, %v1678_v5 }
 0x51b   : > { %v1689_v10 = vrot.slane %v1680_v32, %v2375_v13 }
 0x51d   : > { %v1690_v44 = vadd.f32 %v1689_v10, %v1685_v6  ;;  %v1694_v15 = vadd.f32 %v1692_v12, %v1689_v10  ;;  %v1695_v57 = vadd.f32 %v1693_v14, %v1689_v10 }
 0x51f   : > { %1691 = vst.msk [vmem:[%s382_s22] sm:$0xff] %vm1541_vm7, %v1690_v44 }
 0x520   : > { %1893 = vst.msk [vmem:[%s382_s22 + $0x6] sm:$0xfc] %vm1697_vm8, %v1694_v15 }
 0x521   : > { %1894 = vst.msk [vmem:[%s382_s22 + $0xe] sm:$0x3] %vm1699_vm9, %v1695_v57 }
 0x522 PF: > { %s18_s27 = sadd.s32 1, %s2272_s27  }
 0x523   : > { %p15_p4 = scmp.ge.s32.totalorder %s18_s27, 4  }
 0x525   :  { %17 = sbr.rel (!%p15_p4) target bundleno = 1 (0x1), region = 100 }

// kernel: enhanced_unet_film_forward.11
= control target key start
LH: loop header
LB: loop body
LE: loop exit
PB: predicated region body
PF: predicated region fallthrough
CT: control target
= control target key end

     0   :  { %s2276_s24 = smov 0   ;;  %s2706_s0 = inlined_call_operand.vmem [shape: f32[2,16,128], index: 0, kind: input, shape index: {}]   ;;  %s2707_s1 = inlined_call_operand.vmem [shape: f32[2,2,16,128], index: 1, kind: input, shape index: {}]   ;;  %s2708_s2 = inlined_call_operand.vmem [shape: f32[2,9,128], index: 2, kind: input, shape index: {}]   ;;  %s2709_s3 = inlined_call_operand.vmem [shape: bf16[2,256,384], index: 3, kind: input, shape index: {}]   ;;  %s2710_s4 = inlined_call_operand.vmem [shape: bf16[2,128,384], index: 4, kind: input, shape index: {}]   ;;  %s2711_s5 = inlined_call_operand.vmem [shape: f32[128,128], index: 5, kind: input, shape index: {}]   ;;  %s2712_s6 = inlined_call_operand.vmem [shape: f32[2,1,16], index: 6, kind: input, shape index: {}]   ;;  %s2713_s7 = inlined_call_operand.vmem [shape: f32[2,2,16,16], index: 7, kind: output, shape index: {}]  }
   0x1 LB: > { %s1770_s25 = sadd.s32 4294967295, %s2230_s24   ;;  %p1774_p0 = scmp.ge.s32.totalorder %s2230_s24, 1  ;;  %s2230_s24 = sphi %s2276_s24, %s17_s24  }
   0x2   : > { %p275_p1 = scmp.lt.s32.totalorder %s2230_s24, 3 }
   0x4   : > { %p276_p2 = pnand %p1774_p0, %p275_p1 }
   0x5   : > { %v357_v0 = vld [vmem:[%s2711_s5] sm:$0xff] (!%p276_p2)  ;;  %v358_v1 = vld [vmem:[%s2711_s5 + $0x8] sm:$0xff] (!%p276_p2)  ;;  %v359_v2 = vld [vmem:[%s2711_s5 + $0x10] sm:$0xff] (!%p276_p2)  ;;  %v375_v3 = vlaneseq (!%p276_p2)  ;;  %v2232_v4 = vmov (!%p276_p2), 0.0|0.0   ;;  %vm2233_vm0 = vmmov (!%p276_p2), 0   ;;  %v2234_v7 = vmov (!%p276_p2), 0.0  }
   0x6   : > { %279 = sbr.rel (%p276_p2) target bundleno = 1080 (0x438), region = 48  ;;  %2045 = vmatprep.subr.bf16.mxu0 (!%p276_p2), %v2232_v4  ;;  %v2294_v5 = vpack.c.bf16 (!%p276_p2), %v358_v1, %v357_v0  ;;  %v360_v6 = vld [vmem:[%s2711_s5 + $0x18] sm:$0xff] (!%p276_p2)  ;;  %1979 = vmatprep.mubr.msk.f32.mxu0 (!%p276_p2), %vm2233_vm0, %v2234_v7  ;;  %1290 = vst [vmem:[#allocation3] sm:$0x1] (!%p276_p2), %v2234_v7  ;;  %1305 = vst [vmem:[#allocation3 + $0x11] sm:$0x1] (!%p276_p2), %v2234_v7 }
   0x7   : > { %1306 = vst [vmem:[#allocation3 + $0x12] sm:$0x1] (!%p276_p2), %v2234_v7  ;;  %1316 = vst [vmem:[#allocation3 + $0x23] sm:$0x1] (!%p276_p2), %v2234_v7  ;;  %p325_p3 = scmp.lt.s32.totalorder (!%p276_p2), %s1770_s25, 1  ;;  %v2306_v8 = vshrl.u32 (!%p276_p2), %v375_v3, 7  ;;  %v2309_v9 = vpack.c.bf16 (!%p276_p2), %v360_v6, %v359_v2 }
   0x8   : > { %2047 = vmatpush3.bf16.msra.mxu0 (!%p276_p2), %v2294_v5  ;;  %v361_v10 = vld [vmem:[%s2711_s5 + $0x20] sm:$0xff] (!%p276_p2)  ;;  %v362_v11 = vld [vmem:[%s2711_s5 + $0x28] sm:$0xff] (!%p276_p2)  ;;  %v363_v16 = vld [vmem:[%s2711_s5 + $0x30] sm:$0xff] (!%p276_p2)  ;;  %vm438_vm1 = vcmask (!%p276_p2), 1040384   ;;  %vm442_vm2 = vcmask (!%p276_p2), 1042432   ;;  %vm440_vm3 = vcmask (!%p276_p2), 1041408  }
   0x9   : > { %2048 = vmatprep.subr.bf16.mxu0 (!%p276_p2), %v2232_v4  ;;  %v2321_v12 = vsub.s32 (!%p276_p2), 0, %v2306_v8  ;;  %v385_v13 = vsub.s32 (!%p276_p2), 1, %v2306_v8  ;;  %v373_v14 = vld [vmem:[%s2706_s0] sm:$0xff] (!%p276_p2)  ;;  %v410_v15 = vsub.s32 (!%p276_p2), 2, %v2306_v8  ;;  %v374_v17 = vld [vmem:[%s2706_s0 + $0x8] sm:$0xff] (!%p276_p2)  ;;  %v1783_v18 = vld [vmem:[%s2706_s0 + $0x10] sm:$0xff] (!%p276_p2)  ;;  %v2354_v21 = vpack.c.bf16 (!%p276_p2), %v362_v11, %v361_v10 }
   0xa   : > { %v1784_v19 = vld [vmem:[%s2706_s0 + $0x18] sm:$0xff] (!%p276_p2)  ;;  %v418_v20 = vsub.s32 (!%p276_p2), 3, %v2306_v8  ;;  %v365_v36 = vld [vmem:[%s2711_s5 + $0x40] sm:$0xff] (!%p276_p2)  ;;  %v366_v46 = vld [vmem:[%s2711_s5 + $0x48] sm:$0xff] (!%p276_p2)  ;;  %vm549_vm4 = vcmp.lt.s32.totalorder (!%p276_p2), %v375_v3, 256  ;;  %vm1083_vm5 = vcmask (!%p276_p2), 1046528  }
   0xb   : > { %v364_v25 = vld [vmem:[%s2711_s5 + $0x38] sm:$0xff] (!%p276_p2)  ;;  %v367_v52 = vld [vmem:[%s2711_s5 + $0x50] sm:$0xff] (!%p276_p2)  ;;  %v2412_v58 = vpack.c.bf16 (!%p276_p2), %v366_v46, %v365_v36  ;;  %v369_v11 = vld [vmem:[%s2711_s5 + $0x60] sm:$0xff] (!%p276_p2)  ;;  %551 = vst.msk [vmem:[#allocation2] ss:$8 sm:$0x3] (!%p276_p2), %vm549_vm4, %v2234_v7 }
   0xc   : > { %2050 = vmatpush3.bf16.msra.mxu0 (!%p276_p2), %v2309_v9  ;;  %v2385_v42 = vpack.c.bf16 (!%p276_p2), %v364_v25, %v363_v16  ;;  %v368_v60 = vld [vmem:[%s2711_s5 + $0x58] sm:$0xff] (!%p276_p2)  ;;  %578 = vst.msk [vmem:[#allocation2 + $0x21] ss:$8 sm:$0x3] (!%p276_p2), %vm549_vm4, %v2234_v7  ;;  %vm1096_vm6 = vcmask (!%p276_p2), 1045504   ;;  %vm1658_vm7 = vcmask (!%p276_p2), 130048  }
   0xd   : > { %s2715_s25 = smov (!%p325_p3, %s1770_s25), 1  ;;  %2051 = vmatprep.subr.bf16.mxu0 %v2232_v4  ;;  %597 = vst.msk [vmem:[#allocation2 + $0x22] ss:$8 sm:$0x3] %vm549_vm4, %v2234_v7  ;;  %vm1665_vm8 = vcmask 130050   ;;  %vm1668_vm9 = vcmask 123904  }
   0xe   : > { %s1865_s15 = sshll.u32 %s2715_s25, 5  ;;  %s1866_s16 = sshll.u32 %s2715_s25, 4  ;;  %625 = vst.msk [vmem:[#allocation2 + $0x43] ss:$8 sm:$0x3] %vm549_vm4, %v2234_v7 }
   0xf   : > { %s329_s23 = scalar_lea.vmem %s2707_s1, %s1865_s15  ;;  %s2341_s28 = scalar_lea.vmem %s2708_s2, %s1866_s16 }
  0x10   : > { %s2109_s12 = smul.u32 384, %s2715_s25  ;;  %v2358_v22 = vld [vmem:[%s2341_s28] sm:$0xff]  ;;  %v565_v24 = vld [vmem:[%s329_s23 + $0x8] sm:$0xff]  ;;  %v1785_v30 = vld [vmem:[%s329_s23 + $0x10] sm:$0xff]  ;;  %2053 = vmatpush3.bf16.msra.mxu0 %v2354_v21  ;;  %s347_s21 = scalar_lea.vmem %s2712_s6, %s2715_s25 }
  0x11   : > { %v564_v23 = vld [vmem:[%s329_s23] sm:$0xff]  ;;  %v378_v26 = vrot.slane %v2358_v22, %v2321_v12  ;;  %v386_v27 = vrot.slane %v2358_v22, %v385_v13  ;;  %v411_v28 = vrot.slane %v2358_v22, %v410_v15  ;;  %v419_v29 = vrot.slane %v2358_v22, %v418_v20  ;;  %v1786_v31 = vld [vmem:[%s329_s23 + $0x18] sm:$0xff]  ;;  %2054 = vmatprep.subr.bf16.mxu0 %v2232_v4  ;;  %s2110_s16 = smul.u32 192, %s2715_s25  ;;  %s2687_s26 = scalar_lea.vmem %s2713_s7, %s1865_s15 }
  0x12   : > { %s2378_s18 = scalar_lea.vmem %s2709_s3, %s2109_s12  ;;  %v568_v32 = vrot.slane %v564_v23, 7  ;;  %v569_v33 = vrot.slane %v565_v24, 7  ;;  %v615_v34 = vrot.slane %v1785_v30, 5  ;;  %v616_v35 = vrot.slane %v1786_v31, 5  ;;  %v371_v30 = vld [vmem:[%s2711_s5 + $0x70] sm:$0xff]  ;;  %v372_v31 = vld [vmem:[%s2711_s5 + $0x78] sm:$0xff] }
  0x13   : > { %v379_v37 = vmul.f32 %v378_v26, %v373_v14  ;;  %v380_v38 = vmul.f32 %v378_v26, %v374_v17  ;;  %v412_v39 = vmul.f32 %v1783_v18, %v411_v28  ;;  %v413_v40 = vmul.f32 %v1784_v19, %v411_v28  ;;  %v2123_v41 = vld [vmem:[%s2378_s18 + $0x4] ss:$12 sps:$4 sm:$0xff]   ;;  %v2125_v45 = vld [vmem:[%s2378_s18] ss:$12 sps:$4 sm:$0xff]   ;;  %v2126_v51 = vld [vmem:[%s2378_s18 + $0x1c] ss:$12 sps:$4 sm:$0xff]   ;;  %s2466_s20 = scalar_lea.vmem %s2710_s4, %s2110_s16 }
  0x14   : > { %v2388_v43 = vsel %vm438_vm1, %v568_v32, %v569_v33  ;;  %574 = vst [vmem:[#allocation2 + $0x8] sm:$0xfe] %v568_v32  ;;  %576 = vst [vmem:[#allocation2 + $0x28] sm:$0x1] %v569_v33  ;;  %v2391_v44 = vsel %vm442_vm2, %v615_v34, %v616_v35  ;;  %963 = vmatprep.subr.bf16.mxu1 %v2123_v41  ;;  %v2128_v57 = vld [vmem:[%s2378_s18 + $0x18] ss:$12 sps:$4 sm:$0xff]   ;;  %2056 = vmatpush3.bf16.msra.mxu0 %v2385_v42 }
  0x15   : > { %621 = vst [vmem:[#allocation2 + $0x28] sm:$0xf8] %v615_v34  ;;  %623 = vst [vmem:[#allocation2 + $0x48] sm:$0x7] %v616_v35  ;;  %v381_v47 = vadd.f32 %v379_v37, %v373_v14  ;;  %v382_v48 = vadd.f32 %v380_v38, %v374_v17  ;;  %v414_v49 = vadd.f32 %v1783_v18, %v412_v39  ;;  %964 = vmatpush1.bf16.msra.mxu1 %v2125_v45  ;;  %v2129_v59 = vld [vmem:[%s2378_s18 + $0x34] ss:$12 sps:$4 sm:$0xff]  }
  0x16   : > { %v415_v50 = vadd.f32 %v1784_v19, %v413_v40  ;;  %965 = vmatprep.subr.bf16.mxu1 %v2126_v51  ;;  %2057 = vmatprep.subr.bf16.mxu0 %v2232_v4  ;;  %v2131_v1 = vld [vmem:[%s2378_s18 + $0x30] ss:$12 sps:$4 sm:$0xff]   ;;  %v2132_v10 = vld [vmem:[%s2378_s18 + $0x4c] ss:$12 sps:$4 sm:$0xff]   ;;  %v2440_v19 = vpack.c.bf16 %v368_v60, %v367_v52  ;;  %v2185_v3 = vld [vmem:[%s2378_s18 + $0x168] ss:$12 sps:$4 sm:$0xff]  }
  0x17   : > { %v2402_v53 = vadd.f32 %v386_v27, %v381_v47  ;;  %v2404_v54 = vadd.f32 %v386_v27, %v382_v48  ;;  %v2406_v55 = vadd.f32 %v419_v29, %v414_v49  ;;  %v370_v14 = vld [vmem:[%s2711_s5 + $0x68] sm:$0xff]  ;;  %v2457_v48 = vpack.c.bf16 %v372_v31, %v371_v30  ;;  %v2161_v30 = vld [vmem:[%s2378_s18 + $0x38] ss:$12 sps:$4 sm:$0xff]  }
  0x18   : > { %v2408_v56 = vadd.f32 %v419_v29, %v415_v50  ;;  %2059 = vmatpush3.bf16.msra.mxu0 %v2412_v58  ;;  %v2134_v27 = vld [vmem:[%s2378_s18 + $0x48] ss:$12 sps:$4 sm:$0xff]   ;;  %v2135_v29 = vld [vmem:[%s2378_s18 + $0x64] ss:$12 sps:$4 sm:$0xff]   ;;  %v2452_v35 = vpack.c.bf16 %v370_v14, %v369_v11  ;;  %v2137_v40 = vld [vmem:[%s2378_s18 + $0x60] ss:$12 sps:$4 sm:$0xff]  }
  0x19   : > { %v389_v61 = vadd.f32 %v2404_v54, %v2402_v53  ;;  %v396_v62 = vmul.f32 %v2402_v53, %v2402_v53  ;;  %v397_v63 = vmul.f32 %v2404_v54, %v2404_v54  ;;  %v429_v2 = vmul.f32 %v2406_v55, %v2406_v55  ;;  %966 = vmatpush1.bf16.msra.mxu1 %v2128_v57  ;;  %v2146_v11 = vld [vmem:[%s2378_s18 + $0xa8] ss:$12 sps:$4 sm:$0xff]   ;;  %v2147_v14 = vld [vmem:[%s2378_s18 + $0xc4] ss:$12 sps:$4 sm:$0xff]   ;;  %v2162_v31 = vld [vmem:[%s2378_s18 + $0x10c] ss:$12 sps:$4 sm:$0xff]  }
  0x1a   : > { %v422_v0 = vadd.f32 %v2408_v56, %v2406_v55  ;;  %v430_v6 = vmul.f32 %v2408_v56, %v2408_v56  ;;  %967 = vmatprep.subr.bf16.mxu1 %v2129_v59  ;;  %2060 = vmatprep.subr.bf16.mxu0 %v2232_v4 }
  0x1b   : > { %v390_v16 = vrot.slane %v389_v61, 4  ;;  %v398_v17 = vadd.f32 %v397_v63, %v396_v62 }
  0x1c   : > { %v423_v18 = vrot.slane %v422_v0, 4  ;;  %v431_v23 = vadd.f32 %v430_v6, %v429_v2  ;;  %2062 = vmatpush3.bf16.msra.mxu0 %v2440_v19  ;;  %v2141_v2 = vld [vmem:[%s2378_s18 + $0x94] ss:$12 sps:$4 sm:$0xff]   ;;  %v2143_v6 = vld [vmem:[%s2378_s18 + $0x90] ss:$12 sps:$4 sm:$0xff]  }
  0x1d   : > { %v391_v24 = vadd.f32 %v390_v16, %v389_v61  ;;  %v399_v25 = vrot.slane %v398_v17, 4  ;;  %968 = vmatpush1.bf16.msra.mxu1 %v2131_v1  ;;  %2063 = vmatprep.subr.bf16.mxu0 %v2232_v4  ;;  %v2140_v1 = vld [vmem:[%s2378_s18 + $0x78] ss:$12 sps:$4 sm:$0xff]   ;;  %v2149_v16 = vld [vmem:[%s2378_s18 + $0xc8] ss:$12 sps:$4 sm:$0xff]  }
  0x1e   : > { %v424_v26 = vadd.f32 %v423_v18, %v422_v0  ;;  %v432_v28 = vrot.slane %v431_v23, 4  ;;  %969 = vmatprep.subr.bf16.mxu1 %v2132_v10  ;;  %v2138_v0 = vld [vmem:[%s2378_s18 + $0x7c] ss:$12 sps:$4 sm:$0xff]   ;;  %v2144_v10 = vld [vmem:[%s2378_s18 + $0xac] ss:$12 sps:$4 sm:$0xff]  }
  0x1f   : > { %v392_v32 = vrot.slane %v391_v24, 2  ;;  %v400_v33 = vadd.f32 %v399_v25, %v398_v17  ;;  %v2150_v17 = vld [vmem:[%s2378_s18 + $0xc0] ss:$12 sps:$4 sm:$0xff]   ;;  %v2151_v18 = vld [vmem:[%s2378_s18 + $0x8] ss:$12 sps:$4 sm:$0xff]  }
  0x20   : > { %v425_v34 = vrot.slane %v424_v26, 2  ;;  %v433_v36 = vadd.f32 %v432_v28, %v431_v23  ;;  %2065 = vmatpush3.bf16.msra.mxu0 %v2452_v35  ;;  %v2152_v23 = vld [vmem:[%s2378_s18 + $0xdc] ss:$12 sps:$4 sm:$0xff]   ;;  %v2155_v25 = vld [vmem:[%s2378_s18 + $0xd8] ss:$12 sps:$4 sm:$0xff]  }
  0x21   : > { %v393_v37 = vadd.f32 %v392_v32, %v391_v24  ;;  %v401_v38 = vrot.slane %v400_v33, 2  ;;  %970 = vmatpush1.bf16.msra.mxu1 %v2134_v27  ;;  %2066 = vmatprep.subr.bf16.mxu0 %v2232_v4  ;;  %v2154_v24 = vld [vmem:[%s2378_s18 + $0xe0] ss:$12 sps:$4 sm:$0xff]   ;;  %v2159_v28 = vld [vmem:[%s2378_s18 + $0xf8] ss:$12 sps:$4 sm:$0xff]  }
  0x22   : > { %v426_v39 = vadd.f32 %v425_v34, %v424_v26  ;;  %v434_v41 = vrot.slane %v433_v36, 2  ;;  %971 = vmatprep.subr.bf16.mxu1 %v2135_v29  ;;  %v2156_v26 = vld [vmem:[%s2378_s18 + $0x20] ss:$12 sps:$4 sm:$0xff]   ;;  %v2160_v29 = vld [vmem:[%s2378_s18 + $0xf0] ss:$12 sps:$4 sm:$0xff]  }
  0x23   : > { %v394_v45 = vrot.slane %v393_v37, 1  ;;  %v402_v46 = vadd.f32 %v401_v38, %v400_v33  ;;  %v2157_v27 = vld [vmem:[%s2378_s18 + $0xf4] ss:$12 sps:$4 sm:$0xff]   ;;  %v2164_v32 = vld [vmem:[%s2378_s18 + $0x110] ss:$12 sps:$4 sm:$0xff]  }
  0x24   : > { %v427_v47 = vrot.slane %v426_v39, 1  ;;  %v435_v49 = vadd.f32 %v434_v41, %v433_v36  ;;  %2068 = vmatpush3.bf16.msra.mxu0 %v2457_v48  ;;  %v2165_v33 = vld [vmem:[%s2378_s18 + $0x108] ss:$12 sps:$4 sm:$0xff]   ;;  %v2166_v34 = vld [vmem:[%s2378_s18 + $0x50] ss:$12 sps:$4 sm:$0xff]  }
  0x25   : > { %v395_v50 = vadd.f32 %v394_v45, %v393_v37  ;;  %v403_v51 = vrot.slane %v402_v46, 1  ;;  %972 = vmatpush1.bf16.msra.mxu1 %v2137_v40  ;;  %1885 = vmatprep.subr.bf16.mxu0 %v2149_v16  ;;  %v2167_v36 = vld [vmem:[%s2378_s18 + $0x124] ss:$12 sps:$4 sm:$0xff]   ;;  %v2169_v37 = vld [vmem:[%s2378_s18 + $0x128] ss:$12 sps:$4 sm:$0xff]   ;;  %v537_v16 = vsub.s32 4, %v2306_v8 }
  0x26   : > { %v428_v52 = vadd.f32 %v427_v47, %v426_v39  ;;  %v436_v57 = vrot.slane %v435_v49, 1  ;;  %973 = vmatprep.subr.bf16.mxu1 %v2138_v0  ;;  %v2170_v38 = vld [vmem:[%s2378_s18 + $0x120] ss:$12 sps:$4 sm:$0xff]   ;;  %v2171_v39 = vld [vmem:[%s2378_s18 + $0x68] ss:$12 sps:$4 sm:$0xff]  }
  0x27   : > { %v404_v59 = vadd.f32 %v403_v51, %v402_v46  ;;  %v2172_v40 = vld [vmem:[%s2378_s18 + $0x13c] ss:$12 sps:$4 sm:$0xff]   ;;  %v2174_v41 = vld [vmem:[%s2378_s18 + $0x140] ss:$12 sps:$4 sm:$0xff]   ;;  %v2175_v45 = vld [vmem:[%s2378_s18 + $0x138] ss:$12 sps:$4 sm:$0xff]  }
  0x28   : > { %v437_v60 = vadd.f32 %v436_v57, %v435_v49  ;;  %v2176_v46 = vld [vmem:[%s2378_s18 + $0x80] ss:$12 sps:$4 sm:$0xff]   ;;  %v2179_v49 = vld [vmem:[%s2378_s18 + $0x158] ss:$12 sps:$4 sm:$0xff]   ;;  %v2184_v57 = vld [vmem:[%s2378_s18 + $0x170] ss:$12 sps:$4 sm:$0xff]  }
  0x29   : > { %v439_v61 = vsel %vm438_vm1, %v395_v50, %v404_v59  ;;  %974 = vmatpush1.bf16.msra.mxu1 %v2140_v1  ;;  %v2177_v47 = vld [vmem:[%s2378_s18 + $0x154] ss:$12 sps:$4 sm:$0xff]   ;;  %v2180_v50 = vld [vmem:[%s2378_s18 + $0x150] ss:$12 sps:$4 sm:$0xff]   ;;  %v2181_v51 = vld [vmem:[%s2378_s18 + $0x98] ss:$12 sps:$4 sm:$0xff]  }
  0x2a   : > { %v441_v62 = vsel %vm440_vm3, %v439_v61, %v428_v52  ;;  %975 = vmatprep.subr.bf16.mxu1 %v2141_v2  ;;  %v2182_v52 = vld [vmem:[%s2378_s18 + $0x16c] ss:$12 sps:$4 sm:$0xff]   ;;  %v2186_v59 = vld [vmem:[%s2378_s18 + $0xb0] ss:$12 sps:$4 sm:$0xff]  }
  0x2b   : > { %v443_v63 = vsel %vm442_vm2, %v441_v62, %v437_v60  ;;  %v628_v60 = vld [vmem:[#allocation2 + $0x8] sm:$0xff] }
  0x2c   : > { %1980 = vmatmul.mubr.f32.vlgmr.msra.gmra.mrb[0].mxu0 %v443_v63  ;;  %v638_v61 = vpack.c.bf16 %v2388_v43, %v628_v60 }
  0x2d   : > { %976 = vmatpush1.bf16.msra.mxu1 %v2143_v6  ;;  %1886 = vmatpush3.bf16.msra.mxu0 %v2151_v18 }
  0x2e   : > { %977 = vmatprep.subr.bf16.mxu1 %v2144_v10  ;;  %1887 = vmatprep.subr.bf16.mxu0 %v2154_v24 }
  0x2f   : > { %995 = vmatprep.mubr.bf16.mxu1 %v638_v61  ;;  %1056 = vmatprep.mubr.bf16.mxu0 %v638_v61 }
  0x31   : > { %978 = vmatpush1.bf16.msra.mxu1 %v2146_v11  ;;  %1888 = vmatpush3.bf16.msra.mxu0 %v2156_v26 }
  0x32   : > { %979 = vmatprep.subr.bf16.mxu1 %v2147_v14  ;;  %1889 = vmatprep.subr.bf16.mxu0 %v2159_v28 }
  0x35   : > { %980 = vmatpush1.bf16.msra.mxu1 %v2150_v17  ;;  %1890 = vmatpush3.bf16.msra.mxu0 %v2161_v30  ;;  %v543_v17 = vsub.s32 5, %v2306_v8 }
  0x36   : > { %981 = vmatprep.subr.bf16.mxu1 %v2152_v23  ;;  %1891 = vmatprep.subr.bf16.mxu0 %v2164_v32 }
  0x39   : > { %982 = vmatpush1.bf16.msra.mxu1 %v2155_v25  ;;  %1892 = vmatpush3.bf16.msra.mxu0 %v2166_v34  ;;  %v538_v25 = vrot.slane %v2358_v22, %v537_v16 }
  0x3a   : > { %983 = vmatprep.subr.bf16.mxu1 %v2157_v27  ;;  %1893 = vmatprep.subr.bf16.mxu0 %v2169_v37 }
  0x3d   : > { %984 = vmatpush1.bf16.msra.mxu1 %v2160_v29  ;;  %1894 = vmatpush3.bf16.msra.mxu0 %v2171_v39 }
  0x3e   : > { %985 = vmatprep.subr.bf16.mxu1 %v2162_v31  ;;  %1895 = vmatprep.subr.bf16.mxu0 %v2174_v41 }
  0x41   : > { %986 = vmatpush1.bf16.msra.mxu1 %v2165_v33  ;;  %1896 = vmatpush3.bf16.msra.mxu0 %v2176_v46  ;;  %v632_v46 = vld [vmem:[#allocation2 + $0x28] sm:$0xff] }
  0x42   : > { %987 = vmatprep.subr.bf16.mxu1 %v2167_v36  ;;  %1897 = vmatprep.subr.bf16.mxu0 %v2179_v49  ;;  %v640_v49 = vpack.c.bf16 %v2391_v44, %v632_v46 }
  0x45   : > { %988 = vmatpush1.bf16.msra.mxu1 %v2170_v38  ;;  %1898 = vmatpush3.bf16.msra.mxu0 %v2181_v51  ;;  %v636_v51 = vld [vmem:[#allocation2 + $0x48] sm:$0xf] }
  0x46   : > { %989 = vmatprep.subr.bf16.mxu1 %v2172_v40  ;;  %1899 = vmatprep.subr.bf16.mxu0 %v2184_v57  ;;  %v642_v57 = vpack.c.bf16 %v636_v51, %v636_v51 }
  0x49   : > { %990 = vmatpush1.bf16.msra.mxu1 %v2175_v45  ;;  %1900 = vmatpush3.bf16.msra.mxu0 %v2186_v59 }
  0x4a   : > { %991 = vmatprep.subr.bf16.mxu1 %v2177_v47  ;;  %2069 = vmatprep.subr.bf16.mxu0 %v2232_v4 }
  0x4d   : > { %992 = vmatpush1.bf16.msra.mxu1 %v2180_v50 }
  0x4e   : > { %993 = vmatprep.subr.bf16.mxu1 %v2182_v52 }
  0x51   : > { %994 = vmatpush1.bf16.msra.mxu1 %v2185_v3 }
  0xff   : > { %v510_v62 = vpop.f32.mrb[0].mxu0 }
 0x100   : > { %v514_v63 = vmul.f32 0.00390625, %v510_v62  ;;  %v1981_v0 = vpop.f32.mrb[1].mxu0 }
 0x102   : > { %v515_v1 = vmul.f32 %v514_v63, %v514_v63  ;;  %v524_v14 = vrot.slane %v514_v63, %v2321_v12  ;;  %v583_v43 = vrot.slane %v514_v63, %v410_v15  ;;  %v544_v15 = vrot.slane %v2358_v22, %v543_v17 }
 0x104   : > { %v517_v2 = vrot.slane %v515_v1, 7  ;;  %v525_v23 = vsub.f32 %v2402_v53, %v524_v14  ;;  %v526_v24 = vsub.f32 %v2404_v54, %v524_v14  ;;  %v584_v27 = vsub.f32 %v2406_v55, %v583_v43 }
 0x105   : > { %v585_v28 = vsub.f32 %v2408_v56, %v583_v43 }
 0x106   : > { %v519_v6 = vsub.f32 %v514_v63, %v517_v2 }
 0x108   : > { %v520_v10 = vmax.f32 %v519_v6, 0.0 }
 0x10a   : > { %v527_v11 = vadd.f32 1e-05, %v520_v10 }
 0x10c   : > { %2219 = vrsqrt.f32 %v527_v11 }
 0x116   : > { %v2220_v18 = vpop.eup %2219 }
 0x117   : > { %v532_v26 = vrot.slane %v2220_v18, %v385_v13  ;;  %v589_v29 = vrot.slane %v2220_v18, %v418_v20 }
 0x119   : > { %v533_v30 = vmul.f32 %v532_v26, %v525_v23  ;;  %v534_v31 = vmul.f32 %v532_v26, %v526_v24  ;;  %v590_v32 = vmul.f32 %v589_v29, %v584_v27  ;;  %v591_v53 = vmul.f32 %v589_v29, %v585_v28 }
 0x11b   : > { %v539_v33 = vmul.f32 %v538_v25, %v533_v30  ;;  %v540_v54 = vmul.f32 %v538_v25, %v534_v31  ;;  %v592_v34 = vmul.f32 %v590_v32, %v538_v25  ;;  %v593_v36 = vmul.f32 %v591_v53, %v538_v25 }
 0x11d   : > { %v545_v37 = vadd.f32 %v544_v15, %v539_v33  ;;  %v546_v38 = vadd.f32 %v544_v15, %v540_v54  ;;  %v594_v13 = vadd.f32 %v592_v34, %v544_v15  ;;  %v595_v39 = vadd.f32 %v593_v36, %v544_v15 }
 0x11f   : > { %v555_v55 = vrot.slane %v545_v37, 7  ;;  %v556_v40 = vrot.slane %v546_v38, 7  ;;  %v601_v56 = vrot.slane %v594_v13, 5  ;;  %v602_v41 = vrot.slane %v595_v39, 5 }
 0x121   : > { %v557_v20 = vsel %vm438_vm1, %v555_v55, %v556_v40  ;;  %561 = vst [vmem:[#allocation2] sm:$0xfe] %v555_v55  ;;  %563 = vst [vmem:[#allocation2 + $0x20] sm:$0x1] %v556_v40  ;;  %v603_v45 = vsel %vm442_vm2, %v601_v56, %v602_v41 }
 0x122   : > { %607 = vst [vmem:[#allocation2 + $0x20] sm:$0xf8] %v601_v56  ;;  %609 = vst [vmem:[#allocation2 + $0x40] sm:$0x7] %v602_v41 }
 0x128   : > { %v627_v47 = vld [vmem:[#allocation2] sm:$0xff] }
 0x129   : > { %v637_v50 = vpack.c.bf16 %v557_v20, %v627_v47  ;;  %v631_v52 = vld [vmem:[#allocation2 + $0x20] sm:$0xff] }
 0x12a   : > { %v639_v3 = vpack.c.bf16 %v603_v45, %v631_v52  ;;  %v635_v44 = vld [vmem:[#allocation2 + $0x40] sm:$0xf] }
 0x12b   : > { %996 = vmatmul.mubr.bf16.vlgmr.msra.gmra.mrb[0].mxu1 %v637_v50  ;;  %1057 = vmatmul.mubr.bf16.vlgmr.msra.gmra.mrb[4].mxu0 %v637_v50  ;;  %v641_v59 = vpack.c.bf16 %v635_v44, %v635_v44 }
 0x12c   : > { %1005 = vmatprep.mubr.bf16.mxu1 %v640_v49  ;;  %1064 = vmatprep.mubr.bf16.mxu0 %v640_v49 }
 0x12d   : > { %2071 = vmatpush3.bf16.msra.mxu0 %v2294_v5 }
 0x12e   : > { %2072 = vmatprep.subr.bf16.mxu0 %v2232_v4 }
 0x131   : > { %2074 = vmatpush3.bf16.msra.mxu0 %v2309_v9 }
 0x132   : > { %2075 = vmatprep.subr.bf16.mxu0 %v2232_v4 }
 0x133   : > { %1006 = vmatmul.mubr.bf16.gmra.mrb[4].mxu1 %v639_v3  ;;  %1065 = vmatmul.mubr.bf16.gmra.mrb[8].mxu0 %v639_v3 }
 0x134   : > { %1015 = vmatprep.mubr.bf16.mxu1 %v642_v57  ;;  %1072 = vmatprep.mubr.bf16.mxu0 %v642_v57 }
 0x135   : > { %2077 = vmatpush3.bf16.msra.mxu0 %v2354_v21 }
 0x136   : > { %2078 = vmatprep.subr.bf16.mxu0 %v2232_v4 }
 0x139   : > { %2080 = vmatpush3.bf16.msra.mxu0 %v2385_v42 }
 0x13a   : > { %2081 = vmatprep.subr.bf16.mxu0 %v2232_v4 }
 0x13b   : > { %1016 = vmatmul.mubr.bf16.gmra.mrb[8].mxu1 %v641_v59  ;;  %1073 = vmatmul.mubr.bf16.gmra.mrb[12].mxu0 %v641_v59 }
 0x13c   : > { %2014 = vmatprep.mubr.msk.f32.mxu0 %vm2233_vm0, %v2234_v7 }
 0x13d   : > { %2083 = vmatpush3.bf16.msra.mxu0 %v2412_v58 }
 0x13e   : > { %2084 = vmatprep.subr.bf16.mxu0 %v2232_v4 }
 0x141   : > { %2086 = vmatpush3.bf16.msra.mxu0 %v2440_v19 }
 0x142   : > { %2087 = vmatprep.subr.bf16.mxu0 %v2232_v4 }
 0x145   : > { %2089 = vmatpush3.bf16.msra.mxu0 %v2452_v35 }
 0x146   : > { %2090 = vmatprep.subr.bf16.mxu0 %v2232_v4  ;;  %v1132_v4 = vsub.s32 6, %v2306_v8 }
 0x148   : > { %v1133_v43 = vrot.slane %v2358_v22, %v1132_v4 }
 0x149   : > { %2092 = vmatpush3.bf16.msra.mxu0 %v2457_v48 }
 0x14a   : > { %2017 = vmatprep.subr.bf16.mxu0 %v2234_v7 }
 0x1fe   : > { %v997_v5 = vpop.f32.mrb[0].mxu1  ;;  %v1901_v9 = vpop.f32.mrb[4].mxu0 }
 0x1ff   : > { %v999_v21 = vpop.f32.mrb[1].mxu1  ;;  %v1902_v42 = vpop.f32.mrb[5].mxu0 }
 0x200   : > { %v1903_v60 = vadd.f32 %v1902_v42, %v1901_v9  ;;  %v1001_v58 = vpop.f32.mrb[2].mxu1  ;;  %v1904_v61 = vpop.f32.mrb[6].mxu0  ;;  %v1084_v63 = vrot.slane %v999_v21, 1 }
 0x201   : > { %v1003_v62 = vpop.f32.mrb[3].mxu1  ;;  %v1905_v19 = vpop.f32.mrb[7].mxu0 }
 0x202   : > { %v1085_v0 = vrot.slane %v1003_v62, 1  ;;  %v1906_v1 = vadd.f32 %v1905_v19, %v1904_v61  ;;  %v1097_v35 = vrot.slane %v1903_v60, 2 }
 0x204   : > { %v1086_v48 = vsel %vm1083_vm5, %v1084_v63, %v1085_v0  ;;  %v1098_v2 = vrot.slane %v1906_v1, 2 }
 0x205   : > { %v1091_v6 = vadd.f32 %v1086_v48, %v997_v5 }
 0x206   : > { %v1099_v10 = vsel %vm1096_vm6, %v1097_v35, %v1098_v2  ;;  %v1007_v11 = vpop.f32.mrb[4].mxu1  ;;  %v1907_v14 = vpop.f32.mrb[8].mxu0 }
 0x207   : > { %v1104_v16 = vadd.f32 %v1099_v10, %v1091_v6  ;;  %v1009_v17 = vpop.f32.mrb[5].mxu1  ;;  %v1908_v18 = vpop.f32.mrb[9].mxu0 }
 0x208   : > { %v1087_v23 = vrot.slane %v1009_v17, 1  ;;  %v1909_v24 = vadd.f32 %v1908_v18, %v1907_v14  ;;  %v1011_v25 = vpop.f32.mrb[6].mxu1  ;;  %v1910_v26 = vpop.f32.mrb[10].mxu0 }
 0x209   : > { %v1013_v27 = vpop.f32.mrb[7].mxu1  ;;  %v1911_v28 = vpop.f32.mrb[11].mxu0  ;;  %v1134_v32 = vadd.f32 %v1133_v43, %v1104_v16 }
 0x20a   : > { %v1088_v29 = vsel %vm1083_vm5, %v1085_v0, %v1087_v23  ;;  %v1100_v15 = vrot.slane %v1909_v24, 2  ;;  %v1108_v30 = vrot.slane %v1013_v27, 1  ;;  %v1912_v31 = vadd.f32 %v1911_v28, %v1910_v26 }
 0x20b   : > { %v1092_v53 = vadd.f32 %v1088_v29, %v1001_v58  ;;  %v2558_v39 = vmax.f32 %v1134_v32, 0.0 }
 0x20c   : > { %v1101_v33 = vsel %vm1096_vm6, %v1098_v2, %v1100_v15  ;;  %v1109_v54 = vsel %vm1083_vm5, %v1087_v23, %v1108_v30  ;;  %v1120_v22 = vrot.slane %v1912_v31, 2 }
 0x20d   : > { %v1105_v34 = vadd.f32 %v1101_v33, %v1092_v53  ;;  %v1115_v36 = vadd.f32 %v1109_v54, %v1007_v11  ;;  %v1152_v59 = vmul.f32 %v2558_v39, %v2558_v39 }
 0x20e   : > { %v1121_v37 = vsel %vm1096_vm6, %v1100_v15, %v1120_v22  ;;  %v1017_v38 = vpop.f32.mrb[8].mxu1  ;;  %v1913_v13 = vpop.f32.mrb[12].mxu0 }
 0x20f   : > { %v1135_v55 = vadd.f32 %v1133_v43, %v1105_v34  ;;  %v1127_v40 = vadd.f32 %v1121_v37, %v1115_v36  ;;  %v1019_v56 = vpop.f32.mrb[9].mxu1  ;;  %v1914_v41 = vpop.f32.mrb[13].mxu0 }
 0x210   : > { %v1110_v20 = vrot.slane %v1019_v56, 1  ;;  %v1915_v45 = vadd.f32 %v1914_v41, %v1913_v13  ;;  %v1021_v46 = vpop.f32.mrb[10].mxu1  ;;  %v1916_v47 = vpop.f32.mrb[14].mxu0 }
 0x211   : > { %v2560_v49 = vmax.f32 %v1135_v55, 0.0  ;;  %v1022_v50 = vpop.f32.mrb[11].mxu1  ;;  %v1917_v51 = vpop.f32.mrb[15].mxu0  ;;  %v1138_v52 = vadd.f32 %v1133_v43, %v1127_v40 }
 0x212   : > { %v1111_v57 = vsel %vm1083_vm5, %v1108_v30, %v1110_v20  ;;  %v1117_v3 = vadd.f32 %v1110_v20, %v1017_v38  ;;  %v1122_v44 = vrot.slane %v1915_v45, 2 }
 0x213   : > { %v1153_v5 = vmul.f32 %v2560_v49, %v2560_v49  ;;  %v1116_v9 = vadd.f32 %v1111_v57, %v1011_v25  ;;  %v1144_v60 = vadd.f32 %v2560_v49, %v2558_v39  ;;  %v2570_v61 = vmax.f32 %v1138_v52, 0.0  ;;  %v2189_v52 = vld [vmem:[%s2466_s20 + $0x4] ss:$12 sps:$4 sm:$0xff]   ;;  %v2187_v57 = vld [vmem:[%s2466_s20] ss:$12 sps:$4 sm:$0xff]  }
 0x214   : > { %v1123_v21 = vsel %vm1096_vm6, %v1120_v22, %v1122_v44  ;;  %v1129_v42 = vadd.f32 %v1122_v44, %v1117_v3  ;;  %1485 = vmatprep.subr.bf16.mxu1 %v2189_v52  ;;  %v2595_v3 = vld [vmem:[%s2466_s20 + $0x8] ss:$12 sps:$4 sm:$0xff]  }
 0x215   : > { %v1154_v58 = vadd.f32 %v1153_v5, %v1152_v59  ;;  %v1128_v62 = vadd.f32 %v1123_v21, %v1116_v9  ;;  %v1145_v1 = vrot.slane %v1144_v60, 4  ;;  %v1180_v35 = vmul.f32 %v2570_v61, %v2570_v61  ;;  %1486 = vmatpush1.bf16.msra.mxu1 %v2187_v57  ;;  %v2193_v44 = vld [vmem:[%s2466_s20 + $0x1c] ss:$12 sps:$4 sm:$0xff]   ;;  %v2191_v59 = vld [vmem:[%s2466_s20 + $0x18] ss:$12 sps:$4 sm:$0xff]  }
 0x216   : > { %v1140_v19 = vadd.f32 %v1133_v43, %v1129_v42  ;;  %v1165_v10 = vrot.slane %v2570_v61, 2  ;;  %1487 = vmatprep.subr.bf16.mxu1 %v2193_v44  ;;  %v2602_v5 = vld [vmem:[%s2466_s20 + $0x20] ss:$12 sps:$4 sm:$0xff]   ;;  %v2195_v21 = vld [vmem:[%s2466_s20 + $0x30] ss:$12 sps:$4 sm:$0xff]  }
 0x217   : > { %v1139_v63 = vadd.f32 %v1133_v43, %v1128_v62  ;;  %v1155_v4 = vrot.slane %v1154_v58, 4  ;;  %v1146_v43 = vadd.f32 %v1145_v1, %v1144_v60  ;;  %v1186_v18 = vrot.slane %v1180_v35, 2  ;;  %v2197_v9 = vld [vmem:[%s2466_s20 + $0x34] ss:$12 sps:$4 sm:$0xff]   ;;  %v2609_v42 = vld [vmem:[%s2466_s20 + $0x38] ss:$12 sps:$4 sm:$0xff]  }
 0x218   : > { %v2572_v0 = vmax.f32 %v1140_v19, 0.0  ;;  %v2201_v60 = vld [vmem:[%s2466_s20 + $0x4c] ss:$12 sps:$4 sm:$0xff]   ;;  %v2616_v62 = vld [vmem:[%s2466_s20 + $0x50] ss:$12 sps:$4 sm:$0xff]  }
 0x219   : > { %v2576_v48 = vmax.f32 %v1139_v63, 0.0  ;;  %v1156_v17 = vadd.f32 %v1155_v4, %v1154_v58  ;;  %v1147_v30 = vrot.slane %v1146_v43, 2  ;;  %1488 = vmatpush1.bf16.msra.mxu1 %v2191_v59  ;;  %v2199_v58 = vld [vmem:[%s2466_s20 + $0x48] ss:$12 sps:$4 sm:$0xff]   ;;  %v2205_v19 = vld [vmem:[%s2466_s20 + $0x64] ss:$12 sps:$4 sm:$0xff]  }
 0x21a   : > { %v1168_v2 = vrot.slane %v2572_v0, 2  ;;  %v1182_v6 = vmul.f32 %v2572_v0, %v2572_v0  ;;  %1489 = vmatprep.subr.bf16.mxu1 %v2197_v9  ;;  %v2203_v63 = vld [vmem:[%s2466_s20 + $0x60] ss:$12 sps:$4 sm:$0xff]   ;;  %v2623_v1 = vld [vmem:[%s2466_s20 + $0x68] ss:$12 sps:$4 sm:$0xff]  }
 0x21b   : > { %v1166_v11 = vrot.slane %v2576_v48, 2  ;;  %v1181_v14 = vmul.f32 %v2576_v48, %v2576_v48  ;;  %v1157_v31 = vrot.slane %v1156_v17, 2  ;;  %v1148_v33 = vadd.f32 %v1147_v30, %v1146_v43  ;;  %v2209_v4 = vld [vmem:[%s2466_s20 + $0x7c] ss:$12 sps:$4 sm:$0xff]   ;;  %v2207_v35 = vld [vmem:[%s2466_s20 + $0x78] ss:$12 sps:$4 sm:$0xff]  }
 0x21c   : > { %v1189_v16 = vrot.slane %v1182_v6, 2  ;;  %v2213_v6 = vld [vmem:[%s2466_s20 + $0x94] ss:$12 sps:$4 sm:$0xff]   ;;  %v2235_v43 = vmov 0  }
 0x21d   : > { %v1167_v23 = vsel %vm1096_vm6, %v1165_v10, %v1166_v11  ;;  %v1169_v24 = vsel %vm1096_vm6, %v1166_v11, %v1168_v2  ;;  %v1187_v25 = vrot.slane %v1181_v14, 2  ;;  %v1158_v54 = vadd.f32 %v1157_v31, %v1156_v17  ;;  %1490 = vmatpush1.bf16.msra.mxu1 %v2195_v21  ;;  %v2630_v2 = vld [vmem:[%s2466_s20 + $0x80] ss:$12 sps:$4 sm:$0xff]   ;;  %v2211_v10 = vld [vmem:[%s2466_s20 + $0x90] ss:$12 sps:$4 sm:$0xff]   ;;  %1517 = vmatprep.mubr.bf16.mxu1 %v2235_v43 }
 0x21e   : > { %v1172_v26 = vadd.f32 %v1169_v24, %v1167_v23  ;;  %v1149_v38 = vrot.slane %v1148_v33, 1  ;;  %1491 = vmatprep.subr.bf16.mxu1 %v2201_v60  ;;  %v2637_v11 = vld [vmem:[%s2466_s20 + $0x98] ss:$12 sps:$4 sm:$0xff]   ;;  %v2643_v17 = vld [vmem:[%s2466_s20 + $0xb0] ss:$12 sps:$4 sm:$0xff]   ;;  %v1293_v31 = vsub.s32 7, %v2306_v8 }
 0x21f   : > { %v1188_v27 = vsel %vm1096_vm6, %v1186_v18, %v1187_v25  ;;  %v1190_v28 = vsel %vm1096_vm6, %v1187_v25, %v1189_v16  ;;  %v1159_v13 = vrot.slane %v1158_v54, 1  ;;  %v2217_v14 = vld [vmem:[%s2466_s20 + $0xac] ss:$12 sps:$4 sm:$0xff]   ;;  %v2215_v16 = vld [vmem:[%s2466_s20 + $0xa8] ss:$12 sps:$4 sm:$0xff]  }
 0x220   : > { %v1173_v29 = vrot.slane %v1172_v26, 4  ;;  %v1193_v15 = vadd.f32 %v1190_v28, %v1188_v27  ;;  %v1150_v20 = vadd.f32 %v1149_v38, %v1148_v33 }
 0x221   : > { %v1160_v45 = vadd.f32 %v1159_v13, %v1158_v54  ;;  %1492 = vmatpush1.bf16.msra.mxu1 %v2199_v58  ;;  %v355_v54 = vld [vmem:[%s2341_s28 + $0x8] sm:$0x1] }
 0x222   : > { %v1194_v32 = vrot.slane %v1193_v15, 4  ;;  %v1174_v53 = vadd.f32 %v1173_v29, %v1172_v26  ;;  %1493 = vmatprep.subr.bf16.mxu1 %v2205_v19 }
 0x224   : > { %v1175_v22 = vrot.slane %v1174_v53, 2  ;;  %v1195_v34 = vadd.f32 %v1194_v32, %v1193_v15  ;;  %v2223_v32 = vld [vmem:[%s2341_s28] sm:$0xff] }
 0x225   : > { %1494 = vmatpush1.bf16.msra.mxu1 %v2203_v63  ;;  %v1859_v63 = vld [vmem:[%s347_s21] ss:$0 sm:$0xff] }
 0x226   : > { %v1176_v36 = vadd.f32 %v1175_v22, %v1174_v53  ;;  %v1196_v37 = vrot.slane %v1195_v34, 2  ;;  %1495 = vmatprep.subr.bf16.mxu1 %v2209_v4 }
 0x228   : > { %v1177_v55 = vrot.slane %v1176_v36, 1  ;;  %v1197_v40 = vadd.f32 %v1196_v37, %v1195_v34 }
 0x229   : > { %1496 = vmatpush1.bf16.msra.mxu1 %v2207_v35 }
 0x22a   : > { %v1178_v56 = vadd.f32 %v1177_v55, %v1176_v36  ;;  %v1198_v41 = vrot.slane %v1197_v40, 1  ;;  %1497 = vmatprep.subr.bf16.mxu1 %v2213_v6 }
 0x22c   : > { %v1199_v46 = vadd.f32 %v1198_v41, %v1197_v40  ;;  %v1179_v47 = vadd.f32 %v1178_v56, %v1150_v20 }
 0x22d   : > { %1498 = vmatpush1.bf16.msra.mxu1 %v2211_v10 }
 0x22e   : > { %v1200_v50 = vadd.f32 %v1199_v46, %v1160_v45  ;;  %1499 = vmatprep.subr.bf16.mxu1 %v2217_v14 }
 0x230   : > { %v1201_v51 = vsel %vm438_vm1, %v1179_v47, %v1200_v50 }
 0x231   : > { %2015 = vmatmul.mubr.f32.vlgmr.msra.gmra.mrb[2].mxu0 %v1201_v51  ;;  %1500 = vmatpush1.bf16.msra.mxu1 %v2215_v16 }
 0x232   : > { %2033 = vmatprep.mubr.msk.bf16.mxu0 %vm2233_vm0, %v2234_v7  ;;  %2018 = vmatpush3.bf16.msra.mxu0 %v2595_v3 }
 0x233   : > { %2019 = vmatprep.subr.bf16.mxu0 %v2234_v7  ;;  %2093 = vmatprep.subr.bf16.mxu1 %v2234_v7 }
 0x236   : > { %2020 = vmatpush3.bf16.msra.mxu0 %v2602_v5 }
 0x237   : > { %2021 = vmatprep.subr.bf16.mxu0 %v2234_v7 }
 0x23a   : > { %2022 = vmatpush3.bf16.msra.mxu0 %v2609_v42 }
 0x23b   : > { %2023 = vmatprep.subr.bf16.mxu0 %v2234_v7 }
 0x23e   : > { %2024 = vmatpush3.bf16.msra.mxu0 %v2616_v62 }
 0x23f   : > { %2025 = vmatprep.subr.bf16.mxu0 %v2234_v7 }
 0x242   : > { %2026 = vmatpush3.bf16.msra.mxu0 %v2623_v1 }
 0x243   : > { %2027 = vmatprep.subr.bf16.mxu0 %v2234_v7 }
 0x246   : > { %2028 = vmatpush3.bf16.msra.mxu0 %v2630_v2 }
 0x247   : > { %2029 = vmatprep.subr.bf16.mxu0 %v2234_v7 }
 0x24a   : > { %2030 = vmatpush3.bf16.msra.mxu0 %v2637_v11 }
 0x24b   : > { %2031 = vmatprep.subr.bf16.mxu0 %v2234_v7 }
 0x24e   : > { %2032 = vmatpush3.bf16.msra.mxu0 %v2643_v17 }
 0x304   : > { %v1268_v18 = vpop.f32.mrb[2].mxu0 }
 0x305   : > { %v1272_v23 = vmul.f32 0.001953125, %v1268_v18  ;;  %v2016_v24 = vpop.f32.mrb[3].mxu0 }
 0x307   : > { %v1273_v25 = vmul.f32 %v1272_v23, %v1272_v23 }
 0x309   : > { %v1275_v26 = vrot.slane %v1273_v25, 7 }
 0x30b   : > { %v1277_v27 = vsub.f32 %v1272_v23, %v1275_v26 }
 0x30d   : > { %v1278_v28 = vmax.f32 %v1277_v27, 0.0 }
 0x30f   : > { %v1279_v29 = vadd.f32 1e-05, %v1278_v28 }
 0x311   : > { %2221 = vrsqrt.f32 %v1279_v29 }
 0x31b   : > { %v2222_v15 = vpop.eup %2221 }
 0x31c   : > { %v1282_v30 = vrot.slane %v2222_v15, 2 }
 0x31e   : > { %v1284_v53 = vmul.f32 %v2223_v32, %v1282_v30 }
 0x320   : > { %v1286_v33 = vrot.slane %v1284_v53, 7  ;;  %v1294_v22 = vrot.slane %v1284_v53, %v1293_v31 }
 0x322   : > { %v1288_v34 = vmul.f32 %v1286_v33, %v1272_v23  ;;  %v1295_v37 = vmul.f32 %v1294_v22, %v2558_v39  ;;  %v1296_v38 = vmul.f32 %v1294_v22, %v2560_v49  ;;  %v1307_v55 = vmul.f32 %v1294_v22, %v2570_v61 }
 0x323   : > { %v1308_v40 = vmul.f32 %v1294_v22, %v2576_v48  ;;  %v1309_v56 = vmul.f32 %v1294_v22, %v2572_v0 }
 0x324   : > { %v1289_v36 = vsub.f32 %v355_v54, %v1288_v34 }
 0x326   : > { %v1300_v13 = vrot.slane %v1289_v36, %v2321_v12 }
 0x328   : > { %v1301_v8 = vadd.f32 %v1300_v13, %v1295_v37  ;;  %v1302_v41 = vadd.f32 %v1300_v13, %v1296_v38  ;;  %v1310_v20 = vadd.f32 %v1307_v55, %v1300_v13  ;;  %v1311_v45 = vadd.f32 %v1308_v40, %v1300_v13 }
 0x329   : > { %v1312_v46 = vadd.f32 %v1309_v56, %v1300_v13 }
 0x32a   : > { %1303 = vst [vmem:[#allocation3 + $0x1] sm:$0xff] %v1301_v8  ;;  %1304 = vst [vmem:[#allocation3 + $0x9] sm:$0xff] %v1302_v41 }
 0x32b   : > { %1313 = vst [vmem:[#allocation3 + $0x11] sm:$0xfc] %v1310_v20  ;;  %1314 = vst [vmem:[#allocation3 + $0x19] sm:$0xff] %v1311_v45 }
 0x32c   : > { %1315 = vst [vmem:[#allocation3 + $0x21] sm:$0x3] %v1312_v46 }
 0x331   : > { %v1317_v39 = vld [vmem:[#allocation3] sm:$0xff]  ;;  %v1318_v49 = vld [vmem:[#allocation3 + $0x8] sm:$0xff] }
 0x332   : > { %v1322_v47 = vpack.c.bf16 %v1318_v49, %v1317_v39  ;;  %v1319_v12 = vld [vmem:[#allocation3 + $0x10] sm:$0xff]  ;;  %v1320_v61 = vld [vmem:[#allocation3 + $0x18] sm:$0xff] }
 0x333   : > { %v1323_v0 = vpack.c.bf16 %v1320_v61, %v1319_v12  ;;  %v1321_v48 = vld [vmem:[#allocation3 + $0x20] sm:$0xf] }
 0x334   : > { %1518 = vmatmul.mubr.bf16.vlgmr.msra.gmra.mrb[12].mxu1 %v1322_v47  ;;  %2034 = vmatmul.mubr.bf16.vlgmr.msra.gmra.mrb[16].mxu0 %v1322_v47  ;;  %v1324_v50 = vpack.c.bf16 %v1321_v48, %v1321_v48 }
 0x335   : > { %2101 = vmatpush3.bf16.msra.mxu1 %v2595_v3  ;;  %1527 = vmatprep.mubr.bf16.mxu1 %v2235_v43 }
 0x336   : > { %2094 = vmatprep.subr.bf16.mxu1 %v2234_v7 }
 0x339   : > { %2102 = vmatpush3.bf16.msra.mxu1 %v2602_v5 }
 0x33a   : > { %2095 = vmatprep.subr.bf16.mxu1 %v2234_v7 }
 0x33c   : > { %1528 = vmatmul.mubr.bf16.gmra.mrb[16].mxu1 %v1323_v0 }
 0x33d   : > { %2103 = vmatpush3.bf16.msra.mxu1 %v2609_v42  ;;  %1537 = vmatprep.mubr.bf16.mxu1 %v2235_v43 }
 0x33e   : > { %2096 = vmatprep.subr.bf16.mxu1 %v2234_v7 }
 0x341   : > { %2104 = vmatpush3.bf16.msra.mxu1 %v2616_v62 }
 0x342   : > { %2097 = vmatprep.subr.bf16.mxu1 %v2234_v7 }
 0x344   : > { %1538 = vmatmul.mubr.bf16.gmra.mrb[20].mxu1 %v1324_v50 }
 0x345   : > { %2105 = vmatpush3.bf16.msra.mxu1 %v2623_v1  ;;  %2037 = vmatprep.mubr.msk.bf16.mxu1 %vm2233_vm0, %v2234_v7 }
 0x346   : > { %2098 = vmatprep.subr.bf16.mxu1 %v2234_v7 }
 0x349   : > { %2106 = vmatpush3.bf16.msra.mxu1 %v2630_v2 }
 0x34a   : > { %2099 = vmatprep.subr.bf16.mxu1 %v2234_v7 }
 0x34d   : > { %2107 = vmatpush3.bf16.msra.mxu1 %v2637_v11 }
 0x34e   : > { %2100 = vmatprep.subr.bf16.mxu1 %v2234_v7 }
 0x351   : > { %2108 = vmatpush3.bf16.msra.mxu1 %v2643_v17 }
 0x354   : > { %2038 = vmatmul.mubr.bf16.vlgmr.msra.gmra.mrb[24].mxu1 %v1323_v0 }
 0x355   : > { %2041 = vmatprep.mubr.msk.bf16.mxu1 %vm2233_vm0, %v2234_v7 }
 0x35c   : > { %2042 = vmatmul.mubr.bf16.gmra.mrb[28].mxu1 %v1324_v50 }
 0x407   : > { %v1519_v51 = vpop.f32.mrb[12].mxu1  ;;  %v1580_v52 = vpop.f32.mrb[16].mxu0 }
 0x408   : > { %v1521_v57 = vpop.f32.mrb[13].mxu1  ;;  %v2035_v3 = vpop.f32.mrb[17].mxu0  ;;  %v1617_v5 = vrot.slane %v1580_v52, 2 }
 0x409   : > { %v1523_v44 = vpop.f32.mrb[14].mxu1  ;;  %v1583_v59 = vpop.f32.mrb[18].mxu0  ;;  %v1605_v60 = vrot.slane %v1521_v57, 1 }
 0x40a   : > { %v1618_v9 = vrot.slane %v1583_v59, 2  ;;  %v1525_v21 = vpop.f32.mrb[15].mxu1  ;;  %v2036_v42 = vpop.f32.mrb[19].mxu0 }
 0x40b   : > { %v1606_v58 = vrot.slane %v1525_v21, 1 }
 0x40c   : > { %v1619_v62 = vsel %vm1096_vm6, %v1617_v5, %v1618_v9 }
 0x40d   : > { %v1607_v7 = vsel %vm1083_vm5, %v1605_v60, %v1606_v58 }
 0x40e   : > { %v1612_v19 = vadd.f32 %v1607_v7, %v1519_v51 }
 0x40f   : > { %v1529_v1 = vpop.f32.mrb[16].mxu1 }
 0x410   : > { %v1624_v4 = vadd.f32 %v1619_v62, %v1612_v19  ;;  %v1531_v35 = vpop.f32.mrb[17].mxu1 }
 0x411   : > { %v1608_v2 = vrot.slane %v1531_v35, 1  ;;  %v1533_v6 = vpop.f32.mrb[18].mxu1 }
 0x412   : > { %v1656_v10 = vadd.f32 %v1859_v63, %v1624_v4  ;;  %v1535_v11 = vpop.f32.mrb[19].mxu1 }
 0x413   : > { %v1609_v14 = vsel %vm1083_vm5, %v1606_v58, %v1608_v2  ;;  %v1628_v16 = vrot.slane %v1535_v11, 1 }
 0x414   : > { %1659 = vst.msk [vmem:[%s2687_s26] sm:$0xff] %vm1658_vm7, %v1656_v10  ;;  %v1613_v43 = vadd.f32 %v1609_v14, %v1523_v44 }
 0x415   : > { %v1629_v17 = vsel %vm1083_vm5, %v1608_v2, %v1628_v16 }
 0x416   : > { %v1635_v18 = vadd.f32 %v1629_v17, %v1529_v1 }
 0x417   : > { %v1539_v23 = vpop.f32.mrb[20].mxu1 }
 0x418   : > { %v1541_v24 = vpop.f32.mrb[21].mxu1 }
 0x419   : > { %v1630_v25 = vrot.slane %v1541_v24, 1  ;;  %v1543_v26 = vpop.f32.mrb[22].mxu1 }
 0x41a   : > { %v1544_v27 = vpop.f32.mrb[23].mxu1 }
 0x41b   : > { %v1631_v28 = vsel %vm1083_vm5, %v1628_v16, %v1630_v25  ;;  %v1637_v29 = vadd.f32 %v1630_v25, %v1539_v23 }
 0x41c   : > { %v1636_v15 = vadd.f32 %v1631_v28, %v1533_v6 }
 0x427   : > { %v1588_v30 = vpop.f32.mrb[24].mxu1 }
 0x428   : > { %v1620_v31 = vrot.slane %v1588_v30, 2  ;;  %v2039_v32 = vpop.f32.mrb[25].mxu1 }
 0x429   : > { %v1591_v53 = vpop.f32.mrb[26].mxu1 }
 0x42a   : > { %v1621_v33 = vsel %vm1096_vm6, %v1618_v9, %v1620_v31  ;;  %v1640_v54 = vrot.slane %v1591_v53, 2  ;;  %v2040_v22 = vpop.f32.mrb[27].mxu1 }
 0x42b   : > { %v1625_v34 = vadd.f32 %v1621_v33, %v1613_v43 }
 0x42c   : > { %v1641_v36 = vsel %vm1096_vm6, %v1620_v31, %v1640_v54 }
 0x42d   : > { %v1657_v37 = vadd.f32 %v1859_v63, %v1625_v34  ;;  %v1647_v38 = vadd.f32 %v1641_v36, %v1635_v18 }
 0x42f   : > { %1660 = vst.msk [vmem:[%s2687_s26 + $0x8] sm:$0xff] %vm1658_vm7, %v1657_v37  ;;  %v1661_v13 = vadd.f32 %v1859_v63, %v1647_v38  ;;  %v1596_v55 = vpop.f32.mrb[28].mxu1 }
 0x430   : > { %v1642_v40 = vrot.slane %v1596_v55, 2  ;;  %v2043_v56 = vpop.f32.mrb[29].mxu1 }
 0x431   : > { %1860 = vst.msk [vmem:[%s2687_s26 + $0xe] sm:$0xfc] %vm1665_vm8, %v1661_v13  ;;  %v1599_v8 = vpop.f32.mrb[30].mxu1 }
 0x432   : > { %v1643_v41 = vsel %vm1096_vm6, %v1640_v54, %v1642_v40  ;;  %v1649_v20 = vadd.f32 %v1642_v40, %v1637_v29  ;;  %v2044_v45 = vpop.f32.mrb[31].mxu1 }
 0x433   : > { %v1648_v46 = vadd.f32 %v1643_v41, %v1636_v15 }
 0x434   : > { %v1663_v39 = vadd.f32 %v1859_v63, %v1649_v20 }
 0x435   : > { %v1662_v49 = vadd.f32 %v1859_v63, %v1648_v46 }
 0x436   : > { %1862 = vst.msk [vmem:[%s2687_s26 + $0x1e] sm:$0x3] %vm1668_vm9, %v1663_v39 }
 0x437   : > { %1861 = vst.msk [vmem:[%s2687_s26 + $0x16] sm:$0xff] %vm1658_vm7, %v1662_v49 }
 0x438 PF: > { %s17_s24 = sadd.s32 1, %s2230_s24  }
 0x439   : > { %p14_p4 = scmp.ge.s32.totalorder %s17_s24, 4  }
 0x43b   :  { %16 = sbr.rel (!%p14_p4) target bundleno = 1 (0x1), region = 96 }

</bundles_post_ra>
